<compile_context>
chip_gen: v7x
topology: tpu7x:2x2x1
jax: 0.10.0
libtpu: 0.0.40
codegen_flags: <defaults>
</compile_context>

<pallas_src>
import jax
import jax.numpy as jnp
from jax.experimental import pallas as pl
from jax.experimental.pallas import tpu as pltpu


FC_HIDDEN_PAD = 128  # fc1 hidden dim padded 100 -> 128 for lane-dense blocks


# ------------------------------- Pallas kernels ------------------------------- #

def _conv_pool_kernel(p00_ref, p01_ref, p10_ref, p11_ref, w_ref, b_ref, o_ref):
    """Fused conv-as-GEMM + bias + 2x2/2 max-pool.

    p{h}{w}: (tm, K) bf16 im2col patches of the conv outputs landing at pool
    position (h, w) of each 2x2 window.  o: (tm, Cout) bf16 pooled activations.
    max(y + b) == max(y) + b, so the bias is added once after the max.
    """
    w = w_ref[...]
    y00 = jnp.dot(p00_ref[...], w, preferred_element_type=jnp.float32)
    y01 = jnp.dot(p01_ref[...], w, preferred_element_type=jnp.float32)
    y10 = jnp.dot(p10_ref[...], w, preferred_element_type=jnp.float32)
    y11 = jnp.dot(p11_ref[...], w, preferred_element_type=jnp.float32)
    m = jnp.maximum(jnp.maximum(y00, y01), jnp.maximum(y10, y11))
    o_ref[...] = (m + b_ref[...]).astype(o_ref.dtype)


def _mlp_head_kernel(x_ref, w1_ref, b1_ref, w2_ref, b2_ref, o_ref):
    """Single-step Linear(10816->128pad) + ReLU + Linear(128pad->2), f32 accum."""
    h = jnp.dot(x_ref[...], w1_ref[...], preferred_element_type=jnp.float32)
    h = jnp.maximum(h + b1_ref[...], 0.0)                       # ReLU
    o_ref[...] = (jnp.dot(h, w2_ref[...], preferred_element_type=jnp.float32)
                  + b2_ref[...]).astype(o_ref.dtype)


# ------------------------------ Pallas wrappers ------------------------------- #

def _m_tiling(M, max_block_rows=1024):
    """Row tiling: block rows multiple of 8, even #steps when tiled (v7x 2-TC)."""
    steps = pl.cdiv(M, max_block_rows)
    if steps > 1 and steps % 2:
        steps += 1
    tm = pl.cdiv(M, steps)
    tm = pl.cdiv(tm, 8) * 8
    return tm, tm * steps, steps


def conv_pool(x_nhwc, w_mat, b, kh, kw, stride, max_block_rows=1024):
    """VALID conv (stride `stride`) + 2x2/2 maxpool, fused in one pallas_call."""
    N, H, W, C = x_nhwc.shape
    OH = (H - kh) // stride + 1
    OW = (W - kw) // stride + 1
    PH, PW = OH // 2, OW // 2
    K = kh * kw * C
    Cout = w_mat.shape[1]

    xb = x_nhwc.astype(jnp.bfloat16)

    def patches(h2, w2):
        # rows ordered (n, ph, pw); feature order (kh, kw, cin)
        cols = []
        for i in range(kh):
            for j in range(kw):
                r0 = stride * h2 + i
                c0 = stride * w2 + j
                cols.append(jax.lax.slice(
                    xb,
                    (0, r0, c0, 0),
                    (N, r0 + 2 * stride * (PH - 1) + 1,
                     c0 + 2 * stride * (PW - 1) + 1, C),
                    (1, 2 * stride, 2 * stride, 1)))   # (N, PH, PW, C)
        p = jnp.concatenate(cols, axis=-1)             # (N, PH, PW, K)
        return p.reshape(N * PH * PW, K)

    M = N * PH * PW
    tm, m_pad, steps = _m_tiling(M, max_block_rows)    # conv1: 976 x 6; conv2: 344 x 1

    def padded(p):
        return jnp.pad(p, ((0, m_pad - M), (0, 0))) if m_pad != M else p

    p00, p01, p10, p11 = (padded(patches(h2, w2)) for h2 in (0, 1) for w2 in (0, 1))

    patch_spec = pl.BlockSpec((tm, K), lambda i: (i, 0))
    out = pl.pallas_call(
        _conv_pool_kernel,
        out_shape=jax.ShapeDtypeStruct((m_pad, Cout), jnp.bfloat16),
        grid=(steps,),
        in_specs=[patch_spec, patch_spec, patch_spec, patch_spec,
                  pl.BlockSpec((K, Cout), lambda i: (0, 0)),
                  pl.BlockSpec((1, Cout), lambda i: (0, 0))],
        out_specs=pl.BlockSpec((tm, Cout), lambda i: (i, 0)),
        compiler_params=pltpu.CompilerParams(
            dimension_semantics=("parallel",)),
    )(p00, p01, p10, p11, w_mat, b.reshape(1, Cout))
    return out[:M].reshape(N, PH, PW, Cout)


def mlp_head(x, w1, b1, w2, b2):
    """One fused kernel: x @ w1 + b1 -> ReLU -> @ w2 + b2 (single grid step)."""
    N, K = x.shape
    Kw, Hd = w1.shape
    O = w2.shape[1]
    assert K == Kw
    return pl.pallas_call(
        _mlp_head_kernel,
        out_shape=jax.ShapeDtypeStruct((N, O), jnp.float32),
        grid=(1,),
        in_specs=[
            pl.BlockSpec((N, K), lambda i: (0, 0)),
            pl.BlockSpec((K, Hd), lambda i: (0, 0)),
            pl.BlockSpec((1, Hd), lambda i: (0, 0)),
            pl.BlockSpec((Hd, O), lambda i: (0, 0)),
            pl.BlockSpec((1, O), lambda i: (0, 0)),
        ],
        out_specs=pl.BlockSpec((N, O), lambda i: (0, 0)),
        compiler_params=pltpu.CompilerParams(
            dimension_semantics=("arbitrary",)),
    )(x, w1, b1.reshape(1, Hd), w2, b2.reshape(1, O))


# --------------------------------- parameters --------------------------------- #

def init_params(key):
    """Random parameters in the PyTorch layout of MelanomaDetector."""
    ks = jax.random.split(key, 8)

    def init(k, shape, fan_in):
        return jax.random.normal(k, shape, jnp.float32) / jnp.sqrt(fan_in)

    return {
        "conv1_w": init(ks[0], (32, 3, 5, 5), 3 * 5 * 5),
        "conv1_b": init(ks[1], (32,), 3 * 5 * 5),
        "conv2_w": init(ks[2], (64, 32, 3, 3), 32 * 3 * 3),
        "conv2_b": init(ks[3], (64,), 32 * 3 * 3),
        "fc1_w": init(ks[4], (100, 10816), 10816),
        "fc1_b": init(ks[5], (100,), 10816),
        "fc2_w": init(ks[6], (2, 100), 100),
        "fc2_b": init(ks[7], (2,), 100),
    }


def prepare_params(params):
    """One-time conversion of torch-layout params to kernel-friendly layouts."""
    def conv_mat(w):   # (Cout, Cin, kh, kw) -> (kh*kw*Cin, Cout), order (kh, kw, cin)
        co, ci, kh, kw = w.shape
        return (jnp.transpose(w, (2, 3, 1, 0))
                .reshape(kh * kw * ci, co).astype(jnp.bfloat16))

    # fc1 weight consumes the NCHW flatten (c,h,w) of the (N,64,13,13) activation.
    # Permute its rows so it consumes the NHWC flatten (h,w,c) directly, then
    # zero-pad the hidden dim 100 -> 128 for lane-dense blocks and cast to bf16.
    c, hh, ww = 64, 13, 13
    w1 = params["fc1_w"].reshape(-1, c, hh, ww)                       # (100,64,13,13)
    w1 = jnp.transpose(w1, (2, 3, 1, 0)).reshape(c * hh * ww, -1)     # (10816,100)
    hd = w1.shape[1]
    w1 = jnp.pad(w1, ((0, 0), (0, FC_HIDDEN_PAD - hd))).astype(jnp.bfloat16)
    b1 = jnp.pad(params["fc1_b"], (0, FC_HIDDEN_PAD - hd))            # (128,) f32

    w2 = jnp.pad(params["fc2_w"].T, ((0, FC_HIDDEN_PAD - hd), (0, 0)))  # (128,2) f32

    return {
        "conv1_w": conv_mat(params["conv1_w"]), "conv1_b": params["conv1_b"],
        "conv2_w": conv_mat(params["conv2_w"]), "conv2_b": params["conv2_b"],
        "fc1_w": w1, "fc1_b": b1,
        "fc2_w": w2, "fc2_b": params["fc2_b"],
    }


# ----------------------------------- forward ----------------------------------- #

@jax.jit
def melanoma_forward(kparams, x_nchw):
    x = jnp.transpose(x_nchw, (0, 2, 3, 1))                              # NCHW -> NHWC
    x = conv_pool(x, kparams["conv1_w"], kparams["conv1_b"], 5, 5, 2)    # (N,54,54,32) bf16
    x = conv_pool(x, kparams["conv2_w"], kparams["conv2_b"], 3, 3, 2)    # (N,13,13,64) bf16
    n = x.shape[0]
    x = x.reshape(n, -1)                   # NHWC flatten; fc1 rows are pre-permuted to match
    return mlp_head(x, kparams["fc1_w"], kparams["fc1_b"],
                    kparams["fc2_w"], kparams["fc2_b"])                  # (N, 2) f32


@jax.jit
def reference_forward(params, x_nchw):
    """Pure-XLA f32 reference matching the PyTorch module (for a sanity check)."""
    x = jnp.transpose(x_nchw, (0, 2, 3, 1))

    def conv(x, w, b, s):
        y = jax.lax.conv_general_dilated(
            x, jnp.transpose(w, (2, 3, 1, 0)), (s, s), "VALID",
            dimension_numbers=("NHWC", "HWIO", "NHWC"))
        return y + b

    def pool(x):
        return jax.lax.reduce_window(x, -jnp.inf, jax.lax.max,
                                     (1, 2, 2, 1), (1, 2, 2, 1), "VALID")

    x = pool(conv(x, params["conv1_w"], params["conv1_b"], 2))
    x = pool(conv(x, params["conv2_w"], params["conv2_b"], 2))
    x = jnp.transpose(x, (0, 3, 1, 2)).reshape(x.shape[0], -1)   # torch Flatten (NCHW)
    h = jnp.maximum(x @ params["fc1_w"].T + params["fc1_b"], 0.0)
    return h @ params["fc2_w"].T + params["fc2_b"]


if __name__ == "__main__":
    key = jax.random.PRNGKey(0)
    kx, kp = jax.random.split(key)
    # 219 is the smallest "natural" spatial size making Linear(10816, 100) consistent:
    # 219 -conv5/2-> 108 -pool-> 54 -conv3/2-> 26 -pool-> 13; 64*13*13 = 10816.
    x = jax.random.normal(kx, (2, 3, 219, 219), jnp.float32)
    params = init_params(kp)
    kparams = prepare_params(params)

    out = jax.block_until_ready(melanoma_forward(kparams, x))
    assert out.shape == (2, 2) and out.dtype == jnp.float32

    ref = jax.block_until_ready(reference_forward(params, x))
    # bf16 activations/weights with f32 accumulation: expect ~1% relative error.
    rel_err = float(jnp.max(jnp.abs(out - ref)) / (jnp.max(jnp.abs(ref)) + 1e-6))
    assert rel_err < 0.06, f"mismatch vs XLA reference: rel_err={rel_err}"
    print("KERNEL_OK")
</pallas_src>

<mosaic_0001>
module attributes {stable_mosaic.version = 11 : i64} {
  func.func @_conv_pool_kernel(%arg0: i32, %arg1: memref<976x75xbf16, #tpu.memory_space<vmem>>, %arg2: memref<976x75xbf16, #tpu.memory_space<vmem>>, %arg3: memref<976x75xbf16, #tpu.memory_space<vmem>>, %arg4: memref<976x75xbf16, #tpu.memory_space<vmem>>, %arg5: memref<75x32xbf16, #tpu.memory_space<vmem>>, %arg6: memref<1x32xf32, #tpu.memory_space<vmem>>, %arg7: memref<976x32xbf16, #tpu.memory_space<vmem>>) attributes {dimension_semantics = [#tpu.dimension_semantics<parallel>], iteration_bounds = array<i64: 6>, scalar_prefetch = 0 : i64, scratch_operands = 0 : i64, tpu.core_type = #tpu.core_type<tc>, window_params = [{transform_indices = @transform_0, window_bounds = array<i64: 976, 75>}, {transform_indices = @transform_1, window_bounds = array<i64: 976, 75>}, {transform_indices = @transform_2, window_bounds = array<i64: 976, 75>}, {transform_indices = @transform_3, window_bounds = array<i64: 976, 75>}, {pipeline_mode = #tpu.pipeline_mode<synchronous>, transform_indices = @transform_4, window_bounds = array<i64: 75, 32>}, {pipeline_mode = #tpu.pipeline_mode<synchronous>, transform_indices = @transform_5, window_bounds = array<i64: 1, 32>}, {transform_indices = @transform_6, window_bounds = array<i64: 976, 32>}]} {
    %c0 = arith.constant 0 : index
    %c0_0 = arith.constant 0 : index
    %0 = vector.load %arg5[%c0, %c0_0] : memref<75x32xbf16, #tpu.memory_space<vmem>>, vector<75x32xbf16>
    %c0_1 = arith.constant 0 : index
    %c0_2 = arith.constant 0 : index
    %1 = vector.load %arg1[%c0_1, %c0_2] : memref<976x75xbf16, #tpu.memory_space<vmem>>, vector<976x75xbf16>
    %cst = arith.constant dense<0.000000e+00> : vector<976x32xf32>
    %2 = tpu.matmul %1, %0, %cst {dimension_numbers = #tpu.dot_dimension_numbers<[1], [0], [0], [1], [0, 0, 1, 1], [], []>} : vector<976x75xbf16>, vector<75x32xbf16>, vector<976x32xf32> -> vector<976x32xf32>
    %c0_3 = arith.constant 0 : index
    %c0_4 = arith.constant 0 : index
    %3 = vector.load %arg2[%c0_3, %c0_4] : memref<976x75xbf16, #tpu.memory_space<vmem>>, vector<976x75xbf16>
    %cst_5 = arith.constant dense<0.000000e+00> : vector<976x32xf32>
    %4 = tpu.matmul %3, %0, %cst_5 {dimension_numbers = #tpu.dot_dimension_numbers<[1], [0], [0], [1], [0, 0, 1, 1], [], []>} : vector<976x75xbf16>, vector<75x32xbf16>, vector<976x32xf32> -> vector<976x32xf32>
    %c0_6 = arith.constant 0 : index
    %c0_7 = arith.constant 0 : index
    %5 = vector.load %arg3[%c0_6, %c0_7] : memref<976x75xbf16, #tpu.memory_space<vmem>>, vector<976x75xbf16>
    %cst_8 = arith.constant dense<0.000000e+00> : vector<976x32xf32>
    %6 = tpu.matmul %5, %0, %cst_8 {dimension_numbers = #tpu.dot_dimension_numbers<[1], [0], [0], [1], [0, 0, 1, 1], [], []>} : vector<976x75xbf16>, vector<75x32xbf16>, vector<976x32xf32> -> vector<976x32xf32>
    %c0_9 = arith.constant 0 : index
    %c0_10 = arith.constant 0 : index
    %7 = vector.load %arg4[%c0_9, %c0_10] : memref<976x75xbf16, #tpu.memory_space<vmem>>, vector<976x75xbf16>
    %cst_11 = arith.constant dense<0.000000e+00> : vector<976x32xf32>
    %8 = tpu.matmul %7, %0, %cst_11 {dimension_numbers = #tpu.dot_dimension_numbers<[1], [0], [0], [1], [0, 0, 1, 1], [], []>} : vector<976x75xbf16>, vector<75x32xbf16>, vector<976x32xf32> -> vector<976x32xf32>
    %9 = arith.maximumf %2, %4 : vector<976x32xf32>
    %10 = arith.maximumf %6, %8 : vector<976x32xf32>
    %11 = arith.maximumf %9, %10 : vector<976x32xf32>
    %c0_12 = arith.constant 0 : index
    %c0_13 = arith.constant 0 : index
    %12 = vector.load %arg6[%c0_12, %c0_13] : memref<1x32xf32, #tpu.memory_space<vmem>>, vector<1x32xf32>
    %13 = vector.broadcast %12 : vector<1x32xf32> to vector<976x32xf32>
    %14 = arith.addf %11, %13 : vector<976x32xf32>
    %15 = arith.truncf %14 : vector<976x32xf32> to vector<976x32xbf16>
    %c0_14 = arith.constant 0 : index
    %c0_15 = arith.constant 0 : index
    %16 = vector.load %arg7[%c0_14, %c0_15] : memref<976x32xbf16, #tpu.memory_space<vmem>>, vector<976x32xbf16>
    tpu.vector_store %arg7[%c0_14, %c0_15], %15 {strides = array<i32>} : memref<976x32xbf16, #tpu.memory_space<vmem>>, vector<976x32xbf16>,
    return
  }
  func.func @transform_0(%arg0: i32) -> (i32, i32) {
    %c0_i32 = arith.constant 0 : i32
    %c0_i32_0 = arith.constant 0 : i32
    return %arg0, %c0_i32 : i32, i32
  }
  func.func @transform_1(%arg0: i32) -> (i32, i32) {
    %c0_i32 = arith.constant 0 : i32
    %c0_i32_0 = arith.constant 0 : i32
    return %arg0, %c0_i32 : i32, i32
  }
  func.func @transform_2(%arg0: i32) -> (i32, i32) {
    %c0_i32 = arith.constant 0 : i32
    %c0_i32_0 = arith.constant 0 : i32
    return %arg0, %c0_i32 : i32, i32
  }
  func.func @transform_3(%arg0: i32) -> (i32, i32) {
    %c0_i32 = arith.constant 0 : i32
    %c0_i32_0 = arith.constant 0 : i32
    return %arg0, %c0_i32 : i32, i32
  }
  func.func @transform_4(%arg0: i32) -> (i32, i32) {
    %c0_i32 = arith.constant 0 : i32
    %c0_i32_0 = arith.constant 0 : i32
    %c0_i32_1 = arith.constant 0 : i32
    return %c0_i32, %c0_i32_0 : i32, i32
  }
  func.func @transform_5(%arg0: i32) -> (i32, i32) {
    %c0_i32 = arith.constant 0 : i32
    %c0_i32_0 = arith.constant 0 : i32
    %c0_i32_1 = arith.constant 0 : i32
    return %c0_i32, %c0_i32_0 : i32, i32
  }
  func.func @transform_6(%arg0: i32) -> (i32, i32) {
    %c0_i32 = arith.constant 0 : i32
    %c0_i32_0 = arith.constant 0 : i32
    return %arg0, %c0_i32 : i32, i32
  }
}

module attributes {stable_mosaic.version = 11 : i64} {
  func.func @_conv_pool_kernel(%arg0: i32, %arg1: memref<344x288xbf16, #tpu.memory_space<vmem>>, %arg2: memref<344x288xbf16, #tpu.memory_space<vmem>>, %arg3: memref<344x288xbf16, #tpu.memory_space<vmem>>, %arg4: memref<344x288xbf16, #tpu.memory_space<vmem>>, %arg5: memref<288x64xbf16, #tpu.memory_space<vmem>>, %arg6: memref<1x64xf32, #tpu.memory_space<vmem>>, %arg7: memref<344x64xbf16, #tpu.memory_space<vmem>>) attributes {dimension_semantics = [#tpu.dimension_semantics<parallel>], iteration_bounds = array<i64: 1>, scalar_prefetch = 0 : i64, scratch_operands = 0 : i64, tpu.core_type = #tpu.core_type<tc>, window_params = [{transform_indices = @transform_0, window_bounds = array<i64: 344, 288>}, {transform_indices = @transform_1, window_bounds = array<i64: 344, 288>}, {transform_indices = @transform_2, window_bounds = array<i64: 344, 288>}, {transform_indices = @transform_3, window_bounds = array<i64: 344, 288>}, {pipeline_mode = #tpu.pipeline_mode<synchronous>, transform_indices = @transform_4, window_bounds = array<i64: 288, 64>}, {pipeline_mode = #tpu.pipeline_mode<synchronous>, transform_indices = @transform_5, window_bounds = array<i64: 1, 64>}, {transform_indices = @transform_6, window_bounds = array<i64: 344, 64>}]} {
    %c0 = arith.constant 0 : index
    %c0_0 = arith.constant 0 : index
    %0 = vector.load %arg5[%c0, %c0_0] : memref<288x64xbf16, #tpu.memory_space<vmem>>, vector<288x64xbf16>
    %c0_1 = arith.constant 0 : index
    %c0_2 = arith.constant 0 : index
    %1 = vector.load %arg1[%c0_1, %c0_2] : memref<344x288xbf16, #tpu.memory_space<vmem>>, vector<344x288xbf16>
    %cst = arith.constant dense<0.000000e+00> : vector<344x64xf32>
    %2 = tpu.matmul %1, %0, %cst {dimension_numbers = #tpu.dot_dimension_numbers<[1], [0], [0], [1], [0, 0, 1, 1], [], []>} : vector<344x288xbf16>, vector<288x64xbf16>, vector<344x64xf32> -> vector<344x64xf32>
    %c0_3 = arith.constant 0 : index
    %c0_4 = arith.constant 0 : index
    %3 = vector.load %arg2[%c0_3, %c0_4] : memref<344x288xbf16, #tpu.memory_space<vmem>>, vector<344x288xbf16>
    %cst_5 = arith.constant dense<0.000000e+00> : vector<344x64xf32>
    %4 = tpu.matmul %3, %0, %cst_5 {dimension_numbers = #tpu.dot_dimension_numbers<[1], [0], [0], [1], [0, 0, 1, 1], [], []>} : vector<344x288xbf16>, vector<288x64xbf16>, vector<344x64xf32> -> vector<344x64xf32>
    %c0_6 = arith.constant 0 : index
    %c0_7 = arith.constant 0 : index
    %5 = vector.load %arg3[%c0_6, %c0_7] : memref<344x288xbf16, #tpu.memory_space<vmem>>, vector<344x288xbf16>
    %cst_8 = arith.constant dense<0.000000e+00> : vector<344x64xf32>
    %6 = tpu.matmul %5, %0, %cst_8 {dimension_numbers = #tpu.dot_dimension_numbers<[1], [0], [0], [1], [0, 0, 1, 1], [], []>} : vector<344x288xbf16>, vector<288x64xbf16>, vector<344x64xf32> -> vector<344x64xf32>
    %c0_9 = arith.constant 0 : index
    %c0_10 = arith.constant 0 : index
    %7 = vector.load %arg4[%c0_9, %c0_10] : memref<344x288xbf16, #tpu.memory_space<vmem>>, vector<344x288xbf16>
    %cst_11 = arith.constant dense<0.000000e+00> : vector<344x64xf32>
    %8 = tpu.matmul %7, %0, %cst_11 {dimension_numbers = #tpu.dot_dimension_numbers<[1], [0], [0], [1], [0, 0, 1, 1], [], []>} : vector<344x288xbf16>, vector<288x64xbf16>, vector<344x64xf32> -> vector<344x64xf32>
    %9 = arith.maximumf %2, %4 : vector<344x64xf32>
    %10 = arith.maximumf %6, %8 : vector<344x64xf32>
    %11 = arith.maximumf %9, %10 : vector<344x64xf32>
    %c0_12 = arith.constant 0 : index
    %c0_13 = arith.constant 0 : index
    %12 = vector.load %arg6[%c0_12, %c0_13] : memref<1x64xf32, #tpu.memory_space<vmem>>, vector<1x64xf32>
    %13 = vector.broadcast %12 : vector<1x64xf32> to vector<344x64xf32>
    %14 = arith.addf %11, %13 : vector<344x64xf32>
    %15 = arith.truncf %14 : vector<344x64xf32> to vector<344x64xbf16>
    %c0_14 = arith.constant 0 : index
    %c0_15 = arith.constant 0 : index
    %16 = vector.load %arg7[%c0_14, %c0_15] : memref<344x64xbf16, #tpu.memory_space<vmem>>, vector<344x64xbf16>
    tpu.vector_store %arg7[%c0_14, %c0_15], %15 {strides = array<i32>} : memref<344x64xbf16, #tpu.memory_space<vmem>>, vector<344x64xbf16>,
    return
  }
  func.func @transform_0(%arg0: i32) -> (i32, i32) {
    %c0_i32 = arith.constant 0 : i32
    %c0_i32_0 = arith.constant 0 : i32
    return %arg0, %c0_i32 : i32, i32
  }
  func.func @transform_1(%arg0: i32) -> (i32, i32) {
    %c0_i32 = arith.constant 0 : i32
    %c0_i32_0 = arith.constant 0 : i32
    return %arg0, %c0_i32 : i32, i32
  }
  func.func @transform_2(%arg0: i32) -> (i32, i32) {
    %c0_i32 = arith.constant 0 : i32
    %c0_i32_0 = arith.constant 0 : i32
    return %arg0, %c0_i32 : i32, i32
  }
  func.func @transform_3(%arg0: i32) -> (i32, i32) {
    %c0_i32 = arith.constant 0 : i32
    %c0_i32_0 = arith.constant 0 : i32
    return %arg0, %c0_i32 : i32, i32
  }
  func.func @transform_4(%arg0: i32) -> (i32, i32) {
    %c0_i32 = arith.constant 0 : i32
    %c0_i32_0 = arith.constant 0 : i32
    %c0_i32_1 = arith.constant 0 : i32
    return %c0_i32, %c0_i32_0 : i32, i32
  }
  func.func @transform_5(%arg0: i32) -> (i32, i32) {
    %c0_i32 = arith.constant 0 : i32
    %c0_i32_0 = arith.constant 0 : i32
    %c0_i32_1 = arith.constant 0 : i32
    return %c0_i32, %c0_i32_0 : i32, i32
  }
  func.func @transform_6(%arg0: i32) -> (i32, i32) {
    %c0_i32 = arith.constant 0 : i32
    %c0_i32_0 = arith.constant 0 : i32
    return %arg0, %c0_i32 : i32, i32
  }
}

module attributes {stable_mosaic.version = 11 : i64} {
  func.func @_mlp_head_kernel(%arg0: i32, %arg1: memref<2x10816xbf16, #tpu.memory_space<vmem>>, %arg2: memref<10816x128xbf16, #tpu.memory_space<vmem>>, %arg3: memref<1x128xf32, #tpu.memory_space<vmem>>, %arg4: memref<128x2xf32, #tpu.memory_space<vmem>>, %arg5: memref<1x2xf32, #tpu.memory_space<vmem>>, %arg6: memref<2x2xf32, #tpu.memory_space<vmem>>) attributes {dimension_semantics = [#tpu.dimension_semantics<arbitrary>], iteration_bounds = array<i64: 1>, scalar_prefetch = 0 : i64, scratch_operands = 0 : i64, tpu.core_type = #tpu.core_type<tc>, window_params = [{pipeline_mode = #tpu.pipeline_mode<synchronous>, transform_indices = @transform_0, window_bounds = array<i64: 2, 10816>}, {pipeline_mode = #tpu.pipeline_mode<synchronous>, transform_indices = @transform_1, window_bounds = array<i64: 10816, 128>}, {pipeline_mode = #tpu.pipeline_mode<synchronous>, transform_indices = @transform_2, window_bounds = array<i64: 1, 128>}, {pipeline_mode = #tpu.pipeline_mode<synchronous>, transform_indices = @transform_3, window_bounds = array<i64: 128, 2>}, {pipeline_mode = #tpu.pipeline_mode<synchronous>, transform_indices = @transform_4, window_bounds = array<i64: 1, 2>}, {pipeline_mode = #tpu.pipeline_mode<synchronous>, transform_indices = @transform_5, window_bounds = array<i64: 2, 2>}]} {
    %c0 = arith.constant 0 : index
    %c0_0 = arith.constant 0 : index
    %0 = vector.load %arg1[%c0, %c0_0] : memref<2x10816xbf16, #tpu.memory_space<vmem>>, vector<2x10816xbf16>
    %c0_1 = arith.constant 0 : index
    %c0_2 = arith.constant 0 : index
    %1 = vector.load %arg2[%c0_1, %c0_2] : memref<10816x128xbf16, #tpu.memory_space<vmem>>, vector<10816x128xbf16>
    %cst = arith.constant dense<0.000000e+00> : vector<2x128xf32>
    %2 = tpu.matmul %0, %1, %cst {dimension_numbers = #tpu.dot_dimension_numbers<[1], [0], [0], [1], [0, 0, 1, 1], [], []>} : vector<2x10816xbf16>, vector<10816x128xbf16>, vector<2x128xf32> -> vector<2x128xf32>
    %c0_3 = arith.constant 0 : index
    %c0_4 = arith.constant 0 : index
    %3 = vector.load %arg3[%c0_3, %c0_4] : memref<1x128xf32, #tpu.memory_space<vmem>>, vector<1x128xf32>
    %4 = vector.broadcast %3 : vector<1x128xf32> to vector<2x128xf32>
    %5 = arith.addf %2, %4 : vector<2x128xf32>
    %cst_5 = arith.constant 0.000000e+00 : f32
    %6 = vector.broadcast %cst_5 : f32 to vector<2x128xf32>
    %7 = arith.maximumf %5, %6 : vector<2x128xf32>
    %c0_6 = arith.constant 0 : index
    %c0_7 = arith.constant 0 : index
    %8 = vector.load %arg4[%c0_6, %c0_7] : memref<128x2xf32, #tpu.memory_space<vmem>>, vector<128x2xf32>
    %cst_8 = arith.constant dense<0.000000e+00> : vector<2x2xf32>
    %9 = tpu.matmul %7, %8, %cst_8 {dimension_numbers = #tpu.dot_dimension_numbers<[1], [0], [0], [1], [0, 0, 1, 1], [], []>} : vector<2x128xf32>, vector<128x2xf32>, vector<2x2xf32> -> vector<2x2xf32>
    %c0_9 = arith.constant 0 : index
    %c0_10 = arith.constant 0 : index
    %10 = vector.load %arg5[%c0_9, %c0_10] : memref<1x2xf32, #tpu.memory_space<vmem>>, vector<1x2xf32>
    %11 = vector.broadcast %10 : vector<1x2xf32> to vector<2x2xf32>
    %12 = arith.addf %9, %11 : vector<2x2xf32>
    %c0_11 = arith.constant 0 : index
    %c0_12 = arith.constant 0 : index
    %13 = vector.load %arg6[%c0_11, %c0_12] : memref<2x2xf32, #tpu.memory_space<vmem>>, vector<2x2xf32>
    tpu.vector_store %arg6[%c0_11, %c0_12], %12 {strides = array<i32>} : memref<2x2xf32, #tpu.memory_space<vmem>>, vector<2x2xf32>,
    return
  }
  func.func @transform_0(%arg0: i32) -> (i32, i32) {
    %c0_i32 = arith.constant 0 : i32
    %c0_i32_0 = arith.constant 0 : i32
    %c0_i32_1 = arith.constant 0 : i32
    return %c0_i32, %c0_i32_0 : i32, i32
  }
  func.func @transform_1(%arg0: i32) -> (i32, i32) {
    %c0_i32 = arith.constant 0 : i32
    %c0_i32_0 = arith.constant 0 : i32
    %c0_i32_1 = arith.constant 0 : i32
    return %c0_i32, %c0_i32_0 : i32, i32
  }
  func.func @transform_2(%arg0: i32) -> (i32, i32) {
    %c0_i32 = arith.constant 0 : i32
    %c0_i32_0 = arith.constant 0 : i32
    %c0_i32_1 = arith.constant 0 : i32
    return %c0_i32, %c0_i32_0 : i32, i32
  }
  func.func @transform_3(%arg0: i32) -> (i32, i32) {
    %c0_i32 = arith.constant 0 : i32
    %c0_i32_0 = arith.constant 0 : i32
    %c0_i32_1 = arith.constant 0 : i32
    return %c0_i32, %c0_i32_0 : i32, i32
  }
  func.func @transform_4(%arg0: i32) -> (i32, i32) {
    %c0_i32 = arith.constant 0 : i32
    %c0_i32_0 = arith.constant 0 : i32
    %c0_i32_1 = arith.constant 0 : i32
    return %c0_i32, %c0_i32_0 : i32, i32
  }
  func.func @transform_5(%arg0: i32) -> (i32, i32) {
    %c0_i32 = arith.constant 0 : i32
    %c0_i32_0 = arith.constant 0 : i32
    %c0_i32_1 = arith.constant 0 : i32
    return %c0_i32, %c0_i32_0 : i32, i32
  }
}

</mosaic_0001>

<bundles_post_ra>
// kernel: melanoma_forward.3
= control target key start
LH: loop header
LB: loop body
LE: loop exit
PB: predicated region body
PF: predicated region fallthrough
CT: control target
= control target key end

     0   :  { %s8429_s21 = smov 0   ;;  %s10962_s0 = inlined_call_operand.vmem [shape: bf16[5856,75], index: 0, kind: input, shape index: {}]   ;;  %s10963_s1 = inlined_call_operand.vmem [shape: bf16[5856,75], index: 1, kind: input, shape index: {}]   ;;  %s10964_s2 = inlined_call_operand.vmem [shape: bf16[5856,75], index: 2, kind: input, shape index: {}]   ;;  %s10965_s3 = inlined_call_operand.vmem [shape: bf16[5856,75], index: 3, kind: input, shape index: {}]   ;;  %s10966_s4 = inlined_call_operand.vmem [shape: bf16[75,32], index: 4, kind: input, shape index: {}]   ;;  %s10967_s5 = inlined_call_operand.vmem [shape: f32[1,32], index: 5, kind: input, shape index: {}]   ;;  %s10968_s6 = inlined_call_operand.vmem [shape: bf16[5856,32], index: 6, kind: output, shape index: {}]  }
   0x1 LB: > { %s6091_s22 = sadd.s32 4294967295, %s8389_s21   ;;  %p6095_p0 = scmp.ge.s32.totalorder %s8389_s21, 1  ;;  %s8389_s21 = sphi %s8429_s21, %s16_s21  }
   0x2   : > { %p246_p1 = scmp.lt.s32.totalorder %s8389_s21, 7 }
   0x4   : > { %p247_p2 = pnand %p6095_p0, %p246_p1 }
   0x6   : > { %250 = sbr.rel (%p247_p2) target bundleno = 1225 (0x4c9), region = 44 }
   0xd   : > { %v8132_v0 = vld [vmem:[%s10966_s4] sm:$0xff]   ;;  %v10969_v1 = vmov 0.0   ;;  %v8133_v2 = vld [vmem:[%s10966_s4 + $0x8] sm:$0xff]   ;;  %vm972_vm0 = vcmask 1044480   ;;  %s291_s27 = smul.u32 122, %s6091_s22  ;;  %v8134_v3 = vld [vmem:[%s10966_s4 + $0x10] sm:$0xff]  }
   0xe   : > { %7105 = vmatprep.subr.bf16.mxu0 %v10969_v1  ;;  %7359 = vmatprep.subr.bf16.mxu1 %v10969_v1  ;;  %vm973_vm1 = vcmask 1045504   ;;  %v8392_v4 = vmov 65535   ;;  %vm8393_vm2 = vmmov 0   ;;  %v8135_v6 = vld [vmem:[%s10966_s4 + $0x18] sm:$0xff]   ;;  %v8136_v7 = vld [vmem:[%s10966_s4 + $0x20] sm:$0x3f]  }
   0xf   : > { %7106 = vmatpush3.bf16.msra.mxu0 %v8132_v0  ;;  %7360 = vmatpush3.bf16.msra.mxu1 %v8132_v0  ;;  %p292_p3 = scmp.lt.s32.totalorder %s291_s27, 731  ;;  %v974_v5 = vsel %vm972_vm0, 4294967295, %v8392_v4  ;;  %vm788_vm3 = vcmask 613376   ;;  %vm5876_vm4 = vcmask 257024  }
  0x10   : > { %7107 = vmatprep.subr.bf16.mxu0 %v10969_v1  ;;  %7361 = vmatprep.subr.bf16.mxu1 %v10969_v1  ;;  %v975_v8 = vsel %vm973_vm1, %v974_v5, 0 }
  0x11   : > { %7115 = vmatprep.mubr.msk.bf16.mxu0 %vm8393_vm2, %v10969_v1  ;;  %7369 = vmatprep.mubr.msk.bf16.mxu1 %vm8393_vm2, %v10969_v1  ;;  %s11683_s27 = smov (!%p292_p3, %s291_s27), 731  ;;  %v977_v9 = vand.u32 %v8136_v7, %v975_v8 }
  0x12   : > { %s8464_s10 = sshll.u32 %s11683_s27, 2 }
  0x13   : > { %7108 = vmatpush3.bf16.msra.mxu0 %v8133_v2  ;;  %7362 = vmatpush3.bf16.msra.mxu1 %v8133_v2  ;;  %s8470_s13 = scalar_lea.vmem %s10962_s0, %s8464_s10  ;;  %s8476_s16 = scalar_lea.vmem %s10963_s1, %s8464_s10 }
  0x14   : > { %7109 = vmatprep.subr.bf16.mxu0 %v10969_v1  ;;  %7363 = vmatprep.subr.bf16.mxu1 %v10969_v1  ;;  %v8137_v10 = vld [vmem:[%s8470_s13] sm:$0xff]   ;;  %v8139_v12 = vld [vmem:[%s8470_s13 + $0x8] sm:$0xff]   ;;  %v8141_v14 = vld [vmem:[%s8470_s13 + $0x10] sm:$0xff]   ;;  %s9082_s19 = scalar_lea.vmem %s10964_s2, %s8464_s10  ;;  %s9090_s23 = scalar_lea.vmem %s10965_s3, %s8464_s10 }
  0x15   : > { %v8138_v11 = vld [vmem:[%s8476_s16] sm:$0xff]   ;;  %v8140_v13 = vld [vmem:[%s8476_s16 + $0x8] sm:$0xff]   ;;  %v8142_v15 = vld [vmem:[%s8476_s16 + $0x10] sm:$0xff]   ;;  %s9958_s28 = scalar_lea.vmem %s10968_s6, %s8464_s10 }
  0x16   : > { %v8143_v16 = vld [vmem:[%s8470_s13 + $0x18] sm:$0xff]   ;;  %v8145_v18 = vld [vmem:[%s8470_s13 + $0x20] sm:$0xff]   ;;  %v8147_v20 = vld [vmem:[%s8470_s13 + $0x28] sm:$0xff]  }
  0x17   : > { %7110 = vmatpush3.bf16.msra.mxu0 %v8134_v3  ;;  %7364 = vmatpush3.bf16.msra.mxu1 %v8134_v3  ;;  %v8144_v17 = vld [vmem:[%s8476_s16 + $0x18] sm:$0xff]   ;;  %v8146_v19 = vld [vmem:[%s8476_s16 + $0x20] sm:$0xff]   ;;  %v8148_v21 = vld [vmem:[%s8476_s16 + $0x28] sm:$0xff]  }
  0x18   : > { %7111 = vmatprep.subr.bf16.mxu0 %v10969_v1  ;;  %7365 = vmatprep.subr.bf16.mxu1 %v10969_v1  ;;  %v8149_v22 = vld [vmem:[%s8470_s13 + $0x30] sm:$0xff]   ;;  %v8151_v24 = vld [vmem:[%s8470_s13 + $0x38] sm:$0xff]   ;;  %v8153_v26 = vld [vmem:[%s8470_s13 + $0x40] sm:$0xff]  }
  0x19   : > { %v8150_v23 = vld [vmem:[%s8476_s16 + $0x30] sm:$0xff]   ;;  %v8152_v25 = vld [vmem:[%s8476_s16 + $0x38] sm:$0xff]   ;;  %v8154_v27 = vld [vmem:[%s8476_s16 + $0x40] sm:$0xff]  }
  0x1a   : > { %v8155_v28 = vld [vmem:[%s8470_s13 + $0x48] sm:$0xff]   ;;  %v8157_v30 = vld [vmem:[%s8470_s13 + $0x50] sm:$0xff]   ;;  %v8159_v32 = vld [vmem:[%s8470_s13 + $0x58] sm:$0xff]  }
  0x1b   : > { %7112 = vmatpush3.bf16.msra.mxu0 %v8135_v6  ;;  %7366 = vmatpush3.bf16.msra.mxu1 %v8135_v6  ;;  %v8156_v29 = vld [vmem:[%s8476_s16 + $0x48] sm:$0xff]   ;;  %v8158_v31 = vld [vmem:[%s8476_s16 + $0x50] sm:$0xff]   ;;  %v8160_v33 = vld [vmem:[%s8476_s16 + $0x58] sm:$0xff]  }
  0x1c   : > { %7113 = vmatprep.subr.bf16.mxu0 %v10969_v1  ;;  %7367 = vmatprep.subr.bf16.mxu1 %v10969_v1  ;;  %v8161_v34 = vld [vmem:[%s8470_s13 + $0x60] sm:$0xff]   ;;  %v8163_v36 = vld [vmem:[%s8470_s13 + $0x68] sm:$0xff]   ;;  %v8165_v38 = vld [vmem:[%s8470_s13 + $0x70] sm:$0xff]  }
  0x1d   : > { %v8162_v35 = vld [vmem:[%s8476_s16 + $0x60] sm:$0xff]   ;;  %v8164_v37 = vld [vmem:[%s8476_s16 + $0x68] sm:$0xff]   ;;  %v8166_v39 = vld [vmem:[%s8476_s16 + $0x70] sm:$0xff]  }
  0x1e   : > { %v8167_v40 = vld [vmem:[%s8470_s13 + $0x78] sm:$0xff]   ;;  %v8169_v42 = vld [vmem:[%s8470_s13 + $0x80] sm:$0xff]   ;;  %v8171_v44 = vld [vmem:[%s8470_s13 + $0x88] sm:$0xff]  }
  0x1f   : > { %7114 = vmatpush3.bf16.msra.mxu0 %v977_v9  ;;  %7368 = vmatpush3.bf16.msra.mxu1 %v977_v9  ;;  %v8168_v41 = vld [vmem:[%s8476_s16 + $0x78] sm:$0xff]   ;;  %v8170_v43 = vld [vmem:[%s8476_s16 + $0x80] sm:$0xff]   ;;  %v8172_v45 = vld [vmem:[%s8476_s16 + $0x88] sm:$0xff]  }
  0x20   : > { %7613 = vmatprep.subr.bf16.mxu0 %v10969_v1  ;;  %7867 = vmatprep.subr.bf16.mxu1 %v10969_v1  ;;  %v8173_v46 = vld [vmem:[%s8470_s13 + $0x90] sm:$0xff]   ;;  %v8175_v48 = vld [vmem:[%s8470_s13 + $0x98] sm:$0xff]   ;;  %v8177_v50 = vld [vmem:[%s8470_s13 + $0xa0] sm:$0xff]  }
  0x21   : > { %v8174_v47 = vld [vmem:[%s8476_s16 + $0x90] sm:$0xff]   ;;  %v8176_v49 = vld [vmem:[%s8476_s16 + $0x98] sm:$0xff]   ;;  %v8178_v51 = vld [vmem:[%s8476_s16 + $0xa0] sm:$0xff]  }
  0x22   : > { %7116 = vmatmul.mubr.msk.bf16.vlgmr.msra.gmra.mrb[0].mxu0 %vm788_vm3, %v8137_v10  ;;  %7370 = vmatmul.mubr.msk.bf16.vlgmr.msra.gmra.mrb[0].mxu1 %vm788_vm3, %v8138_v11  ;;  %v8179_v52 = vld [vmem:[%s8470_s13 + $0xa8] sm:$0xff]   ;;  %v8181_v54 = vld [vmem:[%s8470_s13 + $0xb0] sm:$0xff]   ;;  %v8183_v56 = vld [vmem:[%s8470_s13 + $0xb8] sm:$0xff]  }
  0x23   : > { %7614 = vmatpush3.bf16.msra.mxu0 %v8132_v0  ;;  %7868 = vmatpush3.bf16.msra.mxu1 %v8132_v0  ;;  %v8180_v53 = vld [vmem:[%s8476_s16 + $0xa8] sm:$0xff]   ;;  %v8182_v55 = vld [vmem:[%s8476_s16 + $0xb0] sm:$0xff]   ;;  %v8184_v57 = vld [vmem:[%s8476_s16 + $0xb8] sm:$0xff]  }
  0x24   : > { %7119 = vmatprep.mubr.msk.bf16.mxu0 %vm8393_vm2, %v10969_v1  ;;  %7373 = vmatprep.mubr.msk.bf16.mxu1 %vm8393_vm2, %v10969_v1  ;;  %v8185_v58 = vld [vmem:[%s8470_s13 + $0xc0] sm:$0xff]   ;;  %v8187_v60 = vld [vmem:[%s8470_s13 + $0xc8] sm:$0xff]   ;;  %v8189_v62 = vld [vmem:[%s8470_s13 + $0xd0] sm:$0xff]  }
  0x25   : > { %7615 = vmatprep.subr.bf16.mxu0 %v10969_v1  ;;  %7869 = vmatprep.subr.bf16.mxu1 %v10969_v1  ;;  %v8186_v59 = vld [vmem:[%s8476_s16 + $0xc0] sm:$0xff]   ;;  %v8188_v61 = vld [vmem:[%s8476_s16 + $0xc8] sm:$0xff]   ;;  %v8190_v63 = vld [vmem:[%s8476_s16 + $0xd0] sm:$0xff]  }
  0x26   : > { %v8192_v7 = vld [vmem:[%s8476_s16 + $0xd8] sm:$0xff]  }
  0x27   : > { %7616 = vmatpush3.bf16.msra.mxu0 %v8133_v2  ;;  %7870 = vmatpush3.bf16.msra.mxu1 %v8133_v2 }
  0x28   : > { %7617 = vmatprep.subr.bf16.mxu0 %v10969_v1  ;;  %7871 = vmatprep.subr.bf16.mxu1 %v10969_v1 }
  0x2a   : > { %7120 = vmatmul.mubr.msk.bf16.gmra.mrb[4].mxu0 %vm788_vm3, %v8139_v12  ;;  %7374 = vmatmul.mubr.msk.bf16.gmra.mrb[4].mxu1 %vm788_vm3, %v8140_v13 }
  0x2b   : > { %7123 = vmatprep.mubr.msk.bf16.mxu0 %vm8393_vm2, %v10969_v1  ;;  %7377 = vmatprep.mubr.msk.bf16.mxu1 %vm8393_vm2, %v10969_v1 }
  0x2c   : > { %7618 = vmatpush3.bf16.msra.mxu0 %v8134_v3  ;;  %7872 = vmatpush3.bf16.msra.mxu1 %v8134_v3 }
  0x2d   : > { %7619 = vmatprep.subr.bf16.mxu0 %v10969_v1  ;;  %7873 = vmatprep.subr.bf16.mxu1 %v10969_v1 }
  0x30   : > { %7620 = vmatpush3.bf16.msra.mxu0 %v8135_v6  ;;  %7874 = vmatpush3.bf16.msra.mxu1 %v8135_v6  ;;  %v8191_v6 = vld [vmem:[%s8470_s13 + $0xd8] sm:$0xff]  }
  0x31   : > { %7621 = vmatprep.subr.bf16.mxu0 %v10969_v1  ;;  %7875 = vmatprep.subr.bf16.mxu1 %v10969_v1 }
  0x32   : > { %7124 = vmatmul.mubr.msk.bf16.gmra.mrb[8].mxu0 %vm788_vm3, %v8141_v14  ;;  %7378 = vmatmul.mubr.msk.bf16.gmra.mrb[8].mxu1 %vm788_vm3, %v8142_v15 }
  0x33   : > { %7127 = vmatprep.mubr.msk.bf16.mxu0 %vm8393_vm2, %v10969_v1  ;;  %7381 = vmatprep.mubr.msk.bf16.mxu1 %vm8393_vm2, %v10969_v1 }
  0x34   : > { %7622 = vmatpush3.bf16.msra.mxu0 %v977_v9  ;;  %7876 = vmatpush3.bf16.msra.mxu1 %v977_v9 }
  0x3a   : > { %7128 = vmatmul.mubr.msk.bf16.gmra.mrb[12].mxu0 %vm788_vm3, %v8143_v16  ;;  %7382 = vmatmul.mubr.msk.bf16.gmra.mrb[12].mxu1 %vm788_vm3, %v8144_v17 }
  0x3b   : > { %7131 = vmatprep.mubr.msk.bf16.mxu0 %vm8393_vm2, %v10969_v1  ;;  %7385 = vmatprep.mubr.msk.bf16.mxu1 %vm8393_vm2, %v10969_v1 }
  0x42   : > { %7132 = vmatmul.mubr.msk.bf16.gmra.mrb[16].mxu0 %vm788_vm3, %v8145_v18  ;;  %7386 = vmatmul.mubr.msk.bf16.gmra.mrb[16].mxu1 %vm788_vm3, %v8146_v19  ;;  %v8193_v18 = vld [vmem:[%s8470_s13 + $0xe0] sm:$0xff]  }
  0x43   : > { %7135 = vmatprep.mubr.msk.bf16.mxu0 %vm8393_vm2, %v10969_v1  ;;  %7389 = vmatprep.mubr.msk.bf16.mxu1 %vm8393_vm2, %v10969_v1  ;;  %v8194_v19 = vld [vmem:[%s8476_s16 + $0xe0] sm:$0xff]  }
  0x4a   : > { %7136 = vmatmul.mubr.msk.bf16.gmra.mrb[20].mxu0 %vm788_vm3, %v8147_v20  ;;  %7390 = vmatmul.mubr.msk.bf16.gmra.mrb[20].mxu1 %vm788_vm3, %v8148_v21 }
  0x4b   : > { %7139 = vmatprep.mubr.msk.bf16.mxu0 %vm8393_vm2, %v10969_v1  ;;  %7393 = vmatprep.mubr.msk.bf16.mxu1 %vm8393_vm2, %v10969_v1 }
  0x52   : > { %7140 = vmatmul.mubr.msk.bf16.gmra.mrb[24].mxu0 %vm788_vm3, %v8149_v22  ;;  %7394 = vmatmul.mubr.msk.bf16.gmra.mrb[24].mxu1 %vm788_vm3, %v8150_v23 }
  0x53   : > { %7143 = vmatprep.mubr.msk.bf16.mxu0 %vm8393_vm2, %v10969_v1  ;;  %7397 = vmatprep.mubr.msk.bf16.mxu1 %vm8393_vm2, %v10969_v1 }
  0x5a   : > { %7144 = vmatmul.mubr.msk.bf16.gmra.mrb[28].mxu0 %vm788_vm3, %v8151_v24  ;;  %7398 = vmatmul.mubr.msk.bf16.gmra.mrb[28].mxu1 %vm788_vm3, %v8152_v25 }
  0x5b   : > { %7147 = vmatprep.mubr.msk.bf16.mxu0 %vm8393_vm2, %v10969_v1  ;;  %7401 = vmatprep.mubr.msk.bf16.mxu1 %vm8393_vm2, %v10969_v1 }
  0x62   : > { %7148 = vmatmul.mubr.msk.bf16.gmra.mrb[32].mxu0 %vm788_vm3, %v8153_v26  ;;  %7402 = vmatmul.mubr.msk.bf16.gmra.mrb[32].mxu1 %vm788_vm3, %v8154_v27 }
  0x63   : > { %7151 = vmatprep.mubr.msk.bf16.mxu0 %vm8393_vm2, %v10969_v1  ;;  %7405 = vmatprep.mubr.msk.bf16.mxu1 %vm8393_vm2, %v10969_v1 }
  0x6a   : > { %7152 = vmatmul.mubr.msk.bf16.gmra.mrb[36].mxu0 %vm788_vm3, %v8155_v28  ;;  %7406 = vmatmul.mubr.msk.bf16.gmra.mrb[36].mxu1 %vm788_vm3, %v8156_v29 }
  0x6b   : > { %7155 = vmatprep.mubr.msk.bf16.mxu0 %vm8393_vm2, %v10969_v1  ;;  %7409 = vmatprep.mubr.msk.bf16.mxu1 %vm8393_vm2, %v10969_v1 }
  0x72   : > { %7156 = vmatmul.mubr.msk.bf16.gmra.mrb[40].mxu0 %vm788_vm3, %v8157_v30  ;;  %7410 = vmatmul.mubr.msk.bf16.gmra.mrb[40].mxu1 %vm788_vm3, %v8158_v31  ;;  %v8195_v30 = vld [vmem:[%s8470_s13 + $0xe8] sm:$0xff]  }
  0x73   : > { %7159 = vmatprep.mubr.msk.bf16.mxu0 %vm8393_vm2, %v10969_v1  ;;  %7413 = vmatprep.mubr.msk.bf16.mxu1 %vm8393_vm2, %v10969_v1  ;;  %v8196_v31 = vld [vmem:[%s8476_s16 + $0xe8] sm:$0xff]  }
  0x7a   : > { %7160 = vmatmul.mubr.msk.bf16.gmra.mrb[44].mxu0 %vm788_vm3, %v8159_v32  ;;  %7414 = vmatmul.mubr.msk.bf16.gmra.mrb[44].mxu1 %vm788_vm3, %v8160_v33 }
  0x7b   : > { %7163 = vmatprep.mubr.msk.bf16.mxu0 %vm8393_vm2, %v10969_v1  ;;  %7417 = vmatprep.mubr.msk.bf16.mxu1 %vm8393_vm2, %v10969_v1 }
  0x82   : > { %7164 = vmatmul.mubr.msk.bf16.gmra.mrb[48].mxu0 %vm788_vm3, %v8161_v34  ;;  %7418 = vmatmul.mubr.msk.bf16.gmra.mrb[48].mxu1 %vm788_vm3, %v8162_v35 }
  0x83   : > { %7167 = vmatprep.mubr.msk.bf16.mxu0 %vm8393_vm2, %v10969_v1  ;;  %7421 = vmatprep.mubr.msk.bf16.mxu1 %vm8393_vm2, %v10969_v1 }
  0x8a   : > { %7168 = vmatmul.mubr.msk.bf16.gmra.mrb[52].mxu0 %vm788_vm3, %v8163_v36  ;;  %7422 = vmatmul.mubr.msk.bf16.gmra.mrb[52].mxu1 %vm788_vm3, %v8164_v37 }
  0x8b   : > { %7171 = vmatprep.mubr.msk.bf16.mxu0 %vm8393_vm2, %v10969_v1  ;;  %7425 = vmatprep.mubr.msk.bf16.mxu1 %vm8393_vm2, %v10969_v1 }
  0x92   : > { %7172 = vmatmul.mubr.msk.bf16.gmra.mrb[56].mxu0 %vm788_vm3, %v8165_v38  ;;  %7426 = vmatmul.mubr.msk.bf16.gmra.mrb[56].mxu1 %vm788_vm3, %v8166_v39 }
  0x93   : > { %7175 = vmatprep.mubr.msk.bf16.mxu0 %vm8393_vm2, %v10969_v1  ;;  %7429 = vmatprep.mubr.msk.bf16.mxu1 %vm8393_vm2, %v10969_v1 }
  0x9a   : > { %7176 = vmatmul.mubr.msk.bf16.gmra.mrb[60].mxu0 %vm788_vm3, %v8167_v40  ;;  %7430 = vmatmul.mubr.msk.bf16.gmra.mrb[60].mxu1 %vm788_vm3, %v8168_v41 }
  0x9b   : > { %7179 = vmatprep.mubr.msk.bf16.mxu0 %vm8393_vm2, %v10969_v1  ;;  %7433 = vmatprep.mubr.msk.bf16.mxu1 %vm8393_vm2, %v10969_v1 }
  0xa2   : > { %7180 = vmatmul.mubr.msk.bf16.gmra.mrb[64].mxu0 %vm788_vm3, %v8169_v42  ;;  %7434 = vmatmul.mubr.msk.bf16.gmra.mrb[64].mxu1 %vm788_vm3, %v8170_v43  ;;  %v8197_v42 = vld [vmem:[%s8470_s13 + $0xf0] sm:$0xff]  }
  0xa3   : > { %7183 = vmatprep.mubr.msk.bf16.mxu0 %vm8393_vm2, %v10969_v1  ;;  %7437 = vmatprep.mubr.msk.bf16.mxu1 %vm8393_vm2, %v10969_v1  ;;  %v8198_v43 = vld [vmem:[%s8476_s16 + $0xf0] sm:$0xff]  }
  0xaa   : > { %7184 = vmatmul.mubr.msk.bf16.gmra.mrb[68].mxu0 %vm788_vm3, %v8171_v44  ;;  %7438 = vmatmul.mubr.msk.bf16.gmra.mrb[68].mxu1 %vm788_vm3, %v8172_v45 }
  0xab   : > { %7187 = vmatprep.mubr.msk.bf16.mxu0 %vm8393_vm2, %v10969_v1  ;;  %7441 = vmatprep.mubr.msk.bf16.mxu1 %vm8393_vm2, %v10969_v1 }
  0xb2   : > { %7188 = vmatmul.mubr.msk.bf16.gmra.mrb[72].mxu0 %vm788_vm3, %v8173_v46  ;;  %7442 = vmatmul.mubr.msk.bf16.gmra.mrb[72].mxu1 %vm788_vm3, %v8174_v47 }
  0xb3   : > { %7191 = vmatprep.mubr.msk.bf16.mxu0 %vm8393_vm2, %v10969_v1  ;;  %7445 = vmatprep.mubr.msk.bf16.mxu1 %vm8393_vm2, %v10969_v1 }
  0xba   : > { %7192 = vmatmul.mubr.msk.bf16.gmra.mrb[76].mxu0 %vm788_vm3, %v8175_v48  ;;  %7446 = vmatmul.mubr.msk.bf16.gmra.mrb[76].mxu1 %vm788_vm3, %v8176_v49 }
  0xbb   : > { %7195 = vmatprep.mubr.msk.bf16.mxu0 %vm8393_vm2, %v10969_v1  ;;  %7449 = vmatprep.mubr.msk.bf16.mxu1 %vm8393_vm2, %v10969_v1 }
  0xc2   : > { %7196 = vmatmul.mubr.msk.bf16.gmra.mrb[80].mxu0 %vm788_vm3, %v8177_v50  ;;  %7450 = vmatmul.mubr.msk.bf16.gmra.mrb[80].mxu1 %vm788_vm3, %v8178_v51 }
  0xc3   : > { %7199 = vmatprep.mubr.msk.bf16.mxu0 %vm8393_vm2, %v10969_v1  ;;  %7453 = vmatprep.mubr.msk.bf16.mxu1 %vm8393_vm2, %v10969_v1 }
  0xca   : > { %7200 = vmatmul.mubr.msk.bf16.gmra.mrb[84].mxu0 %vm788_vm3, %v8179_v52  ;;  %7454 = vmatmul.mubr.msk.bf16.gmra.mrb[84].mxu1 %vm788_vm3, %v8180_v53 }
  0xcb   : > { %7203 = vmatprep.mubr.msk.bf16.mxu0 %vm8393_vm2, %v10969_v1  ;;  %7457 = vmatprep.mubr.msk.bf16.mxu1 %vm8393_vm2, %v10969_v1 }
  0xd2   : > { %7204 = vmatmul.mubr.msk.bf16.gmra.mrb[88].mxu0 %vm788_vm3, %v8181_v54  ;;  %7458 = vmatmul.mubr.msk.bf16.gmra.mrb[88].mxu1 %vm788_vm3, %v8182_v55  ;;  %v8199_v54 = vld [vmem:[%s8470_s13 + $0xf8] sm:$0xff]  }
  0xd3   : > { %7207 = vmatprep.mubr.msk.bf16.mxu0 %vm8393_vm2, %v10969_v1  ;;  %7461 = vmatprep.mubr.msk.bf16.mxu1 %vm8393_vm2, %v10969_v1  ;;  %v8200_v55 = vld [vmem:[%s8476_s16 + $0xf8] sm:$0xff]  }
  0xda   : > { %7208 = vmatmul.mubr.msk.bf16.gmra.mrb[92].mxu0 %vm788_vm3, %v8183_v56  ;;  %7462 = vmatmul.mubr.msk.bf16.gmra.mrb[92].mxu1 %vm788_vm3, %v8184_v57 }
  0xdb   : > { %7211 = vmatprep.mubr.msk.bf16.mxu0 %vm8393_vm2, %v10969_v1  ;;  %7465 = vmatprep.mubr.msk.bf16.mxu1 %vm8393_vm2, %v10969_v1 }
  0xe2   : > { %7212 = vmatmul.mubr.msk.bf16.gmra.mrb[96].mxu0 %vm788_vm3, %v8185_v58  ;;  %7466 = vmatmul.mubr.msk.bf16.gmra.mrb[96].mxu1 %vm788_vm3, %v8186_v59 }
  0xe3   : > { %7215 = vmatprep.mubr.msk.bf16.mxu0 %vm8393_vm2, %v10969_v1  ;;  %7469 = vmatprep.mubr.msk.bf16.mxu1 %vm8393_vm2, %v10969_v1 }
  0xea   : > { %7216 = vmatmul.mubr.msk.bf16.gmra.mrb[100].mxu0 %vm788_vm3, %v8187_v60  ;;  %7470 = vmatmul.mubr.msk.bf16.gmra.mrb[100].mxu1 %vm788_vm3, %v8188_v61 }
  0xeb   : > { %7219 = vmatprep.mubr.msk.bf16.mxu0 %vm8393_vm2, %v10969_v1  ;;  %7473 = vmatprep.mubr.msk.bf16.mxu1 %vm8393_vm2, %v10969_v1 }
  0xf2   : > { %7220 = vmatmul.mubr.msk.bf16.gmra.mrb[104].mxu0 %vm788_vm3, %v8189_v62  ;;  %7474 = vmatmul.mubr.msk.bf16.gmra.mrb[104].mxu1 %vm788_vm3, %v8190_v63 }
  0xf3   : > { %7223 = vmatprep.mubr.msk.bf16.mxu0 %vm8393_vm2, %v10969_v1  ;;  %7477 = vmatprep.mubr.msk.bf16.mxu1 %vm8393_vm2, %v10969_v1 }
  0xf5   : > { %v8706_v0 = vpop.f32.mrb[0].mxu0  ;;  %v8708_v2 = vpop.f32.mrb[0].mxu1 }
  0xf6   : > { %v7117_v4 = vpop.f32.mrb[1].mxu0  ;;  %v7371_v5 = vpop.f32.mrb[1].mxu1 }
  0xf7   : > { %v8714_v8 = vpop.f32.mrb[2].mxu0  ;;  %v8716_v9 = vpop.f32.mrb[2].mxu1 }
  0xf8   : > { %v7118_v11 = vpop.f32.mrb[3].mxu0  ;;  %v7372_v12 = vpop.f32.mrb[3].mxu1 }
  0xfa   : > { %7224 = vmatmul.mubr.msk.bf16.gmra.mrb[108].mxu0 %vm788_vm3, %v8191_v6  ;;  %7478 = vmatmul.mubr.msk.bf16.gmra.mrb[108].mxu1 %vm788_vm3, %v8192_v7  ;;  %v8201_v6 = vld [vmem:[%s8470_s13 + $0x100] sm:$0xff]  }
  0xfb   : > { %7227 = vmatprep.mubr.msk.bf16.mxu0 %vm8393_vm2, %v10969_v1  ;;  %7481 = vmatprep.mubr.msk.bf16.mxu1 %vm8393_vm2, %v10969_v1  ;;  %v8202_v7 = vld [vmem:[%s8476_s16 + $0x100] sm:$0xff]  }
  0xfd   : > { %v8726_v13 = vpop.f32.mrb[4].mxu0  ;;  %v8728_v14 = vpop.f32.mrb[4].mxu1 }
  0xfe   : > { %v7121_v16 = vpop.f32.mrb[5].mxu0  ;;  %v7375_v17 = vpop.f32.mrb[5].mxu1 }
  0xff   : > { %v8734_v20 = vpop.f32.mrb[6].mxu0  ;;  %v8736_v21 = vpop.f32.mrb[6].mxu1 }
 0x100   : > { %v7122_v23 = vpop.f32.mrb[7].mxu0  ;;  %v7376_v24 = vpop.f32.mrb[7].mxu1 }
 0x102   : > { %7228 = vmatmul.mubr.msk.bf16.gmra.mrb[112].mxu0 %vm788_vm3, %v8193_v18  ;;  %7482 = vmatmul.mubr.msk.bf16.gmra.mrb[112].mxu1 %vm788_vm3, %v8194_v19 }
 0x103   : > { %7231 = vmatprep.mubr.msk.bf16.mxu0 %vm8393_vm2, %v10969_v1  ;;  %7485 = vmatprep.mubr.msk.bf16.mxu1 %vm8393_vm2, %v10969_v1 }
 0x105   : > { %v8746_v25 = vpop.f32.mrb[8].mxu0  ;;  %v8748_v26 = vpop.f32.mrb[8].mxu1 }
 0x106   : > { %v7125_v28 = vpop.f32.mrb[9].mxu0  ;;  %v7379_v29 = vpop.f32.mrb[9].mxu1 }
 0x107   : > { %v8754_v32 = vpop.f32.mrb[10].mxu0  ;;  %v8756_v33 = vpop.f32.mrb[10].mxu1 }
 0x108   : > { %v7126_v35 = vpop.f32.mrb[11].mxu0  ;;  %v7380_v36 = vpop.f32.mrb[11].mxu1 }
 0x10a   : > { %7232 = vmatmul.mubr.msk.bf16.gmra.mrb[116].mxu0 %vm788_vm3, %v8195_v30  ;;  %7486 = vmatmul.mubr.msk.bf16.gmra.mrb[116].mxu1 %vm788_vm3, %v8196_v31  ;;  %v8203_v30 = vld [vmem:[%s8470_s13 + $0x108] sm:$0xff]  }
 0x10b   : > { %7235 = vmatprep.mubr.msk.bf16.mxu0 %vm8393_vm2, %v10969_v1  ;;  %7489 = vmatprep.mubr.msk.bf16.mxu1 %vm8393_vm2, %v10969_v1  ;;  %v8204_v31 = vld [vmem:[%s8476_s16 + $0x108] sm:$0xff]  }
 0x10d   : > { %v8766_v37 = vpop.f32.mrb[12].mxu0  ;;  %v8768_v38 = vpop.f32.mrb[12].mxu1 }
 0x10e   : > { %v7129_v40 = vpop.f32.mrb[13].mxu0  ;;  %v7383_v41 = vpop.f32.mrb[13].mxu1 }
 0x10f   : > { %v8774_v44 = vpop.f32.mrb[14].mxu0  ;;  %v8776_v45 = vpop.f32.mrb[14].mxu1 }
 0x110   : > { %v7130_v47 = vpop.f32.mrb[15].mxu0  ;;  %v7384_v48 = vpop.f32.mrb[15].mxu1 }
 0x112   : > { %7236 = vmatmul.mubr.msk.bf16.gmra.mrb[120].mxu0 %vm788_vm3, %v8197_v42  ;;  %7490 = vmatmul.mubr.msk.bf16.gmra.mrb[120].mxu1 %vm788_vm3, %v8198_v43 }
 0x113   : > { %7239 = vmatprep.mubr.msk.bf16.mxu0 %vm8393_vm2, %v10969_v1  ;;  %7493 = vmatprep.mubr.msk.bf16.mxu1 %vm8393_vm2, %v10969_v1 }
 0x115   : > { %v8786_v49 = vpop.f32.mrb[16].mxu0  ;;  %v8788_v50 = vpop.f32.mrb[16].mxu1 }
 0x116   : > { %v7133_v52 = vpop.f32.mrb[17].mxu0  ;;  %v7387_v53 = vpop.f32.mrb[17].mxu1 }
 0x117   : > { %v8794_v56 = vpop.f32.mrb[18].mxu0  ;;  %v8796_v57 = vpop.f32.mrb[18].mxu1 }
 0x118   : > { %v7134_v59 = vpop.f32.mrb[19].mxu0  ;;  %v7388_v60 = vpop.f32.mrb[19].mxu1 }
 0x11a   : > { %7240 = vmatmul.mubr.msk.bf16.gmra.mrb[124].mxu0 %vm788_vm3, %v8199_v54  ;;  %7494 = vmatmul.mubr.msk.bf16.gmra.mrb[124].mxu1 %vm788_vm3, %v8200_v55  ;;  %v8205_v54 = vld [vmem:[%s8470_s13 + $0x110] sm:$0xff]  }
 0x11b   : > { %7243 = vmatprep.mubr.msk.bf16.mxu0 %vm8393_vm2, %v10969_v1  ;;  %7497 = vmatprep.mubr.msk.bf16.mxu1 %vm8393_vm2, %v10969_v1  ;;  %v8206_v55 = vld [vmem:[%s8476_s16 + $0x110] sm:$0xff]  }
 0x11d   : > { %v8806_v61 = vpop.f32.mrb[20].mxu0  ;;  %v8808_v62 = vpop.f32.mrb[20].mxu1 }
 0x11e   : > { %v7137_v4 = vpop.f32.mrb[21].mxu0  ;;  %v7391_v5 = vpop.f32.mrb[21].mxu1 }
 0x11f   : > { %v8814_v11 = vpop.f32.mrb[22].mxu0  ;;  %v8816_v12 = vpop.f32.mrb[22].mxu1 }
 0x120   : > { %v7138_v17 = vpop.f32.mrb[23].mxu0  ;;  %v7392_v18 = vpop.f32.mrb[23].mxu1 }
 0x122   : > { %7244 = vmatmul.mubr.msk.bf16.gmra.mrb[128].mxu0 %vm788_vm3, %v8201_v6  ;;  %7498 = vmatmul.mubr.msk.bf16.gmra.mrb[128].mxu1 %vm788_vm3, %v8202_v7 }
 0x123   : > { %7247 = vmatprep.mubr.msk.bf16.mxu0 %vm8393_vm2, %v10969_v1  ;;  %7501 = vmatprep.mubr.msk.bf16.mxu1 %vm8393_vm2, %v10969_v1 }
 0x125   : > { %v8826_v19 = vpop.f32.mrb[24].mxu0  ;;  %v8828_v23 = vpop.f32.mrb[24].mxu1 }
 0x126   : > { %v7141_v28 = vpop.f32.mrb[25].mxu0  ;;  %v7395_v29 = vpop.f32.mrb[25].mxu1 }
 0x127   : > { %v8834_v35 = vpop.f32.mrb[26].mxu0  ;;  %v8836_v36 = vpop.f32.mrb[26].mxu1 }
 0x128   : > { %v7142_v41 = vpop.f32.mrb[27].mxu0  ;;  %v7396_v42 = vpop.f32.mrb[27].mxu1 }
 0x12a   : > { %7248 = vmatmul.mubr.msk.bf16.gmra.mrb[132].mxu0 %vm788_vm3, %v8203_v30  ;;  %7502 = vmatmul.mubr.msk.bf16.gmra.mrb[132].mxu1 %vm788_vm3, %v8204_v31  ;;  %v8207_v30 = vld [vmem:[%s8470_s13 + $0x118] sm:$0xff]  }
 0x12b   : > { %7251 = vmatprep.mubr.msk.bf16.mxu0 %vm8393_vm2, %v10969_v1  ;;  %7505 = vmatprep.mubr.msk.bf16.mxu1 %vm8393_vm2, %v10969_v1  ;;  %v8208_v31 = vld [vmem:[%s8476_s16 + $0x118] sm:$0xff]  }
 0x12d   : > { %v8846_v43 = vpop.f32.mrb[28].mxu0  ;;  %v8848_v47 = vpop.f32.mrb[28].mxu1 }
 0x12e   : > { %v7145_v52 = vpop.f32.mrb[29].mxu0  ;;  %v7399_v53 = vpop.f32.mrb[29].mxu1 }
 0x12f   : > { %v8854_v59 = vpop.f32.mrb[30].mxu0  ;;  %v8856_v60 = vpop.f32.mrb[30].mxu1 }
 0x130   : > { %v7146_v5 = vpop.f32.mrb[31].mxu0  ;;  %v7400_v6 = vpop.f32.mrb[31].mxu1 }
 0x131   : > { %v11175_v6 = vmov 0.0  }
 0x132   : > { %7252 = vmatmul.mubr.msk.bf16.gmra.mrb[136].mxu0 %vm788_vm3, %v8205_v54  ;;  %7506 = vmatmul.mubr.msk.bf16.gmra.mrb[136].mxu1 %vm788_vm3, %v8206_v55 }
 0x133   : > { %7255 = vmatprep.mubr.msk.bf16.mxu0 %vm8393_vm2, %v10969_v1  ;;  %7509 = vmatprep.mubr.msk.bf16.mxu1 %vm8393_vm2, %v10969_v1 }
 0x135   : > { %v8866_v7 = vpop.f32.mrb[32].mxu0  ;;  %v8868_v17 = vpop.f32.mrb[32].mxu1 }
 0x136   : > { %v7149_v28 = vpop.f32.mrb[33].mxu0  ;;  %v7403_v29 = vpop.f32.mrb[33].mxu1 }
 0x137   : > { %v8874_v41 = vpop.f32.mrb[34].mxu0  ;;  %v8876_v42 = vpop.f32.mrb[34].mxu1 }
 0x138   : > { %v7150_v53 = vpop.f32.mrb[35].mxu0  ;;  %v7404_v54 = vpop.f32.mrb[35].mxu1 }
 0x139   : > { %v8209_v53 = vld [vmem:[%s8470_s13 + $0x120] sm:$0xff]  }
 0x13a   : > { %7256 = vmatmul.mubr.msk.bf16.gmra.mrb[140].mxu0 %vm788_vm3, %v8207_v30  ;;  %7510 = vmatmul.mubr.msk.bf16.gmra.mrb[140].mxu1 %vm788_vm3, %v8208_v31  ;;  %v8210_v30 = vld [vmem:[%s8476_s16 + $0x120] sm:$0xff]  }
 0x13b   : > { %7259 = vmatprep.mubr.msk.bf16.mxu0 %vm8393_vm2, %v10969_v1  ;;  %7513 = vmatprep.mubr.msk.bf16.mxu1 %vm8393_vm2, %v10969_v1 }
 0x13d   : > { %v8886_v55 = vpop.f32.mrb[36].mxu0  ;;  %v8888_v5 = vpop.f32.mrb[36].mxu1 }
 0x13e   : > { %v7153_v28 = vpop.f32.mrb[37].mxu0  ;;  %v7407_v29 = vpop.f32.mrb[37].mxu1 }
 0x13f   : > { %v8894_v31 = vpop.f32.mrb[38].mxu0  ;;  %v8896_v54 = vpop.f32.mrb[38].mxu1 }
 0x140   : > { %v7154_v18 = vpop.f32.mrb[39].mxu0  ;;  %v7408_v4 = vpop.f32.mrb[39].mxu1 }
 0x141   : > { %v8211_v4 = vld [vmem:[%s8470_s13 + $0x128] sm:$0xff]  }
 0x142   : > { %7260 = vmatmul.mubr.msk.bf16.gmra.mrb[144].mxu0 %vm788_vm3, %v8209_v53  ;;  %7514 = vmatmul.mubr.msk.bf16.gmra.mrb[144].mxu1 %vm788_vm3, %v8210_v30  ;;  %v8212_v53 = vld [vmem:[%s8476_s16 + $0x128] sm:$0xff]  }
 0x143   : > { %7263 = vmatprep.mubr.msk.bf16.mxu0 %vm8393_vm2, %v10969_v1  ;;  %7517 = vmatprep.mubr.msk.bf16.mxu1 %vm8393_vm2, %v10969_v1 }
 0x145   : > { %v8906_v28 = vpop.f32.mrb[40].mxu0  ;;  %v8908_v29 = vpop.f32.mrb[40].mxu1 }
 0x146   : > { %v7157_v52 = vpop.f32.mrb[41].mxu0  ;;  %v7411_v18 = vpop.f32.mrb[41].mxu1 }
 0x147   : > { %v8914_v30 = vpop.f32.mrb[42].mxu0  ;;  %v8916_v48 = vpop.f32.mrb[42].mxu1 }
 0x148   : > { %v7158_v24 = vpop.f32.mrb[43].mxu0  ;;  %v7412_v16 = vpop.f32.mrb[43].mxu1 }
 0x149   : > { %v8213_v16 = vld [vmem:[%s8470_s13 + $0x130] sm:$0xff]  }
 0x14a   : > { %7264 = vmatmul.mubr.msk.bf16.gmra.mrb[148].mxu0 %vm788_vm3, %v8211_v4  ;;  %7518 = vmatmul.mubr.msk.bf16.gmra.mrb[148].mxu1 %vm788_vm3, %v8212_v53  ;;  %v8214_v4 = vld [vmem:[%s8476_s16 + $0x130] sm:$0xff]  }
 0x14b   : > { %7267 = vmatprep.mubr.msk.bf16.mxu0 %vm8393_vm2, %v10969_v1  ;;  %7521 = vmatprep.mubr.msk.bf16.mxu1 %vm8393_vm2, %v10969_v1 }
 0x14d   : > { %v8926_v52 = vpop.f32.mrb[44].mxu0  ;;  %v8928_v18 = vpop.f32.mrb[44].mxu1 }
 0x14e   : > { %v7161_v40 = vpop.f32.mrb[45].mxu0  ;;  %v7415_v24 = vpop.f32.mrb[45].mxu1 }
 0x14f   : > { %v8934_v53 = vpop.f32.mrb[46].mxu0  ;;  %v8936_v63 = vpop.f32.mrb[46].mxu1 }
 0x150   : > { %v7162_v51 = vpop.f32.mrb[47].mxu0  ;;  %v7416_v46 = vpop.f32.mrb[47].mxu1 }
 0x151   : > { %v8215_v46 = vld [vmem:[%s8470_s13 + $0x138] sm:$0xff]  }
 0x152   : > { %7268 = vmatmul.mubr.msk.bf16.gmra.mrb[152].mxu0 %vm788_vm3, %v8213_v16  ;;  %7522 = vmatmul.mubr.msk.bf16.gmra.mrb[152].mxu1 %vm788_vm3, %v8214_v4  ;;  %v8216_v16 = vld [vmem:[%s8476_s16 + $0x138] sm:$0xff]  }
 0x153   : > { %7271 = vmatprep.mubr.msk.bf16.mxu0 %vm8393_vm2, %v10969_v1  ;;  %7525 = vmatprep.mubr.msk.bf16.mxu1 %vm8393_vm2, %v10969_v1 }
 0x155   : > { %v8946_v40 = vpop.f32.mrb[48].mxu0  ;;  %v8948_v24 = vpop.f32.mrb[48].mxu1 }
 0x156   : > { %11167 = vst [vmem:[#allocation2_spill] sm:$0xff] %v8946_v40  ;;  %11168 = vst [vmem:[#allocation3_spill] sm:$0xff] %v8948_v24  ;;  %v7165_v58 = vpop.f32.mrb[49].mxu0  ;;  %v7419_v51 = vpop.f32.mrb[49].mxu1 }
 0x157   : > { %v8954_v4 = vpop.f32.mrb[50].mxu0  ;;  %v8956_v39 = vpop.f32.mrb[50].mxu1 }
 0x158   : > { %11169 = vst [vmem:[#allocation4_spill] sm:$0xff] %v8954_v4  ;;  %11170 = vst [vmem:[#allocation5_spill] sm:$0xff] %v8956_v39  ;;  %v7166_v27 = vpop.f32.mrb[51].mxu0  ;;  %v7420_v22 = vpop.f32.mrb[51].mxu1  ;;  %v8313_v4 = vld [vmem:[%s9082_s19 + $0xd8] sm:$0xff]  }
 0x159   : > { %v8217_v22 = vld [vmem:[%s8470_s13 + $0x140] sm:$0xff]  }
 0x15a   : > { %7272 = vmatmul.mubr.msk.bf16.gmra.mrb[156].mxu0 %vm788_vm3, %v8215_v46  ;;  %7526 = vmatmul.mubr.msk.bf16.gmra.mrb[156].mxu1 %vm788_vm3, %v8216_v16  ;;  %v8218_v46 = vld [vmem:[%s8476_s16 + $0x140] sm:$0xff]  }
 0x15b   : > { %7275 = vmatprep.mubr.msk.bf16.mxu0 %vm8393_vm2, %v10969_v1  ;;  %7529 = vmatprep.mubr.msk.bf16.mxu1 %vm8393_vm2, %v10969_v1 }
 0x15d   : > { %v8966_v58 = vpop.f32.mrb[52].mxu0  ;;  %v8968_v51 = vpop.f32.mrb[52].mxu1 }
 0x15e   : > { %11171 = vst [vmem:[#allocation6_spill] sm:$0xff] %v8966_v58  ;;  %11172 = vst [vmem:[#allocation7_spill] sm:$0xff] %v8968_v51  ;;  %v7169_v34 = vpop.f32.mrb[53].mxu0  ;;  %v7423_v27 = vpop.f32.mrb[53].mxu1 }
 0x15f   : > { %v8974_v16 = vpop.f32.mrb[54].mxu0  ;;  %v8976_v15 = vpop.f32.mrb[54].mxu1 }
 0x160   : > { %11173 = vst [vmem:[#allocation8_spill] sm:$0xff] %v8974_v16  ;;  %11174 = vst [vmem:[#allocation9_spill] sm:$0xff] %v8976_v15  ;;  %v7170_v3 = vpop.f32.mrb[55].mxu0  ;;  %v7424_v1 = vpop.f32.mrb[55].mxu1 }
 0x161   : > { %v8219_v1 = vld [vmem:[%s8470_s13 + $0x148] sm:$0xff]  }
 0x162   : > { %7276 = vmatmul.mubr.msk.bf16.gmra.mrb[160].mxu0 %vm788_vm3, %v8217_v22  ;;  %7530 = vmatmul.mubr.msk.bf16.gmra.mrb[160].mxu1 %vm788_vm3, %v8218_v46  ;;  %v8220_v22 = vld [vmem:[%s8476_s16 + $0x148] sm:$0xff]  }
 0x163   : > { %7279 = vmatprep.mubr.msk.bf16.mxu0 %vm8393_vm2, %v11175_v6  ;;  %7533 = vmatprep.mubr.msk.bf16.mxu1 %vm8393_vm2, %v11175_v6 }
 0x165   : > { %v8986_v34 = vpop.f32.mrb[56].mxu0  ;;  %v8988_v27 = vpop.f32.mrb[56].mxu1 }
 0x166   : > { %11176 = vst [vmem:[#allocation10_spill] sm:$0xff] %v8986_v34  ;;  %11177 = vst [vmem:[#allocation11_spill] sm:$0xff] %v8988_v27  ;;  %v7173_v10 = vpop.f32.mrb[57].mxu0  ;;  %v7427_v3 = vpop.f32.mrb[57].mxu1 }
 0x167   : > { %v8994_v46 = vpop.f32.mrb[58].mxu0  ;;  %v8996_v15 = vpop.f32.mrb[58].mxu1 }
 0x168   : > { %11178 = vst [vmem:[#allocation12_spill] sm:$0xff] %v8994_v46  ;;  %11179 = vst [vmem:[#allocation13_spill] sm:$0xff] %v8996_v15  ;;  %v7174_v58 = vpop.f32.mrb[59].mxu0  ;;  %v7428_v39 = vpop.f32.mrb[59].mxu1 }
 0x169   : > { %v8221_v39 = vld [vmem:[%s8470_s13 + $0x150] sm:$0xff]  }
 0x16a   : > { %7280 = vmatmul.mubr.msk.bf16.gmra.mrb[164].mxu0 %vm788_vm3, %v8219_v1  ;;  %7534 = vmatmul.mubr.msk.bf16.gmra.mrb[164].mxu1 %vm788_vm3, %v8220_v22  ;;  %v8222_v1 = vld [vmem:[%s8476_s16 + $0x150] sm:$0xff]  }
 0x16b   : > { %7283 = vmatprep.mubr.msk.bf16.mxu0 %vm8393_vm2, %v11175_v6  ;;  %7537 = vmatprep.mubr.msk.bf16.mxu1 %vm8393_vm2, %v11175_v6 }
 0x16d   : > { %v9006_v10 = vpop.f32.mrb[60].mxu0  ;;  %v9008_v3 = vpop.f32.mrb[60].mxu1 }
 0x16e   : > { %11180 = vst [vmem:[#allocation14_spill] sm:$0xff] %v9006_v10  ;;  %11181 = vst [vmem:[#allocation15_spill] sm:$0xff] %v9008_v3  ;;  %v7177_v16 = vpop.f32.mrb[61].mxu0  ;;  %v7431_v58 = vpop.f32.mrb[61].mxu1 }
 0x16f   : > { %v9014_v22 = vpop.f32.mrb[62].mxu0  ;;  %v9016_v15 = vpop.f32.mrb[62].mxu1 }
 0x170   : > { %11182 = vst [vmem:[#allocation16_spill] sm:$0xff] %v9014_v22  ;;  %11183 = vst [vmem:[#allocation17_spill] sm:$0xff] %v9016_v15  ;;  %v7178_v27 = vpop.f32.mrb[63].mxu0  ;;  %v7432_v34 = vpop.f32.mrb[63].mxu1 }
 0x171   : > { %v8223_v34 = vld [vmem:[%s8470_s13 + $0x158] sm:$0xff]  }
 0x172   : > { %7284 = vmatmul.mubr.msk.bf16.gmra.mrb[168].mxu0 %vm788_vm3, %v8221_v39  ;;  %7538 = vmatmul.mubr.msk.bf16.gmra.mrb[168].mxu1 %vm788_vm3, %v8222_v1  ;;  %v8224_v39 = vld [vmem:[%s8476_s16 + $0x158] sm:$0xff]  }
 0x173   : > { %7287 = vmatprep.mubr.msk.bf16.mxu0 %vm8393_vm2, %v11175_v6  ;;  %7541 = vmatprep.mubr.msk.bf16.mxu1 %vm8393_vm2, %v11175_v6 }
 0x175   : > { %v9026_v16 = vpop.f32.mrb[64].mxu0  ;;  %v9028_v58 = vpop.f32.mrb[64].mxu1 }
 0x176   : > { %11184 = vst [vmem:[#allocation18_spill] sm:$0xff] %v9026_v16  ;;  %11185 = vst [vmem:[#allocation19_spill] sm:$0xff] %v9028_v58  ;;  %v7181_v46 = vpop.f32.mrb[65].mxu0  ;;  %v7435_v27 = vpop.f32.mrb[65].mxu1 }
 0x177   : > { %v9034_v1 = vpop.f32.mrb[66].mxu0  ;;  %v9036_v15 = vpop.f32.mrb[66].mxu1 }
 0x178   : > { %11186 = vst [vmem:[#allocation20_spill] sm:$0xff] %v9034_v1  ;;  %11187 = vst [vmem:[#allocation21_spill] sm:$0xff] %v9036_v15  ;;  %v7182_v3 = vpop.f32.mrb[67].mxu0  ;;  %v7436_v10 = vpop.f32.mrb[67].mxu1 }
 0x179   : > { %v8225_v10 = vld [vmem:[%s8470_s13 + $0x160] sm:$0xff]  }
 0x17a   : > { %7288 = vmatmul.mubr.msk.bf16.gmra.mrb[172].mxu0 %vm788_vm3, %v8223_v34  ;;  %7542 = vmatmul.mubr.msk.bf16.gmra.mrb[172].mxu1 %vm788_vm3, %v8224_v39  ;;  %v8226_v34 = vld [vmem:[%s8476_s16 + $0x160] sm:$0xff]  }
 0x17b   : > { %7291 = vmatprep.mubr.msk.bf16.mxu0 %vm8393_vm2, %v11175_v6  ;;  %7545 = vmatprep.mubr.msk.bf16.mxu1 %vm8393_vm2, %v11175_v6 }
 0x17d   : > { %v9046_v46 = vpop.f32.mrb[68].mxu0  ;;  %v9048_v27 = vpop.f32.mrb[68].mxu1 }
 0x17e   : > { %11188 = vst [vmem:[#allocation22_spill] sm:$0xff] %v9046_v46  ;;  %11189 = vst [vmem:[#allocation23_spill] sm:$0xff] %v9048_v27  ;;  %v7185_v22 = vpop.f32.mrb[69].mxu0  ;;  %v7439_v3 = vpop.f32.mrb[69].mxu1 }
 0x17f   : > { %v9054_v39 = vpop.f32.mrb[70].mxu0  ;;  %v9056_v15 = vpop.f32.mrb[70].mxu1 }
 0x180   : > { %11190 = vst [vmem:[#allocation24_spill] sm:$0xff] %v9054_v39  ;;  %11191 = vst [vmem:[#allocation25_spill] sm:$0xff] %v9056_v15  ;;  %v7186_v58 = vpop.f32.mrb[71].mxu0  ;;  %v7440_v16 = vpop.f32.mrb[71].mxu1 }
 0x182   : > { %7292 = vmatmul.mubr.msk.bf16.gmra.mrb[176].mxu0 %vm788_vm3, %v8225_v10  ;;  %7546 = vmatmul.mubr.msk.bf16.gmra.mrb[176].mxu1 %vm788_vm3, %v8226_v34  ;;  %v8227_v10 = vld [vmem:[%s8470_s13 + $0x168] sm:$0xff]  }
 0x183   : > { %7295 = vmatprep.mubr.msk.bf16.mxu0 %vm8393_vm2, %v11175_v6  ;;  %7549 = vmatprep.mubr.msk.bf16.mxu1 %vm8393_vm2, %v11175_v6  ;;  %v8228_v34 = vld [vmem:[%s8476_s16 + $0x168] sm:$0xff]  }
 0x185   : > { %v9066_v22 = vpop.f32.mrb[72].mxu0  ;;  %v9068_v3 = vpop.f32.mrb[72].mxu1 }
 0x186   : > { %11192 = vst [vmem:[#allocation26_spill] sm:$0xff] %v9066_v22  ;;  %11193 = vst [vmem:[#allocation27_spill] sm:$0xff] %v9068_v3  ;;  %v7189_v16 = vpop.f32.mrb[73].mxu0  ;;  %v7443_v58 = vpop.f32.mrb[73].mxu1 }
 0x187   : > { %v9074_v51 = vpop.f32.mrb[74].mxu0  ;;  %v9076_v15 = vpop.f32.mrb[74].mxu1  ;;  %v8229_v16 = vld [vmem:[%s8470_s13 + $0x170] sm:$0xff]  }
 0x188   : > { %11194 = vst [vmem:[#allocation28_spill] sm:$0xff] %v9074_v51  ;;  %11195 = vst [vmem:[#allocation29_spill] sm:$0xff] %v9076_v15  ;;  %v7190_v27 = vpop.f32.mrb[75].mxu0  ;;  %v7444_v1 = vpop.f32.mrb[75].mxu1  ;;  %v8230_v58 = vld [vmem:[%s8476_s16 + $0x170] sm:$0xff]  }
 0x18a   : > { %7296 = vmatmul.mubr.msk.bf16.gmra.mrb[180].mxu0 %vm788_vm3, %v8227_v10  ;;  %7550 = vmatmul.mubr.msk.bf16.gmra.mrb[180].mxu1 %vm788_vm3, %v8228_v34 }
 0x18b   : > { %7299 = vmatprep.mubr.msk.bf16.mxu0 %vm8393_vm2, %v11175_v6  ;;  %7553 = vmatprep.mubr.msk.bf16.mxu1 %vm8393_vm2, %v11175_v6 }
 0x18d   : > { %v9100_v1 = vpop.f32.mrb[76].mxu0  ;;  %v9102_v27 = vpop.f32.mrb[76].mxu1 }
 0x18e   : > { %11196 = vst [vmem:[#allocation30_spill] sm:$0xff] %v9100_v1  ;;  %11197 = vst [vmem:[#allocation31_spill] sm:$0xff] %v9102_v27  ;;  %v7193_v10 = vpop.f32.mrb[77].mxu0  ;;  %v7447_v15 = vpop.f32.mrb[77].mxu1 }
 0x18f   : > { %v9106_v34 = vpop.f32.mrb[78].mxu0  ;;  %v9108_v51 = vpop.f32.mrb[78].mxu1  ;;  %v8231_v15 = vld [vmem:[%s8470_s13 + $0x178] sm:$0xff]  }
 0x190   : > { %11198 = vst [vmem:[#allocation32_spill] sm:$0xff] %v9106_v34  ;;  %11199 = vst [vmem:[#allocation33_spill] sm:$0xff] %v9108_v51  ;;  %v7194_v22 = vpop.f32.mrb[79].mxu0  ;;  %v7448_v46 = vpop.f32.mrb[79].mxu1  ;;  %v8232_v10 = vld [vmem:[%s8476_s16 + $0x178] sm:$0xff]  }
 0x192   : > { %7300 = vmatmul.mubr.msk.bf16.gmra.mrb[184].mxu0 %vm788_vm3, %v8229_v16  ;;  %7554 = vmatmul.mubr.msk.bf16.gmra.mrb[184].mxu1 %vm788_vm3, %v8230_v58 }
 0x193   : > { %7303 = vmatprep.mubr.msk.bf16.mxu0 %vm8393_vm2, %v11175_v6  ;;  %7557 = vmatprep.mubr.msk.bf16.mxu1 %vm8393_vm2, %v11175_v6 }
 0x195   : > { %v9120_v39 = vpop.f32.mrb[80].mxu0  ;;  %v9122_v27 = vpop.f32.mrb[80].mxu1 }
 0x196   : > { %11200 = vst [vmem:[#allocation34_spill] sm:$0xff] %v9120_v39  ;;  %11201 = vst [vmem:[#allocation35_spill] sm:$0xff] %v9122_v27  ;;  %v7197_v22 = vpop.f32.mrb[81].mxu0  ;;  %v7451_v16 = vpop.f32.mrb[81].mxu1 }
 0x197   : > { %v9126_v58 = vpop.f32.mrb[82].mxu0  ;;  %v9128_v3 = vpop.f32.mrb[82].mxu1  ;;  %v8233_v22 = vld [vmem:[%s8470_s13 + $0x180] sm:$0xff]  }
 0x198   : > { %11202 = vst [vmem:[#allocation36_spill] sm:$0xff] %v9126_v58  ;;  %11203 = vst [vmem:[#allocation37_spill] sm:$0xff] %v9128_v3  ;;  %v7198_v34 = vpop.f32.mrb[83].mxu0  ;;  %v7452_v1 = vpop.f32.mrb[83].mxu1  ;;  %v8234_v16 = vld [vmem:[%s8476_s16 + $0x180] sm:$0xff]  }
 0x19a   : > { %7304 = vmatmul.mubr.msk.bf16.gmra.mrb[188].mxu0 %vm788_vm3, %v8231_v15  ;;  %7558 = vmatmul.mubr.msk.bf16.gmra.mrb[188].mxu1 %vm788_vm3, %v8232_v10 }
 0x19b   : > { %7307 = vmatprep.mubr.msk.bf16.mxu0 %vm8393_vm2, %v11175_v6  ;;  %7561 = vmatprep.mubr.msk.bf16.mxu1 %vm8393_vm2, %v11175_v6 }
 0x19d   : > { %v9140_v46 = vpop.f32.mrb[84].mxu0  ;;  %v9142_v27 = vpop.f32.mrb[84].mxu1 }
 0x19e   : > { %11204 = vst [vmem:[#allocation38_spill] sm:$0xff] %v9140_v46  ;;  %11205 = vst [vmem:[#allocation39_spill] sm:$0xff] %v9142_v27  ;;  %v7201_v34 = vpop.f32.mrb[85].mxu0  ;;  %v7455_v15 = vpop.f32.mrb[85].mxu1 }
 0x19f   : > { %v9146_v10 = vpop.f32.mrb[86].mxu0  ;;  %v9148_v51 = vpop.f32.mrb[86].mxu1  ;;  %v8235_v34 = vld [vmem:[%s8470_s13 + $0x188] sm:$0xff]  }
 0x1a0   : > { %11206 = vst [vmem:[#allocation40_spill] sm:$0xff] %v9146_v10  ;;  %11207 = vst [vmem:[#allocation41_spill] sm:$0xff] %v9148_v51  ;;  %v7202_v58 = vpop.f32.mrb[87].mxu0  ;;  %v7456_v39 = vpop.f32.mrb[87].mxu1  ;;  %v8236_v15 = vld [vmem:[%s8476_s16 + $0x188] sm:$0xff]  }
 0x1a2   : > { %7308 = vmatmul.mubr.msk.bf16.gmra.mrb[192].mxu0 %vm788_vm3, %v8233_v22  ;;  %7562 = vmatmul.mubr.msk.bf16.gmra.mrb[192].mxu1 %vm788_vm3, %v8234_v16 }
 0x1a3   : > { %7311 = vmatprep.mubr.msk.bf16.mxu0 %vm8393_vm2, %v11175_v6  ;;  %7565 = vmatprep.mubr.msk.bf16.mxu1 %vm8393_vm2, %v11175_v6 }
 0x1a5   : > { %v9160_v1 = vpop.f32.mrb[88].mxu0  ;;  %v9162_v27 = vpop.f32.mrb[88].mxu1 }
 0x1a6   : > { %11208 = vst [vmem:[#allocation42_spill] sm:$0xff] %v9160_v1  ;;  %11209 = vst [vmem:[#allocation43_spill] sm:$0xff] %v9162_v27  ;;  %v7205_v58 = vpop.f32.mrb[89].mxu0  ;;  %v7459_v22 = vpop.f32.mrb[89].mxu1 }
 0x1a7   : > { %v9166_v16 = vpop.f32.mrb[90].mxu0  ;;  %v9168_v3 = vpop.f32.mrb[90].mxu1  ;;  %v8237_v58 = vld [vmem:[%s8470_s13 + $0x190] sm:$0xff]  }
 0x1a8   : > { %11210 = vst [vmem:[#allocation44_spill] sm:$0xff] %v9166_v16  ;;  %11211 = vst [vmem:[#allocation45_spill] sm:$0xff] %v9168_v3  ;;  %v7206_v10 = vpop.f32.mrb[91].mxu0  ;;  %v7460_v46 = vpop.f32.mrb[91].mxu1  ;;  %v8238_v22 = vld [vmem:[%s8476_s16 + $0x190] sm:$0xff]  }
 0x1aa   : > { %7312 = vmatmul.mubr.msk.bf16.gmra.mrb[196].mxu0 %vm788_vm3, %v8235_v34  ;;  %7566 = vmatmul.mubr.msk.bf16.gmra.mrb[196].mxu1 %vm788_vm3, %v8236_v15 }
 0x1ab   : > { %7315 = vmatprep.mubr.msk.bf16.mxu0 %vm8393_vm2, %v11175_v6  ;;  %7569 = vmatprep.mubr.msk.bf16.mxu1 %vm8393_vm2, %v11175_v6 }
 0x1ad   : > { %v9180_v39 = vpop.f32.mrb[92].mxu0  ;;  %v9182_v27 = vpop.f32.mrb[92].mxu1 }
 0x1ae   : > { %11212 = vst [vmem:[#allocation46_spill] sm:$0xff] %v9180_v39  ;;  %11213 = vst [vmem:[#allocation47_spill] sm:$0xff] %v9182_v27  ;;  %v7209_v10 = vpop.f32.mrb[93].mxu0  ;;  %v7463_v34 = vpop.f32.mrb[93].mxu1 }
 0x1af   : > { %v9186_v15 = vpop.f32.mrb[94].mxu0  ;;  %v9188_v51 = vpop.f32.mrb[94].mxu1  ;;  %v8239_v10 = vld [vmem:[%s8470_s13 + $0x198] sm:$0xff]  }
 0x1b0   : > { %11214 = vst [vmem:[#allocation48_spill] sm:$0xff] %v9186_v15  ;;  %11215 = vst [vmem:[#allocation49_spill] sm:$0xff] %v9188_v51  ;;  %v7210_v16 = vpop.f32.mrb[95].mxu0  ;;  %v7464_v1 = vpop.f32.mrb[95].mxu1  ;;  %v8240_v34 = vld [vmem:[%s8476_s16 + $0x198] sm:$0xff]  }
 0x1b2   : > { %7316 = vmatmul.mubr.msk.bf16.gmra.mrb[200].mxu0 %vm788_vm3, %v8237_v58  ;;  %7570 = vmatmul.mubr.msk.bf16.gmra.mrb[200].mxu1 %vm788_vm3, %v8238_v22 }
 0x1b3   : > { %7319 = vmatprep.mubr.msk.bf16.mxu0 %vm8393_vm2, %v11175_v6  ;;  %7573 = vmatprep.mubr.msk.bf16.mxu1 %vm8393_vm2, %v11175_v6 }
 0x1b5   : > { %v9200_v46 = vpop.f32.mrb[96].mxu0  ;;  %v9202_v27 = vpop.f32.mrb[96].mxu1 }
 0x1b6   : > { %11216 = vst [vmem:[#allocation50_spill] sm:$0xff] %v9200_v46  ;;  %11217 = vst [vmem:[#allocation51_spill] sm:$0xff] %v9202_v27  ;;  %v7213_v16 = vpop.f32.mrb[97].mxu0  ;;  %v7467_v58 = vpop.f32.mrb[97].mxu1 }
 0x1b7   : > { %v9206_v22 = vpop.f32.mrb[98].mxu0  ;;  %v9208_v3 = vpop.f32.mrb[98].mxu1  ;;  %v8241_v16 = vld [vmem:[%s8470_s13 + $0x1a0] sm:$0xff]  }
 0x1b8   : > { %11218 = vst [vmem:[#allocation52_spill] sm:$0xff] %v9206_v22  ;;  %11219 = vst [vmem:[#allocation53_spill] sm:$0xff] %v9208_v3  ;;  %v7214_v15 = vpop.f32.mrb[99].mxu0  ;;  %v7468_v39 = vpop.f32.mrb[99].mxu1  ;;  %v8242_v58 = vld [vmem:[%s8476_s16 + $0x1a0] sm:$0xff]  }
 0x1ba   : > { %7320 = vmatmul.mubr.msk.bf16.gmra.mrb[204].mxu0 %vm788_vm3, %v8239_v10  ;;  %7574 = vmatmul.mubr.msk.bf16.gmra.mrb[204].mxu1 %vm788_vm3, %v8240_v34 }
 0x1bb   : > { %7323 = vmatprep.mubr.msk.bf16.mxu0 %vm8393_vm2, %v11175_v6  ;;  %7577 = vmatprep.mubr.msk.bf16.mxu1 %vm8393_vm2, %v11175_v6 }
 0x1bd   : > { %v9220_v1 = vpop.f32.mrb[100].mxu0  ;;  %v9222_v27 = vpop.f32.mrb[100].mxu1 }
 0x1be   : > { %11220 = vst [vmem:[#allocation54_spill] sm:$0xff] %v9220_v1  ;;  %11221 = vst [vmem:[#allocation55_spill] sm:$0xff] %v9222_v27  ;;  %v7217_v15 = vpop.f32.mrb[101].mxu0  ;;  %v7471_v10 = vpop.f32.mrb[101].mxu1 }
 0x1bf   : > { %v9226_v34 = vpop.f32.mrb[102].mxu0  ;;  %v9228_v51 = vpop.f32.mrb[102].mxu1  ;;  %v8243_v15 = vld [vmem:[%s8470_s13 + $0x1a8] sm:$0xff]  }
 0x1c0   : > { %11222 = vst [vmem:[#allocation56_spill] sm:$0xff] %v9226_v34  ;;  %11223 = vst [vmem:[#allocation57_spill] sm:$0xff] %v9228_v51  ;;  %v7218_v22 = vpop.f32.mrb[103].mxu0  ;;  %v7472_v46 = vpop.f32.mrb[103].mxu1  ;;  %v8244_v10 = vld [vmem:[%s8476_s16 + $0x1a8] sm:$0xff]  }
 0x1c2   : > { %7324 = vmatmul.mubr.msk.bf16.gmra.mrb[208].mxu0 %vm788_vm3, %v8241_v16  ;;  %7578 = vmatmul.mubr.msk.bf16.gmra.mrb[208].mxu1 %vm788_vm3, %v8242_v58 }
 0x1c3   : > { %7327 = vmatprep.mubr.msk.bf16.mxu0 %vm8393_vm2, %v11175_v6  ;;  %7581 = vmatprep.mubr.msk.bf16.mxu1 %vm8393_vm2, %v11175_v6 }
 0x1c5   : > { %v9240_v39 = vpop.f32.mrb[104].mxu0  ;;  %v9242_v27 = vpop.f32.mrb[104].mxu1 }
 0x1c6   : > { %11224 = vst [vmem:[#allocation58_spill] sm:$0xff] %v9240_v39  ;;  %11225 = vst [vmem:[#allocation59_spill] sm:$0xff] %v9242_v27  ;;  %v7221_v22 = vpop.f32.mrb[105].mxu0  ;;  %v7475_v16 = vpop.f32.mrb[105].mxu1 }
 0x1c7   : > { %v9246_v58 = vpop.f32.mrb[106].mxu0  ;;  %v9248_v3 = vpop.f32.mrb[106].mxu1  ;;  %v8245_v22 = vld [vmem:[%s8470_s13 + $0x1b0] sm:$0xff]  }
 0x1c8   : > { %11226 = vst [vmem:[#allocation60_spill] sm:$0xff] %v9246_v58  ;;  %11227 = vst [vmem:[#allocation61_spill] sm:$0xff] %v9248_v3  ;;  %v7222_v34 = vpop.f32.mrb[107].mxu0  ;;  %v7476_v1 = vpop.f32.mrb[107].mxu1  ;;  %v8246_v16 = vld [vmem:[%s8476_s16 + $0x1b0] sm:$0xff]  }
 0x1ca   : > { %7328 = vmatmul.mubr.msk.bf16.gmra.mrb[212].mxu0 %vm788_vm3, %v8243_v15  ;;  %7582 = vmatmul.mubr.msk.bf16.gmra.mrb[212].mxu1 %vm788_vm3, %v8244_v10 }
 0x1cb   : > { %7331 = vmatprep.mubr.msk.bf16.mxu0 %vm8393_vm2, %v11175_v6  ;;  %7585 = vmatprep.mubr.msk.bf16.mxu1 %vm8393_vm2, %v11175_v6 }
 0x1cd   : > { %v9260_v46 = vpop.f32.mrb[108].mxu0  ;;  %v9262_v27 = vpop.f32.mrb[108].mxu1 }
 0x1ce   : > { %11228 = vst [vmem:[#allocation62_spill] sm:$0xff] %v9260_v46  ;;  %11229 = vst [vmem:[#allocation63_spill] sm:$0xff] %v9262_v27  ;;  %v7225_v34 = vpop.f32.mrb[109].mxu0  ;;  %v7479_v15 = vpop.f32.mrb[109].mxu1 }
 0x1cf   : > { %v9266_v10 = vpop.f32.mrb[110].mxu0  ;;  %v9268_v51 = vpop.f32.mrb[110].mxu1  ;;  %v8247_v34 = vld [vmem:[%s8470_s13 + $0x1b8] sm:$0xff]  }
 0x1d0   : > { %11230 = vst [vmem:[#allocation64_spill] sm:$0xff] %v9266_v10  ;;  %11231 = vst [vmem:[#allocation65_spill] sm:$0xff] %v9268_v51  ;;  %v7226_v58 = vpop.f32.mrb[111].mxu0  ;;  %v7480_v39 = vpop.f32.mrb[111].mxu1  ;;  %v8248_v15 = vld [vmem:[%s8476_s16 + $0x1b8] sm:$0xff]  }
 0x1d2   : > { %7332 = vmatmul.mubr.msk.bf16.gmra.mrb[216].mxu0 %vm788_vm3, %v8245_v22  ;;  %7586 = vmatmul.mubr.msk.bf16.gmra.mrb[216].mxu1 %vm788_vm3, %v8246_v16 }
 0x1d3   : > { %7335 = vmatprep.mubr.msk.bf16.mxu0 %vm8393_vm2, %v11175_v6  ;;  %7589 = vmatprep.mubr.msk.bf16.mxu1 %vm8393_vm2, %v11175_v6 }
 0x1d5   : > { %v9280_v1 = vpop.f32.mrb[112].mxu0  ;;  %v9282_v27 = vpop.f32.mrb[112].mxu1 }
 0x1d6   : > { %11232 = vst [vmem:[#allocation66_spill] sm:$0xff] %v9280_v1  ;;  %11233 = vst [vmem:[#allocation67_spill] sm:$0xff] %v9282_v27  ;;  %v7229_v58 = vpop.f32.mrb[113].mxu0  ;;  %v7483_v22 = vpop.f32.mrb[113].mxu1 }
 0x1d7   : > { %v9286_v16 = vpop.f32.mrb[114].mxu0  ;;  %v9288_v3 = vpop.f32.mrb[114].mxu1  ;;  %v8249_v58 = vld [vmem:[%s8470_s13 + $0x1c0] sm:$0xff]  }
 0x1d8   : > { %11234 = vst [vmem:[#allocation68_spill] sm:$0xff] %v9286_v16  ;;  %11235 = vst [vmem:[#allocation69_spill] sm:$0xff] %v9288_v3  ;;  %v7230_v10 = vpop.f32.mrb[115].mxu0  ;;  %v7484_v46 = vpop.f32.mrb[115].mxu1  ;;  %v8250_v22 = vld [vmem:[%s8476_s16 + $0x1c0] sm:$0xff]  }
 0x1da   : > { %7336 = vmatmul.mubr.msk.bf16.gmra.mrb[220].mxu0 %vm788_vm3, %v8247_v34  ;;  %7590 = vmatmul.mubr.msk.bf16.gmra.mrb[220].mxu1 %vm788_vm3, %v8248_v15 }
 0x1db   : > { %7339 = vmatprep.mubr.msk.bf16.mxu0 %vm8393_vm2, %v11175_v6  ;;  %7593 = vmatprep.mubr.msk.bf16.mxu1 %vm8393_vm2, %v11175_v6 }
 0x1dd   : > { %v9300_v39 = vpop.f32.mrb[116].mxu0  ;;  %v9302_v27 = vpop.f32.mrb[116].mxu1 }
 0x1de   : > { %11236 = vst [vmem:[#allocation70_spill] sm:$0xff] %v9300_v39  ;;  %11237 = vst [vmem:[#allocation71_spill] sm:$0xff] %v9302_v27  ;;  %v7233_v10 = vpop.f32.mrb[117].mxu0  ;;  %v7487_v34 = vpop.f32.mrb[117].mxu1 }
 0x1df   : > { %v9306_v15 = vpop.f32.mrb[118].mxu0  ;;  %v9308_v51 = vpop.f32.mrb[118].mxu1  ;;  %v8251_v10 = vld [vmem:[%s8470_s13 + $0x1c8] sm:$0xff]  }
 0x1e0   : > { %11238 = vst [vmem:[#allocation72_spill] sm:$0xff] %v9306_v15  ;;  %11239 = vst [vmem:[#allocation73_spill] sm:$0xff] %v9308_v51  ;;  %v7234_v16 = vpop.f32.mrb[119].mxu0  ;;  %v7488_v1 = vpop.f32.mrb[119].mxu1  ;;  %v8252_v34 = vld [vmem:[%s8476_s16 + $0x1c8] sm:$0xff]  }
 0x1e2   : > { %7340 = vmatmul.mubr.msk.bf16.gmra.mrb[224].mxu0 %vm788_vm3, %v8249_v58  ;;  %7594 = vmatmul.mubr.msk.bf16.gmra.mrb[224].mxu1 %vm788_vm3, %v8250_v22 }
 0x1e3   : > { %7343 = vmatprep.mubr.msk.bf16.mxu0 %vm8393_vm2, %v11175_v6  ;;  %7597 = vmatprep.mubr.msk.bf16.mxu1 %vm8393_vm2, %v11175_v6 }
 0x1e5   : > { %v9320_v46 = vpop.f32.mrb[120].mxu0  ;;  %v9322_v27 = vpop.f32.mrb[120].mxu1 }
 0x1e6   : > { %11240 = vst [vmem:[#allocation74_spill] sm:$0xff] %v9320_v46  ;;  %11241 = vst [vmem:[#allocation75_spill] sm:$0xff] %v9322_v27  ;;  %v7237_v16 = vpop.f32.mrb[121].mxu0  ;;  %v7491_v58 = vpop.f32.mrb[121].mxu1 }
 0x1e7   : > { %v9326_v22 = vpop.f32.mrb[122].mxu0  ;;  %v9328_v3 = vpop.f32.mrb[122].mxu1  ;;  %v8253_v16 = vld [vmem:[%s8470_s13 + $0x1d0] sm:$0xff]  }
 0x1e8   : > { %11242 = vst [vmem:[#allocation76_spill] sm:$0xff] %v9326_v22  ;;  %11243 = vst [vmem:[#allocation77_spill] sm:$0xff] %v9328_v3  ;;  %v7238_v15 = vpop.f32.mrb[123].mxu0  ;;  %v7492_v39 = vpop.f32.mrb[123].mxu1  ;;  %v8254_v58 = vld [vmem:[%s8476_s16 + $0x1d0] sm:$0xff]  }
 0x1ea   : > { %7344 = vmatmul.mubr.msk.bf16.gmra.mrb[228].mxu0 %vm788_vm3, %v8251_v10  ;;  %7598 = vmatmul.mubr.msk.bf16.gmra.mrb[228].mxu1 %vm788_vm3, %v8252_v34 }
 0x1eb   : > { %7347 = vmatprep.mubr.msk.bf16.mxu0 %vm8393_vm2, %v11175_v6  ;;  %7601 = vmatprep.mubr.msk.bf16.mxu1 %vm8393_vm2, %v11175_v6 }
 0x1ed   : > { %v9340_v1 = vpop.f32.mrb[124].mxu0  ;;  %v9342_v27 = vpop.f32.mrb[124].mxu1 }
 0x1ee   : > { %11244 = vst [vmem:[#allocation78_spill] sm:$0xff] %v9340_v1  ;;  %11245 = vst [vmem:[#allocation79_spill] sm:$0xff] %v9342_v27  ;;  %v7241_v39 = vpop.f32.mrb[125].mxu0  ;;  %v7495_v10 = vpop.f32.mrb[125].mxu1 }
 0x1ef   : > { %v9346_v34 = vpop.f32.mrb[126].mxu0  ;;  %v9348_v51 = vpop.f32.mrb[126].mxu1 }
 0x1f0   : > { %11246 = vst [vmem:[#allocation80_spill] sm:$0xff] %v9346_v34  ;;  %11247 = vst [vmem:[#allocation81_spill] sm:$0xff] %v9348_v51  ;;  %v7242_v22 = vpop.f32.mrb[127].mxu0  ;;  %v7496_v46 = vpop.f32.mrb[127].mxu1 }
 0x1f1   : > { %v8255_v46 = vld [vmem:[%s8470_s13 + $0x1d8] sm:$0xff]  }
 0x1f2   : > { %7348 = vmatmul.mubr.msk.bf16.gmra.mrb[232].mxu0 %vm788_vm3, %v8253_v16  ;;  %7602 = vmatmul.mubr.msk.bf16.gmra.mrb[232].mxu1 %vm788_vm3, %v8254_v58  ;;  %v8256_v16 = vld [vmem:[%s8476_s16 + $0x1d8] sm:$0xff]  }
 0x1f3   : > { %7351 = vmatprep.mubr.msk.bf16.mxu0 %vm8393_vm2, %v11175_v6  ;;  %7605 = vmatprep.mubr.msk.bf16.mxu1 %vm8393_vm2, %v11175_v6 }
 0x1f5   : > { %v9358_v39 = vpop.f32.mrb[128].mxu0  ;;  %v9360_v10 = vpop.f32.mrb[128].mxu1 }
 0x1f6   : > { %11248 = vst [vmem:[#allocation82_spill] sm:$0xff] %v9358_v39  ;;  %11249 = vst [vmem:[#allocation83_spill] sm:$0xff] %v9360_v10  ;;  %v7245_v3 = vpop.f32.mrb[129].mxu0  ;;  %v7499_v22 = vpop.f32.mrb[129].mxu1 }
 0x1f7   : > { %v9366_v58 = vpop.f32.mrb[130].mxu0  ;;  %v9368_v51 = vpop.f32.mrb[130].mxu1 }
 0x1f8   : > { %11250 = vst [vmem:[#allocation84_spill] sm:$0xff] %v9366_v58  ;;  %11251 = vst [vmem:[#allocation85_spill] sm:$0xff] %v9368_v51  ;;  %v7246_v27 = vpop.f32.mrb[131].mxu0  ;;  %v7500_v1 = vpop.f32.mrb[131].mxu1 }
 0x1f9   : > { %v8257_v1 = vld [vmem:[%s8470_s13 + $0x1e0] sm:$0xff]  }
 0x1fa   : > { %7352 = vmatmul.mubr.msk.bf16.gmra.mrb[236].mxu0 %vm788_vm3, %v8255_v46  ;;  %7606 = vmatmul.mubr.msk.bf16.gmra.mrb[236].mxu1 %vm788_vm3, %v8256_v16  ;;  %v8258_v46 = vld [vmem:[%s8476_s16 + $0x1e0] sm:$0xff]  }
 0x1fb   : > { %7355 = vmatprep.mubr.msk.bf16.mxu0 %vm8393_vm2, %v11175_v6  ;;  %7609 = vmatprep.mubr.msk.bf16.mxu1 %vm8393_vm2, %v11175_v6 }
 0x1fd   : > { %v9378_v3 = vpop.f32.mrb[132].mxu0  ;;  %v9380_v22 = vpop.f32.mrb[132].mxu1 }
 0x1fe   : > { %11252 = vst [vmem:[#allocation86_spill] sm:$0xff] %v9378_v3  ;;  %11253 = vst [vmem:[#allocation87_spill] sm:$0xff] %v9380_v22  ;;  %v7249_v34 = vpop.f32.mrb[133].mxu0  ;;  %v7503_v27 = vpop.f32.mrb[133].mxu1 }
 0x1ff   : > { %v9386_v16 = vpop.f32.mrb[134].mxu0  ;;  %v9388_v51 = vpop.f32.mrb[134].mxu1 }
 0x200   : > { %11254 = vst [vmem:[#allocation88_spill] sm:$0xff] %v9386_v16  ;;  %11255 = vst [vmem:[#allocation89_spill] sm:$0xff] %v9388_v51  ;;  %v7250_v10 = vpop.f32.mrb[135].mxu0  ;;  %v7504_v39 = vpop.f32.mrb[135].mxu1 }
 0x201   : > { %v8259_v39 = vld [vmem:[%s9082_s19] sm:$0xff]  }
 0x202   : > { %7356 = vmatmul.mubr.msk.bf16.gmra.mrb[240].mxu0 %vm788_vm3, %v8257_v1  ;;  %7610 = vmatmul.mubr.msk.bf16.gmra.mrb[240].mxu1 %vm788_vm3, %v8258_v46  ;;  %v8260_v1 = vld [vmem:[%s9090_s23] sm:$0xff]  }
 0x203   : > { %7623 = vmatprep.mubr.msk.bf16.mxu0 %vm8393_vm2, %v11175_v6  ;;  %7877 = vmatprep.mubr.msk.bf16.mxu1 %vm8393_vm2, %v11175_v6 }
 0x205   : > { %v9398_v34 = vpop.f32.mrb[136].mxu0  ;;  %v9400_v27 = vpop.f32.mrb[136].mxu1 }
 0x206   : > { %11256 = vst [vmem:[#allocation90_spill] sm:$0xff] %v9398_v34  ;;  %11257 = vst [vmem:[#allocation91_spill] sm:$0xff] %v9400_v27  ;;  %v7253_v58 = vpop.f32.mrb[137].mxu0  ;;  %v7507_v10 = vpop.f32.mrb[137].mxu1 }
 0x207   : > { %v9406_v46 = vpop.f32.mrb[138].mxu0  ;;  %v9408_v51 = vpop.f32.mrb[138].mxu1 }
 0x208   : > { %11258 = vst [vmem:[#allocation92_spill] sm:$0xff] %v9406_v46  ;;  %11259 = vst [vmem:[#allocation93_spill] sm:$0xff] %v9408_v51  ;;  %v7254_v22 = vpop.f32.mrb[139].mxu0  ;;  %v7508_v3 = vpop.f32.mrb[139].mxu1 }
 0x209   : > { %v8261_v3 = vld [vmem:[%s9082_s19 + $0x8] sm:$0xff]  }
 0x20a   : > { %7624 = vmatmul.mubr.msk.bf16.vlgmr.msra.gmra.mrb[244].mxu0 %vm788_vm3, %v8259_v39  ;;  %7878 = vmatmul.mubr.msk.bf16.vlgmr.msra.gmra.mrb[244].mxu1 %vm788_vm3, %v8260_v1  ;;  %v8262_v39 = vld [vmem:[%s9090_s23 + $0x8] sm:$0xff]  }
 0x20b   : > { %7627 = vmatprep.mubr.msk.bf16.mxu0 %vm8393_vm2, %v11175_v6  ;;  %7881 = vmatprep.mubr.msk.bf16.mxu1 %vm8393_vm2, %v11175_v6 }
 0x20d   : > { %v9418_v58 = vpop.f32.mrb[140].mxu0  ;;  %v9420_v10 = vpop.f32.mrb[140].mxu1 }
 0x20e   : > { %11260 = vst [vmem:[#allocation94_spill] sm:$0xff] %v9418_v58  ;;  %11261 = vst [vmem:[#allocation95_spill] sm:$0xff] %v9420_v10  ;;  %v7257_v16 = vpop.f32.mrb[141].mxu0  ;;  %v7511_v22 = vpop.f32.mrb[141].mxu1 }
 0x20f   : > { %v9426_v1 = vpop.f32.mrb[142].mxu0  ;;  %v9428_v51 = vpop.f32.mrb[142].mxu1 }
 0x210   : > { %11262 = vst [vmem:[#allocation96_spill] sm:$0xff] %v9426_v1  ;;  %11263 = vst [vmem:[#allocation97_spill] sm:$0xff] %v9428_v51  ;;  %v7258_v27 = vpop.f32.mrb[143].mxu0  ;;  %v7512_v34 = vpop.f32.mrb[143].mxu1 }
 0x211   : > { %v8263_v34 = vld [vmem:[%s9082_s19 + $0x10] sm:$0xff]  }
 0x212   : > { %7628 = vmatmul.mubr.msk.bf16.gmra.mrb[248].mxu0 %vm788_vm3, %v8261_v3  ;;  %7882 = vmatmul.mubr.msk.bf16.gmra.mrb[248].mxu1 %vm788_vm3, %v8262_v39  ;;  %v8264_v3 = vld [vmem:[%s9090_s23 + $0x10] sm:$0xff]  }
 0x213   : > { %7631 = vmatprep.mubr.msk.bf16.mxu0 %vm8393_vm2, %v11175_v6  ;;  %7885 = vmatprep.mubr.msk.bf16.mxu1 %vm8393_vm2, %v11175_v6 }
 0x215   : > { %v9438_v16 = vpop.f32.mrb[144].mxu0  ;;  %v9440_v22 = vpop.f32.mrb[144].mxu1 }
 0x216   : > { %11264 = vst [vmem:[#allocation98_spill] sm:$0xff] %v9438_v16  ;;  %11265 = vst [vmem:[#allocation99_spill] sm:$0xff] %v9440_v22  ;;  %v7261_v46 = vpop.f32.mrb[145].mxu0  ;;  %v7515_v27 = vpop.f32.mrb[145].mxu1 }
 0x217   : > { %v9446_v39 = vpop.f32.mrb[146].mxu0  ;;  %v9448_v51 = vpop.f32.mrb[146].mxu1 }
 0x218   : > { %11266 = vst [vmem:[#allocation100_spill] sm:$0xff] %v9446_v39  ;;  %11267 = vst [vmem:[#allocation101_spill] sm:$0xff] %v9448_v51  ;;  %v7262_v10 = vpop.f32.mrb[147].mxu0  ;;  %v7516_v58 = vpop.f32.mrb[147].mxu1 }
 0x219   : > { %v8265_v58 = vld [vmem:[%s9082_s19 + $0x18] sm:$0xff]  }
 0x21a   : > { %7632 = vmatmul.mubr.msk.bf16.gmra.mrb[252].mxu0 %vm788_vm3, %v8263_v34  ;;  %7886 = vmatmul.mubr.msk.bf16.gmra.mrb[252].mxu1 %vm788_vm3, %v8264_v3  ;;  %v8266_v34 = vld [vmem:[%s9090_s23 + $0x18] sm:$0xff]  }
 0x21b   : > { %7635 = vmatprep.mubr.msk.bf16.mxu0 %vm8393_vm2, %v11175_v6  ;;  %7889 = vmatprep.mubr.msk.bf16.mxu1 %vm8393_vm2, %v11175_v6 }
 0x21d   : > { %v9458_v46 = vpop.f32.mrb[148].mxu0  ;;  %v9460_v27 = vpop.f32.mrb[148].mxu1 }
 0x21e   : > { %11268 = vst [vmem:[#allocation102_spill] sm:$0xff] %v9458_v46  ;;  %11269 = vst [vmem:[#allocation103_spill] sm:$0xff] %v9460_v27  ;;  %v7265_v1 = vpop.f32.mrb[149].mxu0  ;;  %v7519_v10 = vpop.f32.mrb[149].mxu1 }
 0x21f   : > { %v9466_v3 = vpop.f32.mrb[150].mxu0  ;;  %v9468_v51 = vpop.f32.mrb[150].mxu1 }
 0x220   : > { %11270 = vst [vmem:[#allocation104_spill] sm:$0xff] %v9466_v3  ;;  %11271 = vst [vmem:[#allocation105_spill] sm:$0xff] %v9468_v51  ;;  %v7266_v22 = vpop.f32.mrb[151].mxu0  ;;  %v7520_v16 = vpop.f32.mrb[151].mxu1 }
 0x221   : > { %v8267_v16 = vld [vmem:[%s9082_s19 + $0x20] sm:$0xff]  }
 0x222   : > { %7636 = vmatmul.mubr.msk.bf16.gmra.mrb[0].mxu0 %vm788_vm3, %v8265_v58  ;;  %7890 = vmatmul.mubr.msk.bf16.gmra.mrb[0].mxu1 %vm788_vm3, %v8266_v34  ;;  %v8268_v58 = vld [vmem:[%s9090_s23 + $0x20] sm:$0xff]  }
 0x223   : > { %7639 = vmatprep.mubr.msk.bf16.mxu0 %vm8393_vm2, %v11175_v6  ;;  %7893 = vmatprep.mubr.msk.bf16.mxu1 %vm8393_vm2, %v11175_v6 }
 0x225   : > { %v9478_v1 = vpop.f32.mrb[152].mxu0  ;;  %v9480_v10 = vpop.f32.mrb[152].mxu1 }
 0x226   : > { %11272 = vst [vmem:[#allocation106_spill] sm:$0xff] %v9478_v1  ;;  %11273 = vst [vmem:[#allocation107_spill] sm:$0xff] %v9480_v10  ;;  %v7269_v39 = vpop.f32.mrb[153].mxu0  ;;  %v7523_v22 = vpop.f32.mrb[153].mxu1 }
 0x227   : > { %v9486_v34 = vpop.f32.mrb[154].mxu0  ;;  %v9488_v51 = vpop.f32.mrb[154].mxu1 }
 0x228   : > { %11274 = vst [vmem:[#allocation108_spill] sm:$0xff] %v9486_v34  ;;  %11275 = vst [vmem:[#allocation109_spill] sm:$0xff] %v9488_v51  ;;  %v7270_v27 = vpop.f32.mrb[155].mxu0  ;;  %v7524_v46 = vpop.f32.mrb[155].mxu1 }
 0x229   : > { %v8269_v46 = vld [vmem:[%s9082_s19 + $0x28] sm:$0xff]  }
 0x22a   : > { %7640 = vmatmul.mubr.msk.bf16.gmra.mrb[4].mxu0 %vm788_vm3, %v8267_v16  ;;  %7894 = vmatmul.mubr.msk.bf16.gmra.mrb[4].mxu1 %vm788_vm3, %v8268_v58  ;;  %v8270_v16 = vld [vmem:[%s9090_s23 + $0x28] sm:$0xff]  }
 0x22b   : > { %7643 = vmatprep.mubr.msk.bf16.mxu0 %vm8393_vm2, %v11175_v6  ;;  %7897 = vmatprep.mubr.msk.bf16.mxu1 %vm8393_vm2, %v11175_v6 }
 0x22d   : > { %v9498_v39 = vpop.f32.mrb[156].mxu0  ;;  %v9500_v22 = vpop.f32.mrb[156].mxu1 }
 0x22e   : > { %11276 = vst [vmem:[#allocation110_spill] sm:$0xff] %v9498_v39  ;;  %11277 = vst [vmem:[#allocation111_spill] sm:$0xff] %v9500_v22  ;;  %v7273_v3 = vpop.f32.mrb[157].mxu0  ;;  %v7527_v27 = vpop.f32.mrb[157].mxu1 }
 0x22f   : > { %v9506_v58 = vpop.f32.mrb[158].mxu0  ;;  %v9508_v51 = vpop.f32.mrb[158].mxu1 }
 0x230   : > { %11278 = vst [vmem:[#allocation112_spill] sm:$0xff] %v9506_v58  ;;  %11279 = vst [vmem:[#allocation113_spill] sm:$0xff] %v9508_v51  ;;  %v7274_v10 = vpop.f32.mrb[159].mxu0  ;;  %v7528_v1 = vpop.f32.mrb[159].mxu1 }
 0x231   : > { %v8271_v1 = vld [vmem:[%s9082_s19 + $0x30] sm:$0xff]  }
 0x232   : > { %7644 = vmatmul.mubr.msk.bf16.gmra.mrb[8].mxu0 %vm788_vm3, %v8269_v46  ;;  %7898 = vmatmul.mubr.msk.bf16.gmra.mrb[8].mxu1 %vm788_vm3, %v8270_v16  ;;  %v8272_v46 = vld [vmem:[%s9090_s23 + $0x30] sm:$0xff]  }
 0x233   : > { %7647 = vmatprep.mubr.msk.bf16.mxu0 %vm8393_vm2, %v11175_v6  ;;  %7901 = vmatprep.mubr.msk.bf16.mxu1 %vm8393_vm2, %v11175_v6 }
 0x235   : > { %v9518_v3 = vpop.f32.mrb[160].mxu0  ;;  %v9520_v27 = vpop.f32.mrb[160].mxu1 }
 0x236   : > { %11280 = vst [vmem:[#allocation114_spill] sm:$0xff] %v9518_v3  ;;  %11281 = vst [vmem:[#allocation115_spill] sm:$0xff] %v9520_v27  ;;  %v7277_v34 = vpop.f32.mrb[161].mxu0  ;;  %v7531_v10 = vpop.f32.mrb[161].mxu1 }
 0x237   : > { %v9526_v16 = vpop.f32.mrb[162].mxu0  ;;  %v9528_v51 = vpop.f32.mrb[162].mxu1 }
 0x238   : > { %11282 = vst [vmem:[#allocation116_spill] sm:$0xff] %v9526_v16  ;;  %11283 = vst [vmem:[#allocation117_spill] sm:$0xff] %v9528_v51  ;;  %v7278_v22 = vpop.f32.mrb[163].mxu0  ;;  %v7532_v39 = vpop.f32.mrb[163].mxu1 }
 0x239   : > { %v8273_v39 = vld [vmem:[%s9082_s19 + $0x38] sm:$0xff]  }
 0x23a   : > { %7648 = vmatmul.mubr.msk.bf16.gmra.mrb[12].mxu0 %vm788_vm3, %v8271_v1  ;;  %7902 = vmatmul.mubr.msk.bf16.gmra.mrb[12].mxu1 %vm788_vm3, %v8272_v46  ;;  %v8274_v1 = vld [vmem:[%s9090_s23 + $0x38] sm:$0xff]  }
 0x23b   : > { %7651 = vmatprep.mubr.msk.bf16.mxu0 %vm8393_vm2, %v11175_v6  ;;  %7905 = vmatprep.mubr.msk.bf16.mxu1 %vm8393_vm2, %v11175_v6 }
 0x23d   : > { %v9538_v34 = vpop.f32.mrb[164].mxu0  ;;  %v9540_v10 = vpop.f32.mrb[164].mxu1 }
 0x23e   : > { %11284 = vst [vmem:[#allocation118_spill] sm:$0xff] %v9538_v34  ;;  %11285 = vst [vmem:[#allocation119_spill] sm:$0xff] %v9540_v10  ;;  %v7281_v58 = vpop.f32.mrb[165].mxu0  ;;  %v7535_v22 = vpop.f32.mrb[165].mxu1 }
 0x23f   : > { %v9546_v46 = vpop.f32.mrb[166].mxu0  ;;  %v9548_v51 = vpop.f32.mrb[166].mxu1 }
 0x240   : > { %11286 = vst [vmem:[#allocation120_spill] sm:$0xff] %v9546_v46  ;;  %11287 = vst [vmem:[#allocation121_spill] sm:$0xff] %v9548_v51  ;;  %v7282_v27 = vpop.f32.mrb[167].mxu0  ;;  %v7536_v3 = vpop.f32.mrb[167].mxu1 }
 0x241   : > { %v8275_v3 = vld [vmem:[%s9082_s19 + $0x40] sm:$0xff]  }
 0x242   : > { %7652 = vmatmul.mubr.msk.bf16.gmra.mrb[16].mxu0 %vm788_vm3, %v8273_v39  ;;  %7906 = vmatmul.mubr.msk.bf16.gmra.mrb[16].mxu1 %vm788_vm3, %v8274_v1  ;;  %v8276_v39 = vld [vmem:[%s9090_s23 + $0x40] sm:$0xff]  }
 0x243   : > { %7655 = vmatprep.mubr.msk.bf16.mxu0 %vm8393_vm2, %v11175_v6  ;;  %7909 = vmatprep.mubr.msk.bf16.mxu1 %vm8393_vm2, %v11175_v6 }
 0x245   : > { %v9558_v58 = vpop.f32.mrb[168].mxu0  ;;  %v9560_v22 = vpop.f32.mrb[168].mxu1 }
 0x246   : > { %11288 = vst [vmem:[#allocation122_spill] sm:$0xff] %v9558_v58  ;;  %11289 = vst [vmem:[#allocation123_spill] sm:$0xff] %v9560_v22  ;;  %v7285_v16 = vpop.f32.mrb[169].mxu0  ;;  %v7539_v27 = vpop.f32.mrb[169].mxu1 }
 0x247   : > { %v9566_v1 = vpop.f32.mrb[170].mxu0  ;;  %v9568_v51 = vpop.f32.mrb[170].mxu1 }
 0x248   : > { %11290 = vst [vmem:[#allocation124_spill] sm:$0xff] %v9566_v1  ;;  %11291 = vst [vmem:[#allocation125_spill] sm:$0xff] %v9568_v51  ;;  %v7286_v10 = vpop.f32.mrb[171].mxu0  ;;  %v7540_v34 = vpop.f32.mrb[171].mxu1 }
 0x249   : > { %v8277_v34 = vld [vmem:[%s9082_s19 + $0x48] sm:$0xff]  }
 0x24a   : > { %7656 = vmatmul.mubr.msk.bf16.gmra.mrb[20].mxu0 %vm788_vm3, %v8275_v3  ;;  %7910 = vmatmul.mubr.msk.bf16.gmra.mrb[20].mxu1 %vm788_vm3, %v8276_v39  ;;  %v8278_v3 = vld [vmem:[%s9090_s23 + $0x48] sm:$0xff]  }
 0x24b   : > { %7659 = vmatprep.mubr.msk.bf16.mxu0 %vm8393_vm2, %v11175_v6  ;;  %7913 = vmatprep.mubr.msk.bf16.mxu1 %vm8393_vm2, %v11175_v6 }
 0x24d   : > { %v9578_v16 = vpop.f32.mrb[172].mxu0  ;;  %v9580_v27 = vpop.f32.mrb[172].mxu1 }
 0x24e   : > { %11292 = vst [vmem:[#allocation126_spill] sm:$0xff] %v9578_v16  ;;  %11293 = vst [vmem:[#allocation127_spill] sm:$0xff] %v9580_v27  ;;  %v7289_v46 = vpop.f32.mrb[173].mxu0  ;;  %v7543_v10 = vpop.f32.mrb[173].mxu1 }
 0x24f   : > { %v9586_v39 = vpop.f32.mrb[174].mxu0  ;;  %v9588_v51 = vpop.f32.mrb[174].mxu1 }
 0x250   : > { %11294 = vst [vmem:[#allocation128_spill] sm:$0xff] %v9586_v39  ;;  %11295 = vst [vmem:[#allocation129_spill] sm:$0xff] %v9588_v51  ;;  %v7290_v22 = vpop.f32.mrb[175].mxu0  ;;  %v7544_v58 = vpop.f32.mrb[175].mxu1 }
 0x251   : > { %v8279_v58 = vld [vmem:[%s9082_s19 + $0x50] sm:$0xff]  }
 0x252   : > { %7660 = vmatmul.mubr.msk.bf16.gmra.mrb[24].mxu0 %vm788_vm3, %v8277_v34  ;;  %7914 = vmatmul.mubr.msk.bf16.gmra.mrb[24].mxu1 %vm788_vm3, %v8278_v3  ;;  %v8280_v34 = vld [vmem:[%s9090_s23 + $0x50] sm:$0xff]  }
 0x253   : > { %7663 = vmatprep.mubr.msk.bf16.mxu0 %vm8393_vm2, %v11175_v6  ;;  %7917 = vmatprep.mubr.msk.bf16.mxu1 %vm8393_vm2, %v11175_v6 }
 0x255   : > { %v9598_v46 = vpop.f32.mrb[176].mxu0  ;;  %v9600_v10 = vpop.f32.mrb[176].mxu1 }
 0x256   : > { %11296 = vst [vmem:[#allocation130_spill] sm:$0xff] %v9598_v46  ;;  %11297 = vst [vmem:[#allocation131_spill] sm:$0xff] %v9600_v10  ;;  %v7293_v1 = vpop.f32.mrb[177].mxu0  ;;  %v7547_v22 = vpop.f32.mrb[177].mxu1 }
 0x257   : > { %v9606_v3 = vpop.f32.mrb[178].mxu0  ;;  %v9608_v51 = vpop.f32.mrb[178].mxu1 }
 0x258   : > { %11298 = vst [vmem:[#allocation132_spill] sm:$0xff] %v9606_v3  ;;  %11299 = vst [vmem:[#allocation133_spill] sm:$0xff] %v9608_v51  ;;  %v7294_v27 = vpop.f32.mrb[179].mxu0  ;;  %v7548_v16 = vpop.f32.mrb[179].mxu1 }
 0x259   : > { %v8281_v16 = vld [vmem:[%s9082_s19 + $0x58] sm:$0xff]  }
 0x25a   : > { %7664 = vmatmul.mubr.msk.bf16.gmra.mrb[28].mxu0 %vm788_vm3, %v8279_v58  ;;  %7918 = vmatmul.mubr.msk.bf16.gmra.mrb[28].mxu1 %vm788_vm3, %v8280_v34  ;;  %v8282_v58 = vld [vmem:[%s9090_s23 + $0x58] sm:$0xff]  }
 0x25b   : > { %7667 = vmatprep.mubr.msk.bf16.mxu0 %vm8393_vm2, %v11175_v6  ;;  %7921 = vmatprep.mubr.msk.bf16.mxu1 %vm8393_vm2, %v11175_v6 }
 0x25d   : > { %v9618_v1 = vpop.f32.mrb[180].mxu0  ;;  %v9620_v22 = vpop.f32.mrb[180].mxu1 }
 0x25e   : > { %11300 = vst [vmem:[#allocation134_spill] sm:$0xff] %v9618_v1  ;;  %11301 = vst [vmem:[#allocation135_spill] sm:$0xff] %v9620_v22  ;;  %v7297_v39 = vpop.f32.mrb[181].mxu0  ;;  %v7551_v27 = vpop.f32.mrb[181].mxu1 }
 0x25f   : > { %v9626_v34 = vpop.f32.mrb[182].mxu0  ;;  %v9628_v51 = vpop.f32.mrb[182].mxu1 }
 0x260   : > { %11302 = vst [vmem:[#allocation136_spill] sm:$0xff] %v9626_v34  ;;  %11303 = vst [vmem:[#allocation137_spill] sm:$0xff] %v9628_v51  ;;  %v7298_v10 = vpop.f32.mrb[183].mxu0  ;;  %v7552_v46 = vpop.f32.mrb[183].mxu1 }
 0x261   : > { %v8283_v46 = vld [vmem:[%s9082_s19 + $0x60] sm:$0xff]  }
 0x262   : > { %7668 = vmatmul.mubr.msk.bf16.gmra.mrb[32].mxu0 %vm788_vm3, %v8281_v16  ;;  %7922 = vmatmul.mubr.msk.bf16.gmra.mrb[32].mxu1 %vm788_vm3, %v8282_v58  ;;  %v8284_v16 = vld [vmem:[%s9090_s23 + $0x60] sm:$0xff]  }
 0x263   : > { %7671 = vmatprep.mubr.msk.bf16.mxu0 %vm8393_vm2, %v11175_v6  ;;  %7925 = vmatprep.mubr.msk.bf16.mxu1 %vm8393_vm2, %v11175_v6 }
 0x265   : > { %v9638_v39 = vpop.f32.mrb[184].mxu0  ;;  %v9640_v27 = vpop.f32.mrb[184].mxu1 }
 0x266   : > { %11304 = vst [vmem:[#allocation138_spill] sm:$0xff] %v9638_v39  ;;  %11305 = vst [vmem:[#allocation139_spill] sm:$0xff] %v9640_v27  ;;  %v7301_v3 = vpop.f32.mrb[185].mxu0  ;;  %v7555_v10 = vpop.f32.mrb[185].mxu1 }
 0x267   : > { %v9646_v58 = vpop.f32.mrb[186].mxu0  ;;  %v9648_v51 = vpop.f32.mrb[186].mxu1 }
 0x268   : > { %11306 = vst [vmem:[#allocation140_spill] sm:$0xff] %v9646_v58  ;;  %11307 = vst [vmem:[#allocation141_spill] sm:$0xff] %v9648_v51  ;;  %v7302_v22 = vpop.f32.mrb[187].mxu0  ;;  %v7556_v1 = vpop.f32.mrb[187].mxu1 }
 0x269   : > { %v8285_v1 = vld [vmem:[%s9082_s19 + $0x68] sm:$0xff]  }
 0x26a   : > { %7672 = vmatmul.mubr.msk.bf16.gmra.mrb[36].mxu0 %vm788_vm3, %v8283_v46  ;;  %7926 = vmatmul.mubr.msk.bf16.gmra.mrb[36].mxu1 %vm788_vm3, %v8284_v16  ;;  %v8286_v46 = vld [vmem:[%s9090_s23 + $0x68] sm:$0xff]  }
 0x26b   : > { %7675 = vmatprep.mubr.msk.bf16.mxu0 %vm8393_vm2, %v11175_v6  ;;  %7929 = vmatprep.mubr.msk.bf16.mxu1 %vm8393_vm2, %v11175_v6 }
 0x26d   : > { %v9658_v3 = vpop.f32.mrb[188].mxu0  ;;  %v9660_v10 = vpop.f32.mrb[188].mxu1 }
 0x26e   : > { %11308 = vst [vmem:[#allocation142_spill] sm:$0xff] %v9658_v3  ;;  %11309 = vst [vmem:[#allocation143_spill] sm:$0xff] %v9660_v10  ;;  %v7305_v34 = vpop.f32.mrb[189].mxu0  ;;  %v7559_v22 = vpop.f32.mrb[189].mxu1 }
 0x26f   : > { %v9666_v16 = vpop.f32.mrb[190].mxu0  ;;  %v9668_v51 = vpop.f32.mrb[190].mxu1 }
 0x270   : > { %11310 = vst [vmem:[#allocation144_spill] sm:$0xff] %v9666_v16  ;;  %11311 = vst [vmem:[#allocation145_spill] sm:$0xff] %v9668_v51  ;;  %v7306_v27 = vpop.f32.mrb[191].mxu0  ;;  %v7560_v39 = vpop.f32.mrb[191].mxu1 }
 0x271   : > { %v8287_v39 = vld [vmem:[%s9082_s19 + $0x70] sm:$0xff]  }
 0x272   : > { %7676 = vmatmul.mubr.msk.bf16.gmra.mrb[40].mxu0 %vm788_vm3, %v8285_v1  ;;  %7930 = vmatmul.mubr.msk.bf16.gmra.mrb[40].mxu1 %vm788_vm3, %v8286_v46  ;;  %v8288_v1 = vld [vmem:[%s9090_s23 + $0x70] sm:$0xff]  }
 0x273   : > { %7679 = vmatprep.mubr.msk.bf16.mxu0 %vm8393_vm2, %v11175_v6  ;;  %7933 = vmatprep.mubr.msk.bf16.mxu1 %vm8393_vm2, %v11175_v6 }
 0x275   : > { %v9678_v34 = vpop.f32.mrb[192].mxu0  ;;  %v9680_v22 = vpop.f32.mrb[192].mxu1 }
 0x276   : > { %11312 = vst [vmem:[#allocation146_spill] sm:$0xff] %v9678_v34  ;;  %11313 = vst [vmem:[#allocation147_spill] sm:$0xff] %v9680_v22  ;;  %v7309_v58 = vpop.f32.mrb[193].mxu0  ;;  %v7563_v27 = vpop.f32.mrb[193].mxu1 }
 0x277   : > { %v9686_v46 = vpop.f32.mrb[194].mxu0  ;;  %v9688_v51 = vpop.f32.mrb[194].mxu1 }
 0x278   : > { %11314 = vst [vmem:[#allocation148_spill] sm:$0xff] %v9686_v46  ;;  %11315 = vst [vmem:[#allocation149_spill] sm:$0xff] %v9688_v51  ;;  %v7310_v10 = vpop.f32.mrb[195].mxu0  ;;  %v7564_v3 = vpop.f32.mrb[195].mxu1 }
 0x279   : > { %v8289_v3 = vld [vmem:[%s9082_s19 + $0x78] sm:$0xff]  }
 0x27a   : > { %7680 = vmatmul.mubr.msk.bf16.gmra.mrb[44].mxu0 %vm788_vm3, %v8287_v39  ;;  %7934 = vmatmul.mubr.msk.bf16.gmra.mrb[44].mxu1 %vm788_vm3, %v8288_v1  ;;  %v8290_v39 = vld [vmem:[%s9090_s23 + $0x78] sm:$0xff]  }
 0x27b   : > { %7683 = vmatprep.mubr.msk.bf16.mxu0 %vm8393_vm2, %v11175_v6  ;;  %7937 = vmatprep.mubr.msk.bf16.mxu1 %vm8393_vm2, %v11175_v6 }
 0x27d   : > { %v9698_v58 = vpop.f32.mrb[196].mxu0  ;;  %v9700_v27 = vpop.f32.mrb[196].mxu1 }
 0x27e   : > { %11316 = vst [vmem:[#allocation150_spill] sm:$0xff] %v9698_v58  ;;  %11317 = vst [vmem:[#allocation151_spill] sm:$0xff] %v9700_v27  ;;  %v7313_v16 = vpop.f32.mrb[197].mxu0  ;;  %v7567_v10 = vpop.f32.mrb[197].mxu1 }
 0x27f   : > { %v9706_v1 = vpop.f32.mrb[198].mxu0  ;;  %v9708_v51 = vpop.f32.mrb[198].mxu1 }
 0x280   : > { %11318 = vst [vmem:[#allocation152_spill] sm:$0xff] %v9706_v1  ;;  %11319 = vst [vmem:[#allocation153_spill] sm:$0xff] %v9708_v51  ;;  %v7314_v22 = vpop.f32.mrb[199].mxu0  ;;  %v7568_v34 = vpop.f32.mrb[199].mxu1 }
 0x281   : > { %v8291_v34 = vld [vmem:[%s9082_s19 + $0x80] sm:$0xff]  }
 0x282   : > { %7684 = vmatmul.mubr.msk.bf16.gmra.mrb[48].mxu0 %vm788_vm3, %v8289_v3  ;;  %7938 = vmatmul.mubr.msk.bf16.gmra.mrb[48].mxu1 %vm788_vm3, %v8290_v39  ;;  %v8292_v3 = vld [vmem:[%s9090_s23 + $0x80] sm:$0xff]  }
 0x283   : > { %7687 = vmatprep.mubr.msk.bf16.mxu0 %vm8393_vm2, %v11175_v6  ;;  %7941 = vmatprep.mubr.msk.bf16.mxu1 %vm8393_vm2, %v11175_v6 }
 0x285   : > { %v9718_v16 = vpop.f32.mrb[200].mxu0  ;;  %v9720_v10 = vpop.f32.mrb[200].mxu1 }
 0x286   : > { %11320 = vst [vmem:[#allocation154_spill] sm:$0xff] %v9718_v16  ;;  %11321 = vst [vmem:[#allocation155_spill] sm:$0xff] %v9720_v10  ;;  %v7317_v46 = vpop.f32.mrb[201].mxu0  ;;  %v7571_v22 = vpop.f32.mrb[201].mxu1 }
 0x287   : > { %v9726_v39 = vpop.f32.mrb[202].mxu0  ;;  %v9728_v51 = vpop.f32.mrb[202].mxu1 }
 0x288   : > { %11322 = vst [vmem:[#allocation156_spill] sm:$0xff] %v9726_v39  ;;  %11323 = vst [vmem:[#allocation157_spill] sm:$0xff] %v9728_v51  ;;  %v7318_v27 = vpop.f32.mrb[203].mxu0  ;;  %v7572_v58 = vpop.f32.mrb[203].mxu1 }
 0x289   : > { %v8293_v58 = vld [vmem:[%s9082_s19 + $0x88] sm:$0xff]  }
 0x28a   : > { %7688 = vmatmul.mubr.msk.bf16.gmra.mrb[52].mxu0 %vm788_vm3, %v8291_v34  ;;  %7942 = vmatmul.mubr.msk.bf16.gmra.mrb[52].mxu1 %vm788_vm3, %v8292_v3  ;;  %v8294_v34 = vld [vmem:[%s9090_s23 + $0x88] sm:$0xff]  }
 0x28b   : > { %7691 = vmatprep.mubr.msk.bf16.mxu0 %vm8393_vm2, %v11175_v6  ;;  %7945 = vmatprep.mubr.msk.bf16.mxu1 %vm8393_vm2, %v11175_v6 }
 0x28d   : > { %v9738_v46 = vpop.f32.mrb[204].mxu0  ;;  %v9740_v22 = vpop.f32.mrb[204].mxu1 }
 0x28e   : > { %11324 = vst [vmem:[#allocation158_spill] sm:$0xff] %v9738_v46  ;;  %11325 = vst [vmem:[#allocation159_spill] sm:$0xff] %v9740_v22  ;;  %v7321_v1 = vpop.f32.mrb[205].mxu0  ;;  %v7575_v27 = vpop.f32.mrb[205].mxu1 }
 0x28f   : > { %v9746_v3 = vpop.f32.mrb[206].mxu0  ;;  %v9748_v51 = vpop.f32.mrb[206].mxu1 }
 0x290   : > { %11326 = vst [vmem:[#allocation160_spill] sm:$0xff] %v9746_v3  ;;  %11327 = vst [vmem:[#allocation161_spill] sm:$0xff] %v9748_v51  ;;  %v7322_v10 = vpop.f32.mrb[207].mxu0  ;;  %v7576_v16 = vpop.f32.mrb[207].mxu1 }
 0x291   : > { %v8295_v16 = vld [vmem:[%s9082_s19 + $0x90] sm:$0xff]  }
 0x292   : > { %7692 = vmatmul.mubr.msk.bf16.gmra.mrb[56].mxu0 %vm788_vm3, %v8293_v58  ;;  %7946 = vmatmul.mubr.msk.bf16.gmra.mrb[56].mxu1 %vm788_vm3, %v8294_v34  ;;  %v8296_v58 = vld [vmem:[%s9090_s23 + $0x90] sm:$0xff]  }
 0x293   : > { %7695 = vmatprep.mubr.msk.bf16.mxu0 %vm8393_vm2, %v11175_v6  ;;  %7949 = vmatprep.mubr.msk.bf16.mxu1 %vm8393_vm2, %v11175_v6 }
 0x295   : > { %v9758_v1 = vpop.f32.mrb[208].mxu0  ;;  %v9760_v27 = vpop.f32.mrb[208].mxu1 }
 0x296   : > { %11328 = vst [vmem:[#allocation162_spill] sm:$0xff] %v9758_v1  ;;  %11329 = vst [vmem:[#allocation163_spill] sm:$0xff] %v9760_v27  ;;  %v7325_v39 = vpop.f32.mrb[209].mxu0  ;;  %v7579_v10 = vpop.f32.mrb[209].mxu1 }
 0x297   : > { %v9766_v34 = vpop.f32.mrb[210].mxu0  ;;  %v9768_v51 = vpop.f32.mrb[210].mxu1 }
 0x298   : > { %11330 = vst [vmem:[#allocation164_spill] sm:$0xff] %v9766_v34  ;;  %11331 = vst [vmem:[#allocation165_spill] sm:$0xff] %v9768_v51  ;;  %v7326_v22 = vpop.f32.mrb[211].mxu0  ;;  %v7580_v46 = vpop.f32.mrb[211].mxu1 }
 0x299   : > { %v8297_v46 = vld [vmem:[%s9082_s19 + $0x98] sm:$0xff]  }
 0x29a   : > { %7696 = vmatmul.mubr.msk.bf16.gmra.mrb[60].mxu0 %vm788_vm3, %v8295_v16  ;;  %7950 = vmatmul.mubr.msk.bf16.gmra.mrb[60].mxu1 %vm788_vm3, %v8296_v58  ;;  %v8298_v16 = vld [vmem:[%s9090_s23 + $0x98] sm:$0xff]  }
 0x29b   : > { %7699 = vmatprep.mubr.msk.bf16.mxu0 %vm8393_vm2, %v11175_v6  ;;  %7953 = vmatprep.mubr.msk.bf16.mxu1 %vm8393_vm2, %v11175_v6 }
 0x29d   : > { %v9778_v39 = vpop.f32.mrb[212].mxu0  ;;  %v9780_v10 = vpop.f32.mrb[212].mxu1 }
 0x29e   : > { %11332 = vst [vmem:[#allocation166_spill] sm:$0xff] %v9778_v39  ;;  %11333 = vst [vmem:[#allocation167_spill] sm:$0xff] %v9780_v10  ;;  %v7329_v3 = vpop.f32.mrb[213].mxu0  ;;  %v7583_v22 = vpop.f32.mrb[213].mxu1 }
 0x29f   : > { %v9786_v58 = vpop.f32.mrb[214].mxu0  ;;  %v9788_v51 = vpop.f32.mrb[214].mxu1 }
 0x2a0   : > { %11334 = vst [vmem:[#allocation168_spill] sm:$0xff] %v9786_v58  ;;  %11335 = vst [vmem:[#allocation169_spill] sm:$0xff] %v9788_v51  ;;  %v7330_v27 = vpop.f32.mrb[215].mxu0  ;;  %v7584_v1 = vpop.f32.mrb[215].mxu1 }
 0x2a1   : > { %v8299_v1 = vld [vmem:[%s9082_s19 + $0xa0] sm:$0xff]  }
 0x2a2   : > { %7700 = vmatmul.mubr.msk.bf16.gmra.mrb[64].mxu0 %vm788_vm3, %v8297_v46  ;;  %7954 = vmatmul.mubr.msk.bf16.gmra.mrb[64].mxu1 %vm788_vm3, %v8298_v16  ;;  %v8300_v46 = vld [vmem:[%s9090_s23 + $0xa0] sm:$0xff]  }
 0x2a3   : > { %7703 = vmatprep.mubr.msk.bf16.mxu0 %vm8393_vm2, %v11175_v6  ;;  %7957 = vmatprep.mubr.msk.bf16.mxu1 %vm8393_vm2, %v11175_v6 }
 0x2a5   : > { %v9798_v3 = vpop.f32.mrb[216].mxu0  ;;  %v9800_v22 = vpop.f32.mrb[216].mxu1 }
 0x2a6   : > { %11336 = vst [vmem:[#allocation170_spill] sm:$0xff] %v9798_v3  ;;  %11337 = vst [vmem:[#allocation171_spill] sm:$0xff] %v9800_v22  ;;  %v7333_v34 = vpop.f32.mrb[217].mxu0  ;;  %v7587_v27 = vpop.f32.mrb[217].mxu1 }
 0x2a7   : > { %v9806_v16 = vpop.f32.mrb[218].mxu0  ;;  %v9808_v51 = vpop.f32.mrb[218].mxu1 }
 0x2a8   : > { %11338 = vst [vmem:[#allocation172_spill] sm:$0xff] %v9806_v16  ;;  %11339 = vst [vmem:[#allocation173_spill] sm:$0xff] %v9808_v51  ;;  %v7334_v10 = vpop.f32.mrb[219].mxu0  ;;  %v7588_v39 = vpop.f32.mrb[219].mxu1 }
 0x2a9   : > { %v8301_v39 = vld [vmem:[%s9082_s19 + $0xa8] sm:$0xff]  }
 0x2aa   : > { %7704 = vmatmul.mubr.msk.bf16.gmra.mrb[68].mxu0 %vm788_vm3, %v8299_v1  ;;  %7958 = vmatmul.mubr.msk.bf16.gmra.mrb[68].mxu1 %vm788_vm3, %v8300_v46  ;;  %v8302_v1 = vld [vmem:[%s9090_s23 + $0xa8] sm:$0xff]  }
 0x2ab   : > { %7707 = vmatprep.mubr.msk.bf16.mxu0 %vm8393_vm2, %v11175_v6  ;;  %7961 = vmatprep.mubr.msk.bf16.mxu1 %vm8393_vm2, %v11175_v6 }
 0x2ad   : > { %v9818_v34 = vpop.f32.mrb[220].mxu0  ;;  %v9820_v27 = vpop.f32.mrb[220].mxu1 }
 0x2ae   : > { %11340 = vst [vmem:[#allocation174_spill] sm:$0xff] %v9818_v34  ;;  %11341 = vst [vmem:[#allocation175_spill] sm:$0xff] %v9820_v27  ;;  %v7337_v58 = vpop.f32.mrb[221].mxu0  ;;  %v7591_v10 = vpop.f32.mrb[221].mxu1 }
 0x2af   : > { %v9826_v46 = vpop.f32.mrb[222].mxu0  ;;  %v9828_v51 = vpop.f32.mrb[222].mxu1 }
 0x2b0   : > { %11342 = vst [vmem:[#allocation176_spill] sm:$0xff] %v9826_v46  ;;  %11343 = vst [vmem:[#allocation177_spill] sm:$0xff] %v9828_v51  ;;  %v7338_v22 = vpop.f32.mrb[223].mxu0  ;;  %v7592_v3 = vpop.f32.mrb[223].mxu1 }
 0x2b1   : > { %v8303_v3 = vld [vmem:[%s9082_s19 + $0xb0] sm:$0xff]  }
 0x2b2   : > { %7708 = vmatmul.mubr.msk.bf16.gmra.mrb[72].mxu0 %vm788_vm3, %v8301_v39  ;;  %7962 = vmatmul.mubr.msk.bf16.gmra.mrb[72].mxu1 %vm788_vm3, %v8302_v1  ;;  %v8304_v39 = vld [vmem:[%s9090_s23 + $0xb0] sm:$0xff]  }
 0x2b3   : > { %7711 = vmatprep.mubr.msk.bf16.mxu0 %vm8393_vm2, %v11175_v6  ;;  %7965 = vmatprep.mubr.msk.bf16.mxu1 %vm8393_vm2, %v11175_v6 }
 0x2b5   : > { %v9838_v58 = vpop.f32.mrb[224].mxu0  ;;  %v9840_v10 = vpop.f32.mrb[224].mxu1 }
 0x2b6   : > { %11344 = vst [vmem:[#allocation178_spill] sm:$0xff] %v9838_v58  ;;  %11345 = vst [vmem:[#allocation179_spill] sm:$0xff] %v9840_v10  ;;  %v7341_v16 = vpop.f32.mrb[225].mxu0  ;;  %v7595_v22 = vpop.f32.mrb[225].mxu1 }
 0x2b7   : > { %v9846_v1 = vpop.f32.mrb[226].mxu0  ;;  %v9848_v51 = vpop.f32.mrb[226].mxu1 }
 0x2b8   : > { %11346 = vst [vmem:[#allocation180_spill] sm:$0xff] %v9846_v1  ;;  %11347 = vst [vmem:[#allocation181_spill] sm:$0xff] %v9848_v51  ;;  %v7342_v27 = vpop.f32.mrb[227].mxu0  ;;  %v7596_v34 = vpop.f32.mrb[227].mxu1 }
 0x2b9   : > { %v8305_v34 = vld [vmem:[%s9082_s19 + $0xb8] sm:$0xff]  }
 0x2ba   : > { %7712 = vmatmul.mubr.msk.bf16.gmra.mrb[76].mxu0 %vm788_vm3, %v8303_v3  ;;  %7966 = vmatmul.mubr.msk.bf16.gmra.mrb[76].mxu1 %vm788_vm3, %v8304_v39  ;;  %v8306_v3 = vld [vmem:[%s9090_s23 + $0xb8] sm:$0xff]  }
 0x2bb   : > { %7715 = vmatprep.mubr.msk.bf16.mxu0 %vm8393_vm2, %v11175_v6  ;;  %7969 = vmatprep.mubr.msk.bf16.mxu1 %vm8393_vm2, %v11175_v6 }
 0x2bd   : > { %v9858_v16 = vpop.f32.mrb[228].mxu0  ;;  %v9860_v22 = vpop.f32.mrb[228].mxu1 }
 0x2be   : > { %11348 = vst [vmem:[#allocation182_spill] sm:$0xff] %v9858_v16  ;;  %11349 = vst [vmem:[#allocation183_spill] sm:$0xff] %v9860_v22  ;;  %v7345_v46 = vpop.f32.mrb[229].mxu0  ;;  %v7599_v27 = vpop.f32.mrb[229].mxu1 }
 0x2bf   : > { %v9866_v39 = vpop.f32.mrb[230].mxu0  ;;  %v9868_v51 = vpop.f32.mrb[230].mxu1 }
 0x2c0   : > { %11350 = vst [vmem:[#allocation184_spill] sm:$0xff] %v9866_v39  ;;  %11351 = vst [vmem:[#allocation185_spill] sm:$0xff] %v9868_v51  ;;  %v7346_v10 = vpop.f32.mrb[231].mxu0  ;;  %v7600_v58 = vpop.f32.mrb[231].mxu1 }
 0x2c1   : > { %v8307_v58 = vld [vmem:[%s9082_s19 + $0xc0] sm:$0xff]  }
 0x2c2   : > { %7716 = vmatmul.mubr.msk.bf16.gmra.mrb[80].mxu0 %vm788_vm3, %v8305_v34  ;;  %7970 = vmatmul.mubr.msk.bf16.gmra.mrb[80].mxu1 %vm788_vm3, %v8306_v3  ;;  %v8308_v34 = vld [vmem:[%s9090_s23 + $0xc0] sm:$0xff]  }
 0x2c3   : > { %7719 = vmatprep.mubr.msk.bf16.mxu0 %vm8393_vm2, %v11175_v6  ;;  %7973 = vmatprep.mubr.msk.bf16.mxu1 %vm8393_vm2, %v11175_v6 }
 0x2c5   : > { %v9878_v46 = vpop.f32.mrb[232].mxu0  ;;  %v9880_v27 = vpop.f32.mrb[232].mxu1 }
 0x2c6   : > { %11352 = vst [vmem:[#allocation186_spill] sm:$0xff] %v9878_v46  ;;  %11353 = vst [vmem:[#allocation187_spill] sm:$0xff] %v9880_v27  ;;  %v7349_v1 = vpop.f32.mrb[233].mxu0  ;;  %v7603_v10 = vpop.f32.mrb[233].mxu1 }
 0x2c7   : > { %v9886_v3 = vpop.f32.mrb[234].mxu0  ;;  %v9888_v51 = vpop.f32.mrb[234].mxu1 }
 0x2c8   : > { %11354 = vst [vmem:[#allocation188_spill] sm:$0xff] %v9886_v3  ;;  %11355 = vst [vmem:[#allocation189_spill] sm:$0xff] %v9888_v51  ;;  %v7350_v22 = vpop.f32.mrb[235].mxu0  ;;  %v7604_v16 = vpop.f32.mrb[235].mxu1 }
 0x2c9   : > { %v8309_v16 = vld [vmem:[%s9082_s19 + $0xc8] sm:$0xff]  }
 0x2ca   : > { %7720 = vmatmul.mubr.msk.bf16.gmra.mrb[84].mxu0 %vm788_vm3, %v8307_v58  ;;  %7974 = vmatmul.mubr.msk.bf16.gmra.mrb[84].mxu1 %vm788_vm3, %v8308_v34  ;;  %v8310_v58 = vld [vmem:[%s9090_s23 + $0xc8] sm:$0xff]  }
 0x2cb   : > { %7723 = vmatprep.mubr.msk.bf16.mxu0 %vm8393_vm2, %v11175_v6  ;;  %7977 = vmatprep.mubr.msk.bf16.mxu1 %vm8393_vm2, %v11175_v6 }
 0x2cd   : > { %v9898_v1 = vpop.f32.mrb[236].mxu0  ;;  %v9900_v10 = vpop.f32.mrb[236].mxu1 }
 0x2ce   : > { %11356 = vst [vmem:[#allocation190_spill] sm:$0xff] %v9898_v1  ;;  %11357 = vst [vmem:[#allocation191_spill] sm:$0xff] %v9900_v10  ;;  %v7353_v39 = vpop.f32.mrb[237].mxu0  ;;  %v7607_v22 = vpop.f32.mrb[237].mxu1 }
 0x2cf   : > { %v9906_v34 = vpop.f32.mrb[238].mxu0  ;;  %v9908_v51 = vpop.f32.mrb[238].mxu1 }
 0x2d0   : > { %11358 = vst [vmem:[#allocation192_spill] sm:$0xff] %v9906_v34  ;;  %11359 = vst [vmem:[#allocation193_spill] sm:$0xff] %v9908_v51  ;;  %v7354_v27 = vpop.f32.mrb[239].mxu0  ;;  %v7608_v46 = vpop.f32.mrb[239].mxu1  ;;  %v8314_v34 = vld [vmem:[%s9090_s23 + $0xd8] sm:$0xff]  }
 0x2d1   : > { %v8311_v46 = vld [vmem:[%s9082_s19 + $0xd0] sm:$0xff]  }
 0x2d2   : > { %7724 = vmatmul.mubr.msk.bf16.gmra.mrb[88].mxu0 %vm788_vm3, %v8309_v16  ;;  %7978 = vmatmul.mubr.msk.bf16.gmra.mrb[88].mxu1 %vm788_vm3, %v8310_v58  ;;  %v8312_v16 = vld [vmem:[%s9090_s23 + $0xd0] sm:$0xff]  }
 0x2d3   : > { %7727 = vmatprep.mubr.msk.bf16.mxu0 %vm8393_vm2, %v11175_v6  ;;  %7981 = vmatprep.mubr.msk.bf16.mxu1 %vm8393_vm2, %v11175_v6 }
 0x2d5   : > { %v9918_v39 = vpop.f32.mrb[240].mxu0  ;;  %v9920_v22 = vpop.f32.mrb[240].mxu1 }
 0x2d6   : > { %11360 = vst [vmem:[#allocation194_spill] sm:$0xff] %v9918_v39  ;;  %11361 = vst [vmem:[#allocation195_spill] sm:$0xff] %v9920_v22  ;;  %v7357_v3 = vpop.f32.mrb[241].mxu0  ;;  %v7611_v27 = vpop.f32.mrb[241].mxu1 }
 0x2d7   : > { %v9926_v58 = vpop.f32.mrb[242].mxu0  ;;  %v9928_v51 = vpop.f32.mrb[242].mxu1 }
 0x2d8   : > { %11362 = vst [vmem:[#allocation196_spill] sm:$0xff] %v9926_v58  ;;  %11363 = vst [vmem:[#allocation197_spill] sm:$0xff] %v9928_v51  ;;  %v7358_v10 = vpop.f32.mrb[243].mxu0  ;;  %v7612_v1 = vpop.f32.mrb[243].mxu1 }
 0x2d9   : > { %v9943_v1 = vld [vmem:[%s10967_s5] ss:$0 sm:$0xff] }
 0x2da   : > { %7728 = vmatmul.mubr.msk.bf16.gmra.mrb[92].mxu0 %vm788_vm3, %v8311_v46  ;;  %7982 = vmatmul.mubr.msk.bf16.gmra.mrb[92].mxu1 %vm788_vm3, %v8312_v16  ;;  %v11364_v16 = vmax.f32 %v8706_v0, %v8708_v2 }
 0x2db   : > { %7731 = vmatprep.mubr.msk.bf16.mxu0 %vm8393_vm2, %v11175_v6  ;;  %7985 = vmatprep.mubr.msk.bf16.mxu1 %vm8393_vm2, %v11175_v6 }
 0x2dd   : > { %v3275_v3 = vpop.f32.mrb[244].mxu0  ;;  %v4406_v27 = vpop.f32.mrb[244].mxu1 }
 0x2de   : > { %v5015_v15 = vmax.f32 %v3275_v3, %v4406_v27  ;;  %v7625_v22 = vpop.f32.mrb[245].mxu0  ;;  %v7879_v39 = vpop.f32.mrb[245].mxu1 }
 0x2df   : > { %v3278_v10 = vpop.f32.mrb[246].mxu0  ;;  %v4409_v46 = vpop.f32.mrb[246].mxu1  ;;  %v11365_v39 = vmax.f32 %v8714_v8, %v8716_v9 }
 0x2e0   : > { %v5137_v51 = vmax.f32 %v11364_v16, %v5015_v15  ;;  %v5016_v58 = vmax.f32 %v3278_v10, %v4409_v46  ;;  %v7626_v24 = vpop.f32.mrb[247].mxu0  ;;  %v7880_v40 = vpop.f32.mrb[247].mxu1  ;;  %v8315_v15 = vld [vmem:[%s9082_s19 + $0xe0] sm:$0xff]   ;;  %v11366_v10 = vmax.f32 %v8726_v13, %v8728_v14 }
 0x2e2   : > { %v5266_v3 = vadd.f32 %v9943_v1, %v5137_v51  ;;  %v5138_v22 = vmax.f32 %v11365_v39, %v5016_v58  ;;  %7732 = vmatmul.mubr.msk.bf16.gmra.mrb[96].mxu0 %vm788_vm3, %v8313_v4  ;;  %7986 = vmatmul.mubr.msk.bf16.gmra.mrb[96].mxu1 %vm788_vm3, %v8314_v34  ;;  %v8316_v34 = vld [vmem:[%s9090_s23 + $0xe0] sm:$0xff]  }
 0x2e3   : > { %7735 = vmatprep.mubr.msk.bf16.mxu0 %vm8393_vm2, %v11175_v6  ;;  %7989 = vmatprep.mubr.msk.bf16.mxu1 %vm8393_vm2, %v11175_v6 }
 0x2e4   : > { %v6719_v0 = vpack.c.bf16 %v5266_v3, %v5266_v3  ;;  %v5267_v2 = vadd.f32 %v9943_v1, %v5138_v22 }
 0x2e5   : > { %v3283_v8 = vpop.f32.mrb[248].mxu0  ;;  %v4414_v9 = vpop.f32.mrb[248].mxu1 }
 0x2e6   : > { %5877 = vst.msk [vmem:[%s9958_s28] sm:$0xf] %vm5876_vm4, %v6719_v0  ;;  %v6720_v40 = vpack.c.bf16 %v5267_v2, %v5267_v2  ;;  %v5017_v24 = vmax.f32 %v3283_v8, %v4414_v9  ;;  %v7629_v4 = vpop.f32.mrb[249].mxu0  ;;  %v7883_v51 = vpop.f32.mrb[249].mxu1  ;;  %v11367_v0 = vmax.f32 %v8734_v20, %v8736_v21 }
 0x2e7   : > { %v3286_v58 = vpop.f32.mrb[250].mxu0  ;;  %v4417_v27 = vpop.f32.mrb[250].mxu1  ;;  %v8317_v4 = vld [vmem:[%s9082_s19 + $0xe8] sm:$0xff]  }
 0x2e8   : > { %5878 = vst.msk [vmem:[%s9958_s28 + $0x4] sm:$0xf] %vm5876_vm4, %v6720_v40  ;;  %v5139_v46 = vmax.f32 %v11366_v10, %v5017_v24  ;;  %v5018_v16 = vmax.f32 %v3286_v58, %v4417_v27  ;;  %v7630_v3 = vpop.f32.mrb[251].mxu0  ;;  %v7884_v39 = vpop.f32.mrb[251].mxu1  ;;  %v8318_v51 = vld [vmem:[%s9090_s23 + $0xe8] sm:$0xff]   ;;  %v11368_v58 = vmax.f32 %v8746_v25, %v8748_v26 }
 0x2e9   : > { %v11369_v39 = vmax.f32 %v8754_v32, %v8756_v33 }
 0x2ea   : > { %v5268_v22 = vadd.f32 %v9943_v1, %v5139_v46  ;;  %v5140_v2 = vmax.f32 %v11367_v0, %v5018_v16  ;;  %7736 = vmatmul.mubr.msk.bf16.gmra.mrb[100].mxu0 %vm788_vm3, %v8315_v15  ;;  %7990 = vmatmul.mubr.msk.bf16.gmra.mrb[100].mxu1 %vm788_vm3, %v8316_v34 }
 0x2eb   : > { %7739 = vmatprep.mubr.msk.bf16.mxu0 %vm8393_vm2, %v11175_v6  ;;  %7993 = vmatprep.mubr.msk.bf16.mxu1 %vm8393_vm2, %v11175_v6 }
 0x2ec   : > { %v6721_v13 = vpack.c.bf16 %v5268_v22, %v5268_v22  ;;  %v5269_v14 = vadd.f32 %v9943_v1, %v5140_v2 }
 0x2ed   : > { %v3291_v8 = vpop.f32.mrb[252].mxu0  ;;  %v4422_v9 = vpop.f32.mrb[252].mxu1 }
 0x2ee   : > { %5879 = vst.msk [vmem:[%s9958_s28 + $0x8] sm:$0xf] %vm5876_vm4, %v6721_v13  ;;  %v6722_v20 = vpack.c.bf16 %v5269_v14, %v5269_v14  ;;  %v5019_v21 = vmax.f32 %v3291_v8, %v4422_v9  ;;  %v7633_v40 = vpop.f32.mrb[253].mxu0  ;;  %v7887_v24 = vpop.f32.mrb[253].mxu1  ;;  %v8319_v8 = vld [vmem:[%s9082_s19 + $0xf0] sm:$0xff]  }
 0x2ef   : > { %v3294_v15 = vpop.f32.mrb[254].mxu0  ;;  %v4425_v34 = vpop.f32.mrb[254].mxu1  ;;  %v8320_v9 = vld [vmem:[%s9090_s23 + $0xf0] sm:$0xff]   ;;  %v11370_v40 = vmax.f32 %v8766_v37, %v8768_v38 }
 0x2f0   : > { %5880 = vst.msk [vmem:[%s9958_s28 + $0xc] sm:$0xf] %vm5876_vm4, %v6722_v20  ;;  %v5141_v27 = vmax.f32 %v11368_v58, %v5019_v21  ;;  %v5020_v10 = vmax.f32 %v3294_v15, %v4425_v34  ;;  %v7634_v46 = vpop.f32.mrb[255].mxu0  ;;  %v7888_v16 = vpop.f32.mrb[255].mxu1  ;;  %v11371_v58 = vmax.f32 %v8774_v44, %v8776_v45 }
 0x2f2   : > { %v5270_v3 = vadd.f32 %v9943_v1, %v5141_v27  ;;  %v5142_v22 = vmax.f32 %v11369_v39, %v5020_v10  ;;  %7740 = vmatmul.mubr.msk.bf16.gmra.mrb[104].mxu0 %vm788_vm3, %v8317_v4  ;;  %7994 = vmatmul.mubr.msk.bf16.gmra.mrb[104].mxu1 %vm788_vm3, %v8318_v51  ;;  %v8321_v39 = vld [vmem:[%s9082_s19 + $0xf8] sm:$0xff]  }
 0x2f3   : > { %7743 = vmatprep.mubr.msk.bf16.mxu0 %vm8393_vm2, %v11175_v6  ;;  %7997 = vmatprep.mubr.msk.bf16.mxu1 %vm8393_vm2, %v11175_v6 }
 0x2f4   : > { %v6723_v25 = vpack.c.bf16 %v5270_v3, %v5270_v3  ;;  %v5271_v26 = vadd.f32 %v9943_v1, %v5142_v22  ;;  %v8322_v22 = vld [vmem:[%s9090_s23 + $0xf8] sm:$0xff]  }
 0x2f5   : > { %v3299_v0 = vpop.f32.mrb[0].mxu0  ;;  %v4430_v2 = vpop.f32.mrb[0].mxu1 }
 0x2f6   : > { %5881 = vst.msk [vmem:[%s9958_s28 + $0x10] sm:$0xf] %vm5876_vm4, %v6723_v25  ;;  %v6724_v32 = vpack.c.bf16 %v5271_v26, %v5271_v26  ;;  %v5021_v33 = vmax.f32 %v3299_v0, %v4430_v2  ;;  %v7637_v13 = vpop.f32.mrb[1].mxu0  ;;  %v7891_v14 = vpop.f32.mrb[1].mxu1  ;;  %v11372_v0 = vmax.f32 %v8786_v49, %v8788_v50 }
 0x2f7   : > { %v3302_v20 = vpop.f32.mrb[2].mxu0  ;;  %v4433_v21 = vpop.f32.mrb[2].mxu1 }
 0x2f8   : > { %5882 = vst.msk [vmem:[%s9958_s28 + $0x14] sm:$0xf] %vm5876_vm4, %v6724_v32  ;;  %v5143_v24 = vmax.f32 %v11370_v40, %v5021_v33  ;;  %v5022_v4 = vmax.f32 %v3302_v20, %v4433_v21  ;;  %v7638_v51 = vpop.f32.mrb[3].mxu0  ;;  %v7892_v15 = vpop.f32.mrb[3].mxu1 }
 0x2f9   : > { %v8324_v51 = vld [vmem:[%s9090_s23 + $0x100] sm:$0xff]  }
 0x2fa   : > { %v5272_v34 = vadd.f32 %v9943_v1, %v5143_v24  ;;  %v5144_v27 = vmax.f32 %v11371_v58, %v5022_v4  ;;  %7744 = vmatmul.mubr.msk.bf16.gmra.mrb[108].mxu0 %vm788_vm3, %v8319_v8  ;;  %7998 = vmatmul.mubr.msk.bf16.gmra.mrb[108].mxu1 %vm788_vm3, %v8320_v9  ;;  %v11373_v8 = vmax.f32 %v8794_v56, %v8796_v57  ;;  %v8323_v4 = vld [vmem:[%s9082_s19 + $0x100] sm:$0xff]  }
 0x2fb   : > { %7747 = vmatprep.mubr.msk.bf16.mxu0 %vm8393_vm2, %v11175_v6  ;;  %8001 = vmatprep.mubr.msk.bf16.mxu1 %vm8393_vm2, %v11175_v6  ;;  %v11374_v58 = vmax.f32 %v8806_v61, %v8808_v62 }
 0x2fc   : > { %v6725_v37 = vpack.c.bf16 %v5272_v34, %v5272_v34  ;;  %v5273_v38 = vadd.f32 %v9943_v1, %v5144_v27 }
 0x2fd   : > { %v3307_v10 = vpop.f32.mrb[4].mxu0  ;;  %v4438_v46 = vpop.f32.mrb[4].mxu1 }
 0x2fe   : > { %5883 = vst.msk [vmem:[%s9958_s28 + $0x18] sm:$0xf] %vm5876_vm4, %v6725_v37  ;;  %v6726_v44 = vpack.c.bf16 %v5273_v38, %v5273_v38  ;;  %v5023_v45 = vmax.f32 %v3307_v10, %v4438_v46  ;;  %v7641_v16 = vpop.f32.mrb[5].mxu0  ;;  %v7895_v3 = vpop.f32.mrb[5].mxu1 }
 0x2ff   : > { %v3310_v25 = vpop.f32.mrb[6].mxu0  ;;  %v4441_v26 = vpop.f32.mrb[6].mxu1 }
 0x300   : > { %5884 = vst.msk [vmem:[%s9958_s28 + $0x1c] sm:$0xf] %vm5876_vm4, %v6726_v44  ;;  %v5145_v2 = vmax.f32 %v11372_v0, %v5023_v45  ;;  %v5024_v32 = vmax.f32 %v3310_v25, %v4441_v26  ;;  %v7642_v33 = vpop.f32.mrb[7].mxu0  ;;  %v7896_v13 = vpop.f32.mrb[7].mxu1  ;;  %v11375_v44 = vmax.f32 %v8814_v11, %v8816_v12  ;;  %v8325_v25 = vld [vmem:[%s9082_s19 + $0x108] sm:$0xff]  }
 0x301   : > { %v8326_v26 = vld [vmem:[%s9090_s23 + $0x108] sm:$0xff]  }
 0x302   : > { %v5274_v14 = vadd.f32 %v9943_v1, %v5145_v2  ;;  %v5146_v9 = vmax.f32 %v11373_v8, %v5024_v32  ;;  %7748 = vmatmul.mubr.msk.bf16.gmra.mrb[112].mxu0 %vm788_vm3, %v8321_v39  ;;  %8002 = vmatmul.mubr.msk.bf16.gmra.mrb[112].mxu1 %vm788_vm3, %v8322_v22  ;;  %v11376_v32 = vmax.f32 %v8826_v19, %v8828_v23 }
 0x303   : > { %7751 = vmatprep.mubr.msk.bf16.mxu0 %vm8393_vm2, %v11175_v6  ;;  %8005 = vmatprep.mubr.msk.bf16.mxu1 %vm8393_vm2, %v11175_v6 }
 0x304   : > { %v6727_v49 = vpack.c.bf16 %v5274_v14, %v5274_v14  ;;  %v5275_v50 = vadd.f32 %v9943_v1, %v5146_v9 }
 0x305   : > { %v3315_v20 = vpop.f32.mrb[8].mxu0  ;;  %v4446_v21 = vpop.f32.mrb[8].mxu1 }
 0x306   : > { %5885 = vst.msk [vmem:[%s9958_s28 + $0x20] sm:$0xf] %vm5876_vm4, %v6727_v49  ;;  %v6728_v56 = vpack.c.bf16 %v5275_v50, %v5275_v50  ;;  %v5025_v57 = vmax.f32 %v3315_v20, %v4446_v21  ;;  %v7645_v40 = vpop.f32.mrb[9].mxu0  ;;  %v7899_v24 = vpop.f32.mrb[9].mxu1  ;;  %v11377_v49 = vmax.f32 %v8834_v35, %v8836_v36 }
 0x307   : > { %v3318_v15 = vpop.f32.mrb[10].mxu0  ;;  %v4449_v34 = vpop.f32.mrb[10].mxu1  ;;  %v8327_v40 = vld [vmem:[%s9082_s19 + $0x110] sm:$0xff]  }
 0x308   : > { %5886 = vst.msk [vmem:[%s9958_s28 + $0x24] sm:$0xf] %vm5876_vm4, %v6728_v56  ;;  %v5147_v27 = vmax.f32 %v11374_v58, %v5025_v57  ;;  %v5026_v37 = vmax.f32 %v3318_v15, %v4449_v34  ;;  %v7646_v38 = vpop.f32.mrb[11].mxu0  ;;  %v7900_v10 = vpop.f32.mrb[11].mxu1  ;;  %v8328_v24 = vld [vmem:[%s9090_s23 + $0x110] sm:$0xff]   ;;  %v11378_v15 = vmax.f32 %v8846_v43, %v8848_v47 }
 0x309   : > { %v11379_v10 = vmax.f32 %v8854_v59, %v8856_v60 }
 0x30a   : > { %v5276_v46 = vadd.f32 %v9943_v1, %v5147_v27  ;;  %v5148_v45 = vmax.f32 %v11375_v44, %v5026_v37  ;;  %7752 = vmatmul.mubr.msk.bf16.gmra.mrb[116].mxu0 %vm788_vm3, %v8323_v4  ;;  %8006 = vmatmul.mubr.msk.bf16.gmra.mrb[116].mxu1 %vm788_vm3, %v8324_v51 }
 0x30b   : > { %7755 = vmatprep.mubr.msk.bf16.mxu0 %vm8393_vm2, %v11175_v6  ;;  %8009 = vmatprep.mubr.msk.bf16.mxu1 %vm8393_vm2, %v11175_v6 }
 0x30c   : > { %v6729_v61 = vpack.c.bf16 %v5276_v46, %v5276_v46  ;;  %v5277_v62 = vadd.f32 %v9943_v1, %v5148_v45 }
 0x30d   : > { %v3323_v16 = vpop.f32.mrb[12].mxu0  ;;  %v4454_v3 = vpop.f32.mrb[12].mxu1 }
 0x30e   : > { %5887 = vst.msk [vmem:[%s9958_s28 + $0x28] sm:$0xf] %vm5876_vm4, %v6729_v61  ;;  %v6730_v11 = vpack.c.bf16 %v5277_v62, %v5277_v62  ;;  %v5027_v12 = vmax.f32 %v3323_v16, %v4454_v3  ;;  %v7649_v39 = vpop.f32.mrb[13].mxu0  ;;  %v7903_v22 = vpop.f32.mrb[13].mxu1  ;;  %v8329_v16 = vld [vmem:[%s9082_s19 + $0x118] sm:$0xff]  }
 0x30f   : > { %v3326_v0 = vpop.f32.mrb[14].mxu0  ;;  %v4457_v2 = vpop.f32.mrb[14].mxu1  ;;  %v8330_v3 = vld [vmem:[%s9090_s23 + $0x118] sm:$0xff]   ;;  %v11380_v39 = vmax.f32 %v8866_v7, %v8868_v17 }
 0x310   : > { %5888 = vst.msk [vmem:[%s9958_s28 + $0x2c] sm:$0xf] %vm5876_vm4, %v6730_v11  ;;  %v5149_v33 = vmax.f32 %v11376_v32, %v5027_v12  ;;  %v5028_v13 = vmax.f32 %v3326_v0, %v4457_v2  ;;  %v7650_v14 = vpop.f32.mrb[15].mxu0  ;;  %v7904_v8 = vpop.f32.mrb[15].mxu1  ;;  %v11381_v32 = vmax.f32 %v8874_v41, %v8876_v42 }
 0x312   : > { %v5278_v9 = vadd.f32 %v9943_v1, %v5149_v33  ;;  %v5150_v50 = vmax.f32 %v11377_v49, %v5028_v13  ;;  %7756 = vmatmul.mubr.msk.bf16.gmra.mrb[120].mxu0 %vm788_vm3, %v8325_v25  ;;  %8010 = vmatmul.mubr.msk.bf16.gmra.mrb[120].mxu1 %vm788_vm3, %v8326_v26  ;;  %v8331_v49 = vld [vmem:[%s9082_s19 + $0x120] sm:$0xff]  }
 0x313   : > { %7759 = vmatprep.mubr.msk.bf16.mxu0 %vm8393_vm2, %v11175_v6  ;;  %8013 = vmatprep.mubr.msk.bf16.mxu1 %vm8393_vm2, %v11175_v6 }
 0x314   : > { %v6731_v19 = vpack.c.bf16 %v5278_v9, %v5278_v9  ;;  %v5279_v23 = vadd.f32 %v9943_v1, %v5150_v50  ;;  %v8332_v50 = vld [vmem:[%s9090_s23 + $0x120] sm:$0xff]  }
 0x315   : > { %v3331_v20 = vpop.f32.mrb[16].mxu0  ;;  %v4462_v21 = vpop.f32.mrb[16].mxu1 }
 0x316   : > { %5889 = vst.msk [vmem:[%s9958_s28 + $0x30] sm:$0xf] %vm5876_vm4, %v6731_v19  ;;  %v6732_v35 = vpack.c.bf16 %v5279_v23, %v5279_v23  ;;  %v5029_v36 = vmax.f32 %v3331_v20, %v4462_v21  ;;  %v7653_v56 = vpop.f32.mrb[17].mxu0  ;;  %v7907_v57 = vpop.f32.mrb[17].mxu1  ;;  %v11382_v20 = vmax.f32 %v8886_v55, %v8888_v5 }
 0x317   : > { %v3334_v4 = vpop.f32.mrb[18].mxu0  ;;  %v4465_v51 = vpop.f32.mrb[18].mxu1 }
 0x318   : > { %5890 = vst.msk [vmem:[%s9958_s28 + $0x34] sm:$0xf] %vm5876_vm4, %v6732_v35  ;;  %v5151_v34 = vmax.f32 %v11378_v15, %v5029_v36  ;;  %v5030_v58 = vmax.f32 %v3334_v4, %v4465_v51  ;;  %v7654_v27 = vpop.f32.mrb[19].mxu0  ;;  %v7908_v37 = vpop.f32.mrb[19].mxu1 }
 0x319   : > { %v8334_v27 = vld [vmem:[%s9090_s23 + $0x128] sm:$0xff]  }
 0x31a   : > { %v5280_v38 = vadd.f32 %v9943_v1, %v5151_v34  ;;  %v5152_v46 = vmax.f32 %v11379_v10, %v5030_v58  ;;  %7760 = vmatmul.mubr.msk.bf16.gmra.mrb[124].mxu0 %vm788_vm3, %v8327_v40  ;;  %8014 = vmatmul.mubr.msk.bf16.gmra.mrb[124].mxu1 %vm788_vm3, %v8328_v24  ;;  %v11383_v40 = vmax.f32 %v8894_v31, %v8896_v54  ;;  %v8333_v58 = vld [vmem:[%s9082_s19 + $0x128] sm:$0xff]  }
 0x31b   : > { %7763 = vmatprep.mubr.msk.bf16.mxu0 %vm8393_vm2, %v11175_v6  ;;  %8017 = vmatprep.mubr.msk.bf16.mxu1 %vm8393_vm2, %v11175_v6  ;;  %v11384_v10 = vmax.f32 %v8906_v28, %v8908_v29 }
 0x31c   : > { %v6733_v43 = vpack.c.bf16 %v5280_v38, %v5280_v38  ;;  %v5281_v47 = vadd.f32 %v9943_v1, %v5152_v46 }
 0x31d   : > { %v3339_v44 = vpop.f32.mrb[20].mxu0  ;;  %v4470_v45 = vpop.f32.mrb[20].mxu1 }
 0x31e   : > { %5891 = vst.msk [vmem:[%s9958_s28 + $0x38] sm:$0xf] %vm5876_vm4, %v6733_v43  ;;  %v6734_v59 = vpack.c.bf16 %v5281_v47, %v5281_v47  ;;  %v5031_v60 = vmax.f32 %v3339_v44, %v4470_v45  ;;  %v7657_v61 = vpop.f32.mrb[21].mxu0  ;;  %v7911_v62 = vpop.f32.mrb[21].mxu1 }
 0x31f   : > { %v3342_v11 = vpop.f32.mrb[22].mxu0  ;;  %v4473_v12 = vpop.f32.mrb[22].mxu1 }
 0x320   : > { %5892 = vst.msk [vmem:[%s9958_s28 + $0x3c] sm:$0xf] %vm5876_vm4, %v6734_v59  ;;  %v5153_v22 = vmax.f32 %v11380_v39, %v5031_v60  ;;  %v5032_v25 = vmax.f32 %v3342_v11, %v4473_v12  ;;  %v7658_v26 = vpop.f32.mrb[23].mxu0  ;;  %v7912_v0 = vpop.f32.mrb[23].mxu1  ;;  %v11385_v59 = vmax.f32 %v8914_v30, %v8916_v48  ;;  %v8335_v11 = vld [vmem:[%s9082_s19 + $0x130] sm:$0xff]  }
 0x321   : > { %v8336_v12 = vld [vmem:[%s9090_s23 + $0x130] sm:$0xff]  }
 0x322   : > { %v5282_v2 = vadd.f32 %v9943_v1, %v5153_v22  ;;  %v5154_v33 = vmax.f32 %v11381_v32, %v5032_v25  ;;  %7764 = vmatmul.mubr.msk.bf16.gmra.mrb[128].mxu0 %vm788_vm3, %v8329_v16  ;;  %8018 = vmatmul.mubr.msk.bf16.gmra.mrb[128].mxu1 %vm788_vm3, %v8330_v3  ;;  %v11386_v25 = vmax.f32 %v8926_v52, %v8928_v18 }
 0x323   : > { %7767 = vmatprep.mubr.msk.bf16.mxu0 %vm8393_vm2, %v11175_v6  ;;  %8021 = vmatprep.mubr.msk.bf16.mxu1 %vm8393_vm2, %v11175_v6 }
 0x324   : > { %v6735_v7 = vpack.c.bf16 %v5282_v2, %v5282_v2  ;;  %v5283_v17 = vadd.f32 %v9943_v1, %v5154_v33 }
 0x325   : > { %v3347_v13 = vpop.f32.mrb[24].mxu0  ;;  %v4478_v14 = vpop.f32.mrb[24].mxu1 }
 0x326   : > { %5893 = vst.msk [vmem:[%s9958_s28 + $0x40] sm:$0xf] %vm5876_vm4, %v6735_v7  ;;  %v6736_v41 = vpack.c.bf16 %v5283_v17, %v5283_v17  ;;  %v5033_v42 = vmax.f32 %v3347_v13, %v4478_v14  ;;  %v7661_v8 = vpop.f32.mrb[25].mxu0  ;;  %v7915_v9 = vpop.f32.mrb[25].mxu1  ;;  %v11387_v7 = vmax.f32 %v8934_v53, %v8936_v63 }
 0x327   : > { %v3350_v19 = vpop.f32.mrb[26].mxu0  ;;  %v4481_v23 = vpop.f32.mrb[26].mxu1  ;;  %v8337_v8 = vld [vmem:[%s9082_s19 + $0x138] sm:$0xff]  }
 0x328   : > { %5894 = vst.msk [vmem:[%s9958_s28 + $0x44] sm:$0xf] %vm5876_vm4, %v6736_v41  ;;  %v5155_v21 = vmax.f32 %v11382_v20, %v5033_v42  ;;  %v5034_v35 = vmax.f32 %v3350_v19, %v4481_v23  ;;  %v7662_v36 = vpop.f32.mrb[27].mxu0  ;;  %v7916_v56 = vpop.f32.mrb[27].mxu1  ;;  %v8338_v9 = vld [vmem:[%s9090_s23 + $0x138] sm:$0xff]   ;;  %v11388_v19 = vld [vmem:[#allocation2_spill] sm:$0xff] }
 0x329   : > { %v11389_v23 = vld [vmem:[#allocation3_spill] sm:$0xff] }
 0x32a   : > { %v5284_v57 = vadd.f32 %v9943_v1, %v5155_v21  ;;  %v5156_v24 = vmax.f32 %v11383_v40, %v5034_v35  ;;  %7768 = vmatmul.mubr.msk.bf16.gmra.mrb[132].mxu0 %vm788_vm3, %v8331_v49  ;;  %8022 = vmatmul.mubr.msk.bf16.gmra.mrb[132].mxu1 %vm788_vm3, %v8332_v50  ;;  %v11390_v20 = vmax.f32 %v11388_v19, %v11389_v23  ;;  %v11391_v40 = vld [vmem:[#allocation4_spill] sm:$0xff] }
 0x32b   : > { %7771 = vmatprep.mubr.msk.bf16.mxu0 %vm8393_vm2, %v11175_v6  ;;  %8025 = vmatprep.mubr.msk.bf16.mxu1 %vm8393_vm2, %v11175_v6 }
 0x32c   : > { %v6737_v55 = vpack.c.bf16 %v5284_v57, %v5284_v57  ;;  %v5285_v5 = vadd.f32 %v9943_v1, %v5156_v24  ;;  %v11392_v24 = vld [vmem:[#allocation5_spill] sm:$0xff] }
 0x32d   : > { %v3355_v4 = vpop.f32.mrb[28].mxu0  ;;  %v4486_v51 = vpop.f32.mrb[28].mxu1 }
 0x32e   : > { %5895 = vst.msk [vmem:[%s9958_s28 + $0x48] sm:$0xf] %vm5876_vm4, %v6737_v55  ;;  %v6738_v31 = vpack.c.bf16 %v5285_v5, %v5285_v5  ;;  %v5035_v54 = vmax.f32 %v3355_v4, %v4486_v51  ;;  %v7665_v15 = vpop.f32.mrb[29].mxu0  ;;  %v7919_v34 = vpop.f32.mrb[29].mxu1  ;;  %v11393_v55 = vmax.f32 %v11391_v40, %v11392_v24 }
 0x32f   : > { %v3358_v37 = vpop.f32.mrb[30].mxu0  ;;  %v4489_v38 = vpop.f32.mrb[30].mxu1 }
 0x330   : > { %5896 = vst.msk [vmem:[%s9958_s28 + $0x4c] sm:$0xf] %vm5876_vm4, %v6738_v31  ;;  %v5157_v46 = vmax.f32 %v11384_v10, %v5035_v54  ;;  %v5036_v43 = vmax.f32 %v3358_v37, %v4489_v38  ;;  %v7666_v47 = vpop.f32.mrb[31].mxu0  ;;  %v7920_v44 = vpop.f32.mrb[31].mxu1  ;;  %v8339_v37 = vld [vmem:[%s9082_s19 + $0x140] sm:$0xff]  }
 0x331   : > { %v8340_v38 = vld [vmem:[%s9090_s23 + $0x140] sm:$0xff]   ;;  %v11395_v47 = vld [vmem:[#allocation7_spill] sm:$0xff] }
 0x332   : > { %v5286_v45 = vadd.f32 %v9943_v1, %v5157_v46  ;;  %v5158_v60 = vmax.f32 %v11385_v59, %v5036_v43  ;;  %7772 = vmatmul.mubr.msk.bf16.gmra.mrb[136].mxu0 %vm788_vm3, %v8333_v58  ;;  %8026 = vmatmul.mubr.msk.bf16.gmra.mrb[136].mxu1 %vm788_vm3, %v8334_v27  ;;  %v11394_v43 = vld [vmem:[#allocation6_spill] sm:$0xff] }
 0x333   : > { %7775 = vmatprep.mubr.msk.bf16.mxu0 %vm8393_vm2, %v11175_v6  ;;  %8029 = vmatprep.mubr.msk.bf16.mxu1 %vm8393_vm2, %v11175_v6  ;;  %v11396_v44 = vmax.f32 %v11394_v43, %v11395_v47 }
 0x334   : > { %v6739_v28 = vpack.c.bf16 %v5286_v45, %v5286_v45  ;;  %v5287_v29 = vadd.f32 %v9943_v1, %v5158_v60 }
 0x335   : > { %v3363_v61 = vpop.f32.mrb[32].mxu0  ;;  %v4494_v62 = vpop.f32.mrb[32].mxu1 }
 0x336   : > { %5897 = vst.msk [vmem:[%s9958_s28 + $0x50] sm:$0xf] %vm5876_vm4, %v6739_v28  ;;  %v6740_v48 = vpack.c.bf16 %v5287_v29, %v5287_v29  ;;  %v5037_v30 = vmax.f32 %v3363_v61, %v4494_v62  ;;  %v7669_v16 = vpop.f32.mrb[33].mxu0  ;;  %v7923_v3 = vpop.f32.mrb[33].mxu1  ;;  %v11397_v61 = vld [vmem:[#allocation8_spill] sm:$0xff]  ;;  %v11398_v62 = vld [vmem:[#allocation9_spill] sm:$0xff] }
 0x337   : > { %v3366_v39 = vpop.f32.mrb[34].mxu0  ;;  %v4497_v22 = vpop.f32.mrb[34].mxu1 }
 0x338   : > { %5898 = vst.msk [vmem:[%s9958_s28 + $0x54] sm:$0xf] %vm5876_vm4, %v6740_v48  ;;  %v5159_v26 = vmax.f32 %v11386_v25, %v5037_v30  ;;  %v5038_v0 = vmax.f32 %v3366_v39, %v4497_v22  ;;  %v7670_v2 = vpop.f32.mrb[35].mxu0  ;;  %v7924_v32 = vpop.f32.mrb[35].mxu1  ;;  %v11399_v48 = vmax.f32 %v11397_v61, %v11398_v62 }
 0x339   : > { %v8342_v2 = vld [vmem:[%s9090_s23 + $0x148] sm:$0xff]  }
 0x33a   : > { %v5288_v33 = vadd.f32 %v9943_v1, %v5159_v26  ;;  %v5160_v17 = vmax.f32 %v11387_v7, %v5038_v0  ;;  %7776 = vmatmul.mubr.msk.bf16.gmra.mrb[140].mxu0 %vm788_vm3, %v8335_v11  ;;  %8030 = vmatmul.mubr.msk.bf16.gmra.mrb[140].mxu1 %vm788_vm3, %v8336_v12  ;;  %v8341_v0 = vld [vmem:[%s9082_s19 + $0x148] sm:$0xff]   ;;  %v11400_v7 = vld [vmem:[#allocation10_spill] sm:$0xff] }
 0x33b   : > { %7779 = vmatprep.mubr.msk.bf16.mxu0 %vm8393_vm2, %v11175_v6  ;;  %8033 = vmatprep.mubr.msk.bf16.mxu1 %vm8393_vm2, %v11175_v6 }
 0x33c   : > { %v6741_v52 = vpack.c.bf16 %v5288_v33, %v5288_v33  ;;  %v5289_v18 = vadd.f32 %v9943_v1, %v5160_v17  ;;  %v11401_v17 = vld [vmem:[#allocation11_spill] sm:$0xff] }
 0x33d   : > { %v3371_v13 = vpop.f32.mrb[36].mxu0  ;;  %v4502_v14 = vpop.f32.mrb[36].mxu1 }
 0x33e   : > { %5899 = vst.msk [vmem:[%s9958_s28 + $0x58] sm:$0xf] %vm5876_vm4, %v6741_v52  ;;  %v6742_v63 = vpack.c.bf16 %v5289_v18, %v5289_v18  ;;  %v5039_v53 = vmax.f32 %v3371_v13, %v4502_v14  ;;  %v7673_v41 = vpop.f32.mrb[37].mxu0  ;;  %v7927_v42 = vpop.f32.mrb[37].mxu1  ;;  %v11402_v52 = vmax.f32 %v11400_v7, %v11401_v17 }
 0x33f   : > { %v3374_v49 = vpop.f32.mrb[38].mxu0  ;;  %v4505_v50 = vpop.f32.mrb[38].mxu1  ;;  %v11403_v41 = vld [vmem:[#allocation12_spill] sm:$0xff]  ;;  %v11404_v42 = vld [vmem:[#allocation13_spill] sm:$0xff] }
 0x340   : > { %5900 = vst.msk [vmem:[%s9958_s28 + $0x5c] sm:$0xf] %vm5876_vm4, %v6742_v63  ;;  %v5161_v21 = vmax.f32 %v11390_v20, %v5039_v53  ;;  %v5040_v35 = vmax.f32 %v3374_v49, %v4505_v50  ;;  %v7674_v36 = vpop.f32.mrb[39].mxu0  ;;  %v7928_v56 = vpop.f32.mrb[39].mxu1 }
 0x341   : > { %v8343_v56 = vld [vmem:[%s9082_s19 + $0x150] sm:$0xff]  }
 0x342   : > { %v5290_v57 = vadd.f32 %v9943_v1, %v5161_v21  ;;  %v5162_v5 = vmax.f32 %v11393_v55, %v5040_v35  ;;  %7780 = vmatmul.mubr.msk.bf16.gmra.mrb[144].mxu0 %vm788_vm3, %v8337_v8  ;;  %8034 = vmatmul.mubr.msk.bf16.gmra.mrb[144].mxu1 %vm788_vm3, %v8338_v9  ;;  %v11405_v8 = vmax.f32 %v11403_v41, %v11404_v42  ;;  %v11406_v55 = vld [vmem:[#allocation14_spill] sm:$0xff] }
 0x343   : > { %7783 = vmatprep.mubr.msk.bf16.mxu0 %vm8393_vm2, %v11175_v6  ;;  %8037 = vmatprep.mubr.msk.bf16.mxu1 %vm8393_vm2, %v11175_v6 }
 0x344   : > { %v6743_v4 = vpack.c.bf16 %v5290_v57, %v5290_v57  ;;  %v5291_v51 = vadd.f32 %v9943_v1, %v5162_v5  ;;  %v8344_v57 = vld [vmem:[%s9090_s23 + $0x150] sm:$0xff]   ;;  %v11407_v5 = vld [vmem:[#allocation15_spill] sm:$0xff] }
 0x345   : > { %v3379_v31 = vpop.f32.mrb[40].mxu0  ;;  %v4510_v54 = vpop.f32.mrb[40].mxu1 }
 0x346   : > { %5901 = vst.msk [vmem:[%s9958_s28 + $0x60] sm:$0xf] %vm5876_vm4, %v6743_v4  ;;  %v6744_v15 = vpack.c.bf16 %v5291_v51, %v5291_v51  ;;  %v5041_v34 = vmax.f32 %v3379_v31, %v4510_v54  ;;  %v7677_v58 = vpop.f32.mrb[41].mxu0  ;;  %v7931_v27 = vpop.f32.mrb[41].mxu1  ;;  %v11408_v4 = vmax.f32 %v11406_v55, %v11407_v5 }
 0x347   : > { %v3382_v10 = vpop.f32.mrb[42].mxu0  ;;  %v4513_v46 = vpop.f32.mrb[42].mxu1  ;;  %v11409_v58 = vld [vmem:[#allocation16_spill] sm:$0xff]  ;;  %v11410_v27 = vld [vmem:[#allocation17_spill] sm:$0xff] }
 0x348   : > { %5902 = vst.msk [vmem:[%s9958_s28 + $0x64] sm:$0xf] %vm5876_vm4, %v6744_v15  ;;  %v5163_v45 = vmax.f32 %v11396_v44, %v5041_v34  ;;  %v5042_v59 = vmax.f32 %v3382_v10, %v4513_v46  ;;  %v7678_v60 = vpop.f32.mrb[43].mxu0  ;;  %v7932_v28 = vpop.f32.mrb[43].mxu1 }
 0x349   : > { %v8345_v28 = vld [vmem:[%s9082_s19 + $0x158] sm:$0xff]  }
 0x34a   : > { %v5292_v29 = vadd.f32 %v9943_v1, %v5163_v45  ;;  %v5164_v30 = vmax.f32 %v11399_v48, %v5042_v59  ;;  %7784 = vmatmul.mubr.msk.bf16.gmra.mrb[148].mxu0 %vm788_vm3, %v8339_v37  ;;  %8038 = vmatmul.mubr.msk.bf16.gmra.mrb[148].mxu1 %vm788_vm3, %v8340_v38  ;;  %v11411_v37 = vmax.f32 %v11409_v58, %v11410_v27  ;;  %v11412_v48 = vld [vmem:[#allocation18_spill] sm:$0xff] }
 0x34b   : > { %7787 = vmatprep.mubr.msk.bf16.mxu0 %vm8393_vm2, %v11175_v6  ;;  %8041 = vmatprep.mubr.msk.bf16.mxu1 %vm8393_vm2, %v11175_v6 }
 0x34c   : > { %v6745_v16 = vpack.c.bf16 %v5292_v29, %v5292_v29  ;;  %v5293_v3 = vadd.f32 %v9943_v1, %v5164_v30  ;;  %v8346_v29 = vld [vmem:[%s9090_s23 + $0x158] sm:$0xff]   ;;  %v11413_v30 = vld [vmem:[#allocation19_spill] sm:$0xff] }
 0x34d   : > { %v3387_v11 = vpop.f32.mrb[44].mxu0  ;;  %v4518_v12 = vpop.f32.mrb[44].mxu1 }
 0x34e   : > { %5903 = vst.msk [vmem:[%s9958_s28 + $0x68] sm:$0xf] %vm5876_vm4, %v6745_v16  ;;  %v6746_v39 = vpack.c.bf16 %v5293_v3, %v5293_v3  ;;  %v5043_v22 = vmax.f32 %v3387_v11, %v4518_v12  ;;  %v7681_v25 = vpop.f32.mrb[45].mxu0  ;;  %v7935_v26 = vpop.f32.mrb[45].mxu1  ;;  %v11414_v16 = vmax.f32 %v11412_v48, %v11413_v30 }
 0x34f   : > { %v3390_v32 = vpop.f32.mrb[46].mxu0  ;;  %v4521_v33 = vpop.f32.mrb[46].mxu1  ;;  %v11415_v25 = vld [vmem:[#allocation20_spill] sm:$0xff]  ;;  %v11416_v26 = vld [vmem:[#allocation21_spill] sm:$0xff] }
 0x350   : > { %5904 = vst.msk [vmem:[%s9958_s28 + $0x6c] sm:$0xf] %vm5876_vm4, %v6746_v39  ;;  %v5165_v18 = vmax.f32 %v11402_v52, %v5043_v22  ;;  %v5044_v13 = vmax.f32 %v3390_v32, %v4521_v33  ;;  %v7682_v14 = vpop.f32.mrb[47].mxu0  ;;  %v7936_v63 = vpop.f32.mrb[47].mxu1 }
 0x351   : > { %v8347_v63 = vld [vmem:[%s9082_s19 + $0x160] sm:$0xff]  }
 0x352   : > { %v5294_v53 = vadd.f32 %v9943_v1, %v5165_v18  ;;  %v5166_v9 = vmax.f32 %v11405_v8, %v5044_v13  ;;  %7788 = vmatmul.mubr.msk.bf16.gmra.mrb[152].mxu0 %vm788_vm3, %v8341_v0  ;;  %8042 = vmatmul.mubr.msk.bf16.gmra.mrb[152].mxu1 %vm788_vm3, %v8342_v2  ;;  %v11417_v0 = vmax.f32 %v11415_v25, %v11416_v26  ;;  %v11418_v8 = vld [vmem:[#allocation22_spill] sm:$0xff] }
 0x353   : > { %7791 = vmatprep.mubr.msk.bf16.mxu0 %vm8393_vm2, %v11175_v6  ;;  %8045 = vmatprep.mubr.msk.bf16.mxu1 %vm8393_vm2, %v11175_v6 }
 0x354   : > { %v6747_v49 = vpack.c.bf16 %v5294_v53, %v5294_v53  ;;  %v5295_v50 = vadd.f32 %v9943_v1, %v5166_v9  ;;  %v8348_v53 = vld [vmem:[%s9090_s23 + $0x160] sm:$0xff]   ;;  %v11419_v9 = vld [vmem:[#allocation23_spill] sm:$0xff] }
 0x355   : > { %v3395_v19 = vpop.f32.mrb[48].mxu0  ;;  %v4526_v23 = vpop.f32.mrb[48].mxu1 }
 0x356   : > { %5905 = vst.msk [vmem:[%s9958_s28 + $0x70] sm:$0xf] %vm5876_vm4, %v6747_v49  ;;  %v6748_v20 = vpack.c.bf16 %v5295_v50, %v5295_v50  ;;  %v5045_v21 = vmax.f32 %v3395_v19, %v4526_v23  ;;  %v7685_v35 = vpop.f32.mrb[49].mxu0  ;;  %v7939_v36 = vpop.f32.mrb[49].mxu1  ;;  %v11420_v49 = vmax.f32 %v11418_v8, %v11419_v9 }
 0x357   : > { %v3398_v40 = vpop.f32.mrb[50].mxu0  ;;  %v4529_v24 = vpop.f32.mrb[50].mxu1  ;;  %v11421_v35 = vld [vmem:[#allocation24_spill] sm:$0xff]  ;;  %v11422_v36 = vld [vmem:[#allocation25_spill] sm:$0xff] }
 0x358   : > { %5906 = vst.msk [vmem:[%s9958_s28 + $0x74] sm:$0xf] %vm5876_vm4, %v6748_v20  ;;  %v5167_v51 = vmax.f32 %v11408_v4, %v5045_v21  ;;  %v5046_v31 = vmax.f32 %v3398_v40, %v4529_v24  ;;  %v7686_v54 = vpop.f32.mrb[51].mxu0  ;;  %v7940_v15 = vpop.f32.mrb[51].mxu1 }
 0x359   : > { %v8349_v15 = vld [vmem:[%s9082_s19 + $0x168] sm:$0xff]  }
 0x35a   : > { %v5296_v34 = vadd.f32 %v9943_v1, %v5167_v51  ;;  %v5168_v38 = vmax.f32 %v11411_v37, %v5046_v31  ;;  %7792 = vmatmul.mubr.msk.bf16.gmra.mrb[156].mxu0 %vm788_vm3, %v8343_v56  ;;  %8046 = vmatmul.mubr.msk.bf16.gmra.mrb[156].mxu1 %vm788_vm3, %v8344_v57  ;;  %v11423_v56 = vmax.f32 %v11421_v35, %v11422_v36  ;;  %v11424_v37 = vld [vmem:[#allocation26_spill] sm:$0xff] }
 0x35b   : > { %7795 = vmatprep.mubr.msk.bf16.mxu0 %vm8393_vm2, %v11175_v6  ;;  %8049 = vmatprep.mubr.msk.bf16.mxu1 %vm8393_vm2, %v11175_v6 }
 0x35c   : > { %v6749_v10 = vpack.c.bf16 %v5296_v34, %v5296_v34  ;;  %v5297_v46 = vadd.f32 %v9943_v1, %v5168_v38  ;;  %v8350_v34 = vld [vmem:[%s9090_s23 + $0x168] sm:$0xff]  }
 0x35d   : > { %v3403_v43 = vpop.f32.mrb[52].mxu0  ;;  %v4534_v47 = vpop.f32.mrb[52].mxu1  ;;  %v11425_v38 = vld [vmem:[#allocation27_spill] sm:$0xff] }
 0x35e   : > { %5907 = vst.msk [vmem:[%s9958_s28 + $0x78] sm:$0xf] %vm5876_vm4, %v6749_v10  ;;  %v6750_v44 = vpack.c.bf16 %v5297_v46, %v5297_v46  ;;  %v5047_v45 = vmax.f32 %v3403_v43, %v4534_v47  ;;  %v7689_v59 = vpop.f32.mrb[53].mxu0  ;;  %v7943_v60 = vpop.f32.mrb[53].mxu1  ;;  %v11426_v10 = vmax.f32 %v11424_v37, %v11425_v38 }
 0x35f   : > { %v3406_v61 = vpop.f32.mrb[54].mxu0  ;;  %v4537_v62 = vpop.f32.mrb[54].mxu1  ;;  %v11427_v59 = vld [vmem:[#allocation28_spill] sm:$0xff]  ;;  %v11428_v60 = vld [vmem:[#allocation29_spill] sm:$0xff] }
 0x360   : > { %5908 = vst.msk [vmem:[%s9958_s28 + $0x7c] sm:$0xf] %vm5876_vm4, %v6750_v44  ;;  %v5169_v3 = vmax.f32 %v11414_v16, %v5047_v45  ;;  %v5048_v11 = vmax.f32 %v3406_v61, %v4537_v62  ;;  %v7690_v12 = vpop.f32.mrb[55].mxu0  ;;  %v7944_v39 = vpop.f32.mrb[55].mxu1 }
 0x361   : > { %v8351_v39 = vld [vmem:[%s9082_s19 + $0x170] sm:$0xff]  }
 0x362   : > { %v5298_v22 = vadd.f32 %v9943_v1, %v5169_v3  ;;  %v5170_v2 = vmax.f32 %v11417_v0, %v5048_v11  ;;  %7796 = vmatmul.mubr.msk.bf16.gmra.mrb[160].mxu0 %vm788_vm3, %v8345_v28  ;;  %8050 = vmatmul.mubr.msk.bf16.gmra.mrb[160].mxu1 %vm788_vm3, %v8346_v29  ;;  %v11429_v28 = vmax.f32 %v11427_v59, %v11428_v60  ;;  %v11430_v0 = vld [vmem:[#allocation30_spill] sm:$0xff] }
 0x363   : > { %7799 = vmatprep.mubr.msk.bf16.mxu0 %vm8393_vm2, %v11175_v6  ;;  %8053 = vmatprep.mubr.msk.bf16.mxu1 %vm8393_vm2, %v11175_v6 }
 0x364   : > { %v6751_v32 = vpack.c.bf16 %v5298_v22, %v5298_v22  ;;  %v5299_v33 = vadd.f32 %v9943_v1, %v5170_v2  ;;  %v8352_v22 = vld [vmem:[%s9090_s23 + $0x170] sm:$0xff]   ;;  %v11431_v2 = vld [vmem:[#allocation31_spill] sm:$0xff] }
 0x365   : > { %v3411_v7 = vpop.f32.mrb[56].mxu0  ;;  %v4542_v17 = vpop.f32.mrb[56].mxu1 }
 0x366   : > { %5909 = vst.msk [vmem:[%s9958_s28 + $0x80] sm:$0xf] %vm5876_vm4, %v6751_v32  ;;  %v6752_v52 = vpack.c.bf16 %v5299_v33, %v5299_v33  ;;  %v5049_v18 = vmax.f32 %v3411_v7, %v4542_v17  ;;  %v7693_v13 = vpop.f32.mrb[57].mxu0  ;;  %v7947_v14 = vpop.f32.mrb[57].mxu1  ;;  %v11432_v32 = vmax.f32 %v11430_v0, %v11431_v2 }
 0x367   : > { %v3414_v41 = vpop.f32.mrb[58].mxu0  ;;  %v4545_v42 = vpop.f32.mrb[58].mxu1  ;;  %v11433_v13 = vld [vmem:[#allocation32_spill] sm:$0xff]  ;;  %v11434_v14 = vld [vmem:[#allocation33_spill] sm:$0xff] }
 0x368   : > { %5910 = vst.msk [vmem:[%s9958_s28 + $0x84] sm:$0xf] %vm5876_vm4, %v6752_v52  ;;  %v5171_v50 = vmax.f32 %v11420_v49, %v5049_v18  ;;  %v5050_v19 = vmax.f32 %v3414_v41, %v4545_v42  ;;  %v7694_v23 = vpop.f32.mrb[59].mxu0  ;;  %v7948_v20 = vpop.f32.mrb[59].mxu1 }
 0x369   : > { %v8353_v20 = vld [vmem:[%s9082_s19 + $0x178] sm:$0xff]  }
 0x36a   : > { %v5300_v21 = vadd.f32 %v9943_v1, %v5171_v50  ;;  %v5172_v57 = vmax.f32 %v11423_v56, %v5050_v19  ;;  %7800 = vmatmul.mubr.msk.bf16.gmra.mrb[164].mxu0 %vm788_vm3, %v8347_v63  ;;  %8054 = vmatmul.mubr.msk.bf16.gmra.mrb[164].mxu1 %vm788_vm3, %v8348_v53  ;;  %v11435_v63 = vmax.f32 %v11433_v13, %v11434_v14  ;;  %v11436_v56 = vld [vmem:[#allocation34_spill] sm:$0xff] }
 0x36b   : > { %7803 = vmatprep.mubr.msk.bf16.mxu0 %vm8393_vm2, %v11175_v6  ;;  %8057 = vmatprep.mubr.msk.bf16.mxu1 %vm8393_vm2, %v11175_v6 }
 0x36c   : > { %v6753_v40 = vpack.c.bf16 %v5300_v21, %v5300_v21  ;;  %v5301_v24 = vadd.f32 %v9943_v1, %v5172_v57  ;;  %v8354_v21 = vld [vmem:[%s9090_s23 + $0x178] sm:$0xff]   ;;  %v11437_v57 = vld [vmem:[#allocation35_spill] sm:$0xff] }
 0x36d   : > { %v3419_v55 = vpop.f32.mrb[60].mxu0  ;;  %v4550_v5 = vpop.f32.mrb[60].mxu1 }
 0x36e   : > { %5911 = vst.msk [vmem:[%s9958_s28 + $0x88] sm:$0xf] %vm5876_vm4, %v6753_v40  ;;  %v6754_v4 = vpack.c.bf16 %v5301_v24, %v5301_v24  ;;  %v5051_v51 = vmax.f32 %v3419_v55, %v4550_v5  ;;  %v7697_v31 = vpop.f32.mrb[61].mxu0  ;;  %v7951_v54 = vpop.f32.mrb[61].mxu1  ;;  %v11438_v40 = vmax.f32 %v11436_v56, %v11437_v57 }
 0x36f   : > { %v3422_v58 = vpop.f32.mrb[62].mxu0  ;;  %v4553_v27 = vpop.f32.mrb[62].mxu1  ;;  %v11439_v31 = vld [vmem:[#allocation36_spill] sm:$0xff]  ;;  %v11440_v54 = vld [vmem:[#allocation37_spill] sm:$0xff] }
 0x370   : > { %5912 = vst.msk [vmem:[%s9958_s28 + $0x8c] sm:$0xf] %vm5876_vm4, %v6754_v4  ;;  %v5173_v46 = vmax.f32 %v11426_v10, %v5051_v51  ;;  %v5052_v43 = vmax.f32 %v3422_v58, %v4553_v27  ;;  %v7698_v47 = vpop.f32.mrb[63].mxu0  ;;  %v7952_v44 = vpop.f32.mrb[63].mxu1 }
 0x371   : > { %v8355_v44 = vld [vmem:[%s9082_s19 + $0x180] sm:$0xff]  }
 0x372   : > { %v5302_v45 = vadd.f32 %v9943_v1, %v5173_v46  ;;  %v5174_v29 = vmax.f32 %v11429_v28, %v5052_v43  ;;  %7804 = vmatmul.mubr.msk.bf16.gmra.mrb[168].mxu0 %vm788_vm3, %v8349_v15  ;;  %8058 = vmatmul.mubr.msk.bf16.gmra.mrb[168].mxu1 %vm788_vm3, %v8350_v34  ;;  %v11441_v15 = vmax.f32 %v11439_v31, %v11440_v54  ;;  %v11442_v28 = vld [vmem:[#allocation38_spill] sm:$0xff] }
 0x373   : > { %7807 = vmatprep.mubr.msk.bf16.mxu0 %vm8393_vm2, %v11175_v6  ;;  %8061 = vmatprep.mubr.msk.bf16.mxu1 %vm8393_vm2, %v11175_v6 }
 0x374   : > { %v6755_v61 = vpack.c.bf16 %v5302_v45, %v5302_v45  ;;  %v5303_v62 = vadd.f32 %v9943_v1, %v5174_v29  ;;  %v8356_v45 = vld [vmem:[%s9090_s23 + $0x180] sm:$0xff]   ;;  %v11443_v29 = vld [vmem:[#allocation39_spill] sm:$0xff] }
 0x375   : > { %v3427_v48 = vpop.f32.mrb[64].mxu0  ;;  %v4558_v30 = vpop.f32.mrb[64].mxu1 }
 0x376   : > { %5913 = vst.msk [vmem:[%s9958_s28 + $0x90] sm:$0xf] %vm5876_vm4, %v6755_v61  ;;  %v6756_v16 = vpack.c.bf16 %v5303_v62, %v5303_v62  ;;  %v5053_v3 = vmax.f32 %v3427_v48, %v4558_v30  ;;  %v7701_v11 = vpop.f32.mrb[65].mxu0  ;;  %v7955_v12 = vpop.f32.mrb[65].mxu1  ;;  %v11444_v61 = vmax.f32 %v11442_v28, %v11443_v29 }
 0x377   : > { %v3430_v25 = vpop.f32.mrb[66].mxu0  ;;  %v4561_v26 = vpop.f32.mrb[66].mxu1  ;;  %v11445_v11 = vld [vmem:[#allocation40_spill] sm:$0xff]  ;;  %v11446_v12 = vld [vmem:[#allocation41_spill] sm:$0xff] }
 0x378   : > { %5914 = vst.msk [vmem:[%s9958_s28 + $0x94] sm:$0xf] %vm5876_vm4, %v6756_v16  ;;  %v5175_v33 = vmax.f32 %v11432_v32, %v5053_v3  ;;  %v5054_v7 = vmax.f32 %v3430_v25, %v4561_v26  ;;  %v7702_v17 = vpop.f32.mrb[67].mxu0  ;;  %v7956_v52 = vpop.f32.mrb[67].mxu1  ;;  %v10377_v16 = vld [vmem:[%s10967_s5] ss:$0 sm:$0xff] }
 0x379   : > { %v8357_v52 = vld [vmem:[%s9082_s19 + $0x188] sm:$0xff]  }
 0x37a   : > { %v5304_v18 = vadd.f32 %v9943_v1, %v5175_v33  ;;  %v5176_v53 = vmax.f32 %v11435_v63, %v5054_v7  ;;  %7808 = vmatmul.mubr.msk.bf16.gmra.mrb[172].mxu0 %vm788_vm3, %v8351_v39  ;;  %8062 = vmatmul.mubr.msk.bf16.gmra.mrb[172].mxu1 %vm788_vm3, %v8352_v22  ;;  %v11447_v39 = vmax.f32 %v11445_v11, %v11446_v12  ;;  %v11448_v63 = vld [vmem:[#allocation42_spill] sm:$0xff] }
 0x37b   : > { %7811 = vmatprep.mubr.msk.bf16.mxu0 %vm8393_vm2, %v11175_v6  ;;  %8065 = vmatprep.mubr.msk.bf16.mxu1 %vm8393_vm2, %v11175_v6 }
 0x37c   : > { %v6757_v41 = vpack.c.bf16 %v5304_v18, %v5304_v18  ;;  %v5305_v42 = vadd.f32 %v9943_v1, %v5176_v53  ;;  %v8358_v18 = vld [vmem:[%s9090_s23 + $0x188] sm:$0xff]  }
 0x37d   : > { %v3435_v8 = vpop.f32.mrb[68].mxu0  ;;  %v4566_v9 = vpop.f32.mrb[68].mxu1  ;;  %v11449_v53 = vld [vmem:[#allocation43_spill] sm:$0xff] }
 0x37e   : > { %5915 = vst.msk [vmem:[%s9958_s28 + $0x98] sm:$0xf] %vm5876_vm4, %v6757_v41  ;;  %v6758_v49 = vpack.c.bf16 %v5305_v42, %v5305_v42  ;;  %v5055_v50 = vmax.f32 %v3435_v8, %v4566_v9  ;;  %v7705_v19 = vpop.f32.mrb[69].mxu0  ;;  %v7959_v23 = vpop.f32.mrb[69].mxu1  ;;  %v11450_v41 = vmax.f32 %v11448_v63, %v11449_v53 }
 0x37f   : > { %v3438_v35 = vpop.f32.mrb[70].mxu0  ;;  %v4569_v36 = vpop.f32.mrb[70].mxu1  ;;  %v11451_v19 = vld [vmem:[#allocation44_spill] sm:$0xff]  ;;  %v11452_v23 = vld [vmem:[#allocation45_spill] sm:$0xff] }
 0x380   : > { %5916 = vst.msk [vmem:[%s9958_s28 + $0x9c] sm:$0xf] %vm5876_vm4, %v6758_v49  ;;  %v5177_v24 = vmax.f32 %v11438_v40, %v5055_v50  ;;  %v5056_v55 = vmax.f32 %v3438_v35, %v4569_v36  ;;  %v7706_v5 = vpop.f32.mrb[71].mxu0  ;;  %v7960_v4 = vpop.f32.mrb[71].mxu1 }
 0x381   : > { %v8359_v4 = vld [vmem:[%s9082_s19 + $0x190] sm:$0xff]  }
 0x382   : > { %v5306_v51 = vadd.f32 %v9943_v1, %v5177_v24  ;;  %v5178_v34 = vmax.f32 %v11441_v15, %v5056_v55  ;;  %7812 = vmatmul.mubr.msk.bf16.gmra.mrb[176].mxu0 %vm788_vm3, %v8353_v20  ;;  %8066 = vmatmul.mubr.msk.bf16.gmra.mrb[176].mxu1 %vm788_vm3, %v8354_v21  ;;  %v11453_v20 = vmax.f32 %v11451_v19, %v11452_v23  ;;  %v11454_v15 = vld [vmem:[#allocation46_spill] sm:$0xff] }
 0x383   : > { %7815 = vmatprep.mubr.msk.bf16.mxu0 %vm8393_vm2, %v11175_v6  ;;  %8069 = vmatprep.mubr.msk.bf16.mxu1 %vm8393_vm2, %v11175_v6 }
 0x384   : > { %v6759_v58 = vpack.c.bf16 %v5306_v51, %v5306_v51  ;;  %v5307_v27 = vadd.f32 %v9943_v1, %v5178_v34  ;;  %v8360_v51 = vld [vmem:[%s9090_s23 + $0x190] sm:$0xff]   ;;  %v11455_v34 = vld [vmem:[#allocation47_spill] sm:$0xff] }
 0x385   : > { %v3443_v37 = vpop.f32.mrb[72].mxu0  ;;  %v4574_v38 = vpop.f32.mrb[72].mxu1 }
 0x386   : > { %5917 = vst.msk [vmem:[%s9958_s28 + $0xa0] sm:$0xf] %vm5876_vm4, %v6759_v58  ;;  %v6760_v10 = vpack.c.bf16 %v5307_v27, %v5307_v27  ;;  %v5057_v46 = vmax.f32 %v3443_v37, %v4574_v38  ;;  %v7709_v43 = vpop.f32.mrb[73].mxu0  ;;  %v7963_v47 = vpop.f32.mrb[73].mxu1  ;;  %v11456_v58 = vmax.f32 %v11454_v15, %v11455_v34 }
 0x387   : > { %v3446_v59 = vpop.f32.mrb[74].mxu0  ;;  %v4577_v60 = vpop.f32.mrb[74].mxu1  ;;  %v11457_v43 = vld [vmem:[#allocation48_spill] sm:$0xff]  ;;  %v11458_v47 = vld [vmem:[#allocation49_spill] sm:$0xff] }
 0x388   : > { %5918 = vst.msk [vmem:[%s9958_s28 + $0xa4] sm:$0xf] %vm5876_vm4, %v6760_v10  ;;  %v5179_v62 = vmax.f32 %v11444_v61, %v5057_v46  ;;  %v5058_v1 = vmax.f32 %v3446_v59, %v4577_v60  ;;  %v7710_v48 = vpop.f32.mrb[75].mxu0  ;;  %v7964_v30 = vpop.f32.mrb[75].mxu1 }
 0x389   : > { %v8361_v30 = vld [vmem:[%s9082_s19 + $0x198] sm:$0xff]  }
 0x38a   : > { %v5308_v3 = vadd.f32 %v10377_v16, %v5179_v62  ;;  %v5180_v22 = vmax.f32 %v11447_v39, %v5058_v1  ;;  %7816 = vmatmul.mubr.msk.bf16.gmra.mrb[180].mxu0 %vm788_vm3, %v8355_v44  ;;  %8070 = vmatmul.mubr.msk.bf16.gmra.mrb[180].mxu1 %vm788_vm3, %v8356_v45  ;;  %v11459_v44 = vmax.f32 %v11457_v43, %v11458_v47  ;;  %v11460_v39 = vld [vmem:[#allocation50_spill] sm:$0xff] }
 0x38b   : > { %7819 = vmatprep.mubr.msk.bf16.mxu0 %vm8393_vm2, %v11175_v6  ;;  %8073 = vmatprep.mubr.msk.bf16.mxu1 %vm8393_vm2, %v11175_v6 }
 0x38c   : > { %v6761_v25 = vpack.c.bf16 %v5308_v3, %v5308_v3  ;;  %v5309_v26 = vadd.f32 %v10377_v16, %v5180_v22  ;;  %v8362_v3 = vld [vmem:[%s9090_s23 + $0x198] sm:$0xff]   ;;  %v11461_v22 = vld [vmem:[#allocation51_spill] sm:$0xff] }
 0x38d   : > { %v3451_v0 = vpop.f32.mrb[76].mxu0  ;;  %v4582_v2 = vpop.f32.mrb[76].mxu1 }
 0x38e   : > { %5919 = vst.msk [vmem:[%s9958_s28 + $0xa8] sm:$0xf] %vm5876_vm4, %v6761_v25  ;;  %v6762_v32 = vpack.c.bf16 %v5309_v26, %v5309_v26  ;;  %v5059_v33 = vmax.f32 %v3451_v0, %v4582_v2  ;;  %v7713_v7 = vpop.f32.mrb[77].mxu0  ;;  %v7967_v17 = vpop.f32.mrb[77].mxu1  ;;  %v11462_v25 = vmax.f32 %v11460_v39, %v11461_v22 }
 0x38f   : > { %v3454_v13 = vpop.f32.mrb[78].mxu0  ;;  %v4585_v14 = vpop.f32.mrb[78].mxu1  ;;  %v11463_v7 = vld [vmem:[#allocation52_spill] sm:$0xff]  ;;  %v11464_v17 = vld [vmem:[#allocation53_spill] sm:$0xff] }
 0x390   : > { %5920 = vst.msk [vmem:[%s9958_s28 + $0xac] sm:$0xf] %vm5876_vm4, %v6762_v32  ;;  %v5181_v42 = vmax.f32 %v11450_v41, %v5059_v33  ;;  %v5060_v8 = vmax.f32 %v3454_v13, %v4585_v14  ;;  %v7714_v9 = vpop.f32.mrb[79].mxu0  ;;  %v7968_v49 = vpop.f32.mrb[79].mxu1 }
 0x391   : > { %v8363_v49 = vld [vmem:[%s9082_s19 + $0x1a0] sm:$0xff]  }
 0x392   : > { %v5310_v50 = vadd.f32 %v10377_v16, %v5181_v42  ;;  %v5182_v21 = vmax.f32 %v11453_v20, %v5060_v8  ;;  %7820 = vmatmul.mubr.msk.bf16.gmra.mrb[184].mxu0 %vm788_vm3, %v8357_v52  ;;  %8074 = vmatmul.mubr.msk.bf16.gmra.mrb[184].mxu1 %vm788_vm3, %v8358_v18  ;;  %v11465_v52 = vmax.f32 %v11463_v7, %v11464_v17  ;;  %v11466_v20 = vld [vmem:[#allocation54_spill] sm:$0xff] }
 0x393   : > { %7823 = vmatprep.mubr.msk.bf16.mxu0 %vm8393_vm2, %v11175_v6  ;;  %8077 = vmatprep.mubr.msk.bf16.mxu1 %vm8393_vm2, %v11175_v6 }
 0x394   : > { %v6763_v35 = vpack.c.bf16 %v5310_v50, %v5310_v50  ;;  %v5311_v36 = vadd.f32 %v10377_v16, %v5182_v21  ;;  %v8364_v50 = vld [vmem:[%s9090_s23 + $0x1a0] sm:$0xff]   ;;  %v11467_v21 = vld [vmem:[#allocation55_spill] sm:$0xff] }
 0x395   : > { %v3459_v56 = vpop.f32.mrb[80].mxu0  ;;  %v4590_v57 = vpop.f32.mrb[80].mxu1 }
 0x396   : > { %5921 = vst.msk [vmem:[%s9958_s28 + $0xb0] sm:$0xf] %vm5876_vm4, %v6763_v35  ;;  %v6764_v40 = vpack.c.bf16 %v5311_v36, %v5311_v36  ;;  %v5061_v24 = vmax.f32 %v3459_v56, %v4590_v57  ;;  %v7717_v55 = vpop.f32.mrb[81].mxu0  ;;  %v7971_v5 = vpop.f32.mrb[81].mxu1  ;;  %v11468_v35 = vmax.f32 %v11466_v20, %v11467_v21 }
 0x397   : > { %v3462_v31 = vpop.f32.mrb[82].mxu0  ;;  %v4593_v54 = vpop.f32.mrb[82].mxu1  ;;  %v11469_v55 = vld [vmem:[#allocation56_spill] sm:$0xff]  ;;  %v11470_v5 = vld [vmem:[#allocation57_spill] sm:$0xff] }
 0x398   : > { %5922 = vst.msk [vmem:[%s9958_s28 + $0xb4] sm:$0xf] %vm5876_vm4, %v6764_v40  ;;  %v5183_v27 = vmax.f32 %v11456_v58, %v5061_v24  ;;  %v5062_v37 = vmax.f32 %v3462_v31, %v4593_v54  ;;  %v7718_v38 = vpop.f32.mrb[83].mxu0  ;;  %v7972_v10 = vpop.f32.mrb[83].mxu1 }
 0x399   : > { %v8365_v10 = vld [vmem:[%s9082_s19 + $0x1a8] sm:$0xff]  }
 0x39a   : > { %v5312_v46 = vadd.f32 %v10377_v16, %v5183_v27  ;;  %v5184_v45 = vmax.f32 %v11459_v44, %v5062_v37  ;;  %7824 = vmatmul.mubr.msk.bf16.gmra.mrb[188].mxu0 %vm788_vm3, %v8359_v4  ;;  %8078 = vmatmul.mubr.msk.bf16.gmra.mrb[188].mxu1 %vm788_vm3, %v8360_v51  ;;  %v11471_v4 = vmax.f32 %v11469_v55, %v11470_v5  ;;  %v11472_v44 = vld [vmem:[#allocation58_spill] sm:$0xff] }
 0x39b   : > { %7827 = vmatprep.mubr.msk.bf16.mxu0 %vm8393_vm2, %v11175_v6  ;;  %8081 = vmatprep.mubr.msk.bf16.mxu1 %vm8393_vm2, %v11175_v6 }
 0x39c   : > { %v6765_v59 = vpack.c.bf16 %v5312_v46, %v5312_v46  ;;  %v5313_v60 = vadd.f32 %v10377_v16, %v5184_v45  ;;  %v8366_v46 = vld [vmem:[%s9090_s23 + $0x1a8] sm:$0xff]  }
 0x39d   : > { %v3467_v28 = vpop.f32.mrb[84].mxu0  ;;  %v4598_v29 = vpop.f32.mrb[84].mxu1  ;;  %v11473_v45 = vld [vmem:[#allocation59_spill] sm:$0xff] }
 0x39e   : > { %5923 = vst.msk [vmem:[%s9958_s28 + $0xb8] sm:$0xf] %vm5876_vm4, %v6765_v59  ;;  %v6766_v61 = vpack.c.bf16 %v5313_v60, %v5313_v60  ;;  %v5063_v62 = vmax.f32 %v3467_v28, %v4598_v29  ;;  %v7721_v1 = vpop.f32.mrb[85].mxu0  ;;  %v7975_v48 = vpop.f32.mrb[85].mxu1  ;;  %v11474_v59 = vmax.f32 %v11472_v44, %v11473_v45 }
 0x39f   : > { %v3470_v11 = vpop.f32.mrb[86].mxu0  ;;  %v4601_v12 = vpop.f32.mrb[86].mxu1  ;;  %v11475_v1 = vld [vmem:[#allocation60_spill] sm:$0xff]  ;;  %v11476_v48 = vld [vmem:[#allocation61_spill] sm:$0xff] }
 0x3a0   : > { %5924 = vst.msk [vmem:[%s9958_s28 + $0xbc] sm:$0xf] %vm5876_vm4, %v6766_v61  ;;  %v5185_v26 = vmax.f32 %v11462_v25, %v5063_v62  ;;  %v5064_v0 = vmax.f32 %v3470_v11, %v4601_v12  ;;  %v7722_v2 = vpop.f32.mrb[87].mxu0  ;;  %v7976_v32 = vpop.f32.mrb[87].mxu1 }
 0x3a1   : > { %v8367_v32 = vld [vmem:[%s9082_s19 + $0x1b0] sm:$0xff]  }
 0x3a2   : > { %v5314_v33 = vadd.f32 %v10377_v16, %v5185_v26  ;;  %v5186_v18 = vmax.f32 %v11465_v52, %v5064_v0  ;;  %7828 = vmatmul.mubr.msk.bf16.gmra.mrb[192].mxu0 %vm788_vm3, %v8361_v30  ;;  %8082 = vmatmul.mubr.msk.bf16.gmra.mrb[192].mxu1 %vm788_vm3, %v8362_v3  ;;  %v11477_v30 = vmax.f32 %v11475_v1, %v11476_v48  ;;  %v11478_v52 = vld [vmem:[#allocation62_spill] sm:$0xff] }
 0x3a3   : > { %7831 = vmatprep.mubr.msk.bf16.mxu0 %vm8393_vm2, %v11175_v6  ;;  %8085 = vmatprep.mubr.msk.bf16.mxu1 %vm8393_vm2, %v11175_v6 }
 0x3a4   : > { %v6767_v13 = vpack.c.bf16 %v5314_v33, %v5314_v33  ;;  %v5315_v14 = vadd.f32 %v10377_v16, %v5186_v18  ;;  %v8368_v33 = vld [vmem:[%s9090_s23 + $0x1b0] sm:$0xff]   ;;  %v11479_v18 = vld [vmem:[#allocation63_spill] sm:$0xff] }
 0x3a5   : > { %v3475_v63 = vpop.f32.mrb[88].mxu0  ;;  %v4606_v53 = vpop.f32.mrb[88].mxu1 }
 0x3a6   : > { %5925 = vst.msk [vmem:[%s9958_s28 + $0xc0] sm:$0xf] %vm5876_vm4, %v6767_v13  ;;  %v6768_v41 = vpack.c.bf16 %v5315_v14, %v5315_v14  ;;  %v5065_v42 = vmax.f32 %v3475_v63, %v4606_v53  ;;  %v7725_v8 = vpop.f32.mrb[89].mxu0  ;;  %v7979_v9 = vpop.f32.mrb[89].mxu1  ;;  %v11480_v13 = vmax.f32 %v11478_v52, %v11479_v18 }
 0x3a7   : > { %v3478_v19 = vpop.f32.mrb[90].mxu0  ;;  %v4609_v23 = vpop.f32.mrb[90].mxu1  ;;  %v11481_v8 = vld [vmem:[#allocation64_spill] sm:$0xff]  ;;  %v11482_v9 = vld [vmem:[#allocation65_spill] sm:$0xff] }
 0x3a8   : > { %5926 = vst.msk [vmem:[%s9958_s28 + $0xc4] sm:$0xf] %vm5876_vm4, %v6768_v41  ;;  %v5187_v36 = vmax.f32 %v11468_v35, %v5065_v42  ;;  %v5066_v56 = vmax.f32 %v3478_v19, %v4609_v23  ;;  %v7726_v57 = vpop.f32.mrb[91].mxu0  ;;  %v7980_v40 = vpop.f32.mrb[91].mxu1 }
 0x3a9   : > { %v8369_v40 = vld [vmem:[%s9082_s19 + $0x1b8] sm:$0xff]  }
 0x3aa   : > { %v5316_v24 = vadd.f32 %v10377_v16, %v5187_v36  ;;  %v5188_v51 = vmax.f32 %v11471_v4, %v5066_v56  ;;  %7832 = vmatmul.mubr.msk.bf16.gmra.mrb[196].mxu0 %vm788_vm3, %v8363_v49  ;;  %8086 = vmatmul.mubr.msk.bf16.gmra.mrb[196].mxu1 %vm788_vm3, %v8364_v50  ;;  %v11483_v49 = vmax.f32 %v11481_v8, %v11482_v9  ;;  %v11484_v4 = vld [vmem:[#allocation66_spill] sm:$0xff] }
 0x3ab   : > { %7835 = vmatprep.mubr.msk.bf16.mxu0 %vm8393_vm2, %v11175_v6  ;;  %8089 = vmatprep.mubr.msk.bf16.mxu1 %vm8393_vm2, %v11175_v6 }
 0x3ac   : > { %v6769_v31 = vpack.c.bf16 %v5316_v24, %v5316_v24  ;;  %v5317_v54 = vadd.f32 %v10377_v16, %v5188_v51  ;;  %v8370_v24 = vld [vmem:[%s9090_s23 + $0x1b8] sm:$0xff]   ;;  %v11485_v51 = vld [vmem:[#allocation67_spill] sm:$0xff] }
 0x3ad   : > { %v3483_v15 = vpop.f32.mrb[92].mxu0  ;;  %v4614_v34 = vpop.f32.mrb[92].mxu1 }
 0x3ae   : > { %5927 = vst.msk [vmem:[%s9958_s28 + $0xc8] sm:$0xf] %vm5876_vm4, %v6769_v31  ;;  %v6770_v58 = vpack.c.bf16 %v5317_v54, %v5317_v54  ;;  %v5067_v27 = vmax.f32 %v3483_v15, %v4614_v34  ;;  %v7729_v37 = vpop.f32.mrb[93].mxu0  ;;  %v7983_v38 = vpop.f32.mrb[93].mxu1  ;;  %v11486_v31 = vmax.f32 %v11484_v4, %v11485_v51 }
 0x3af   : > { %v3486_v43 = vpop.f32.mrb[94].mxu0  ;;  %v4617_v47 = vpop.f32.mrb[94].mxu1  ;;  %v11487_v37 = vld [vmem:[#allocation68_spill] sm:$0xff]  ;;  %v11488_v38 = vld [vmem:[#allocation69_spill] sm:$0xff] }
 0x3b0   : > { %5928 = vst.msk [vmem:[%s9958_s28 + $0xcc] sm:$0xf] %vm5876_vm4, %v6770_v58  ;;  %v5189_v60 = vmax.f32 %v11474_v59, %v5067_v27  ;;  %v5068_v28 = vmax.f32 %v3486_v43, %v4617_v47  ;;  %v7730_v29 = vpop.f32.mrb[95].mxu0  ;;  %v7984_v61 = vpop.f32.mrb[95].mxu1 }
 0x3b1   : > { %v8371_v61 = vld [vmem:[%s9082_s19 + $0x1c0] sm:$0xff]  }
 0x3b2   : > { %v5318_v62 = vadd.f32 %v10377_v16, %v5189_v60  ;;  %v5190_v3 = vmax.f32 %v11477_v30, %v5068_v28  ;;  %7836 = vmatmul.mubr.msk.bf16.gmra.mrb[200].mxu0 %vm788_vm3, %v8365_v10  ;;  %8090 = vmatmul.mubr.msk.bf16.gmra.mrb[200].mxu1 %vm788_vm3, %v8366_v46  ;;  %v11489_v10 = vmax.f32 %v11487_v37, %v11488_v38  ;;  %v11490_v30 = vld [vmem:[#allocation70_spill] sm:$0xff] }
 0x3b3   : > { %7839 = vmatprep.mubr.msk.bf16.mxu0 %vm8393_vm2, %v11175_v6  ;;  %8093 = vmatprep.mubr.msk.bf16.mxu1 %vm8393_vm2, %v11175_v6 }
 0x3b4   : > { %v6771_v11 = vpack.c.bf16 %v5318_v62, %v5318_v62  ;;  %v5319_v12 = vadd.f32 %v10377_v16, %v5190_v3  ;;  %v8372_v62 = vld [vmem:[%s9090_s23 + $0x1c0] sm:$0xff]   ;;  %v11491_v3 = vld [vmem:[#allocation71_spill] sm:$0xff] }
 0x3b5   : > { %v3491_v39 = vpop.f32.mrb[96].mxu0  ;;  %v4622_v22 = vpop.f32.mrb[96].mxu1 }
 0x3b6   : > { %5929 = vst.msk [vmem:[%s9958_s28 + $0xd0] sm:$0xf] %vm5876_vm4, %v6771_v11  ;;  %v6772_v25 = vpack.c.bf16 %v5319_v12, %v5319_v12  ;;  %v5069_v26 = vmax.f32 %v3491_v39, %v4622_v22  ;;  %v7733_v0 = vpop.f32.mrb[97].mxu0  ;;  %v7987_v2 = vpop.f32.mrb[97].mxu1  ;;  %v11492_v11 = vmax.f32 %v11490_v30, %v11491_v3 }
 0x3b7   : > { %v3494_v7 = vpop.f32.mrb[98].mxu0  ;;  %v4625_v17 = vpop.f32.mrb[98].mxu1  ;;  %v11493_v0 = vld [vmem:[#allocation72_spill] sm:$0xff]  ;;  %v11494_v2 = vld [vmem:[#allocation73_spill] sm:$0xff] }
 0x3b8   : > { %5930 = vst.msk [vmem:[%s9958_s28 + $0xd4] sm:$0xf] %vm5876_vm4, %v6772_v25  ;;  %v5191_v14 = vmax.f32 %v11480_v13, %v5069_v26  ;;  %v5070_v63 = vmax.f32 %v3494_v7, %v4625_v17  ;;  %v7734_v53 = vpop.f32.mrb[99].mxu0  ;;  %v7988_v41 = vpop.f32.mrb[99].mxu1 }
 0x3b9   : > { %v8373_v41 = vld [vmem:[%s9082_s19 + $0x1c8] sm:$0xff]  }
 0x3ba   : > { %v5320_v42 = vadd.f32 %v10377_v16, %v5191_v14  ;;  %v5192_v50 = vmax.f32 %v11483_v49, %v5070_v63  ;;  %7840 = vmatmul.mubr.msk.bf16.gmra.mrb[204].mxu0 %vm788_vm3, %v8367_v32  ;;  %8094 = vmatmul.mubr.msk.bf16.gmra.mrb[204].mxu1 %vm788_vm3, %v8368_v33  ;;  %v11495_v32 = vmax.f32 %v11493_v0, %v11494_v2  ;;  %v11496_v49 = vld [vmem:[#allocation74_spill] sm:$0xff] }
 0x3bb   : > { %7843 = vmatprep.mubr.msk.bf16.mxu0 %vm8393_vm2, %v11175_v6  ;;  %8097 = vmatprep.mubr.msk.bf16.mxu1 %vm8393_vm2, %v11175_v6 }
 0x3bc   : > { %v6773_v19 = vpack.c.bf16 %v5320_v42, %v5320_v42  ;;  %v5321_v23 = vadd.f32 %v10377_v16, %v5192_v50  ;;  %v8374_v42 = vld [vmem:[%s9090_s23 + $0x1c8] sm:$0xff]  }
 0x3bd   : > { %v3499_v20 = vpop.f32.mrb[100].mxu0  ;;  %v4630_v21 = vpop.f32.mrb[100].mxu1  ;;  %v11497_v50 = vld [vmem:[#allocation75_spill] sm:$0xff] }
 0x3be   : > { %5931 = vst.msk [vmem:[%s9958_s28 + $0xd8] sm:$0xf] %vm5876_vm4, %v6773_v19  ;;  %v6774_v35 = vpack.c.bf16 %v5321_v23, %v5321_v23  ;;  %v5071_v36 = vmax.f32 %v3499_v20, %v4630_v21  ;;  %v7737_v56 = vpop.f32.mrb[101].mxu0  ;;  %v7991_v57 = vpop.f32.mrb[101].mxu1  ;;  %v11498_v19 = vmax.f32 %v11496_v49, %v11497_v50 }
 0x3bf   : > { %v3502_v55 = vpop.f32.mrb[102].mxu0  ;;  %v4633_v5 = vpop.f32.mrb[102].mxu1  ;;  %v11499_v56 = vld [vmem:[#allocation76_spill] sm:$0xff]  ;;  %v11500_v57 = vld [vmem:[#allocation77_spill] sm:$0xff] }
 0x3c0   : > { %5932 = vst.msk [vmem:[%s9958_s28 + $0xdc] sm:$0xf] %vm5876_vm4, %v6774_v35  ;;  %v5193_v54 = vmax.f32 %v11486_v31, %v5071_v36  ;;  %v5072_v15 = vmax.f32 %v3502_v55, %v4633_v5  ;;  %v7738_v34 = vpop.f32.mrb[103].mxu0  ;;  %v7992_v58 = vpop.f32.mrb[103].mxu1 }
 0x3c1   : > { %v8375_v58 = vld [vmem:[%s9082_s19 + $0x1d0] sm:$0xff]  }
 0x3c2   : > { %v5322_v27 = vadd.f32 %v10377_v16, %v5193_v54  ;;  %v5194_v46 = vmax.f32 %v11489_v10, %v5072_v15  ;;  %7844 = vmatmul.mubr.msk.bf16.gmra.mrb[208].mxu0 %vm788_vm3, %v8369_v40  ;;  %8098 = vmatmul.mubr.msk.bf16.gmra.mrb[208].mxu1 %vm788_vm3, %v8370_v24  ;;  %v11501_v40 = vmax.f32 %v11499_v56, %v11500_v57  ;;  %v11502_v10 = vld [vmem:[#allocation78_spill] sm:$0xff] }
 0x3c3   : > { %7847 = vmatprep.mubr.msk.bf16.mxu0 %vm8393_vm2, %v11175_v6  ;;  %8101 = vmatprep.mubr.msk.bf16.mxu1 %vm8393_vm2, %v11175_v6 }
 0x3c4   : > { %v6775_v43 = vpack.c.bf16 %v5322_v27, %v5322_v27  ;;  %v5323_v47 = vadd.f32 %v10377_v16, %v5194_v46  ;;  %v8376_v27 = vld [vmem:[%s9090_s23 + $0x1d0] sm:$0xff]   ;;  %v11503_v46 = vld [vmem:[#allocation79_spill] sm:$0xff] }
 0x3c5   : > { %v3507_v44 = vpop.f32.mrb[104].mxu0  ;;  %v4638_v45 = vpop.f32.mrb[104].mxu1 }
 0x3c6   : > { %5933 = vst.msk [vmem:[%s9958_s28 + $0xe0] sm:$0xf] %vm5876_vm4, %v6775_v43  ;;  %v6776_v59 = vpack.c.bf16 %v5323_v47, %v5323_v47  ;;  %v5073_v60 = vmax.f32 %v3507_v44, %v4638_v45  ;;  %v7741_v28 = vpop.f32.mrb[105].mxu0  ;;  %v7995_v29 = vpop.f32.mrb[105].mxu1  ;;  %v11504_v43 = vmax.f32 %v11502_v10, %v11503_v46 }
 0x3c7   : > { %v3510_v1 = vpop.f32.mrb[106].mxu0  ;;  %v4641_v48 = vpop.f32.mrb[106].mxu1  ;;  %v11505_v28 = vld [vmem:[#allocation80_spill] sm:$0xff]  ;;  %v11506_v29 = vld [vmem:[#allocation81_spill] sm:$0xff] }
 0x3c8   : > { %5934 = vst.msk [vmem:[%s9958_s28 + $0xe4] sm:$0xf] %vm5876_vm4, %v6776_v59  ;;  %v5195_v12 = vmax.f32 %v11492_v11, %v5073_v60  ;;  %v5074_v39 = vmax.f32 %v3510_v1, %v4641_v48  ;;  %v7742_v22 = vpop.f32.mrb[107].mxu0  ;;  %v7996_v25 = vpop.f32.mrb[107].mxu1 }
 0x3c9   : > { %v8377_v25 = vld [vmem:[%s9082_s19 + $0x1d8] sm:$0xff]  }
 0x3ca   : > { %v5324_v26 = vadd.f32 %v10377_v16, %v5195_v12  ;;  %v5196_v33 = vmax.f32 %v11495_v32, %v5074_v39  ;;  %7848 = vmatmul.mubr.msk.bf16.gmra.mrb[212].mxu0 %vm788_vm3, %v8371_v61  ;;  %8102 = vmatmul.mubr.msk.bf16.gmra.mrb[212].mxu1 %vm788_vm3, %v8372_v62  ;;  %v11507_v61 = vmax.f32 %v11505_v28, %v11506_v29  ;;  %v11508_v32 = vld [vmem:[#allocation82_spill] sm:$0xff]  ;;  %v11521_v28 = vld [vmem:[#allocation91_spill] sm:$0xff] }
 0x3cb   : > { %7851 = vmatprep.mubr.msk.bf16.mxu0 %vm8393_vm2, %v11175_v6  ;;  %8105 = vmatprep.mubr.msk.bf16.mxu1 %vm8393_vm2, %v11175_v6 }
 0x3cc   : > { %v6777_v7 = vpack.c.bf16 %v5324_v26, %v5324_v26  ;;  %v5325_v17 = vadd.f32 %v10377_v16, %v5196_v33  ;;  %v8378_v26 = vld [vmem:[%s9090_s23 + $0x1d8] sm:$0xff]   ;;  %v11509_v33 = vld [vmem:[#allocation83_spill] sm:$0xff] }
 0x3cd   : > { %v3515_v52 = vpop.f32.mrb[108].mxu0  ;;  %v4646_v18 = vpop.f32.mrb[108].mxu1 }
 0x3ce   : > { %5935 = vst.msk [vmem:[%s9958_s28 + $0xe8] sm:$0xf] %vm5876_vm4, %v6777_v7  ;;  %v6778_v13 = vpack.c.bf16 %v5325_v17, %v5325_v17  ;;  %v5075_v14 = vmax.f32 %v3515_v52, %v4646_v18  ;;  %v7745_v63 = vpop.f32.mrb[109].mxu0  ;;  %v7999_v53 = vpop.f32.mrb[109].mxu1  ;;  %v11510_v7 = vmax.f32 %v11508_v32, %v11509_v33 }
 0x3cf   : > { %v3518_v8 = vpop.f32.mrb[110].mxu0  ;;  %v4649_v9 = vpop.f32.mrb[110].mxu1  ;;  %v11511_v63 = vld [vmem:[#allocation84_spill] sm:$0xff]  ;;  %v11512_v53 = vld [vmem:[#allocation85_spill] sm:$0xff] }
 0x3d0   : > { %5936 = vst.msk [vmem:[%s9958_s28 + $0xec] sm:$0xf] %vm5876_vm4, %v6778_v13  ;;  %v5197_v23 = vmax.f32 %v11498_v19, %v5075_v14  ;;  %v5076_v20 = vmax.f32 %v3518_v8, %v4649_v9  ;;  %v7746_v21 = vpop.f32.mrb[111].mxu0  ;;  %v8000_v35 = vpop.f32.mrb[111].mxu1 }
 0x3d1   : > { %v8379_v35 = vld [vmem:[%s9082_s19 + $0x1e0] sm:$0xff]  }
 0x3d2   : > { %v5326_v36 = vadd.f32 %v10377_v16, %v5197_v23  ;;  %v5198_v24 = vmax.f32 %v11501_v40, %v5076_v20  ;;  %7852 = vmatmul.mubr.msk.bf16.gmra.mrb[216].mxu0 %vm788_vm3, %v8373_v41  ;;  %8106 = vmatmul.mubr.msk.bf16.gmra.mrb[216].mxu1 %vm788_vm3, %v8374_v42  ;;  %v11513_v41 = vmax.f32 %v11511_v63, %v11512_v53  ;;  %v11514_v40 = vld [vmem:[#allocation86_spill] sm:$0xff] }
 0x3d3   : > { %7855 = vmatprep.mubr.msk.bf16.mxu0 %vm8393_vm2, %v11175_v6  ;;  %8109 = vmatprep.mubr.msk.bf16.mxu1 %vm8393_vm2, %v11175_v6 }
 0x3d4   : > { %v6779_v55 = vpack.c.bf16 %v5326_v36, %v5326_v36  ;;  %v5327_v5 = vadd.f32 %v10377_v16, %v5198_v24  ;;  %v8380_v36 = vld [vmem:[%s9090_s23 + $0x1e0] sm:$0xff]  }
 0x3d5   : > { %v3523_v4 = vpop.f32.mrb[112].mxu0  ;;  %v4654_v51 = vpop.f32.mrb[112].mxu1 }
 0x3d6   : > { %5937 = vst.msk [vmem:[%s9958_s28 + $0xf0] sm:$0xf] %vm5876_vm4, %v6779_v55  ;;  %v6780_v31 = vpack.c.bf16 %v5327_v5, %v5327_v5  ;;  %v5077_v54 = vmax.f32 %v3523_v4, %v4654_v51  ;;  %v7749_v15 = vpop.f32.mrb[113].mxu0  ;;  %v8003_v34 = vpop.f32.mrb[113].mxu1 }
 0x3d7   : > { %v3526_v37 = vpop.f32.mrb[114].mxu0  ;;  %v4657_v38 = vpop.f32.mrb[114].mxu1  ;;  %v11518_v15 = vld [vmem:[#allocation89_spill] sm:$0xff] }
 0x3d8   : > { %5938 = vst.msk [vmem:[%s9958_s28 + $0xf4] sm:$0xf] %vm5876_vm4, %v6780_v31  ;;  %v5199_v47 = vmax.f32 %v11504_v43, %v5077_v54  ;;  %v5078_v44 = vmax.f32 %v3526_v37, %v4657_v38  ;;  %v7750_v45 = vpop.f32.mrb[115].mxu0  ;;  %v8004_v59 = vpop.f32.mrb[115].mxu1  ;;  %v11517_v54 = vld [vmem:[#allocation88_spill] sm:$0xff] }
 0x3d9   : > { %v11519_v34 = vmax.f32 %v11517_v54, %v11518_v15 }
 0x3da   : > { %v5328_v60 = vadd.f32 %v10377_v16, %v5199_v47  ;;  %v5200_v62 = vmax.f32 %v11507_v61, %v5078_v44  ;;  %7856 = vmatmul.mubr.msk.bf16.gmra.mrb[220].mxu0 %vm788_vm3, %v8375_v58  ;;  %8110 = vmatmul.mubr.msk.bf16.gmra.mrb[220].mxu1 %vm788_vm3, %v8376_v27 }
 0x3db   : > { %7859 = vmatprep.mubr.msk.bf16.mxu0 %vm8393_vm2, %v11175_v6  ;;  %8113 = vmatprep.mubr.msk.bf16.mxu1 %vm8393_vm2, %v11175_v6 }
 0x3dc   : > { %v6781_v1 = vpack.c.bf16 %v5328_v60, %v5328_v60  ;;  %v5329_v48 = vadd.f32 %v10377_v16, %v5200_v62  ;;  %v11520_v60 = vld [vmem:[#allocation90_spill] sm:$0xff] }
 0x3dd   : > { %v3531_v30 = vpop.f32.mrb[116].mxu0  ;;  %v4662_v3 = vpop.f32.mrb[116].mxu1  ;;  %v11522_v29 = vmax.f32 %v11520_v60, %v11521_v28 }
 0x3de   : > { %5939 = vst.msk [vmem:[%s9958_s28 + $0xf8] sm:$0xf] %vm5876_vm4, %v6781_v1  ;;  %v6782_v11 = vpack.c.bf16 %v5329_v48, %v5329_v48  ;;  %v5079_v12 = vmax.f32 %v3531_v30, %v4662_v3  ;;  %v7753_v39 = vpop.f32.mrb[117].mxu0  ;;  %v8007_v22 = vpop.f32.mrb[117].mxu1  ;;  %v11523_v3 = vld [vmem:[#allocation92_spill] sm:$0xff] }
 0x3df   : > { %v3534_v0 = vpop.f32.mrb[118].mxu0  ;;  %v4665_v2 = vpop.f32.mrb[118].mxu1 }
 0x3e0   : > { %5940 = vst.msk [vmem:[%s9958_s28 + $0xfc] sm:$0xf] %vm5876_vm4, %v6782_v11  ;;  %v5201_v17 = vmax.f32 %v11510_v7, %v5079_v12  ;;  %v5080_v52 = vmax.f32 %v3534_v0, %v4665_v2  ;;  %v7754_v18 = vpop.f32.mrb[119].mxu0  ;;  %v8008_v13 = vpop.f32.mrb[119].mxu1  ;;  %v11524_v11 = vld [vmem:[#allocation93_spill] sm:$0xff] }
 0x3e1   : > { %v11525_v12 = vmax.f32 %v11523_v3, %v11524_v11  ;;  %v11526_v18 = vld [vmem:[#allocation94_spill] sm:$0xff]  ;;  %v11527_v13 = vld [vmem:[#allocation95_spill] sm:$0xff] }
 0x3e2   : > { %v5330_v14 = vadd.f32 %v10377_v16, %v5201_v17  ;;  %v5202_v42 = vmax.f32 %v11513_v41, %v5080_v52  ;;  %7860 = vmatmul.mubr.msk.bf16.gmra.mrb[224].mxu0 %vm788_vm3, %v8377_v25  ;;  %8114 = vmatmul.mubr.msk.bf16.gmra.mrb[224].mxu1 %vm788_vm3, %v8378_v26 }
 0x3e3   : > { %7863 = vmatprep.mubr.msk.bf16.mxu0 %vm8393_vm2, %v11175_v6  ;;  %8117 = vmatprep.mubr.msk.bf16.mxu1 %vm8393_vm2, %v11175_v6  ;;  %v11515_v6 = vld [vmem:[#allocation87_spill] sm:$0xff] }
 0x3e4   : > { %v6783_v8 = vpack.c.bf16 %v5330_v14, %v5330_v14  ;;  %v5331_v9 = vadd.f32 %v10377_v16, %v5202_v42  ;;  %v11516_v24 = vmax.f32 %v11514_v40, %v11515_v6  ;;  %v11528_v14 = vmax.f32 %v11526_v18, %v11527_v13 }
 0x3e5   : > { %v3539_v49 = vpop.f32.mrb[120].mxu0  ;;  %v4670_v50 = vpop.f32.mrb[120].mxu1 }
 0x3e6   : > { %5941 = vst.msk [vmem:[%s9958_s28 + $0x100] sm:$0xf] %vm5876_vm4, %v6783_v8  ;;  %v6784_v19 = vpack.c.bf16 %v5331_v9, %v5331_v9  ;;  %v5081_v23 = vmax.f32 %v3539_v49, %v4670_v50  ;;  %v7757_v20 = vpop.f32.mrb[121].mxu0  ;;  %v8011_v21 = vpop.f32.mrb[121].mxu1  ;;  %v11529_v9 = vld [vmem:[#allocation96_spill] sm:$0xff]  ;;  %v11530_v49 = vld [vmem:[#allocation97_spill] sm:$0xff] }
 0x3e7   : > { %v3542_v56 = vpop.f32.mrb[122].mxu0  ;;  %v4673_v57 = vpop.f32.mrb[122].mxu1  ;;  %v11531_v50 = vmax.f32 %v11529_v9, %v11530_v49 }
 0x3e8   : > { %5942 = vst.msk [vmem:[%s9958_s28 + $0x104] sm:$0xf] %vm5876_vm4, %v6784_v19  ;;  %v5203_v55 = vmax.f32 %v11516_v24, %v5081_v23  ;;  %v5082_v5 = vmax.f32 %v3542_v56, %v4673_v57  ;;  %v7758_v4 = vpop.f32.mrb[123].mxu0  ;;  %v8012_v51 = vpop.f32.mrb[123].mxu1 }
 0x3ea   : > { %v5332_v31 = vadd.f32 %v10377_v16, %v5203_v55  ;;  %v5204_v58 = vmax.f32 %v11519_v34, %v5082_v5  ;;  %7864 = vmatmul.mubr.msk.bf16.gmra.mrb[228].mxu0 %vm788_vm3, %v8379_v35  ;;  %8118 = vmatmul.mubr.msk.bf16.gmra.mrb[228].mxu1 %vm788_vm3, %v8380_v36  ;;  %v11532_v55 = vld [vmem:[#allocation98_spill] sm:$0xff]  ;;  %v11533_v5 = vld [vmem:[#allocation99_spill] sm:$0xff] }
 0x3eb   : > { %v11534_v4 = vmax.f32 %v11532_v55, %v11533_v5 }
 0x3ec   : > { %v6785_v27 = vpack.c.bf16 %v5332_v31, %v5332_v31  ;;  %v5333_v37 = vadd.f32 %v10377_v16, %v5204_v58  ;;  %v11535_v58 = vld [vmem:[#allocation100_spill] sm:$0xff] }
 0x3ed   : > { %v3547_v38 = vpop.f32.mrb[124].mxu0  ;;  %v4678_v10 = vpop.f32.mrb[124].mxu1 }
 0x3ee   : > { %5943 = vst.msk [vmem:[%s9958_s28 + $0x108] sm:$0xf] %vm5876_vm4, %v6785_v27  ;;  %v6786_v46 = vpack.c.bf16 %v5333_v37, %v5333_v37  ;;  %v5083_v43 = vmax.f32 %v3547_v38, %v4678_v10  ;;  %v7761_v47 = vpop.f32.mrb[125].mxu0  ;;  %v8015_v44 = vpop.f32.mrb[125].mxu1  ;;  %v11536_v27 = vld [vmem:[#allocation101_spill] sm:$0xff] }
 0x3ef   : > { %v3550_v45 = vpop.f32.mrb[126].mxu0  ;;  %v4681_v59 = vpop.f32.mrb[126].mxu1  ;;  %v11537_v37 = vmax.f32 %v11535_v58, %v11536_v27 }
 0x3f0   : > { %5944 = vst.msk [vmem:[%s9958_s28 + $0x10c] sm:$0xf] %vm5876_vm4, %v6786_v46  ;;  %v5205_v61 = vmax.f32 %v11522_v29, %v5083_v43  ;;  %v5084_v62 = vmax.f32 %v3550_v45, %v4681_v59  ;;  %v7762_v1 = vpop.f32.mrb[127].mxu0  ;;  %v8016_v48 = vpop.f32.mrb[127].mxu1 }
 0x3f2   : > { %v5334_v30 = vadd.f32 %v10377_v16, %v5205_v61  ;;  %v5206_v39 = vmax.f32 %v11525_v12, %v5084_v62  ;;  %v11538_v61 = vld [vmem:[#allocation102_spill] sm:$0xff]  ;;  %v11539_v62 = vld [vmem:[#allocation103_spill] sm:$0xff] }
 0x3f3   : > { %v11540_v1 = vmax.f32 %v11538_v61, %v11539_v62 }
 0x3f4   : > { %v6787_v22 = vpack.c.bf16 %v5334_v30, %v5334_v30  ;;  %v5335_v25 = vadd.f32 %v10377_v16, %v5206_v39  ;;  %v11541_v39 = vld [vmem:[#allocation104_spill] sm:$0xff] }
 0x3f5   : > { %v3555_v26 = vpop.f32.mrb[128].mxu0  ;;  %v4686_v0 = vpop.f32.mrb[128].mxu1 }
 0x3f6   : > { %5945 = vst.msk [vmem:[%s9958_s28 + $0x110] sm:$0xf] %vm5876_vm4, %v6787_v22  ;;  %v6788_v2 = vpack.c.bf16 %v5335_v25, %v5335_v25  ;;  %v5085_v32 = vmax.f32 %v3555_v26, %v4686_v0  ;;  %v7765_v33 = vpop.f32.mrb[129].mxu0  ;;  %v8019_v7 = vpop.f32.mrb[129].mxu1  ;;  %v11542_v22 = vld [vmem:[#allocation105_spill] sm:$0xff] }
 0x3f7   : > { %v3558_v17 = vpop.f32.mrb[130].mxu0  ;;  %v4689_v52 = vpop.f32.mrb[130].mxu1  ;;  %v11543_v25 = vmax.f32 %v11541_v39, %v11542_v22 }
 0x3f8   : > { %5946 = vst.msk [vmem:[%s9958_s28 + $0x114] sm:$0xf] %vm5876_vm4, %v6788_v2  ;;  %v5207_v63 = vmax.f32 %v11528_v14, %v5085_v32  ;;  %v5086_v53 = vmax.f32 %v3558_v17, %v4689_v52  ;;  %v7766_v41 = vpop.f32.mrb[131].mxu0  ;;  %v8020_v42 = vpop.f32.mrb[131].mxu1 }
 0x3fa   : > { %v5336_v8 = vadd.f32 %v10377_v16, %v5207_v63  ;;  %v5208_v19 = vmax.f32 %v11531_v50, %v5086_v53  ;;  %v11544_v63 = vld [vmem:[#allocation106_spill] sm:$0xff]  ;;  %v11545_v53 = vld [vmem:[#allocation107_spill] sm:$0xff] }
 0x3fb   : > { %v11546_v41 = vmax.f32 %v11544_v63, %v11545_v53 }
 0x3fc   : > { %v6789_v23 = vpack.c.bf16 %v5336_v8, %v5336_v8  ;;  %v5337_v20 = vadd.f32 %v10377_v16, %v5208_v19  ;;  %v11547_v19 = vld [vmem:[#allocation108_spill] sm:$0xff] }
 0x3fd   : > { %v3563_v21 = vpop.f32.mrb[132].mxu0  ;;  %v4694_v35 = vpop.f32.mrb[132].mxu1 }
 0x3fe   : > { %5947 = vst.msk [vmem:[%s9958_s28 + $0x118] sm:$0xf] %vm5876_vm4, %v6789_v23  ;;  %v6790_v36 = vpack.c.bf16 %v5337_v20, %v5337_v20  ;;  %v5087_v56 = vmax.f32 %v3563_v21, %v4694_v35  ;;  %v7769_v57 = vpop.f32.mrb[133].mxu0  ;;  %v8023_v40 = vpop.f32.mrb[133].mxu1  ;;  %v11548_v23 = vld [vmem:[#allocation109_spill] sm:$0xff] }
 0x3ff   : > { %v3566_v6 = vpop.f32.mrb[134].mxu0  ;;  %v4697_v24 = vpop.f32.mrb[134].mxu1  ;;  %v11549_v20 = vmax.f32 %v11547_v19, %v11548_v23 }
 0x400   : > { %5948 = vst.msk [vmem:[%s9958_s28 + $0x11c] sm:$0xf] %vm5876_vm4, %v6790_v36  ;;  %v5209_v51 = vmax.f32 %v11534_v4, %v5087_v56  ;;  %v5088_v31 = vmax.f32 %v3566_v6, %v4697_v24  ;;  %v7770_v54 = vpop.f32.mrb[135].mxu0  ;;  %v8024_v15 = vpop.f32.mrb[135].mxu1 }
 0x402   : > { %v5338_v34 = vadd.f32 %v10377_v16, %v5209_v51  ;;  %v5210_v38 = vmax.f32 %v11537_v37, %v5088_v31  ;;  %v11550_v51 = vld [vmem:[#allocation110_spill] sm:$0xff]  ;;  %v11551_v31 = vld [vmem:[#allocation111_spill] sm:$0xff] }
 0x403   : > { %v11552_v54 = vmax.f32 %v11550_v51, %v11551_v31 }
 0x404   : > { %v6791_v10 = vpack.c.bf16 %v5338_v34, %v5338_v34  ;;  %v5339_v46 = vadd.f32 %v10377_v16, %v5210_v38  ;;  %v11553_v38 = vld [vmem:[#allocation112_spill] sm:$0xff] }
 0x405   : > { %v3571_v43 = vpop.f32.mrb[136].mxu0  ;;  %v4702_v47 = vpop.f32.mrb[136].mxu1 }
 0x406   : > { %5949 = vst.msk [vmem:[%s9958_s28 + $0x120] sm:$0xf] %vm5876_vm4, %v6791_v10  ;;  %v6792_v44 = vpack.c.bf16 %v5339_v46, %v5339_v46  ;;  %v5089_v45 = vmax.f32 %v3571_v43, %v4702_v47  ;;  %v7773_v59 = vpop.f32.mrb[137].mxu0  ;;  %v8027_v60 = vpop.f32.mrb[137].mxu1  ;;  %v11554_v10 = vld [vmem:[#allocation113_spill] sm:$0xff] }
 0x407   : > { %v3574_v28 = vpop.f32.mrb[138].mxu0  ;;  %v4705_v29 = vpop.f32.mrb[138].mxu1  ;;  %v11555_v46 = vmax.f32 %v11553_v38, %v11554_v10 }
 0x408   : > { %5950 = vst.msk [vmem:[%s9958_s28 + $0x124] sm:$0xf] %vm5876_vm4, %v6792_v44  ;;  %v5211_v48 = vmax.f32 %v11540_v1, %v5089_v45  ;;  %v5090_v30 = vmax.f32 %v3574_v28, %v4705_v29  ;;  %v7774_v3 = vpop.f32.mrb[139].mxu0  ;;  %v8028_v11 = vpop.f32.mrb[139].mxu1 }
 0x40a   : > { %v5340_v12 = vadd.f32 %v10377_v16, %v5211_v48  ;;  %v5212_v26 = vmax.f32 %v11543_v25, %v5090_v30  ;;  %v11556_v48 = vld [vmem:[#allocation114_spill] sm:$0xff]  ;;  %v11557_v30 = vld [vmem:[#allocation115_spill] sm:$0xff] }
 0x40b   : > { %v11558_v3 = vmax.f32 %v11556_v48, %v11557_v30 }
 0x40c   : > { %v6793_v0 = vpack.c.bf16 %v5340_v12, %v5340_v12  ;;  %v5341_v2 = vadd.f32 %v10377_v16, %v5212_v26  ;;  %v11559_v26 = vld [vmem:[#allocation116_spill] sm:$0xff] }
 0x40d   : > { %v3579_v32 = vpop.f32.mrb[140].mxu0  ;;  %v4710_v33 = vpop.f32.mrb[140].mxu1 }
 0x40e   : > { %5951 = vst.msk [vmem:[%s9958_s28 + $0x128] sm:$0xf] %vm5876_vm4, %v6793_v0  ;;  %v6794_v7 = vpack.c.bf16 %v5341_v2, %v5341_v2  ;;  %v5091_v17 = vmax.f32 %v3579_v32, %v4710_v33  ;;  %v7777_v52 = vpop.f32.mrb[141].mxu0  ;;  %v8031_v18 = vpop.f32.mrb[141].mxu1  ;;  %v11560_v0 = vld [vmem:[#allocation117_spill] sm:$0xff] }
 0x40f   : > { %v3582_v13 = vpop.f32.mrb[142].mxu0  ;;  %v4713_v14 = vpop.f32.mrb[142].mxu1  ;;  %v11561_v2 = vmax.f32 %v11559_v26, %v11560_v0 }
 0x410   : > { %5952 = vst.msk [vmem:[%s9958_s28 + $0x12c] sm:$0xf] %vm5876_vm4, %v6794_v7  ;;  %v5213_v42 = vmax.f32 %v11546_v41, %v5091_v17  ;;  %v5092_v8 = vmax.f32 %v3582_v13, %v4713_v14  ;;  %v7778_v9 = vpop.f32.mrb[143].mxu0  ;;  %v8032_v49 = vpop.f32.mrb[143].mxu1 }
 0x412   : > { %v5342_v50 = vadd.f32 %v10377_v16, %v5213_v42  ;;  %v5214_v21 = vmax.f32 %v11549_v20, %v5092_v8  ;;  %v11562_v42 = vld [vmem:[#allocation118_spill] sm:$0xff]  ;;  %v11563_v8 = vld [vmem:[#allocation119_spill] sm:$0xff] }
 0x413   : > { %v11564_v9 = vmax.f32 %v11562_v42, %v11563_v8 }
 0x414   : > { %v6795_v35 = vpack.c.bf16 %v5342_v50, %v5342_v50  ;;  %v5343_v36 = vadd.f32 %v10377_v16, %v5214_v21  ;;  %v11565_v21 = vld [vmem:[#allocation120_spill] sm:$0xff] }
 0x415   : > { %v3587_v56 = vpop.f32.mrb[144].mxu0  ;;  %v4718_v57 = vpop.f32.mrb[144].mxu1 }
 0x416   : > { %5953 = vst.msk [vmem:[%s9958_s28 + $0x130] sm:$0xf] %vm5876_vm4, %v6795_v35  ;;  %v6796_v40 = vpack.c.bf16 %v5343_v36, %v5343_v36  ;;  %v5093_v6 = vmax.f32 %v3587_v56, %v4718_v57  ;;  %v7781_v24 = vpop.f32.mrb[145].mxu0  ;;  %v8035_v55 = vpop.f32.mrb[145].mxu1  ;;  %v11566_v35 = vld [vmem:[#allocation121_spill] sm:$0xff] }
 0x417   : > { %v3590_v5 = vpop.f32.mrb[146].mxu0  ;;  %v4721_v4 = vpop.f32.mrb[146].mxu1  ;;  %v11567_v36 = vmax.f32 %v11565_v21, %v11566_v35 }
 0x418   : > { %5954 = vst.msk [vmem:[%s9958_s28 + $0x134] sm:$0xf] %vm5876_vm4, %v6796_v40  ;;  %v5215_v15 = vmax.f32 %v11552_v54, %v5093_v6  ;;  %v5094_v34 = vmax.f32 %v3590_v5, %v4721_v4  ;;  %v7782_v58 = vpop.f32.mrb[147].mxu0  ;;  %v8036_v27 = vpop.f32.mrb[147].mxu1 }
 0x41a   : > { %v5344_v37 = vadd.f32 %v10377_v16, %v5215_v15  ;;  %v5216_v43 = vmax.f32 %v11555_v46, %v5094_v34  ;;  %v11568_v15 = vld [vmem:[#allocation122_spill] sm:$0xff]  ;;  %v11569_v34 = vld [vmem:[#allocation123_spill] sm:$0xff] }
 0x41b   : > { %v11570_v58 = vmax.f32 %v11568_v15, %v11569_v34 }
 0x41c   : > { %v6797_v47 = vpack.c.bf16 %v5344_v37, %v5344_v37  ;;  %v5345_v44 = vadd.f32 %v10377_v16, %v5216_v43  ;;  %v11571_v43 = vld [vmem:[#allocation124_spill] sm:$0xff] }
 0x41d   : > { %v3595_v45 = vpop.f32.mrb[148].mxu0  ;;  %v4726_v59 = vpop.f32.mrb[148].mxu1 }
 0x41e   : > { %5955 = vst.msk [vmem:[%s9958_s28 + $0x138] sm:$0xf] %vm5876_vm4, %v6797_v47  ;;  %v6798_v60 = vpack.c.bf16 %v5345_v44, %v5345_v44  ;;  %v5095_v28 = vmax.f32 %v3595_v45, %v4726_v59  ;;  %v7785_v29 = vpop.f32.mrb[149].mxu0  ;;  %v8039_v61 = vpop.f32.mrb[149].mxu1  ;;  %v11572_v47 = vld [vmem:[#allocation125_spill] sm:$0xff] }
 0x41f   : > { %v3598_v62 = vpop.f32.mrb[150].mxu0  ;;  %v4729_v1 = vpop.f32.mrb[150].mxu1  ;;  %v11573_v44 = vmax.f32 %v11571_v43, %v11572_v47 }
 0x420   : > { %5956 = vst.msk [vmem:[%s9958_s28 + $0x13c] sm:$0xf] %vm5876_vm4, %v6798_v60  ;;  %v5217_v11 = vmax.f32 %v11558_v3, %v5095_v28  ;;  %v5096_v12 = vmax.f32 %v3598_v62, %v4729_v1  ;;  %v7786_v39 = vpop.f32.mrb[151].mxu0  ;;  %v8040_v22 = vpop.f32.mrb[151].mxu1 }
 0x422   : > { %v5346_v25 = vadd.f32 %v10377_v16, %v5217_v11  ;;  %v5218_v32 = vmax.f32 %v11561_v2, %v5096_v12  ;;  %v11574_v11 = vld [vmem:[#allocation126_spill] sm:$0xff]  ;;  %v11575_v12 = vld [vmem:[#allocation127_spill] sm:$0xff] }
 0x423   : > { %v11576_v39 = vmax.f32 %v11574_v11, %v11575_v12 }
 0x424   : > { %v6799_v33 = vpack.c.bf16 %v5346_v25, %v5346_v25  ;;  %v5347_v7 = vadd.f32 %v10377_v16, %v5218_v32  ;;  %v11577_v32 = vld [vmem:[#allocation128_spill] sm:$0xff] }
 0x425   : > { %v3603_v17 = vpop.f32.mrb[152].mxu0  ;;  %v4734_v52 = vpop.f32.mrb[152].mxu1 }
 0x426   : > { %5957 = vst.msk [vmem:[%s9958_s28 + $0x140] sm:$0xf] %vm5876_vm4, %v6799_v33  ;;  %v6800_v18 = vpack.c.bf16 %v5347_v7, %v5347_v7  ;;  %v5097_v13 = vmax.f32 %v3603_v17, %v4734_v52  ;;  %v7789_v14 = vpop.f32.mrb[153].mxu0  ;;  %v8043_v63 = vpop.f32.mrb[153].mxu1  ;;  %v11578_v33 = vld [vmem:[#allocation129_spill] sm:$0xff] }
 0x427   : > { %v3606_v53 = vpop.f32.mrb[154].mxu0  ;;  %v4737_v41 = vpop.f32.mrb[154].mxu1  ;;  %v11579_v7 = vmax.f32 %v11577_v32, %v11578_v33  ;;  %v10780_v33 = vld [vmem:[%s10967_s5] ss:$0 sm:$0xff] }
 0x428   : > { %5958 = vst.msk [vmem:[%s9958_s28 + $0x144] sm:$0xf] %vm5876_vm4, %v6800_v18  ;;  %v5219_v49 = vmax.f32 %v11564_v9, %v5097_v13  ;;  %v5098_v50 = vmax.f32 %v3606_v53, %v4737_v41  ;;  %v7790_v19 = vpop.f32.mrb[155].mxu0  ;;  %v8044_v23 = vpop.f32.mrb[155].mxu1 }
 0x42a   : > { %v5348_v20 = vadd.f32 %v10377_v16, %v5219_v49  ;;  %v5220_v56 = vmax.f32 %v11567_v36, %v5098_v50  ;;  %v11580_v49 = vld [vmem:[#allocation130_spill] sm:$0xff]  ;;  %v11581_v50 = vld [vmem:[#allocation131_spill] sm:$0xff] }
 0x42b   : > { %v11582_v19 = vmax.f32 %v11580_v49, %v11581_v50 }
 0x42c   : > { %v6801_v57 = vpack.c.bf16 %v5348_v20, %v5348_v20  ;;  %v5349_v40 = vadd.f32 %v10377_v16, %v5220_v56  ;;  %v11583_v56 = vld [vmem:[#allocation132_spill] sm:$0xff] }
 0x42d   : > { %v3611_v6 = vpop.f32.mrb[156].mxu0  ;;  %v4742_v24 = vpop.f32.mrb[156].mxu1 }
 0x42e   : > { %5959 = vst.msk [vmem:[%s9958_s28 + $0x148] sm:$0xf] %vm5876_vm4, %v6801_v57  ;;  %v6802_v55 = vpack.c.bf16 %v5349_v40, %v5349_v40  ;;  %v5099_v5 = vmax.f32 %v3611_v6, %v4742_v24  ;;  %v7793_v4 = vpop.f32.mrb[157].mxu0  ;;  %v8047_v51 = vpop.f32.mrb[157].mxu1  ;;  %v11584_v57 = vld [vmem:[#allocation133_spill] sm:$0xff] }
 0x42f   : > { %v3614_v31 = vpop.f32.mrb[158].mxu0  ;;  %v4745_v54 = vpop.f32.mrb[158].mxu1  ;;  %v11585_v40 = vmax.f32 %v11583_v56, %v11584_v57 }
 0x430   : > { %5960 = vst.msk [vmem:[%s9958_s28 + $0x14c] sm:$0xf] %vm5876_vm4, %v6802_v55  ;;  %v5221_v27 = vmax.f32 %v11570_v58, %v5099_v5  ;;  %v5100_v37 = vmax.f32 %v3614_v31, %v4745_v54  ;;  %v7794_v38 = vpop.f32.mrb[159].mxu0  ;;  %v8048_v10 = vpop.f32.mrb[159].mxu1 }
 0x432   : > { %v5350_v46 = vadd.f32 %v10377_v16, %v5221_v27  ;;  %v5222_v45 = vmax.f32 %v11573_v44, %v5100_v37  ;;  %v11586_v27 = vld [vmem:[#allocation134_spill] sm:$0xff]  ;;  %v11587_v37 = vld [vmem:[#allocation135_spill] sm:$0xff] }
 0x433   : > { %v11588_v38 = vmax.f32 %v11586_v27, %v11587_v37 }
 0x434   : > { %v6803_v59 = vpack.c.bf16 %v5350_v46, %v5350_v46  ;;  %v5351_v60 = vadd.f32 %v10377_v16, %v5222_v45  ;;  %v11589_v45 = vld [vmem:[#allocation136_spill] sm:$0xff] }
 0x435   : > { %v3619_v28 = vpop.f32.mrb[160].mxu0  ;;  %v4750_v29 = vpop.f32.mrb[160].mxu1 }
 0x436   : > { %5961 = vst.msk [vmem:[%s9958_s28 + $0x150] sm:$0xf] %vm5876_vm4, %v6803_v59  ;;  %v6804_v61 = vpack.c.bf16 %v5351_v60, %v5351_v60  ;;  %v5101_v62 = vmax.f32 %v3619_v28, %v4750_v29  ;;  %v7797_v1 = vpop.f32.mrb[161].mxu0  ;;  %v8051_v48 = vpop.f32.mrb[161].mxu1  ;;  %v11590_v59 = vld [vmem:[#allocation137_spill] sm:$0xff] }
 0x437   : > { %v3622_v30 = vpop.f32.mrb[162].mxu0  ;;  %v4753_v3 = vpop.f32.mrb[162].mxu1  ;;  %v11591_v60 = vmax.f32 %v11589_v45, %v11590_v59 }
 0x438   : > { %5962 = vst.msk [vmem:[%s9958_s28 + $0x154] sm:$0xf] %vm5876_vm4, %v6804_v61  ;;  %v5223_v22 = vmax.f32 %v11576_v39, %v5101_v62  ;;  %v5102_v25 = vmax.f32 %v3622_v30, %v4753_v3  ;;  %v7798_v26 = vpop.f32.mrb[163].mxu0  ;;  %v8052_v0 = vpop.f32.mrb[163].mxu1 }
 0x43a   : > { %v5352_v2 = vadd.f32 %v10377_v16, %v5223_v22  ;;  %v5224_v17 = vmax.f32 %v11579_v7, %v5102_v25  ;;  %v11592_v22 = vld [vmem:[#allocation138_spill] sm:$0xff]  ;;  %v11593_v25 = vld [vmem:[#allocation139_spill] sm:$0xff] }
 0x43b   : > { %v11594_v26 = vmax.f32 %v11592_v22, %v11593_v25 }
 0x43c   : > { %v6805_v52 = vpack.c.bf16 %v5352_v2, %v5352_v2  ;;  %v5353_v18 = vadd.f32 %v10377_v16, %v5224_v17  ;;  %v11595_v17 = vld [vmem:[#allocation140_spill] sm:$0xff] }
 0x43d   : > { %v3627_v13 = vpop.f32.mrb[164].mxu0  ;;  %v4758_v14 = vpop.f32.mrb[164].mxu1 }
 0x43e   : > { %5963 = vst.msk [vmem:[%s9958_s28 + $0x158] sm:$0xf] %vm5876_vm4, %v6805_v52  ;;  %v6806_v63 = vpack.c.bf16 %v5353_v18, %v5353_v18  ;;  %v5103_v53 = vmax.f32 %v3627_v13, %v4758_v14  ;;  %v7801_v41 = vpop.f32.mrb[165].mxu0  ;;  %v8055_v42 = vpop.f32.mrb[165].mxu1  ;;  %v11596_v52 = vld [vmem:[#allocation141_spill] sm:$0xff] }
 0x43f   : > { %v3630_v8 = vpop.f32.mrb[166].mxu0  ;;  %v4761_v9 = vpop.f32.mrb[166].mxu1  ;;  %v11597_v18 = vmax.f32 %v11595_v17, %v11596_v52 }
 0x440   : > { %5964 = vst.msk [vmem:[%s9958_s28 + $0x15c] sm:$0xf] %vm5876_vm4, %v6806_v63  ;;  %v5225_v23 = vmax.f32 %v11582_v19, %v5103_v53  ;;  %v5104_v20 = vmax.f32 %v3630_v8, %v4761_v9  ;;  %v7802_v21 = vpop.f32.mrb[167].mxu0  ;;  %v8056_v35 = vpop.f32.mrb[167].mxu1 }
 0x442   : > { %v5354_v36 = vadd.f32 %v10377_v16, %v5225_v23  ;;  %v5226_v6 = vmax.f32 %v11585_v40, %v5104_v20  ;;  %v11598_v23 = vld [vmem:[#allocation142_spill] sm:$0xff]  ;;  %v11599_v20 = vld [vmem:[#allocation143_spill] sm:$0xff] }
 0x443   : > { %v11600_v21 = vmax.f32 %v11598_v23, %v11599_v20 }
 0x444   : > { %v6807_v24 = vpack.c.bf16 %v5354_v36, %v5354_v36  ;;  %v5355_v55 = vadd.f32 %v10377_v16, %v5226_v6  ;;  %v11601_v6 = vld [vmem:[#allocation144_spill] sm:$0xff] }
 0x445   : > { %v3635_v5 = vpop.f32.mrb[168].mxu0  ;;  %v4766_v4 = vpop.f32.mrb[168].mxu1 }
 0x446   : > { %5965 = vst.msk [vmem:[%s9958_s28 + $0x160] sm:$0xf] %vm5876_vm4, %v6807_v24  ;;  %v6808_v51 = vpack.c.bf16 %v5355_v55, %v5355_v55  ;;  %v5105_v31 = vmax.f32 %v3635_v5, %v4766_v4  ;;  %v7805_v54 = vpop.f32.mrb[169].mxu0  ;;  %v8059_v15 = vpop.f32.mrb[169].mxu1  ;;  %v11602_v24 = vld [vmem:[#allocation145_spill] sm:$0xff] }
 0x447   : > { %v3638_v34 = vpop.f32.mrb[170].mxu0  ;;  %v4769_v58 = vpop.f32.mrb[170].mxu1  ;;  %v11603_v55 = vmax.f32 %v11601_v6, %v11602_v24 }
 0x448   : > { %5966 = vst.msk [vmem:[%s9958_s28 + $0x164] sm:$0xf] %vm5876_vm4, %v6808_v51  ;;  %v5227_v10 = vmax.f32 %v11588_v38, %v5105_v31  ;;  %v5106_v46 = vmax.f32 %v3638_v34, %v4769_v58  ;;  %v7806_v43 = vpop.f32.mrb[171].mxu0  ;;  %v8060_v47 = vpop.f32.mrb[171].mxu1 }
 0x44a   : > { %v5356_v44 = vadd.f32 %v10377_v16, %v5227_v10  ;;  %v5228_v28 = vmax.f32 %v11591_v60, %v5106_v46  ;;  %v11604_v10 = vld [vmem:[#allocation146_spill] sm:$0xff]  ;;  %v11605_v46 = vld [vmem:[#allocation147_spill] sm:$0xff] }
 0x44b   : > { %v11606_v43 = vmax.f32 %v11604_v10, %v11605_v46 }
 0x44c   : > { %v6809_v29 = vpack.c.bf16 %v5356_v44, %v5356_v44  ;;  %v5357_v61 = vadd.f32 %v10377_v16, %v5228_v28  ;;  %v11607_v28 = vld [vmem:[#allocation148_spill] sm:$0xff] }
 0x44d   : > { %v3643_v62 = vpop.f32.mrb[172].mxu0  ;;  %v4774_v1 = vpop.f32.mrb[172].mxu1 }
 0x44e   : > { %5967 = vst.msk [vmem:[%s9958_s28 + $0x168] sm:$0xf] %vm5876_vm4, %v6809_v29  ;;  %v6810_v48 = vpack.c.bf16 %v5357_v61, %v5357_v61  ;;  %v5107_v30 = vmax.f32 %v3643_v62, %v4774_v1  ;;  %v7809_v3 = vpop.f32.mrb[173].mxu0  ;;  %v8063_v11 = vpop.f32.mrb[173].mxu1  ;;  %v11608_v29 = vld [vmem:[#allocation149_spill] sm:$0xff] }
 0x44f   : > { %v3646_v12 = vpop.f32.mrb[174].mxu0  ;;  %v4777_v39 = vpop.f32.mrb[174].mxu1  ;;  %v11609_v61 = vmax.f32 %v11607_v28, %v11608_v29 }
 0x450   : > { %5968 = vst.msk [vmem:[%s9958_s28 + $0x16c] sm:$0xf] %vm5876_vm4, %v6810_v48  ;;  %v5229_v0 = vmax.f32 %v11594_v26, %v5107_v30  ;;  %v5108_v2 = vmax.f32 %v3646_v12, %v4777_v39  ;;  %v7810_v32 = vpop.f32.mrb[175].mxu0  ;;  %v8064_v16 = vpop.f32.mrb[175].mxu1 }
 0x452   : > { %v5358_v7 = vadd.f32 %v10780_v33, %v5229_v0  ;;  %v5230_v13 = vmax.f32 %v11597_v18, %v5108_v2  ;;  %v11610_v0 = vld [vmem:[#allocation150_spill] sm:$0xff]  ;;  %v11611_v2 = vld [vmem:[#allocation151_spill] sm:$0xff] }
 0x453   : > { %v11612_v32 = vmax.f32 %v11610_v0, %v11611_v2 }
 0x454   : > { %v6811_v14 = vpack.c.bf16 %v5358_v7, %v5358_v7  ;;  %v5359_v63 = vadd.f32 %v10780_v33, %v5230_v13  ;;  %v11613_v13 = vld [vmem:[#allocation152_spill] sm:$0xff] }
 0x455   : > { %v3651_v53 = vpop.f32.mrb[176].mxu0  ;;  %v4782_v41 = vpop.f32.mrb[176].mxu1 }
 0x456   : > { %5969 = vst.msk [vmem:[%s9958_s28 + $0x170] sm:$0xf] %vm5876_vm4, %v6811_v14  ;;  %v6812_v42 = vpack.c.bf16 %v5359_v63, %v5359_v63  ;;  %v5109_v8 = vmax.f32 %v3651_v53, %v4782_v41  ;;  %v7813_v9 = vpop.f32.mrb[177].mxu0  ;;  %v8067_v49 = vpop.f32.mrb[177].mxu1  ;;  %v11614_v14 = vld [vmem:[#allocation153_spill] sm:$0xff] }
 0x457   : > { %v3654_v50 = vpop.f32.mrb[178].mxu0  ;;  %v4785_v19 = vpop.f32.mrb[178].mxu1  ;;  %v11615_v63 = vmax.f32 %v11613_v13, %v11614_v14 }
 0x458   : > { %5970 = vst.msk [vmem:[%s9958_s28 + $0x174] sm:$0xf] %vm5876_vm4, %v6812_v42  ;;  %v5231_v35 = vmax.f32 %v11600_v21, %v5109_v8  ;;  %v5110_v36 = vmax.f32 %v3654_v50, %v4785_v19  ;;  %v7814_v56 = vpop.f32.mrb[179].mxu0  ;;  %v8068_v57 = vpop.f32.mrb[179].mxu1 }
 0x45a   : > { %v5360_v40 = vadd.f32 %v10780_v33, %v5231_v35  ;;  %v5232_v5 = vmax.f32 %v11603_v55, %v5110_v36  ;;  %v11616_v35 = vld [vmem:[#allocation154_spill] sm:$0xff]  ;;  %v11617_v36 = vld [vmem:[#allocation155_spill] sm:$0xff] }
 0x45b   : > { %v11618_v56 = vmax.f32 %v11616_v35, %v11617_v36 }
 0x45c   : > { %v6813_v4 = vpack.c.bf16 %v5360_v40, %v5360_v40  ;;  %v5361_v51 = vadd.f32 %v10780_v33, %v5232_v5  ;;  %v11619_v5 = vld [vmem:[#allocation156_spill] sm:$0xff] }
 0x45d   : > { %v3659_v31 = vpop.f32.mrb[180].mxu0  ;;  %v4790_v54 = vpop.f32.mrb[180].mxu1 }
 0x45e   : > { %5971 = vst.msk [vmem:[%s9958_s28 + $0x178] sm:$0xf] %vm5876_vm4, %v6813_v4  ;;  %v6814_v15 = vpack.c.bf16 %v5361_v51, %v5361_v51  ;;  %v5111_v34 = vmax.f32 %v3659_v31, %v4790_v54  ;;  %v7817_v58 = vpop.f32.mrb[181].mxu0  ;;  %v8071_v27 = vpop.f32.mrb[181].mxu1  ;;  %v11620_v4 = vld [vmem:[#allocation157_spill] sm:$0xff] }
 0x45f   : > { %v3662_v37 = vpop.f32.mrb[182].mxu0  ;;  %v4793_v38 = vpop.f32.mrb[182].mxu1  ;;  %v11621_v51 = vmax.f32 %v11619_v5, %v11620_v4 }
 0x460   : > { %5972 = vst.msk [vmem:[%s9958_s28 + $0x17c] sm:$0xf] %vm5876_vm4, %v6814_v15  ;;  %v5233_v47 = vmax.f32 %v11606_v43, %v5111_v34  ;;  %v5112_v44 = vmax.f32 %v3662_v37, %v4793_v38  ;;  %v7818_v45 = vpop.f32.mrb[183].mxu0  ;;  %v8072_v59 = vpop.f32.mrb[183].mxu1 }
 0x462   : > { %v5362_v60 = vadd.f32 %v10780_v33, %v5233_v47  ;;  %v5234_v62 = vmax.f32 %v11609_v61, %v5112_v44  ;;  %v11622_v47 = vld [vmem:[#allocation158_spill] sm:$0xff]  ;;  %v11623_v44 = vld [vmem:[#allocation159_spill] sm:$0xff] }
 0x463   : > { %v11624_v45 = vmax.f32 %v11622_v47, %v11623_v44 }
 0x464   : > { %v6815_v1 = vpack.c.bf16 %v5362_v60, %v5362_v60  ;;  %v5363_v48 = vadd.f32 %v10780_v33, %v5234_v62  ;;  %v11625_v62 = vld [vmem:[#allocation160_spill] sm:$0xff] }
 0x465   : > { %v3667_v30 = vpop.f32.mrb[184].mxu0  ;;  %v4798_v3 = vpop.f32.mrb[184].mxu1 }
 0x466   : > { %5973 = vst.msk [vmem:[%s9958_s28 + $0x180] sm:$0xf] %vm5876_vm4, %v6815_v1  ;;  %v6816_v11 = vpack.c.bf16 %v5363_v48, %v5363_v48  ;;  %v5113_v12 = vmax.f32 %v3667_v30, %v4798_v3  ;;  %v7821_v39 = vpop.f32.mrb[185].mxu0  ;;  %v8075_v22 = vpop.f32.mrb[185].mxu1  ;;  %v11626_v1 = vld [vmem:[#allocation161_spill] sm:$0xff] }
 0x467   : > { %v3670_v25 = vpop.f32.mrb[186].mxu0  ;;  %v4801_v26 = vpop.f32.mrb[186].mxu1  ;;  %v11627_v48 = vmax.f32 %v11625_v62, %v11626_v1 }
 0x468   : > { %5974 = vst.msk [vmem:[%s9958_s28 + $0x184] sm:$0xf] %vm5876_vm4, %v6816_v11  ;;  %v5235_v16 = vmax.f32 %v11612_v32, %v5113_v12  ;;  %v5114_v7 = vmax.f32 %v3670_v25, %v4801_v26  ;;  %v7822_v17 = vpop.f32.mrb[187].mxu0  ;;  %v8076_v52 = vpop.f32.mrb[187].mxu1 }
 0x46a   : > { %v5364_v18 = vadd.f32 %v10780_v33, %v5235_v16  ;;  %v5236_v53 = vmax.f32 %v11615_v63, %v5114_v7  ;;  %v11628_v16 = vld [vmem:[#allocation162_spill] sm:$0xff]  ;;  %v11629_v7 = vld [vmem:[#allocation163_spill] sm:$0xff] }
 0x46b   : > { %v11630_v17 = vmax.f32 %v11628_v16, %v11629_v7 }
 0x46c   : > { %v6817_v41 = vpack.c.bf16 %v5364_v18, %v5364_v18  ;;  %v5365_v42 = vadd.f32 %v10780_v33, %v5236_v53  ;;  %v11631_v53 = vld [vmem:[#allocation164_spill] sm:$0xff] }
 0x46d   : > { %v3675_v8 = vpop.f32.mrb[188].mxu0  ;;  %v4806_v9 = vpop.f32.mrb[188].mxu1 }
 0x46e   : > { %5975 = vst.msk [vmem:[%s9958_s28 + $0x188] sm:$0xf] %vm5876_vm4, %v6817_v41  ;;  %v6818_v49 = vpack.c.bf16 %v5365_v42, %v5365_v42  ;;  %v5115_v50 = vmax.f32 %v3675_v8, %v4806_v9  ;;  %v7825_v19 = vpop.f32.mrb[189].mxu0  ;;  %v8079_v23 = vpop.f32.mrb[189].mxu1  ;;  %v11632_v41 = vld [vmem:[#allocation165_spill] sm:$0xff] }
 0x46f   : > { %v3678_v20 = vpop.f32.mrb[190].mxu0  ;;  %v4809_v21 = vpop.f32.mrb[190].mxu1  ;;  %v11633_v42 = vmax.f32 %v11631_v53, %v11632_v41 }
 0x470   : > { %5976 = vst.msk [vmem:[%s9958_s28 + $0x18c] sm:$0xf] %vm5876_vm4, %v6818_v49  ;;  %v5237_v57 = vmax.f32 %v11618_v56, %v5115_v50  ;;  %v5116_v40 = vmax.f32 %v3678_v20, %v4809_v21  ;;  %v7826_v6 = vpop.f32.mrb[191].mxu0  ;;  %v8080_v24 = vpop.f32.mrb[191].mxu1 }
 0x472   : > { %v5366_v55 = vadd.f32 %v10780_v33, %v5237_v57  ;;  %v5238_v31 = vmax.f32 %v11621_v51, %v5116_v40  ;;  %v11634_v57 = vld [vmem:[#allocation166_spill] sm:$0xff]  ;;  %v11635_v40 = vld [vmem:[#allocation167_spill] sm:$0xff] }
 0x473   : > { %v11636_v6 = vmax.f32 %v11634_v57, %v11635_v40 }
 0x474   : > { %v6819_v54 = vpack.c.bf16 %v5366_v55, %v5366_v55  ;;  %v5367_v15 = vadd.f32 %v10780_v33, %v5238_v31  ;;  %v11637_v31 = vld [vmem:[#allocation168_spill] sm:$0xff] }
 0x475   : > { %v3683_v34 = vpop.f32.mrb[192].mxu0  ;;  %v4814_v58 = vpop.f32.mrb[192].mxu1 }
 0x476   : > { %5977 = vst.msk [vmem:[%s9958_s28 + $0x190] sm:$0xf] %vm5876_vm4, %v6819_v54  ;;  %v6820_v27 = vpack.c.bf16 %v5367_v15, %v5367_v15  ;;  %v5117_v37 = vmax.f32 %v3683_v34, %v4814_v58  ;;  %v7829_v38 = vpop.f32.mrb[193].mxu0  ;;  %v8083_v10 = vpop.f32.mrb[193].mxu1  ;;  %v11638_v54 = vld [vmem:[#allocation169_spill] sm:$0xff] }
 0x477   : > { %v3686_v46 = vpop.f32.mrb[194].mxu0  ;;  %v4817_v43 = vpop.f32.mrb[194].mxu1  ;;  %v11639_v15 = vmax.f32 %v11637_v31, %v11638_v54 }
 0x478   : > { %5978 = vst.msk [vmem:[%s9958_s28 + $0x194] sm:$0xf] %vm5876_vm4, %v6820_v27  ;;  %v5239_v59 = vmax.f32 %v11624_v45, %v5117_v37  ;;  %v5118_v60 = vmax.f32 %v3686_v46, %v4817_v43  ;;  %v7830_v28 = vpop.f32.mrb[195].mxu0  ;;  %v8084_v29 = vpop.f32.mrb[195].mxu1 }
 0x47a   : > { %v5368_v61 = vadd.f32 %v10780_v33, %v5239_v59  ;;  %v5240_v30 = vmax.f32 %v11627_v48, %v5118_v60  ;;  %v11640_v59 = vld [vmem:[#allocation170_spill] sm:$0xff]  ;;  %v11641_v60 = vld [vmem:[#allocation171_spill] sm:$0xff] }
 0x47b   : > { %v11642_v28 = vmax.f32 %v11640_v59, %v11641_v60 }
 0x47c   : > { %v6821_v3 = vpack.c.bf16 %v5368_v61, %v5368_v61  ;;  %v5369_v11 = vadd.f32 %v10780_v33, %v5240_v30  ;;  %v11643_v30 = vld [vmem:[#allocation172_spill] sm:$0xff] }
 0x47d   : > { %v3691_v12 = vpop.f32.mrb[196].mxu0  ;;  %v4822_v39 = vpop.f32.mrb[196].mxu1 }
 0x47e   : > { %5979 = vst.msk [vmem:[%s9958_s28 + $0x198] sm:$0xf] %vm5876_vm4, %v6821_v3  ;;  %v6822_v22 = vpack.c.bf16 %v5369_v11, %v5369_v11  ;;  %v5119_v25 = vmax.f32 %v3691_v12, %v4822_v39  ;;  %v7833_v26 = vpop.f32.mrb[197].mxu0  ;;  %v8087_v0 = vpop.f32.mrb[197].mxu1  ;;  %v11644_v3 = vld [vmem:[#allocation173_spill] sm:$0xff] }
 0x47f   : > { %v3694_v2 = vpop.f32.mrb[198].mxu0  ;;  %v4825_v32 = vpop.f32.mrb[198].mxu1  ;;  %v11645_v11 = vmax.f32 %v11643_v30, %v11644_v3 }
 0x480   : > { %5980 = vst.msk [vmem:[%s9958_s28 + $0x19c] sm:$0xf] %vm5876_vm4, %v6822_v22  ;;  %v5241_v52 = vmax.f32 %v11630_v17, %v5119_v25  ;;  %v5120_v18 = vmax.f32 %v3694_v2, %v4825_v32  ;;  %v7834_v13 = vpop.f32.mrb[199].mxu0  ;;  %v8088_v14 = vpop.f32.mrb[199].mxu1 }
 0x482   : > { %v5370_v63 = vadd.f32 %v10780_v33, %v5241_v52  ;;  %v5242_v8 = vmax.f32 %v11633_v42, %v5120_v18  ;;  %v11646_v52 = vld [vmem:[#allocation174_spill] sm:$0xff]  ;;  %v11647_v18 = vld [vmem:[#allocation175_spill] sm:$0xff] }
 0x483   : > { %v11648_v13 = vmax.f32 %v11646_v52, %v11647_v18 }
 0x484   : > { %v6823_v9 = vpack.c.bf16 %v5370_v63, %v5370_v63  ;;  %v5371_v49 = vadd.f32 %v10780_v33, %v5242_v8  ;;  %v11649_v8 = vld [vmem:[#allocation176_spill] sm:$0xff] }
 0x485   : > { %v3699_v50 = vpop.f32.mrb[200].mxu0  ;;  %v4830_v19 = vpop.f32.mrb[200].mxu1 }
 0x486   : > { %5981 = vst.msk [vmem:[%s9958_s28 + $0x1a0] sm:$0xf] %vm5876_vm4, %v6823_v9  ;;  %v6824_v23 = vpack.c.bf16 %v5371_v49, %v5371_v49  ;;  %v5121_v20 = vmax.f32 %v3699_v50, %v4830_v19  ;;  %v7837_v21 = vpop.f32.mrb[201].mxu0  ;;  %v8091_v35 = vpop.f32.mrb[201].mxu1  ;;  %v11650_v9 = vld [vmem:[#allocation177_spill] sm:$0xff] }
 0x487   : > { %v3702_v36 = vpop.f32.mrb[202].mxu0  ;;  %v4833_v56 = vpop.f32.mrb[202].mxu1  ;;  %v11651_v49 = vmax.f32 %v11649_v8, %v11650_v9 }
 0x488   : > { %5982 = vst.msk [vmem:[%s9958_s28 + $0x1a4] sm:$0xf] %vm5876_vm4, %v6824_v23  ;;  %v5243_v24 = vmax.f32 %v11636_v6, %v5121_v20  ;;  %v5122_v55 = vmax.f32 %v3702_v36, %v4833_v56  ;;  %v7838_v5 = vpop.f32.mrb[203].mxu0  ;;  %v8092_v4 = vpop.f32.mrb[203].mxu1 }
 0x48a   : > { %v5372_v51 = vadd.f32 %v10780_v33, %v5243_v24  ;;  %v5244_v34 = vmax.f32 %v11639_v15, %v5122_v55  ;;  %v11652_v24 = vld [vmem:[#allocation178_spill] sm:$0xff]  ;;  %v11653_v55 = vld [vmem:[#allocation179_spill] sm:$0xff] }
 0x48b   : > { %v11654_v5 = vmax.f32 %v11652_v24, %v11653_v55 }
 0x48c   : > { %v6825_v58 = vpack.c.bf16 %v5372_v51, %v5372_v51  ;;  %v5373_v27 = vadd.f32 %v10780_v33, %v5244_v34  ;;  %v11655_v34 = vld [vmem:[#allocation180_spill] sm:$0xff] }
 0x48d   : > { %v3707_v37 = vpop.f32.mrb[204].mxu0  ;;  %v4838_v38 = vpop.f32.mrb[204].mxu1 }
 0x48e   : > { %5983 = vst.msk [vmem:[%s9958_s28 + $0x1a8] sm:$0xf] %vm5876_vm4, %v6825_v58  ;;  %v6826_v10 = vpack.c.bf16 %v5373_v27, %v5373_v27  ;;  %v5123_v46 = vmax.f32 %v3707_v37, %v4838_v38  ;;  %v7841_v43 = vpop.f32.mrb[205].mxu0  ;;  %v8095_v47 = vpop.f32.mrb[205].mxu1  ;;  %v11656_v58 = vld [vmem:[#allocation181_spill] sm:$0xff] }
 0x48f   : > { %v3710_v44 = vpop.f32.mrb[206].mxu0  ;;  %v4841_v45 = vpop.f32.mrb[206].mxu1  ;;  %v11657_v27 = vmax.f32 %v11655_v34, %v11656_v58 }
 0x490   : > { %5984 = vst.msk [vmem:[%s9958_s28 + $0x1ac] sm:$0xf] %vm5876_vm4, %v6826_v10  ;;  %v5245_v29 = vmax.f32 %v11642_v28, %v5123_v46  ;;  %v5124_v61 = vmax.f32 %v3710_v44, %v4841_v45  ;;  %v7842_v62 = vpop.f32.mrb[207].mxu0  ;;  %v8096_v1 = vpop.f32.mrb[207].mxu1 }
 0x492   : > { %v5374_v48 = vadd.f32 %v10780_v33, %v5245_v29  ;;  %v5246_v12 = vmax.f32 %v11645_v11, %v5124_v61  ;;  %v11658_v29 = vld [vmem:[#allocation182_spill] sm:$0xff]  ;;  %v11659_v61 = vld [vmem:[#allocation183_spill] sm:$0xff] }
 0x493   : > { %v11660_v62 = vmax.f32 %v11658_v29, %v11659_v61 }
 0x494   : > { %v6827_v39 = vpack.c.bf16 %v5374_v48, %v5374_v48  ;;  %v5375_v22 = vadd.f32 %v10780_v33, %v5246_v12  ;;  %v11661_v12 = vld [vmem:[#allocation184_spill] sm:$0xff] }
 0x495   : > { %v3715_v25 = vpop.f32.mrb[208].mxu0  ;;  %v4846_v26 = vpop.f32.mrb[208].mxu1 }
 0x496   : > { %5985 = vst.msk [vmem:[%s9958_s28 + $0x1b0] sm:$0xf] %vm5876_vm4, %v6827_v39  ;;  %v6828_v0 = vpack.c.bf16 %v5375_v22, %v5375_v22  ;;  %v5125_v2 = vmax.f32 %v3715_v25, %v4846_v26  ;;  %v7845_v32 = vpop.f32.mrb[209].mxu0  ;;  %v8099_v16 = vpop.f32.mrb[209].mxu1  ;;  %v11662_v39 = vld [vmem:[#allocation185_spill] sm:$0xff] }
 0x497   : > { %v3718_v7 = vpop.f32.mrb[210].mxu0  ;;  %v4849_v17 = vpop.f32.mrb[210].mxu1  ;;  %v11663_v22 = vmax.f32 %v11661_v12, %v11662_v39 }
 0x498   : > { %5986 = vst.msk [vmem:[%s9958_s28 + $0x1b4] sm:$0xf] %vm5876_vm4, %v6828_v0  ;;  %v5247_v14 = vmax.f32 %v11648_v13, %v5125_v2  ;;  %v5126_v63 = vmax.f32 %v3718_v7, %v4849_v17  ;;  %v7846_v53 = vpop.f32.mrb[211].mxu0  ;;  %v8100_v41 = vpop.f32.mrb[211].mxu1 }
 0x49a   : > { %v5376_v42 = vadd.f32 %v10780_v33, %v5247_v14  ;;  %v5248_v50 = vmax.f32 %v11651_v49, %v5126_v63  ;;  %v11664_v14 = vld [vmem:[#allocation186_spill] sm:$0xff]  ;;  %v11665_v63 = vld [vmem:[#allocation187_spill] sm:$0xff] }
 0x49b   : > { %v11666_v53 = vmax.f32 %v11664_v14, %v11665_v63 }
 0x49c   : > { %v6829_v19 = vpack.c.bf16 %v5376_v42, %v5376_v42  ;;  %v5377_v23 = vadd.f32 %v10780_v33, %v5248_v50  ;;  %v11667_v50 = vld [vmem:[#allocation188_spill] sm:$0xff] }
 0x49d   : > { %v3723_v20 = vpop.f32.mrb[212].mxu0  ;;  %v4854_v21 = vpop.f32.mrb[212].mxu1 }
 0x49e   : > { %5987 = vst.msk [vmem:[%s9958_s28 + $0x1b8] sm:$0xf] %vm5876_vm4, %v6829_v19  ;;  %v6830_v35 = vpack.c.bf16 %v5377_v23, %v5377_v23  ;;  %v5127_v36 = vmax.f32 %v3723_v20, %v4854_v21  ;;  %v7849_v56 = vpop.f32.mrb[213].mxu0  ;;  %v8103_v57 = vpop.f32.mrb[213].mxu1  ;;  %v11668_v19 = vld [vmem:[#allocation189_spill] sm:$0xff] }
 0x49f   : > { %v3726_v40 = vpop.f32.mrb[214].mxu0  ;;  %v4857_v6 = vpop.f32.mrb[214].mxu1  ;;  %v11669_v23 = vmax.f32 %v11667_v50, %v11668_v19 }
 0x4a0   : > { %5988 = vst.msk [vmem:[%s9958_s28 + $0x1bc] sm:$0xf] %vm5876_vm4, %v6830_v35  ;;  %v5249_v4 = vmax.f32 %v11654_v5, %v5127_v36  ;;  %v5128_v51 = vmax.f32 %v3726_v40, %v4857_v6  ;;  %v7850_v31 = vpop.f32.mrb[215].mxu0  ;;  %v8104_v54 = vpop.f32.mrb[215].mxu1 }
 0x4a2   : > { %v5378_v15 = vadd.f32 %v10780_v33, %v5249_v4  ;;  %v5250_v37 = vmax.f32 %v11657_v27, %v5128_v51  ;;  %v11670_v4 = vld [vmem:[#allocation190_spill] sm:$0xff]  ;;  %v11671_v51 = vld [vmem:[#allocation191_spill] sm:$0xff] }
 0x4a3   : > { %v11672_v31 = vmax.f32 %v11670_v4, %v11671_v51 }
 0x4a4   : > { %v6831_v38 = vpack.c.bf16 %v5378_v15, %v5378_v15  ;;  %v5379_v10 = vadd.f32 %v10780_v33, %v5250_v37  ;;  %v11673_v37 = vld [vmem:[#allocation192_spill] sm:$0xff] }
 0x4a5   : > { %v3731_v46 = vpop.f32.mrb[216].mxu0  ;;  %v4862_v43 = vpop.f32.mrb[216].mxu1 }
 0x4a6   : > { %5989 = vst.msk [vmem:[%s9958_s28 + $0x1c0] sm:$0xf] %vm5876_vm4, %v6831_v38  ;;  %v6832_v47 = vpack.c.bf16 %v5379_v10, %v5379_v10  ;;  %v5129_v44 = vmax.f32 %v3731_v46, %v4862_v43  ;;  %v7853_v45 = vpop.f32.mrb[217].mxu0  ;;  %v8107_v59 = vpop.f32.mrb[217].mxu1  ;;  %v11674_v38 = vld [vmem:[#allocation193_spill] sm:$0xff] }
 0x4a7   : > { %v3734_v60 = vpop.f32.mrb[218].mxu0  ;;  %v4865_v28 = vpop.f32.mrb[218].mxu1  ;;  %v11675_v10 = vmax.f32 %v11673_v37, %v11674_v38 }
 0x4a8   : > { %5990 = vst.msk [vmem:[%s9958_s28 + $0x1c4] sm:$0xf] %vm5876_vm4, %v6832_v47  ;;  %v5251_v1 = vmax.f32 %v11660_v62, %v5129_v44  ;;  %v5130_v48 = vmax.f32 %v3734_v60, %v4865_v28  ;;  %v7854_v30 = vpop.f32.mrb[219].mxu0  ;;  %v8108_v3 = vpop.f32.mrb[219].mxu1 }
 0x4aa   : > { %v5380_v11 = vadd.f32 %v10780_v33, %v5251_v1  ;;  %v5252_v25 = vmax.f32 %v11663_v22, %v5130_v48  ;;  %v11676_v1 = vld [vmem:[#allocation194_spill] sm:$0xff]  ;;  %v11677_v48 = vld [vmem:[#allocation195_spill] sm:$0xff] }
 0x4ab   : > { %v11678_v30 = vmax.f32 %v11676_v1, %v11677_v48 }
 0x4ac   : > { %v6833_v26 = vpack.c.bf16 %v5380_v11, %v5380_v11  ;;  %v5381_v0 = vadd.f32 %v10780_v33, %v5252_v25  ;;  %v11679_v25 = vld [vmem:[#allocation196_spill] sm:$0xff] }
 0x4ad   : > { %v3739_v2 = vpop.f32.mrb[220].mxu0  ;;  %v4870_v32 = vpop.f32.mrb[220].mxu1 }
 0x4ae   : > { %5991 = vst.msk [vmem:[%s9958_s28 + $0x1c8] sm:$0xf] %vm5876_vm4, %v6833_v26  ;;  %v6834_v16 = vpack.c.bf16 %v5381_v0, %v5381_v0  ;;  %v5131_v7 = vmax.f32 %v3739_v2, %v4870_v32  ;;  %v7857_v17 = vpop.f32.mrb[221].mxu0  ;;  %v8111_v52 = vpop.f32.mrb[221].mxu1  ;;  %v11680_v26 = vld [vmem:[#allocation197_spill] sm:$0xff] }
 0x4af   : > { %v3742_v18 = vpop.f32.mrb[222].mxu0  ;;  %v4873_v13 = vpop.f32.mrb[222].mxu1  ;;  %v11681_v0 = vmax.f32 %v11679_v25, %v11680_v26 }
 0x4b0   : > { %5992 = vst.msk [vmem:[%s9958_s28 + $0x1cc] sm:$0xf] %vm5876_vm4, %v6834_v16  ;;  %v5253_v41 = vmax.f32 %v11666_v53, %v5131_v7  ;;  %v5132_v42 = vmax.f32 %v3742_v18, %v4873_v13  ;;  %v7858_v8 = vpop.f32.mrb[223].mxu0  ;;  %v8112_v9 = vpop.f32.mrb[223].mxu1 }
 0x4b2   : > { %v5382_v49 = vadd.f32 %v10780_v33, %v5253_v41  ;;  %v5254_v20 = vmax.f32 %v11669_v23, %v5132_v42 }
 0x4b4   : > { %v6835_v21 = vpack.c.bf16 %v5382_v49, %v5382_v49  ;;  %v5383_v35 = vadd.f32 %v10780_v33, %v5254_v20 }
 0x4b5   : > { %v3747_v36 = vpop.f32.mrb[224].mxu0  ;;  %v4878_v56 = vpop.f32.mrb[224].mxu1 }
 0x4b6   : > { %5993 = vst.msk [vmem:[%s9958_s28 + $0x1d0] sm:$0xf] %vm5876_vm4, %v6835_v21  ;;  %v6836_v57 = vpack.c.bf16 %v5383_v35, %v5383_v35  ;;  %v5133_v40 = vmax.f32 %v3747_v36, %v4878_v56  ;;  %v7861_v6 = vpop.f32.mrb[225].mxu0  ;;  %v8115_v24 = vpop.f32.mrb[225].mxu1 }
 0x4b7   : > { %v3750_v55 = vpop.f32.mrb[226].mxu0  ;;  %v4881_v5 = vpop.f32.mrb[226].mxu1 }
 0x4b8   : > { %5994 = vst.msk [vmem:[%s9958_s28 + $0x1d4] sm:$0xf] %vm5876_vm4, %v6836_v57  ;;  %v5255_v54 = vmax.f32 %v11672_v31, %v5133_v40  ;;  %v5134_v15 = vmax.f32 %v3750_v55, %v4881_v5  ;;  %v7862_v34 = vpop.f32.mrb[227].mxu0  ;;  %v8116_v58 = vpop.f32.mrb[227].mxu1 }
 0x4ba   : > { %v5384_v27 = vadd.f32 %v10780_v33, %v5255_v54  ;;  %v5256_v46 = vmax.f32 %v11675_v10, %v5134_v15 }
 0x4bc   : > { %v6837_v43 = vpack.c.bf16 %v5384_v27, %v5384_v27  ;;  %v5385_v47 = vadd.f32 %v10780_v33, %v5256_v46 }
 0x4bd   : > { %v3755_v44 = vpop.f32.mrb[228].mxu0  ;;  %v4886_v45 = vpop.f32.mrb[228].mxu1 }
 0x4be   : > { %5995 = vst.msk [vmem:[%s9958_s28 + $0x1d8] sm:$0xf] %vm5876_vm4, %v6837_v43  ;;  %v6838_v59 = vpack.c.bf16 %v5385_v47, %v5385_v47  ;;  %v5135_v60 = vmax.f32 %v3755_v44, %v4886_v45  ;;  %v7865_v28 = vpop.f32.mrb[229].mxu0  ;;  %v8119_v29 = vpop.f32.mrb[229].mxu1 }
 0x4bf   : > { %v3758_v61 = vpop.f32.mrb[230].mxu0  ;;  %v4889_v62 = vpop.f32.mrb[230].mxu1 }
 0x4c0   : > { %5996 = vst.msk [vmem:[%s9958_s28 + $0x1dc] sm:$0xf] %vm5876_vm4, %v6838_v59  ;;  %v5257_v3 = vmax.f32 %v11678_v30, %v5135_v60  ;;  %v5136_v11 = vmax.f32 %v3758_v61, %v4889_v62  ;;  %v7866_v12 = vpop.f32.mrb[231].mxu0  ;;  %v8120_v39 = vpop.f32.mrb[231].mxu1 }
 0x4c2   : > { %v5386_v22 = vadd.f32 %v10780_v33, %v5257_v3  ;;  %v5258_v2 = vmax.f32 %v11681_v0, %v5136_v11 }
 0x4c4   : > { %v6839_v32 = vpack.c.bf16 %v5386_v22, %v5386_v22  ;;  %v5387_v16 = vadd.f32 %v10780_v33, %v5258_v2 }
 0x4c6   : > { %5997 = vst.msk [vmem:[%s9958_s28 + $0x1e0] sm:$0xf] %vm5876_vm4, %v6839_v32  ;;  %v6840_v7 = vpack.c.bf16 %v5387_v16, %v5387_v16 }
 0x4c8   : > { %5998 = vst.msk [vmem:[%s9958_s28 + $0x1e4] sm:$0xf] %vm5876_vm4, %v6840_v7 }
 0x4c9 PF: > { %s16_s21 = sadd.s32 1, %s8389_s21  }
 0x4ca   : > { %p13_p4 = scmp.ge.s32.totalorder %s16_s21, 8  }
 0x4cc   :  { %15 = sbr.rel (!%p13_p4) target bundleno = 1 (0x1), region = 83 }

// kernel: melanoma_forward.4
= control target key start
LH: loop header
LB: loop body
LE: loop exit
PB: predicated region body
PF: predicated region fallthrough
CT: control target
= control target key end

     0   :  { %v5277_v0 = vmov 0   ;;  %vm579_vm0 = vcmask 261120   ;;  %vm4093_vm1 = vcmask 519168   ;;  %s7602_s4 = inlined_call_operand.vmem [shape: bf16[288,64], index: 4, kind: input, shape index: {}]   ;;  %s7603_s0 = inlined_call_operand.vmem [shape: bf16[344,288], index: 0, kind: input, shape index: {}]   ;;  %s7604_s1 = inlined_call_operand.vmem [shape: bf16[344,288], index: 1, kind: input, shape index: {}]   ;;  %s7605_s2 = inlined_call_operand.vmem [shape: bf16[344,288], index: 2, kind: input, shape index: {}]   ;;  %s7606_s3 = inlined_call_operand.vmem [shape: bf16[344,288], index: 3, kind: input, shape index: {}]   ;;  %s7607_s5 = inlined_call_operand.vmem [shape: f32[1,64], index: 5, kind: input, shape index: {}]   ;;  %s7608_s6 = inlined_call_operand.vmem [shape: bf16[344,64], index: 6, kind: output, shape index: {}]  }
   0x1   :  { %646 = vmatprep.subr.bf16.mxu0 %v5277_v0  ;;  %v5317_v1 = vld [vmem:[%s7602_s4] sm:$0xff]   ;;  %v5328_v3 = vld [vmem:[%s7602_s4 + $0x8] sm:$0xff]   ;;  %v5347_v6 = vld [vmem:[%s7602_s4 + $0x10] sm:$0xff]  }
   0x2   :  { %v5322_v2 = vld [vmem:[%s7602_s4 + $0x80] sm:$0xff]   ;;  %647 = vmatpush1.bf16.msra.mxu0 %v5317_v1  ;;  %v5335_v4 = vld [vmem:[%s7602_s4 + $0x88] sm:$0xff]   ;;  %v5362_v9 = vld [vmem:[%s7602_s4 + $0x18] sm:$0xff]  }
   0x3   :  { %4694 = vmatprep.subr.bf16.mxu1 %v5322_v2  ;;  %648 = vmatprep.subr.bf16.mxu0 %v5277_v0  ;;  %v4895_v5 = vld [vmem:[%s7603_s0 + $0x8] ss:$12 sps:$4 sm:$0xff]   ;;  %v4897_v7 = vld [vmem:[%s7603_s0 + $0x20] ss:$12 sps:$4 sm:$0xff]   ;;  %v4899_v8 = vld [vmem:[%s7603_s0 + $0x38] ss:$12 sps:$4 sm:$0xff]  }
   0x4   :  { %4695 = vmatpush3.bf16.msra.mxu1 %v5322_v2  ;;  %4698 = vmatprep.mubr.msk.bf16.mxu1 %vm579_vm0, %v4895_v5  ;;  %v5373_v10 = vld [vmem:[%s7602_s4 + $0x20] sm:$0xff]   ;;  %v4901_v11 = vld [vmem:[%s7603_s0 + $0x50] ss:$12 sps:$4 sm:$0xff]   ;;  %v4903_v12 = vld [vmem:[%s7603_s0 + $0x68] ss:$12 sps:$4 sm:$0xff]  }
   0x5   :  { %4696 = vmatprep.subr.bf16.mxu1 %v5335_v4  ;;  %v5388_v13 = vld [vmem:[%s7602_s4 + $0x28] sm:$0xff]   ;;  %v5399_v14 = vld [vmem:[%s7602_s4 + $0x30] sm:$0xff]   ;;  %v4907_v16 = vld [vmem:[%s7603_s0 + $0x98] ss:$12 sps:$4 sm:$0xff]  }
   0x6   :  { %649 = vmatpush1.bf16.msra.mxu0 %v5328_v3  ;;  %v4905_v15 = vld [vmem:[%s7603_s0 + $0x80] ss:$12 sps:$4 sm:$0xff]   ;;  %v5414_v17 = vld [vmem:[%s7602_s4 + $0x38] sm:$0xff]   ;;  %v4911_v20 = vld [vmem:[%s7603_s0 + $0xc8] ss:$12 sps:$4 sm:$0xff]  }
   0x7   :  { %650 = vmatprep.subr.bf16.mxu0 %v5277_v0  ;;  %v5425_v18 = vld [vmem:[%s7602_s4 + $0x40] sm:$0xff]   ;;  %v4909_v19 = vld [vmem:[%s7603_s0 + $0xb0] ss:$12 sps:$4 sm:$0xff]   ;;  %v5443_v22 = vld [vmem:[%s7602_s4 + $0x48] sm:$0xff]  }
   0x8   :  { %4697 = vmatpush3.bf16.msra.mxu1 %v5335_v4  ;;  %v4925_v21 = vld [vmem:[%s7603_s0 + $0x4] ss:$12 sps:$4 sm:$0xff]   ;;  %v4913_v24 = vld [vmem:[%s7603_s0 + $0xe0] ss:$12 sps:$4 sm:$0xff]   ;;  %v5469_v26 = vld [vmem:[%s7602_s4 + $0x58] sm:$0xff]  }
   0x9   :  { %1539 = vmatprep.subr.bf16.mxu1 %v5277_v0  ;;  %678 = vmatprep.mubr.bf16.mxu0 %v4925_v21  ;;  %v5454_v23 = vld [vmem:[%s7602_s4 + $0x50] sm:$0xff]   ;;  %v4915_v25 = vld [vmem:[%s7603_s0 + $0xf8] ss:$12 sps:$4 sm:$0xff]   ;;  %v5495_v30 = vld [vmem:[%s7602_s4 + $0x68] sm:$0xff]  }
   0xa   :  { %651 = vmatpush1.bf16.msra.mxu0 %v5347_v6  ;;  %v5480_v27 = vld [vmem:[%s7602_s4 + $0x60] sm:$0xff]   ;;  %v4917_v28 = vld [vmem:[%s7603_s0 + $0x110] ss:$12 sps:$4 sm:$0xff]   ;;  %v4919_v29 = vld [vmem:[%s7603_s0 + $0x128] ss:$12 sps:$4 sm:$0xff]  }
   0xb   :  { %4699 = vmatmul.mubr.msk.bf16.vlgmr.msra.gmra.mrb[0].mxu1 %vm579_vm0, %v4897_v7  ;;  %652 = vmatprep.subr.bf16.mxu0 %v5277_v0  ;;  %v5506_v31 = vld [vmem:[%s7602_s4 + $0x70] sm:$0xff]   ;;  %v4921_v32 = vld [vmem:[%s7603_s0 + $0x140] ss:$12 sps:$4 sm:$0xff]   ;;  %v4926_v33 = vld [vmem:[%s7603_s0 + $0x158] ss:$12 sps:$4 sm:$0xff]  }
   0xc   :  { %1540 = vmatpush1.bf16.msra.mxu1 %v5317_v1  ;;  %4702 = vmatprep.mubr.msk.bf16.mxu1 %vm579_vm0, %v4899_v8  ;;  %v5521_v34 = vld [vmem:[%s7602_s4 + $0x78] sm:$0xff]   ;;  %v4923_v35 = vld [vmem:[%s7603_s0] ss:$12 sps:$4 sm:$0xff]   ;;  %v4931_v38 = vld [vmem:[%s7603_s0 + $0x188] ss:$12 sps:$4 sm:$0xff]  }
   0xd   :  { %1541 = vmatprep.subr.bf16.mxu1 %v5277_v0  ;;  %v4928_v36 = vld [vmem:[%s7603_s0 + $0x1c] ss:$12 sps:$4 sm:$0xff]   ;;  %v4930_v39 = vld [vmem:[%s7603_s0 + $0x18] ss:$12 sps:$4 sm:$0xff]   ;;  %v4933_v40 = vld [vmem:[%s7603_s0 + $0x34] ss:$12 sps:$4 sm:$0xff]  }
   0xe   :  { %653 = vmatpush1.bf16.msra.mxu0 %v5362_v9  ;;  %v4927_v37 = vld [vmem:[%s7603_s0 + $0x170] ss:$12 sps:$4 sm:$0xff]   ;;  %v4932_v41 = vld [vmem:[%s7603_s0 + $0x1a0] ss:$12 sps:$4 sm:$0xff]   ;;  %v4936_v42 = vld [vmem:[%s7603_s0 + $0x1b8] ss:$12 sps:$4 sm:$0xff]  }
   0xf   :  { %654 = vmatprep.subr.bf16.mxu0 %v5277_v0  ;;  %v4935_v43 = vld [vmem:[%s7603_s0 + $0x30] ss:$12 sps:$4 sm:$0xff]   ;;  %v4938_v44 = vld [vmem:[%s7603_s0 + $0x4c] ss:$12 sps:$4 sm:$0xff]   ;;  %v4941_v46 = vld [vmem:[%s7603_s0 + $0x1e8] ss:$12 sps:$4 sm:$0xff]  }
  0x10   :  { %1542 = vmatpush1.bf16.msra.mxu1 %v5328_v3  ;;  %v4937_v45 = vld [vmem:[%s7603_s0 + $0x1d0] ss:$12 sps:$4 sm:$0xff]   ;;  %v4940_v47 = vld [vmem:[%s7603_s0 + $0x48] ss:$12 sps:$4 sm:$0xff]   ;;  %v4942_v48 = vld [vmem:[%s7603_s0 + $0x200] ss:$0 sps:$4 sm:$0xff]  }
  0x11   :  { %1543 = vmatprep.subr.bf16.mxu1 %v5277_v0  ;;  %v4943_v49 = vld [vmem:[%s7603_s0 + $0x64] ss:$12 sps:$4 sm:$0xff]   ;;  %v4945_v51 = vld [vmem:[%s7603_s0 + $0x60] ss:$12 sps:$4 sm:$0xff]   ;;  %v4949_v52 = vld [vmem:[%s7603_s0 + $0x7c] ss:$12 sps:$4 sm:$0xff]  }
  0x12   :  { %655 = vmatpush1.bf16.msra.mxu0 %v5373_v10  ;;  %v4948_v50 = vld [vmem:[%s7604_s1 + $0x4] ss:$12 sps:$4 sm:$0xff]   ;;  %v4946_v53 = vld [vmem:[%s7604_s1] ss:$12 sps:$4 sm:$0xff]   ;;  %v4952_v54 = vld [vmem:[%s7604_s1 + $0x1c] ss:$12 sps:$4 sm:$0xff]  }
  0x13   :  { %4703 = vmatmul.mubr.msk.bf16.gmra.mrb[4].mxu1 %vm579_vm0, %v4901_v11  ;;  %656 = vmatprep.subr.bf16.mxu0 %v5277_v0  ;;  %v4951_v55 = vld [vmem:[%s7603_s0 + $0x78] ss:$12 sps:$4 sm:$0xff]   ;;  %v4955_v57 = vld [vmem:[%s7603_s0 + $0x94] ss:$12 sps:$4 sm:$0xff]   ;;  %v4957_v59 = vld [vmem:[%s7603_s0 + $0x90] ss:$12 sps:$4 sm:$0xff]  }
  0x14   :  { %4706 = vmatprep.mubr.msk.bf16.mxu1 %vm579_vm0, %v4903_v12  ;;  %1544 = vmatpush1.bf16.msra.mxu1 %v5347_v6  ;;  %v4954_v56 = vld [vmem:[%s7604_s1 + $0x18] ss:$12 sps:$4 sm:$0xff]   ;;  %v4958_v58 = vld [vmem:[%s7604_s1 + $0x34] ss:$12 sps:$4 sm:$0xff]   ;;  %v4960_v61 = vld [vmem:[%s7604_s1 + $0x30] ss:$12 sps:$4 sm:$0xff]  }
  0x15   :  { %1545 = vmatprep.subr.bf16.mxu1 %v5277_v0  ;;  %v4961_v60 = vld [vmem:[%s7603_s0 + $0xac] ss:$12 sps:$4 sm:$0xff]   ;;  %v4963_v63 = vld [vmem:[%s7603_s0 + $0xa8] ss:$12 sps:$4 sm:$0xff]  }
  0x16   :  { %657 = vmatpush1.bf16.msra.mxu0 %v5388_v13  ;;  %v4964_v62 = vld [vmem:[%s7604_s1 + $0x4c] ss:$12 sps:$4 sm:$0xff]   ;;  %v4976_v8 = vld [vmem:[%s7604_s1 + $0x7c] ss:$12 sps:$4 sm:$0xff]   ;;  %v4982_v12 = vld [vmem:[%s7604_s1 + $0x94] ss:$12 sps:$4 sm:$0xff]  }
  0x17   :  { %658 = vmatprep.subr.bf16.mxu0 %v5277_v0  ;;  %v4969_v5 = vld [vmem:[%s7603_s0 + $0xc0] ss:$12 sps:$4 sm:$0xff]   ;;  %v4978_v11 = vld [vmem:[%s7604_s1 + $0x78] ss:$12 sps:$4 sm:$0xff]  }
  0x18   :  { %1546 = vmatpush1.bf16.msra.mxu1 %v5362_v9  ;;  %v4972_v7 = vld [vmem:[%s7604_s1 + $0x60] ss:$12 sps:$4 sm:$0xff]  }
  0x19   :  { %1547 = vmatprep.subr.bf16.mxu1 %v5277_v0  ;;  %v4993_v21 = vld [vmem:[%s7603_s0 + $0x120] ss:$12 sps:$4 sm:$0xff]  }
  0x1a   :  { %659 = vmatpush1.bf16.msra.mxu0 %v5399_v14 }
  0x1b   :  { %4707 = vmatmul.mubr.msk.bf16.gmra.mrb[8].mxu1 %vm579_vm0, %v4905_v15  ;;  %660 = vmatprep.subr.bf16.mxu0 %v5277_v0  ;;  %v4984_v15 = vld [vmem:[%s7604_s1 + $0x90] ss:$12 sps:$4 sm:$0xff]  }
  0x1c   :  { %4710 = vmatprep.mubr.msk.bf16.mxu1 %vm579_vm0, %v4907_v16  ;;  %1548 = vmatpush1.bf16.msra.mxu1 %v5373_v10  ;;  %v4988_v16 = vld [vmem:[%s7604_s1 + $0xac] ss:$12 sps:$4 sm:$0xff]  }
  0x1d   :  { %1549 = vmatprep.subr.bf16.mxu1 %v5277_v0 }
  0x1e   :  { %661 = vmatpush1.bf16.msra.mxu0 %v5414_v17 }
  0x1f   :  { %662 = vmatprep.subr.bf16.mxu0 %v5277_v0 }
  0x20   :  { %1550 = vmatpush1.bf16.msra.mxu1 %v5388_v13 }
  0x21   :  { %1551 = vmatprep.subr.bf16.mxu1 %v5277_v0 }
  0x22   :  { %663 = vmatpush1.bf16.msra.mxu0 %v5425_v18 }
  0x23   :  { %4711 = vmatmul.mubr.msk.bf16.gmra.mrb[12].mxu1 %vm579_vm0, %v4909_v19  ;;  %664 = vmatprep.subr.bf16.mxu0 %v5277_v0  ;;  %v4990_v19 = vld [vmem:[%s7604_s1 + $0xa8] ss:$12 sps:$4 sm:$0xff]  }
  0x24   :  { %4714 = vmatprep.mubr.msk.bf16.mxu1 %vm579_vm0, %v4911_v20  ;;  %1552 = vmatpush1.bf16.msra.mxu1 %v5399_v14  ;;  %v4994_v20 = vld [vmem:[%s7604_s1 + $0xc4] ss:$12 sps:$4 sm:$0xff]  }
  0x25   :  { %1553 = vmatprep.subr.bf16.mxu1 %v5277_v0 }
  0x26   :  { %665 = vmatpush1.bf16.msra.mxu0 %v5443_v22 }
  0x27   :  { %666 = vmatprep.subr.bf16.mxu0 %v5277_v0 }
  0x28   :  { %1554 = vmatpush1.bf16.msra.mxu1 %v5414_v17 }
  0x29   :  { %1555 = vmatprep.subr.bf16.mxu1 %v5277_v0 }
  0x2a   :  { %667 = vmatpush1.bf16.msra.mxu0 %v5454_v23 }
  0x2b   :  { %4715 = vmatmul.mubr.msk.bf16.gmra.mrb[16].mxu1 %vm579_vm0, %v4913_v24  ;;  %668 = vmatprep.subr.bf16.mxu0 %v5277_v0  ;;  %v5000_v24 = vld [vmem:[%s7604_s1 + $0xdc] ss:$12 sps:$4 sm:$0xff]  }
  0x2c   :  { %4718 = vmatprep.mubr.msk.bf16.mxu1 %vm579_vm0, %v4915_v25  ;;  %1556 = vmatpush1.bf16.msra.mxu1 %v5425_v18  ;;  %v4999_v25 = vld [vmem:[%s7603_s0 + $0x138] ss:$12 sps:$4 sm:$0xff]  }
  0x2d   :  { %1557 = vmatprep.subr.bf16.mxu1 %v5277_v0 }
  0x2e   :  { %669 = vmatpush1.bf16.msra.mxu0 %v5469_v26 }
  0x2f   :  { %670 = vmatprep.subr.bf16.mxu0 %v5277_v0 }
  0x30   :  { %1558 = vmatpush1.bf16.msra.mxu1 %v5443_v22 }
  0x31   :  { %1559 = vmatprep.subr.bf16.mxu1 %v5277_v0 }
  0x32   :  { %671 = vmatpush1.bf16.msra.mxu0 %v5480_v27 }
  0x33   :  { %4719 = vmatmul.mubr.msk.bf16.gmra.mrb[20].mxu1 %vm579_vm0, %v4917_v28  ;;  %672 = vmatprep.subr.bf16.mxu0 %v5277_v0  ;;  %v5006_v28 = vld [vmem:[%s7604_s1 + $0xf4] ss:$12 sps:$4 sm:$0xff]  }
  0x34   :  { %4722 = vmatprep.mubr.msk.bf16.mxu1 %vm579_vm0, %v4919_v29  ;;  %1560 = vmatpush1.bf16.msra.mxu1 %v5454_v23  ;;  %v5009_v29 = vld [vmem:[%s7603_s0 + $0x16c] ss:$12 sps:$4 sm:$0xff]  }
  0x35   :  { %1561 = vmatprep.subr.bf16.mxu1 %v5277_v0 }
  0x36   :  { %673 = vmatpush1.bf16.msra.mxu0 %v5495_v30 }
  0x37   :  { %674 = vmatprep.subr.bf16.mxu0 %v5277_v0 }
  0x38   :  { %1562 = vmatpush1.bf16.msra.mxu1 %v5469_v26 }
  0x39   :  { %1563 = vmatprep.subr.bf16.mxu1 %v5277_v0 }
  0x3a   :  { %675 = vmatpush1.bf16.msra.mxu0 %v5506_v31 }
  0x3b   :  { %4723 = vmatmul.mubr.msk.bf16.gmra.mrb[24].mxu1 %vm579_vm0, %v4921_v32  ;;  %676 = vmatprep.subr.bf16.mxu0 %v5277_v0  ;;  %v5011_v32 = vld [vmem:[%s7603_s0 + $0x168] ss:$12 sps:$4 sm:$0xff]  }
  0x3c   :  { %4726 = vmatprep.mubr.msk.bf16.mxu1 %vm579_vm0, %v4926_v33  ;;  %1564 = vmatpush1.bf16.msra.mxu1 %v5480_v27  ;;  %v5015_v33 = vld [vmem:[%s7603_s0 + $0x184] ss:$12 sps:$4 sm:$0xff]  }
  0x3d   :  { %1565 = vmatprep.subr.bf16.mxu1 %v5277_v0 }
  0x3e   :  { %677 = vmatpush1.bf16.msra.mxu0 %v5521_v34 }
  0x3f   :  { %4742 = vmatprep.subr.bf16.mxu0 %v5322_v2 }
  0x40   :  { %1566 = vmatpush1.bf16.msra.mxu1 %v5495_v30 }
  0x41   :  { %679 = vmatmul.mubr.bf16.vlgmr.msra.gmra.mrb[0].mxu0 %v4923_v35  ;;  %1567 = vmatprep.subr.bf16.mxu1 %v5277_v0  ;;  %v5018_v35 = vld [vmem:[%s7604_s1 + $0x124] ss:$12 sps:$4 sm:$0xff]  }
  0x42   :  { %4743 = vmatpush3.bf16.msra.mxu0 %v5322_v2  ;;  %686 = vmatprep.mubr.bf16.mxu0 %v4928_v36  ;;  %v5017_v36 = vld [vmem:[%s7603_s0 + $0x180] ss:$12 sps:$4 sm:$0xff]  }
  0x43   :  { %4727 = vmatmul.mubr.msk.bf16.gmra.mrb[28].mxu1 %vm579_vm0, %v4927_v37  ;;  %4744 = vmatprep.subr.bf16.mxu0 %v5335_v4  ;;  %v5021_v37 = vld [vmem:[%s7603_s0 + $0x19c] ss:$12 sps:$4 sm:$0xff]  }
  0x44   :  { %4730 = vmatprep.mubr.msk.bf16.mxu1 %vm579_vm0, %v4931_v38  ;;  %1568 = vmatpush1.bf16.msra.mxu1 %v5506_v31  ;;  %v5020_v38 = vld [vmem:[%s7604_s1 + $0x120] ss:$12 sps:$4 sm:$0xff]  }
  0x45   :  { %1569 = vmatprep.subr.bf16.mxu1 %v5277_v0 }
  0x46   :  { %4745 = vmatpush3.bf16.msra.mxu0 %v5335_v4  ;;  %v4970_v4 = vld [vmem:[%s7604_s1 + $0x64] ss:$12 sps:$4 sm:$0xff]  }
  0x47   :  { %4790 = vmatprep.subr.bf16.mxu0 %v5322_v2 }
  0x48   :  { %1570 = vmatpush1.bf16.msra.mxu1 %v5521_v34 }
  0x49   :  { %687 = vmatmul.mubr.bf16.gmra.mrb[4].mxu0 %v4930_v39  ;;  %2432 = vmatprep.subr.bf16.mxu1 %v5277_v0  ;;  %v5024_v39 = vld [vmem:[%s7604_s1 + $0x13c] ss:$12 sps:$4 sm:$0xff]  }
  0x4a   :  { %694 = vmatprep.mubr.bf16.mxu0 %v4933_v40  ;;  %v5023_v40 = vld [vmem:[%s7603_s0 + $0x198] ss:$12 sps:$4 sm:$0xff]  }
  0x4b   :  { %4731 = vmatmul.mubr.msk.bf16.gmra.mrb[32].mxu1 %vm579_vm0, %v4932_v41  ;;  %v5027_v41 = vld [vmem:[%s7603_s0 + $0x1b4] ss:$12 sps:$4 sm:$0xff]  }
  0x4c   :  { %4734 = vmatprep.mubr.msk.bf16.mxu1 %vm579_vm0, %v4936_v42  ;;  %v5026_v42 = vld [vmem:[%s7604_s1 + $0x138] ss:$12 sps:$4 sm:$0xff]  }
  0x51   :  { %695 = vmatmul.mubr.bf16.gmra.mrb[8].mxu0 %v4935_v43  ;;  %v5030_v43 = vld [vmem:[%s7604_s1 + $0x154] ss:$12 sps:$4 sm:$0xff]  }
  0x52   :  { %702 = vmatprep.mubr.bf16.mxu0 %v4938_v44  ;;  %v5029_v44 = vld [vmem:[%s7603_s0 + $0x1b0] ss:$12 sps:$4 sm:$0xff]  }
  0x53   :  { %4735 = vmatmul.mubr.msk.bf16.gmra.mrb[36].mxu1 %vm579_vm0, %v4937_v45  ;;  %v5033_v45 = vld [vmem:[%s7603_s0 + $0x1cc] ss:$12 sps:$4 sm:$0xff]  }
  0x54   :  { %4738 = vmatprep.mubr.msk.bf16.mxu1 %vm579_vm0, %v4941_v46  ;;  %v5032_v46 = vld [vmem:[%s7604_s1 + $0x150] ss:$12 sps:$4 sm:$0xff]  }
  0x59   :  { %703 = vmatmul.mubr.bf16.gmra.mrb[12].mxu0 %v4940_v47  ;;  %v5036_v47 = vld [vmem:[%s7604_s1 + $0x16c] ss:$12 sps:$4 sm:$0xff]  }
  0x5a   :  { %710 = vmatprep.mubr.bf16.mxu0 %v4943_v49  ;;  %v5039_v49 = vld [vmem:[%s7603_s0 + $0x1e4] ss:$12 sps:$4 sm:$0xff]  }
  0x5b   :  { %4739 = vmatmul.mubr.msk.bf16.gmra.mrb[40].mxu1 %vm579_vm0, %v4942_v48  ;;  %v5035_v48 = vld [vmem:[%s7603_s0 + $0x1c8] ss:$12 sps:$4 sm:$0xff]  }
  0x5c   :  { %1571 = vmatprep.mubr.bf16.mxu1 %v4948_v50  ;;  %v5038_v50 = vld [vmem:[%s7604_s1 + $0x168] ss:$12 sps:$4 sm:$0xff]  }
  0x61   :  { %711 = vmatmul.mubr.bf16.gmra.mrb[16].mxu0 %v4945_v51  ;;  %v5042_v51 = vld [vmem:[%s7604_s1 + $0x184] ss:$12 sps:$4 sm:$0xff]  }
  0x62   :  { %718 = vmatprep.mubr.bf16.mxu0 %v4949_v52  ;;  %v144_v52 = vld [vmem:[%s7603_s0 + $0x1f8] sm:$0xff] }
  0x63   :  { %1572 = vmatmul.mubr.bf16.vlgmr.msra.gmra.mrb[44].mxu1 %v4946_v53  ;;  %v5041_v53 = vld [vmem:[%s7603_s0 + $0x1e0] ss:$12 sps:$4 sm:$0xff]  }
  0x64   :  { %2433 = vmatpush1.bf16.msra.mxu1 %v5317_v1  ;;  %1579 = vmatprep.mubr.bf16.mxu1 %v4952_v54  ;;  %v4967_v1 = vld [vmem:[%s7603_s0 + $0xc4] ss:$12 sps:$4 sm:$0xff]  }
  0x65   :  { %2434 = vmatprep.subr.bf16.mxu1 %v5277_v0 }
  0x68   :  { %2435 = vmatpush1.bf16.msra.mxu1 %v5328_v3  ;;  %v4966_v3 = vld [vmem:[%s7604_s1 + $0x48] ss:$12 sps:$4 sm:$0xff]  }
  0x69   :  { %719 = vmatmul.mubr.bf16.gmra.mrb[20].mxu0 %v4951_v55  ;;  %2436 = vmatprep.subr.bf16.mxu1 %v5277_v0  ;;  %v4205_v55 = vcombine.high %v144_v52, %v144_v52 }
  0x6a   :  { %726 = vmatprep.mubr.bf16.mxu0 %v4955_v57  ;;  %v5044_v57 = vld [vmem:[%s7604_s1 + $0x180] ss:$12 sps:$4 sm:$0xff]  }
  0x6b   :  { %1580 = vmatmul.mubr.bf16.gmra.mrb[48].mxu1 %v4954_v56 }
  0x6c   :  { %1587 = vmatprep.mubr.bf16.mxu1 %v4958_v58  ;;  %2437 = vmatpush1.bf16.msra.mxu1 %v5347_v6  ;;  %v4973_v6 = vld [vmem:[%s7603_s0 + $0xdc] ss:$12 sps:$4 sm:$0xff]  }
  0x6d   :  { %2438 = vmatprep.subr.bf16.mxu1 %v5277_v0 }
  0x70   :  { %2439 = vmatpush1.bf16.msra.mxu1 %v5362_v9  ;;  %v4975_v9 = vld [vmem:[%s7603_s0 + $0xd8] ss:$12 sps:$4 sm:$0xff]  }
  0x71   :  { %727 = vmatmul.mubr.bf16.gmra.mrb[24].mxu0 %v4957_v59  ;;  %2440 = vmatprep.subr.bf16.mxu1 %v5277_v0  ;;  %v5047_v59 = vld [vmem:[%s7604_s1 + $0x19c] ss:$12 sps:$4 sm:$0xff]  }
  0x72   :  { %734 = vmatprep.mubr.bf16.mxu0 %v4961_v60 }
  0x73   :  { %1588 = vmatmul.mubr.bf16.gmra.mrb[52].mxu1 %v4960_v61  ;;  %v4204_v61 = vcombine.low %v144_v52, %v144_v52 }
  0x74   :  { %1595 = vmatprep.mubr.bf16.mxu1 %v4964_v62  ;;  %2441 = vmatpush1.bf16.msra.mxu1 %v5373_v10  ;;  %v4979_v10 = vld [vmem:[%s7603_s0 + $0xf4] ss:$12 sps:$4 sm:$0xff]  }
  0x75   :  { %2442 = vmatprep.subr.bf16.mxu1 %v5277_v0 }
  0x78   :  { %2443 = vmatpush1.bf16.msra.mxu1 %v5388_v13  ;;  %v4981_v13 = vld [vmem:[%s7603_s0 + $0xf0] ss:$12 sps:$4 sm:$0xff]  }
  0x79   :  { %735 = vmatmul.mubr.bf16.gmra.mrb[28].mxu0 %v4963_v63  ;;  %2444 = vmatprep.subr.bf16.mxu1 %v5277_v0  ;;  %v5050_v63 = vld [vmem:[%s7604_s1 + $0x8] ss:$12 sps:$4 sm:$0xff]  }
  0x7a   :  { %742 = vmatprep.mubr.bf16.mxu0 %v4967_v1 }
  0x7b   :  { %1596 = vmatmul.mubr.bf16.gmra.mrb[56].mxu1 %v4966_v3  ;;  %v5049_v3 = vld [vmem:[%s7604_s1 + $0x198] ss:$12 sps:$4 sm:$0xff]  }
  0x7c   :  { %1603 = vmatprep.mubr.bf16.mxu1 %v4970_v4  ;;  %2445 = vmatpush1.bf16.msra.mxu1 %v5399_v14  ;;  %v4985_v14 = vld [vmem:[%s7603_s0 + $0x10c] ss:$12 sps:$4 sm:$0xff]  }
  0x7d   :  { %2446 = vmatprep.subr.bf16.mxu1 %v5277_v0 }
  0x80   :  { %2447 = vmatpush1.bf16.msra.mxu1 %v5414_v17  ;;  %v4987_v17 = vld [vmem:[%s7603_s0 + $0x108] ss:$12 sps:$4 sm:$0xff]  }
  0x81   :  { %743 = vmatmul.mubr.bf16.gmra.mrb[32].mxu0 %v4969_v5  ;;  %2448 = vmatprep.subr.bf16.mxu1 %v5277_v0  ;;  %v5051_v5 = vld [vmem:[%s7604_s1 + $0x1b4] ss:$12 sps:$4 sm:$0xff]  }
  0x82   :  { %750 = vmatprep.mubr.bf16.mxu0 %v4973_v6 }
  0x83   :  { %1604 = vmatmul.mubr.bf16.gmra.mrb[60].mxu1 %v4972_v7  ;;  %v5053_v7 = vld [vmem:[%s7604_s1 + $0x20] ss:$12 sps:$4 sm:$0xff]  }
  0x84   :  { %1611 = vmatprep.mubr.bf16.mxu1 %v4976_v8  ;;  %2449 = vmatpush1.bf16.msra.mxu1 %v5425_v18  ;;  %v4991_v18 = vld [vmem:[%s7603_s0 + $0x124] ss:$12 sps:$4 sm:$0xff]  }
  0x85   :  { %2450 = vmatprep.subr.bf16.mxu1 %v5277_v0 }
  0x88   :  { %2451 = vmatpush1.bf16.msra.mxu1 %v5443_v22  ;;  %v4997_v22 = vld [vmem:[%s7603_s0 + $0x13c] ss:$12 sps:$4 sm:$0xff]  }
  0x89   :  { %751 = vmatmul.mubr.bf16.gmra.mrb[36].mxu0 %v4975_v9  ;;  %2452 = vmatprep.subr.bf16.mxu1 %v5277_v0  ;;  %v5055_v9 = vld [vmem:[%s7604_s1 + $0x38] ss:$12 sps:$4 sm:$0xff]  }
  0x8a   :  { %758 = vmatprep.mubr.bf16.mxu0 %v4979_v10 }
  0x8b   :  { %1612 = vmatmul.mubr.bf16.gmra.mrb[64].mxu1 %v4978_v11  ;;  %v5054_v11 = vld [vmem:[%s7604_s1 + $0x1b0] ss:$12 sps:$4 sm:$0xff]  }
  0x8c   :  { %1619 = vmatprep.mubr.bf16.mxu1 %v4982_v12  ;;  %2453 = vmatpush1.bf16.msra.mxu1 %v5454_v23  ;;  %v4996_v23 = vld [vmem:[%s7604_s1 + $0xc0] ss:$12 sps:$4 sm:$0xff]  }
  0x8d   :  { %2454 = vmatprep.subr.bf16.mxu1 %v5277_v0 }
  0x90   :  { %2455 = vmatpush1.bf16.msra.mxu1 %v5469_v26  ;;  %v5003_v26 = vld [vmem:[%s7603_s0 + $0x154] ss:$12 sps:$4 sm:$0xff]  }
  0x91   :  { %759 = vmatmul.mubr.bf16.gmra.mrb[40].mxu0 %v4981_v13  ;;  %2456 = vmatprep.subr.bf16.mxu1 %v5277_v0  ;;  %v5056_v13 = vld [vmem:[%s7604_s1 + $0x1cc] ss:$12 sps:$4 sm:$0xff]  }
  0x92   :  { %766 = vmatprep.mubr.bf16.mxu0 %v4985_v14 }
  0x93   :  { %1620 = vmatmul.mubr.bf16.gmra.mrb[68].mxu1 %v4984_v15  ;;  %v5881_v15 = vld [vmem:[%s7602_s4 + $0x80] sm:$0xff]  }
  0x94   :  { %1627 = vmatprep.mubr.bf16.mxu1 %v4988_v16  ;;  %2457 = vmatpush1.bf16.msra.mxu1 %v5480_v27  ;;  %v5002_v27 = vld [vmem:[%s7604_s1 + $0xd8] ss:$12 sps:$4 sm:$0xff]   ;;  %v5888_v16 = vld [vmem:[%s7602_s4 + $0x88] sm:$0xff]  }
  0x95   :  { %2458 = vmatprep.subr.bf16.mxu1 %v5277_v0 }
  0x98   :  { %2459 = vmatpush1.bf16.msra.mxu1 %v5495_v30  ;;  %v5008_v30 = vld [vmem:[%s7604_s1 + $0xf0] ss:$12 sps:$4 sm:$0xff]  }
  0x99   :  { %767 = vmatmul.mubr.bf16.gmra.mrb[44].mxu0 %v4987_v17  ;;  %2460 = vmatprep.subr.bf16.mxu1 %v5277_v0  ;;  %v5058_v17 = vld [vmem:[%s7604_s1 + $0x50] ss:$12 sps:$4 sm:$0xff]  }
  0x9a   :  { %774 = vmatprep.mubr.bf16.mxu0 %v4991_v18 }
  0x9b   :  { %1628 = vmatmul.mubr.bf16.gmra.mrb[72].mxu1 %v4990_v19  ;;  %v5060_v19 = vld [vmem:[%s7604_s1 + $0x68] ss:$12 sps:$4 sm:$0xff]  }
  0x9c   :  { %1635 = vmatprep.mubr.bf16.mxu1 %v4994_v20  ;;  %2461 = vmatpush1.bf16.msra.mxu1 %v5506_v31  ;;  %v5012_v31 = vld [vmem:[%s7604_s1 + $0x10c] ss:$12 sps:$4 sm:$0xff]  }
  0x9d   :  { %2462 = vmatprep.subr.bf16.mxu1 %v5277_v0 }
  0xa0   :  { %2463 = vmatpush1.bf16.msra.mxu1 %v5521_v34  ;;  %v5014_v34 = vld [vmem:[%s7604_s1 + $0x108] ss:$12 sps:$4 sm:$0xff]  }
  0xa1   :  { %775 = vmatmul.mubr.bf16.gmra.mrb[48].mxu0 %v4993_v21  ;;  %4886 = vmatprep.subr.bf16.mxu1 %v5322_v2  ;;  %v5005_v2 = vld [vmem:[%s7603_s0 + $0x150] ss:$12 sps:$4 sm:$0xff]   ;;  %v5059_v21 = vld [vmem:[%s7604_s1 + $0x1c8] ss:$12 sps:$4 sm:$0xff]  }
  0xa2   :  { %782 = vmatprep.mubr.bf16.mxu0 %v4997_v22 }
  0xa3   :  { %1636 = vmatmul.mubr.bf16.gmra.mrb[76].mxu1 %v4996_v23  ;;  %v5061_v23 = vld [vmem:[%s7604_s1 + $0x1e4] ss:$12 sps:$4 sm:$0xff]  }
  0xa4   :  { %1643 = vmatprep.mubr.bf16.mxu1 %v5000_v24 }
  0xa9   :  { %783 = vmatmul.mubr.bf16.gmra.mrb[52].mxu0 %v4999_v25  ;;  %v5063_v25 = vld [vmem:[%s7604_s1 + $0x80] ss:$12 sps:$4 sm:$0xff]  }
  0xaa   :  { %790 = vmatprep.mubr.bf16.mxu0 %v5003_v26  ;;  %v1146_v26 = vld [vmem:[%s7604_s1 + $0x1f8] sm:$0xff] }
  0xab   :  { %1644 = vmatmul.mubr.bf16.gmra.mrb[80].mxu1 %v5002_v27 }
  0xac   :  { %1651 = vmatprep.mubr.bf16.mxu1 %v5006_v28  ;;  %v5065_v28 = vld [vmem:[%s7604_s1 + $0x98] ss:$12 sps:$4 sm:$0xff]  }
  0xb1   :  { %791 = vmatmul.mubr.bf16.gmra.mrb[56].mxu0 %v5005_v2 }
  0xb2   :  { %798 = vmatprep.mubr.bf16.mxu0 %v5009_v29  ;;  %v5064_v29 = vld [vmem:[%s7604_s1 + $0x1e0] ss:$12 sps:$4 sm:$0xff]  }
  0xb3   :  { %1652 = vmatmul.mubr.bf16.gmra.mrb[84].mxu1 %v5008_v30 }
  0xb4   :  { %1659 = vmatprep.mubr.bf16.mxu1 %v5012_v31  ;;  %v4311_v31 = vcombine.high %v1146_v26, %v1146_v26 }
  0xb9   :  { %799 = vmatmul.mubr.bf16.gmra.mrb[60].mxu0 %v5011_v32 }
  0xba   :  { %806 = vmatprep.mubr.bf16.mxu0 %v5015_v33  ;;  %v5067_v33 = vld [vmem:[%s7604_s1 + $0xb0] ss:$12 sps:$4 sm:$0xff]  }
  0xbb   :  { %1660 = vmatmul.mubr.bf16.gmra.mrb[88].mxu1 %v5014_v34 }
  0xbc   :  { %1667 = vmatprep.mubr.bf16.mxu1 %v5018_v35  ;;  %v5069_v35 = vld [vmem:[%s7604_s1 + $0xc8] ss:$12 sps:$4 sm:$0xff]  }
  0xc1   :  { %807 = vmatmul.mubr.bf16.gmra.mrb[64].mxu0 %v5017_v36 }
  0xc2   :  { %814 = vmatprep.mubr.bf16.mxu0 %v5021_v37  ;;  %v4310_v37 = vcombine.low %v1146_v26, %v1146_v26 }
  0xc3   :  { %1668 = vmatmul.mubr.bf16.gmra.mrb[92].mxu1 %v5020_v38 }
  0xc4   :  { %1675 = vmatprep.mubr.bf16.mxu1 %v5024_v39  ;;  %v5073_v39 = vld [vmem:[%s7605_s2 + $0x4] ss:$12 sps:$4 sm:$0xff]  }
  0xc9   :  { %815 = vmatmul.mubr.bf16.gmra.mrb[68].mxu0 %v5023_v40 }
  0xca   :  { %822 = vmatprep.mubr.bf16.mxu0 %v5027_v41  ;;  %v5070_v41 = vld [vmem:[%s7604_s1 + $0xe0] ss:$12 sps:$4 sm:$0xff]  }
  0xcb   :  { %1676 = vmatmul.mubr.bf16.gmra.mrb[96].mxu1 %v5026_v42  ;;  %v5074_v42 = vld [vmem:[%s7604_s1 + $0xf8] ss:$12 sps:$4 sm:$0xff]  }
  0xcc   :  { %1683 = vmatprep.mubr.bf16.mxu1 %v5030_v43 }
  0xd1   :  { %823 = vmatmul.mubr.bf16.gmra.mrb[72].mxu0 %v5029_v44 }
  0xd2   :  { %830 = vmatprep.mubr.bf16.mxu0 %v5033_v45  ;;  %v5071_v45 = vld [vmem:[%s7605_s2] ss:$12 sps:$4 sm:$0xff]  }
  0xd3   :  { %1684 = vmatmul.mubr.bf16.gmra.mrb[100].mxu1 %v5032_v46 }
  0xd4   :  { %1691 = vmatprep.mubr.bf16.mxu1 %v5036_v47  ;;  %v5076_v47 = vld [vmem:[%s7605_s2 + $0x1c] ss:$12 sps:$4 sm:$0xff]  }
  0xd9   :  { %831 = vmatmul.mubr.bf16.gmra.mrb[76].mxu0 %v5035_v48 }
  0xda   :  { %838 = vmatprep.mubr.bf16.mxu0 %v5039_v49  ;;  %v5075_v49 = vld [vmem:[%s7604_s1 + $0x110] ss:$12 sps:$4 sm:$0xff]  }
  0xdb   :  { %1692 = vmatmul.mubr.bf16.gmra.mrb[104].mxu1 %v5038_v50 }
  0xdc   :  { %1699 = vmatprep.mubr.bf16.mxu1 %v5042_v51  ;;  %v5079_v51 = vld [vmem:[%s7604_s1 + $0x128] ss:$12 sps:$4 sm:$0xff]  }
  0xde   :  { %v5825_v54 = vpop.f32.mrb[0].mxu1 }
  0xdf   :  { %v5827_v56 = vpop.f32.mrb[1].mxu1 }
  0xe0   :  { %v5832_v58 = vpop.f32.mrb[2].mxu1 }
  0xe1   :  { %839 = vmatmul.mubr.bf16.gmra.mrb[80].mxu0 %v5041_v53  ;;  %v5837_v60 = vpop.f32.mrb[3].mxu1 }
  0xe2   :  { %846 = vmatprep.mubr.bf16.mxu0 %v4205_v55 }
  0xe3   :  { %1700 = vmatmul.mubr.bf16.gmra.mrb[108].mxu1 %v5044_v57 }
  0xe4   :  { %1707 = vmatprep.mubr.bf16.mxu1 %v5047_v59 }
  0xe6   :  { %v5839_v62 = vpop.f32.mrb[4].mxu1 }
  0xe7   :  { %v5844_v1 = vpop.f32.mrb[5].mxu1 }
  0xe8   :  { %v5849_v4 = vpop.f32.mrb[6].mxu1 }
  0xe9   :  { %847 = vmatmul.mubr.bf16.gmra.mrb[84].mxu0 %v4204_v61  ;;  %v5854_v6 = vpop.f32.mrb[7].mxu1 }
  0xea   :  { %4746 = vmatprep.mubr.msk.bf16.mxu0 %vm579_vm0, %v5050_v63 }
  0xeb   :  { %1708 = vmatmul.mubr.bf16.gmra.mrb[112].mxu1 %v5049_v3  ;;  %v5078_v3 = vld [vmem:[%s7605_s2 + $0x18] ss:$12 sps:$4 sm:$0xff]  }
  0xec   :  { %1715 = vmatprep.mubr.bf16.mxu1 %v5051_v5 }
  0xee   :  { %v5860_v8 = vpop.f32.mrb[8].mxu1 }
  0xef   :  { %v5865_v10 = vpop.f32.mrb[9].mxu1 }
  0xf0   :  { %v5870_v12 = vpop.f32.mrb[10].mxu1 }
  0xf1   :  { %4747 = vmatmul.mubr.msk.bf16.vlgmr.msra.gmra.mrb[88].mxu0 %vm579_vm0, %v5053_v7  ;;  %v5876_v14 = vpop.f32.mrb[11].mxu1 }
  0xf2   :  { %4791 = vmatpush3.bf16.msra.mxu0 %v5881_v15  ;;  %4750 = vmatprep.mubr.msk.bf16.mxu0 %vm579_vm0, %v5055_v9 }
  0xf3   :  { %1716 = vmatmul.mubr.bf16.gmra.mrb[116].mxu1 %v5054_v11  ;;  %4792 = vmatprep.subr.bf16.mxu0 %v5888_v16  ;;  %v5084_v11 = vld [vmem:[%s7604_s1 + $0x158] ss:$12 sps:$4 sm:$0xff]  }
  0xf4   :  { %1723 = vmatprep.mubr.bf16.mxu1 %v5056_v13 }
  0xf6   :  { %v5894_v18 = vpop.f32.mrb[12].mxu1  ;;  %4793 = vmatpush3.bf16.msra.mxu0 %v5888_v16 }
  0xf7   :  { %v5900_v20 = vpop.f32.mrb[13].mxu1  ;;  %3325 = vmatprep.subr.bf16.mxu0 %v5277_v0 }
  0xf8   :  { %v5906_v22 = vpop.f32.mrb[14].mxu1 }
  0xf9   :  { %4751 = vmatmul.mubr.msk.bf16.gmra.mrb[92].mxu0 %vm579_vm0, %v5058_v17  ;;  %v5912_v24 = vpop.f32.mrb[15].mxu1 }
  0xfa   :  { %4754 = vmatprep.mubr.msk.bf16.mxu0 %vm579_vm0, %v5060_v19 }
  0xfb   :  { %1724 = vmatmul.mubr.bf16.gmra.mrb[120].mxu1 %v5059_v21 }
  0xfc   :  { %1731 = vmatprep.mubr.bf16.mxu1 %v5061_v23 }
  0xfe   :  { %v5921_v27 = vpop.f32.mrb[16].mxu1 }
  0xff   :  { %v5926_v2 = vpop.f32.mrb[17].mxu1 }
 0x100   :  { %v5931_v30 = vpop.f32.mrb[18].mxu1 }
 0x101   :  { %4755 = vmatmul.mubr.msk.bf16.gmra.mrb[96].mxu0 %vm579_vm0, %v5063_v25  ;;  %v5934_v32 = vpop.f32.mrb[19].mxu1  ;;  %v5083_v25 = vld [vmem:[%s7605_s2 + $0x30] ss:$12 sps:$4 sm:$0xff]  }
 0x102   :  { %4758 = vmatprep.mubr.msk.bf16.mxu0 %vm579_vm0, %v5065_v28 }
 0x103   :  { %1732 = vmatmul.mubr.bf16.gmra.mrb[124].mxu1 %v5064_v29 }
 0x104   :  { %1739 = vmatprep.mubr.bf16.mxu1 %v4311_v31  ;;  %v5089_v31 = vld [vmem:[%s7604_s1 + $0x188] ss:$12 sps:$4 sm:$0xff]  }
 0x106   :  { %v5940_v34 = vpop.f32.mrb[20].mxu1 }
 0x107   :  { %v5945_v36 = vpop.f32.mrb[21].mxu1 }
 0x108   :  { %v5947_v38 = vpop.f32.mrb[22].mxu1 }
 0x109   :  { %4759 = vmatmul.mubr.msk.bf16.gmra.mrb[100].mxu0 %vm579_vm0, %v5067_v33  ;;  %v5953_v40 = vpop.f32.mrb[23].mxu1 }
 0x10a   :  { %4762 = vmatprep.mubr.msk.bf16.mxu0 %vm579_vm0, %v5069_v35 }
 0x10b   :  { %1740 = vmatmul.mubr.bf16.gmra.mrb[128].mxu1 %v4310_v37 }
 0x10c   :  { %2464 = vmatprep.mubr.bf16.mxu1 %v5073_v39 }
 0x10e   :  { %v5962_v43 = vpop.f32.mrb[24].mxu1 }
 0x10f   :  { %v5964_v44 = vpop.f32.mrb[25].mxu1 }
 0x110   :  { %v5969_v46 = vpop.f32.mrb[26].mxu1 }
 0x111   :  { %4763 = vmatmul.mubr.msk.bf16.gmra.mrb[104].mxu0 %vm579_vm0, %v5070_v41  ;;  %v5975_v48 = vpop.f32.mrb[27].mxu1 }
 0x112   :  { %4766 = vmatprep.mubr.msk.bf16.mxu0 %vm579_vm0, %v5074_v42 }
 0x113   :  { %2465 = vmatmul.mubr.bf16.vlgmr.msra.gmra.mrb[132].mxu1 %v5071_v45 }
 0x114   :  { %v680_v50 = vpop.f32.mrb[0].mxu0  ;;  %4888 = vmatpush3.bf16.msra.mxu1 %v5881_v15  ;;  %2472 = vmatprep.mubr.bf16.mxu1 %v5076_v47  ;;  %v5088_v47 = vld [vmem:[%s7605_s2 + $0x48] ss:$12 sps:$4 sm:$0xff]  }
 0x115   :  { %v5986_v52 = vadd.f32 %v5827_v56, %v680_v50  ;;  %v682_v53 = vpop.f32.mrb[1].mxu0  ;;  %4887 = vmatprep.subr.bf16.mxu1 %v5888_v16  ;;  %v5081_v56 = vld [vmem:[%s7605_s2 + $0x34] ss:$12 sps:$4 sm:$0xff]  }
 0x116   :  { %v683_v55 = vpop.f32.mrb[2].mxu0  ;;  %v5989_v57 = vpop.f32.mrb[28].mxu1 }
 0x117   :  { %v5992_v59 = vadd.f32 %v5837_v60, %v683_v55  ;;  %v685_v61 = vpop.f32.mrb[3].mxu0  ;;  %v5994_v63 = vpop.f32.mrb[29].mxu1  ;;  %v5080_v60 = vld [vmem:[%s7604_s1 + $0x140] ss:$12 sps:$4 sm:$0xff]  }
 0x118   :  { %v5999_v5 = vpop.f32.mrb[30].mxu1  ;;  %4889 = vmatpush3.bf16.msra.mxu1 %v5888_v16  ;;  %v5090_v55 = vld [vmem:[%s7604_s1 + $0x1a0] ss:$12 sps:$4 sm:$0xff]  }
 0x119   :  { %4767 = vmatmul.mubr.msk.bf16.gmra.mrb[108].mxu0 %vm579_vm0, %v5075_v49  ;;  %v6006_v7 = vpop.f32.mrb[31].mxu1  ;;  %4838 = vmatprep.subr.bf16.mxu1 %v5881_v15 }
 0x11a   :  { %4770 = vmatprep.mubr.msk.bf16.mxu0 %vm579_vm0, %v5079_v51 }
 0x11b   :  { %2473 = vmatmul.mubr.bf16.gmra.mrb[136].mxu1 %v5078_v3 }
 0x11c   :  { %v688_v9 = vpop.f32.mrb[4].mxu0  ;;  %2480 = vmatprep.mubr.bf16.mxu1 %v5081_v56  ;;  %v5094_v56 = vld [vmem:[%s7604_s1 + $0x1b8] ss:$12 sps:$4 sm:$0xff]  }
 0x11d   :  { %v6017_v13 = vadd.f32 %v5825_v54, %v688_v9  ;;  %v690_v16 = vpop.f32.mrb[5].mxu0  ;;  %v5086_v54 = vld [vmem:[%s7605_s2 + $0x4c] ss:$12 sps:$4 sm:$0xff]  }
 0x11e   :  { %v691_v17 = vpop.f32.mrb[6].mxu0  ;;  %v6019_v19 = vpop.f32.mrb[32].mxu1 }
 0x11f   :  { %v6022_v15 = vadd.f32 %v5832_v58, %v691_v17  ;;  %v693_v21 = vpop.f32.mrb[7].mxu0  ;;  %v6024_v23 = vpop.f32.mrb[33].mxu1  ;;  %v5085_v58 = vld [vmem:[%s7604_s1 + $0x170] ss:$12 sps:$4 sm:$0xff]  }
 0x120   :  { %v6029_v26 = vpop.f32.mrb[34].mxu1  ;;  %v5096_v17 = vld [vmem:[%s7605_s2 + $0x7c] ss:$12 sps:$4 sm:$0xff]  }
 0x121   :  { %4771 = vmatmul.mubr.msk.bf16.gmra.mrb[112].mxu0 %vm579_vm0, %v5080_v60  ;;  %v6035_v28 = vpop.f32.mrb[35].mxu1 }
 0x122   :  { %4774 = vmatprep.mubr.msk.bf16.mxu0 %vm579_vm0, %v5084_v11 }
 0x123   :  { %2481 = vmatmul.mubr.bf16.gmra.mrb[140].mxu1 %v5083_v25 }
 0x124   :  { %v696_v29 = vpop.f32.mrb[8].mxu0  ;;  %2488 = vmatprep.mubr.bf16.mxu1 %v5086_v54 }
 0x125   :  { %v6045_v33 = vadd.f32 %v5844_v1, %v696_v29  ;;  %v698_v35 = vpop.f32.mrb[9].mxu0  ;;  %v5091_v1 = vld [vmem:[%s7605_s2 + $0x64] ss:$12 sps:$4 sm:$0xff]  }
 0x126   :  { %v699_v37 = vpop.f32.mrb[10].mxu0  ;;  %v6047_v39 = vpop.f32.mrb[36].mxu1  ;;  %v5099_v35 = vld [vmem:[%s7604_s1 + $0x1e8] ss:$12 sps:$4 sm:$0xff]  }
 0x127   :  { %v6050_v41 = vadd.f32 %v5854_v6, %v699_v37  ;;  %v701_v42 = vpop.f32.mrb[11].mxu0  ;;  %v6052_v45 = vpop.f32.mrb[37].mxu1 }
 0x128   :  { %v6057_v49 = vpop.f32.mrb[38].mxu1 }
 0x129   :  { %4775 = vmatmul.mubr.msk.bf16.gmra.mrb[116].mxu0 %vm579_vm0, %v5085_v58  ;;  %v6063_v50 = vpop.f32.mrb[39].mxu1  ;;  %v5095_v58 = vld [vmem:[%s7604_s1 + $0x1d0] ss:$12 sps:$4 sm:$0xff]  }
 0x12a   :  { %4778 = vmatprep.mubr.msk.bf16.mxu0 %vm579_vm0, %v5089_v31 }
 0x12b   :  { %2489 = vmatmul.mubr.bf16.gmra.mrb[144].mxu1 %v5088_v47 }
 0x12c   :  { %v704_v6 = vpop.f32.mrb[12].mxu0  ;;  %2496 = vmatprep.mubr.bf16.mxu1 %v5091_v1 }
 0x12d   :  { %v6067_v51 = vadd.f32 %v5839_v62, %v704_v6  ;;  %v706_v53 = vpop.f32.mrb[13].mxu0  ;;  %v5093_v62 = vld [vmem:[%s7605_s2 + $0x60] ss:$12 sps:$4 sm:$0xff]  }
 0x12e   :  { %v707_v61 = vpop.f32.mrb[14].mxu0  ;;  %v6072_v3 = vpop.f32.mrb[40].mxu1  ;;  %v5101_v6 = vld [vmem:[%s7605_s2 + $0x94] ss:$12 sps:$4 sm:$0xff]  }
 0x12f   :  { %v6078_v60 = vadd.f32 %v5849_v4, %v707_v61  ;;  %v709_v9 = vpop.f32.mrb[15].mxu0  ;;  %v6080_v11 = vpop.f32.mrb[41].mxu1 }
 0x130   :  { %v4741_v16 = vpop.f32.mrb[42].mxu1 }
 0x131   :  { %4779 = vmatmul.mubr.msk.bf16.gmra.mrb[120].mxu0 %vm579_vm0, %v5090_v55  ;;  %v6089_v21 = vpop.f32.mrb[43].mxu1  ;;  %v5104_v16 = vld [vmem:[%s7605_s2 + $0x8] ss:$12 sps:$4 sm:$0xff]  }
 0x132   :  { %4782 = vmatprep.mubr.msk.bf16.mxu0 %vm579_vm0, %v5094_v56  ;;  %v5100_v56 = vld [vmem:[%s7604_s1 + $0x200] ss:$0 sps:$4 sm:$0xff]  }
 0x133   :  { %2497 = vmatmul.mubr.bf16.gmra.mrb[148].mxu1 %v5093_v62 }
 0x134   :  { %v712_v4 = vpop.f32.mrb[16].mxu0  ;;  %2504 = vmatprep.mubr.bf16.mxu1 %v5096_v17 }
 0x135   :  { %v6093_v25 = vadd.f32 %v5865_v10, %v712_v4  ;;  %v714_v54 = vpop.f32.mrb[17].mxu0  ;;  %v5098_v10 = vld [vmem:[%s7605_s2 + $0x78] ss:$12 sps:$4 sm:$0xff]  }
 0x136   :  { %v715_v29 = vpop.f32.mrb[18].mxu0  ;;  %v6098_v31 = vpop.f32.mrb[44].mxu1 }
 0x137   :  { %7680 = vst [vmem:[#allocation2_spill] sm:$0xff] %v6093_v25  ;;  %v6104_v37 = vadd.f32 %v5876_v14, %v715_v29  ;;  %v717_v42 = vpop.f32.mrb[19].mxu0  ;;  %v1575_v47 = vpop.f32.mrb[45].mxu1  ;;  %v5105_v29 = vld [vmem:[%s7605_s2 + $0xac] ss:$12 sps:$4 sm:$0xff]  }
 0x138   :  { %v6109_v1 = vpop.f32.mrb[46].mxu1 }
 0x139   :  { %7681 = vst [vmem:[#allocation3_spill] sm:$0xff] %v6104_v37  ;;  %4783 = vmatmul.mubr.msk.bf16.gmra.mrb[124].mxu0 %vm579_vm0, %v5095_v58  ;;  %v1578_v53 = vpop.f32.mrb[47].mxu1 }
 0x13a   :  { %4786 = vmatprep.mubr.msk.bf16.mxu0 %vm579_vm0, %v5099_v35 }
 0x13b   :  { %2505 = vmatmul.mubr.bf16.gmra.mrb[152].mxu1 %v5098_v10  ;;  %v5107_v10 = vld [vmem:[%s7605_s2 + $0x20] ss:$12 sps:$4 sm:$0xff]  }
 0x13c   :  { %v720_v14 = vpop.f32.mrb[20].mxu0  ;;  %2512 = vmatprep.mubr.bf16.mxu1 %v5101_v6 }
 0x13d   :  { %v6117_v55 = vadd.f32 %v5860_v8, %v720_v14  ;;  %v722_v61 = vpop.f32.mrb[21].mxu0  ;;  %v5103_v8 = vld [vmem:[%s7605_s2 + $0x90] ss:$12 sps:$4 sm:$0xff]   ;;  %v5109_v14 = vld [vmem:[%s7605_s2 + $0x38] ss:$12 sps:$4 sm:$0xff]  }
 0x13e   :  { %v723_v9 = vpop.f32.mrb[22].mxu0  ;;  %v6122_v62 = vpop.f32.mrb[48].mxu1 }
 0x13f   :  { %v6128_v17 = vadd.f32 %v5870_v12, %v723_v9  ;;  %v725_v4 = vpop.f32.mrb[23].mxu0  ;;  %v1583_v54 = vpop.f32.mrb[49].mxu1 }
 0x140   :  { %v6133_v58 = vpop.f32.mrb[50].mxu1  ;;  %v5110_v4 = vld [vmem:[%s7605_s2 + $0xc4] ss:$12 sps:$4 sm:$0xff]  }
 0x141   :  { %7682 = vst [vmem:[#allocation4_spill] sm:$0xff] %v6128_v17  ;;  %4787 = vmatmul.mubr.msk.bf16.gmra.mrb[128].mxu0 %vm579_vm0, %v5100_v56  ;;  %v1586_v35 = vpop.f32.mrb[51].mxu1 }
 0x142   :  { %4794 = vmatprep.mubr.msk.bf16.mxu0 %vm579_vm0, %v5104_v16 }
 0x143   :  { %2513 = vmatmul.mubr.bf16.gmra.mrb[156].mxu1 %v5103_v8 }
 0x144   :  { %v728_v12 = vpop.f32.mrb[24].mxu0  ;;  %2520 = vmatprep.mubr.bf16.mxu1 %v5105_v29 }
 0x145   :  { %v6141_v42 = vadd.f32 %v5900_v20, %v728_v12  ;;  %v730_v47 = vpop.f32.mrb[25].mxu0  ;;  %v5108_v20 = vld [vmem:[%s7605_s2 + $0xa8] ss:$12 sps:$4 sm:$0xff]   ;;  %v5112_v12 = vld [vmem:[%s7605_s2 + $0x50] ss:$12 sps:$4 sm:$0xff]  }
 0x146   :  { %v731_v6 = vpop.f32.mrb[26].mxu0  ;;  %v6146_v53 = vpop.f32.mrb[52].mxu1 }
 0x147   :  { %7683 = vst [vmem:[#allocation5_spill] sm:$0xff] %v6141_v42  ;;  %v6152_v61 = vadd.f32 %v5912_v24, %v731_v6  ;;  %v733_v56 = vpop.f32.mrb[27].mxu0  ;;  %v1591_v9 = vpop.f32.mrb[53].mxu1  ;;  %v5259_v24 = vld [vmem:[%s7602_s4] sm:$0xff]  }
 0x148   :  { %v6157_v16 = vpop.f32.mrb[54].mxu1 }
 0x149   :  { %7684 = vst [vmem:[#allocation6_spill] sm:$0xff] %v6152_v61  ;;  %4795 = vmatmul.mubr.msk.bf16.vlgmr.msra.gmra.mrb[132].mxu0 %vm579_vm0, %v5107_v10  ;;  %v1594_v54 = vpop.f32.mrb[55].mxu1  ;;  %v5260_v10 = vld [vmem:[%s7602_s4 + $0x8] sm:$0xff]  }
 0x14a   :  { %3326 = vmatpush1.bf16.msra.mxu0 %v5259_v24  ;;  %4798 = vmatprep.mubr.msk.bf16.mxu0 %vm579_vm0, %v5109_v14  ;;  %v5114_v14 = vld [vmem:[%s7605_s2 + $0x68] ss:$12 sps:$4 sm:$0xff]  }
 0x14b   :  { %2521 = vmatmul.mubr.bf16.gmra.mrb[160].mxu1 %v5108_v20  ;;  %3327 = vmatprep.subr.bf16.mxu0 %v5277_v0  ;;  %v5113_v20 = vld [vmem:[%s7605_s2 + $0xc0] ss:$12 sps:$4 sm:$0xff]   ;;  %v5115_v54 = vld [vmem:[%s7605_s2 + $0xdc] ss:$12 sps:$4 sm:$0xff]  }
 0x14c   :  { %v736_v8 = vpop.f32.mrb[28].mxu0  ;;  %2528 = vmatprep.mubr.bf16.mxu1 %v5110_v4 }
 0x14d   :  { %v6169_v29 = vadd.f32 %v5894_v18, %v736_v8  ;;  %v738_v35 = vpop.f32.mrb[29].mxu0 }
 0x14e   :  { %v739_v47 = vpop.f32.mrb[30].mxu0  ;;  %3328 = vmatpush1.bf16.msra.mxu0 %v5260_v10  ;;  %v6177_v6 = vpop.f32.mrb[56].mxu1 }
 0x14f   :  { %7685 = vst [vmem:[#allocation7_spill] sm:$0xff] %v6169_v29  ;;  %v6183_v18 = vadd.f32 %v5906_v22, %v739_v47  ;;  %v741_v56 = vpop.f32.mrb[31].mxu0  ;;  %v1599_v9 = vpop.f32.mrb[57].mxu1  ;;  %3329 = vmatprep.subr.bf16.mxu0 %v5277_v0  ;;  %v5261_v22 = vld [vmem:[%s7602_s4 + $0x10] sm:$0xff]  }
 0x150   :  { %v6189_v4 = vpop.f32.mrb[58].mxu1  ;;  %v5262_v56 = vld [vmem:[%s7602_s4 + $0x18] sm:$0xff]  }
 0x151   :  { %7686 = vst [vmem:[#allocation8_spill] sm:$0xff] %v6183_v18  ;;  %4799 = vmatmul.mubr.msk.bf16.gmra.mrb[136].mxu0 %vm579_vm0, %v5112_v12  ;;  %v1602_v24 = vpop.f32.mrb[59].mxu1  ;;  %v5117_v12 = vld [vmem:[%s7605_s2 + $0x80] ss:$12 sps:$4 sm:$0xff]   ;;  %v5119_v9 = vld [vmem:[%s7605_s2 + $0x98] ss:$12 sps:$4 sm:$0xff]  }
 0x152   :  { %3330 = vmatpush1.bf16.msra.mxu0 %v5261_v22  ;;  %4802 = vmatprep.mubr.msk.bf16.mxu0 %vm579_vm0, %v5114_v14  ;;  %v5118_v24 = vld [vmem:[%s7605_s2 + $0xd8] ss:$12 sps:$4 sm:$0xff]  }
 0x153   :  { %2529 = vmatmul.mubr.bf16.gmra.mrb[164].mxu1 %v5113_v20  ;;  %3331 = vmatprep.subr.bf16.mxu0 %v5277_v0 }
 0x154   :  { %v744_v8 = vpop.f32.mrb[32].mxu0  ;;  %2536 = vmatprep.mubr.bf16.mxu1 %v5115_v54 }
 0x155   :  { %v6201_v35 = vadd.f32 %v5926_v2, %v744_v8  ;;  %v746_v47 = vpop.f32.mrb[33].mxu0  ;;  %v5120_v8 = vld [vmem:[%s7605_s2 + $0xf4] ss:$12 sps:$4 sm:$0xff]  }
 0x156   :  { %v747_v10 = vpop.f32.mrb[34].mxu0  ;;  %3332 = vmatpush1.bf16.msra.mxu0 %v5262_v56  ;;  %v6209_v14 = vpop.f32.mrb[60].mxu1 }
 0x157   :  { %7687 = vst [vmem:[#allocation9_spill] sm:$0xff] %v6201_v35  ;;  %v6215_v2 = vadd.f32 %v5934_v32, %v747_v10  ;;  %v749_v20 = vpop.f32.mrb[35].mxu0  ;;  %v1607_v54 = vpop.f32.mrb[61].mxu1  ;;  %3333 = vmatprep.subr.bf16.mxu0 %v5277_v0  ;;  %v5263_v32 = vld [vmem:[%s7602_s4 + $0x20] sm:$0xff]  }
 0x158   :  { %v6221_v22 = vpop.f32.mrb[62].mxu1 }
 0x159   :  { %7688 = vst [vmem:[#allocation10_spill] sm:$0xff] %v6215_v2  ;;  %4803 = vmatmul.mubr.msk.bf16.gmra.mrb[140].mxu0 %vm579_vm0, %v5117_v12  ;;  %v1610_v47 = vpop.f32.mrb[63].mxu1  ;;  %v5122_v12 = vld [vmem:[%s7605_s2 + $0xb0] ss:$12 sps:$4 sm:$0xff]  }
 0x15a   :  { %3334 = vmatpush1.bf16.msra.mxu0 %v5263_v32  ;;  %4806 = vmatprep.mubr.msk.bf16.mxu0 %vm579_vm0, %v5119_v9  ;;  %v5264_v47 = vld [vmem:[%s7602_s4 + $0x28] sm:$0xff]  }
 0x15b   :  { %2537 = vmatmul.mubr.bf16.gmra.mrb[168].mxu1 %v5118_v24  ;;  %3335 = vmatprep.subr.bf16.mxu0 %v5277_v0  ;;  %v5124_v24 = vld [vmem:[%s7605_s2 + $0xc8] ss:$12 sps:$4 sm:$0xff]  }
 0x15c   :  { %v752_v10 = vpop.f32.mrb[36].mxu0  ;;  %2544 = vmatprep.mubr.bf16.mxu1 %v5120_v8 }
 0x15d   :  { %v6233_v56 = vadd.f32 %v5921_v27, %v752_v10  ;;  %v754_v20 = vpop.f32.mrb[37].mxu0  ;;  %v5123_v10 = vld [vmem:[%s7605_s2 + $0xf0] ss:$12 sps:$4 sm:$0xff]  }
 0x15e   :  { %v755_v54 = vpop.f32.mrb[38].mxu0  ;;  %3336 = vmatpush1.bf16.msra.mxu0 %v5264_v47  ;;  %v6241_v9 = vpop.f32.mrb[64].mxu1  ;;  %v5125_v47 = vld [vmem:[%s7605_s2 + $0x10c] ss:$12 sps:$4 sm:$0xff]  }
 0x15f   :  { %7689 = vst [vmem:[#allocation11_spill] sm:$0xff] %v6233_v56  ;;  %v6247_v27 = vadd.f32 %v5931_v30, %v755_v54  ;;  %v757_v8 = vpop.f32.mrb[39].mxu0  ;;  %v1615_v32 = vpop.f32.mrb[65].mxu1  ;;  %3337 = vmatprep.subr.bf16.mxu0 %v5277_v0  ;;  %v5265_v30 = vld [vmem:[%s7602_s4 + $0x30] sm:$0xff]  }
 0x160   :  { %v6253_v20 = vpop.f32.mrb[66].mxu1 }
 0x161   :  { %7690 = vst [vmem:[#allocation12_spill] sm:$0xff] %v6247_v27  ;;  %4807 = vmatmul.mubr.msk.bf16.gmra.mrb[144].mxu0 %vm579_vm0, %v5122_v12  ;;  %v1618_v2 = vpop.f32.mrb[67].mxu1 }
 0x162   :  { %3338 = vmatpush1.bf16.msra.mxu0 %v5265_v30  ;;  %4810 = vmatprep.mubr.msk.bf16.mxu0 %vm579_vm0, %v5124_v24  ;;  %v5127_v2 = vld [vmem:[%s7605_s2 + $0xe0] ss:$12 sps:$4 sm:$0xff]   ;;  %v5266_v30 = vld [vmem:[%s7602_s4 + $0x38] sm:$0xff]  }
 0x163   :  { %2545 = vmatmul.mubr.bf16.gmra.mrb[172].mxu1 %v5123_v10  ;;  %3339 = vmatprep.subr.bf16.mxu0 %v5277_v0  ;;  %v5129_v10 = vld [vmem:[%s7605_s2 + $0xf8] ss:$12 sps:$4 sm:$0xff]  }
 0x164   :  { %v760_v54 = vpop.f32.mrb[40].mxu0  ;;  %2552 = vmatprep.mubr.bf16.mxu1 %v5125_v47 }
 0x165   :  { %v6265_v8 = vadd.f32 %v5945_v36, %v760_v54  ;;  %v762_v32 = vpop.f32.mrb[41].mxu0 }
 0x166   :  { %v763_v12 = vpop.f32.mrb[42].mxu0  ;;  %3340 = vmatpush1.bf16.msra.mxu0 %v5266_v30  ;;  %v6273_v24 = vpop.f32.mrb[68].mxu1  ;;  %v5128_v32 = vld [vmem:[%s7605_s2 + $0x108] ss:$12 sps:$4 sm:$0xff]   ;;  %v5130_v30 = vld [vmem:[%s7605_s2 + $0x124] ss:$12 sps:$4 sm:$0xff]  }
 0x167   :  { %7691 = vst [vmem:[#allocation13_spill] sm:$0xff] %v6265_v8  ;;  %v6279_v36 = vadd.f32 %v5953_v40, %v763_v12  ;;  %v765_v47 = vpop.f32.mrb[43].mxu0  ;;  %v1623_v54 = vpop.f32.mrb[69].mxu1  ;;  %3341 = vmatprep.subr.bf16.mxu0 %v5277_v0  ;;  %v5267_v40 = vld [vmem:[%s7602_s4 + $0x40] sm:$0xff]  }
 0x168   :  { %v6285_v8 = vpop.f32.mrb[70].mxu1 }
 0x169   :  { %7692 = vst [vmem:[#allocation14_spill] sm:$0xff] %v6279_v36  ;;  %4811 = vmatmul.mubr.msk.bf16.gmra.mrb[148].mxu0 %vm579_vm0, %v5127_v2  ;;  %v1626_v27 = vpop.f32.mrb[71].mxu1 }
 0x16a   :  { %3342 = vmatpush1.bf16.msra.mxu0 %v5267_v40  ;;  %4814 = vmatprep.mubr.msk.bf16.mxu0 %vm579_vm0, %v5129_v10  ;;  %v5132_v27 = vld [vmem:[%s7605_s2 + $0x110] ss:$12 sps:$4 sm:$0xff]   ;;  %v5268_v40 = vld [vmem:[%s7602_s4 + $0x48] sm:$0xff]  }
 0x16b   :  { %2553 = vmatmul.mubr.bf16.gmra.mrb[176].mxu1 %v5128_v32  ;;  %3343 = vmatprep.subr.bf16.mxu0 %v5277_v0  ;;  %v5134_v32 = vld [vmem:[%s7605_s2 + $0x128] ss:$12 sps:$4 sm:$0xff]  }
 0x16c   :  { %v768_v12 = vpop.f32.mrb[44].mxu0  ;;  %2560 = vmatprep.mubr.bf16.mxu1 %v5130_v30 }
 0x16d   :  { %v6297_v47 = vadd.f32 %v5940_v34, %v768_v12  ;;  %v770_v54 = vpop.f32.mrb[45].mxu0 }
 0x16e   :  { %v771_v2 = vpop.f32.mrb[46].mxu0  ;;  %3344 = vmatpush1.bf16.msra.mxu0 %v5268_v40  ;;  %v6305_v10 = vpop.f32.mrb[72].mxu1  ;;  %v5133_v54 = vld [vmem:[%s7605_s2 + $0x120] ss:$12 sps:$4 sm:$0xff]   ;;  %v5135_v40 = vld [vmem:[%s7605_s2 + $0x13c] ss:$12 sps:$4 sm:$0xff]  }
 0x16f   :  { %7693 = vst [vmem:[#allocation15_spill] sm:$0xff] %v6297_v47  ;;  %v6311_v34 = vadd.f32 %v5947_v38, %v771_v2  ;;  %v773_v30 = vpop.f32.mrb[47].mxu0  ;;  %v1631_v12 = vpop.f32.mrb[73].mxu1  ;;  %3345 = vmatprep.subr.bf16.mxu0 %v5277_v0  ;;  %v5269_v38 = vld [vmem:[%s7602_s4 + $0x50] sm:$0xff]  }
 0x170   :  { %v6317_v36 = vpop.f32.mrb[74].mxu1 }
 0x171   :  { %7694 = vst [vmem:[#allocation16_spill] sm:$0xff] %v6311_v34  ;;  %4815 = vmatmul.mubr.msk.bf16.gmra.mrb[152].mxu0 %vm579_vm0, %v5132_v27  ;;  %v1634_v47 = vpop.f32.mrb[75].mxu1 }
 0x172   :  { %3346 = vmatpush1.bf16.msra.mxu0 %v5269_v38  ;;  %4818 = vmatprep.mubr.msk.bf16.mxu0 %vm579_vm0, %v5134_v32  ;;  %v5137_v47 = vld [vmem:[%s7605_s2 + $0x140] ss:$12 sps:$4 sm:$0xff]   ;;  %v5270_v38 = vld [vmem:[%s7602_s4 + $0x58] sm:$0xff]  }
 0x173   :  { %2561 = vmatmul.mubr.bf16.gmra.mrb[180].mxu1 %v5133_v54  ;;  %3347 = vmatprep.subr.bf16.mxu0 %v5277_v0  ;;  %v5139_v54 = vld [vmem:[%s7605_s2 + $0x158] ss:$12 sps:$4 sm:$0xff]  }
 0x174   :  { %v776_v2 = vpop.f32.mrb[48].mxu0  ;;  %2568 = vmatprep.mubr.bf16.mxu1 %v5135_v40 }
 0x175   :  { %v6329_v30 = vadd.f32 %v5964_v44, %v776_v2  ;;  %v778_v12 = vpop.f32.mrb[49].mxu0 }
 0x176   :  { %v779_v27 = vpop.f32.mrb[50].mxu0  ;;  %3348 = vmatpush1.bf16.msra.mxu0 %v5270_v38  ;;  %v6337_v32 = vpop.f32.mrb[76].mxu1  ;;  %v5138_v12 = vld [vmem:[%s7605_s2 + $0x138] ss:$12 sps:$4 sm:$0xff]   ;;  %v5140_v38 = vld [vmem:[%s7605_s2 + $0x154] ss:$12 sps:$4 sm:$0xff]  }
 0x177   :  { %7695 = vst [vmem:[#allocation17_spill] sm:$0xff] %v6329_v30  ;;  %v6343_v44 = vadd.f32 %v5975_v48, %v779_v27  ;;  %v781_v40 = vpop.f32.mrb[51].mxu0  ;;  %v1639_v2 = vpop.f32.mrb[77].mxu1  ;;  %3349 = vmatprep.subr.bf16.mxu0 %v5277_v0  ;;  %v5271_v48 = vld [vmem:[%s7602_s4 + $0x60] sm:$0xff]  }
 0x178   :  { %v6349_v30 = vpop.f32.mrb[78].mxu1 }
 0x179   :  { %7696 = vst [vmem:[#allocation18_spill] sm:$0xff] %v6343_v44  ;;  %4819 = vmatmul.mubr.msk.bf16.gmra.mrb[156].mxu0 %vm579_vm0, %v5137_v47  ;;  %v1642_v34 = vpop.f32.mrb[79].mxu1 }
 0x17a   :  { %3350 = vmatpush1.bf16.msra.mxu0 %v5271_v48  ;;  %4822 = vmatprep.mubr.msk.bf16.mxu0 %vm579_vm0, %v5139_v54  ;;  %v5142_v34 = vld [vmem:[%s7605_s2 + $0x170] ss:$12 sps:$4 sm:$0xff]   ;;  %v5272_v48 = vld [vmem:[%s7602_s4 + $0x68] sm:$0xff]  }
 0x17b   :  { %2569 = vmatmul.mubr.bf16.gmra.mrb[184].mxu1 %v5138_v12  ;;  %3351 = vmatprep.subr.bf16.mxu0 %v5277_v0  ;;  %v5146_v12 = vld [vmem:[%s7606_s3 + $0x4] ss:$12 sps:$4 sm:$0xff]  }
 0x17c   :  { %v784_v27 = vpop.f32.mrb[52].mxu0  ;;  %2576 = vmatprep.mubr.bf16.mxu1 %v5140_v38 }
 0x17d   :  { %v6361_v40 = vadd.f32 %v5962_v43, %v784_v27  ;;  %v786_v2 = vpop.f32.mrb[53].mxu0 }
 0x17e   :  { %v787_v47 = vpop.f32.mrb[54].mxu0  ;;  %3352 = vmatpush1.bf16.msra.mxu0 %v5272_v48  ;;  %v6369_v54 = vpop.f32.mrb[80].mxu1  ;;  %v5143_v2 = vld [vmem:[%s7605_s2 + $0x150] ss:$12 sps:$4 sm:$0xff]   ;;  %v5147_v48 = vld [vmem:[%s7605_s2 + $0x16c] ss:$12 sps:$4 sm:$0xff]  }
 0x17f   :  { %7697 = vst [vmem:[#allocation19_spill] sm:$0xff] %v6361_v40  ;;  %v6375_v43 = vadd.f32 %v5969_v46, %v787_v47  ;;  %v789_v38 = vpop.f32.mrb[55].mxu0  ;;  %v1647_v27 = vpop.f32.mrb[81].mxu1  ;;  %3353 = vmatprep.subr.bf16.mxu0 %v5277_v0  ;;  %v5273_v46 = vld [vmem:[%s7602_s4 + $0x70] sm:$0xff]  }
 0x180   :  { %v6381_v44 = vpop.f32.mrb[82].mxu1 }
 0x181   :  { %7698 = vst [vmem:[#allocation20_spill] sm:$0xff] %v6375_v43  ;;  %4823 = vmatmul.mubr.msk.bf16.gmra.mrb[160].mxu0 %vm579_vm0, %v5142_v34  ;;  %v1650_v40 = vpop.f32.mrb[83].mxu1  ;;  %v5144_v34 = vld [vmem:[%s7606_s3] ss:$12 sps:$4 sm:$0xff]   ;;  %v5274_v43 = vld [vmem:[%s7602_s4 + $0x78] sm:$0xff]  }
 0x182   :  { %3354 = vmatpush1.bf16.msra.mxu0 %v5273_v46  ;;  %3357 = vmatprep.mubr.bf16.mxu0 %v5146_v12  ;;  %v5149_v46 = vld [vmem:[%s7605_s2 + $0x168] ss:$12 sps:$4 sm:$0xff]  }
 0x183   :  { %2577 = vmatmul.mubr.bf16.gmra.mrb[188].mxu1 %v5143_v2  ;;  %3355 = vmatprep.subr.bf16.mxu0 %v5277_v0  ;;  %v5150_v0 = vld [vmem:[%s7606_s3 + $0x1c] ss:$12 sps:$4 sm:$0xff]  }
 0x184   :  { %v792_v47 = vpop.f32.mrb[56].mxu0  ;;  %2584 = vmatprep.mubr.bf16.mxu1 %v5147_v48 }
 0x185   :  { %v6392_v38 = vadd.f32 %v5994_v63, %v792_v47  ;;  %v794_v27 = vpop.f32.mrb[57].mxu0 }
 0x186   :  { %v795_v40 = vpop.f32.mrb[58].mxu0  ;;  %3356 = vmatpush1.bf16.msra.mxu0 %v5274_v43  ;;  %v6400_v12 = vpop.f32.mrb[84].mxu1  ;;  %v5152_v43 = vld [vmem:[%s7605_s2 + $0x184] ss:$12 sps:$4 sm:$0xff]  }
 0x187   :  { %7699 = vst [vmem:[#allocation21_spill] sm:$0xff] %v6392_v38  ;;  %v6406_v63 = vadd.f32 %v6006_v7, %v795_v40  ;;  %v797_v2 = vpop.f32.mrb[59].mxu0  ;;  %v1655_v48 = vpop.f32.mrb[85].mxu1 }
 0x188   :  { %v6411_v47 = vpop.f32.mrb[86].mxu1  ;;  %v5154_v2 = vld [vmem:[%s7606_s3 + $0x18] ss:$12 sps:$4 sm:$0xff]  }
 0x189   :  { %7700 = vst [vmem:[#allocation22_spill] sm:$0xff] %v6406_v63  ;;  %3358 = vmatmul.mubr.bf16.vlgmr.msra.gmra.mrb[164].mxu0 %v5144_v34  ;;  %v1658_v27 = vpop.f32.mrb[87].mxu1  ;;  %v5156_v34 = vld [vmem:[%s7606_s3 + $0x34] ss:$12 sps:$4 sm:$0xff]  }
 0x18a   :  { %3365 = vmatprep.mubr.bf16.mxu0 %v5150_v0  ;;  %v5158_v27 = vld [vmem:[%s7605_s2 + $0x19c] ss:$12 sps:$4 sm:$0xff]  }
 0x18b   :  { %2585 = vmatmul.mubr.bf16.gmra.mrb[192].mxu1 %v5149_v46 }
 0x18c   :  { %v800_v38 = vpop.f32.mrb[60].mxu0  ;;  %2592 = vmatprep.mubr.bf16.mxu1 %v5152_v43 }
 0x18d   :  { %v6417_v7 = vadd.f32 %v5989_v57, %v800_v38  ;;  %v802_v40 = vpop.f32.mrb[61].mxu0  ;;  %v5155_v57 = vld [vmem:[%s7605_s2 + $0x180] ss:$12 sps:$4 sm:$0xff]  }
 0x18e   :  { %v803_v48 = vpop.f32.mrb[62].mxu0  ;;  %v6422_v63 = vpop.f32.mrb[88].mxu1 }
 0x18f   :  { %7701 = vst [vmem:[#allocation23_spill] sm:$0xff] %v6417_v7  ;;  %v6428_v0 = vadd.f32 %v5999_v5, %v803_v48  ;;  %v805_v46 = vpop.f32.mrb[63].mxu0  ;;  %v1663_v43 = vpop.f32.mrb[89].mxu1 }
 0x190   :  { %v6433_v38 = vpop.f32.mrb[90].mxu1  ;;  %v5160_v46 = vld [vmem:[%s7606_s3 + $0x30] ss:$12 sps:$4 sm:$0xff]  }
 0x191   :  { %7702 = vst [vmem:[#allocation24_spill] sm:$0xff] %v6428_v0  ;;  %3366 = vmatmul.mubr.bf16.gmra.mrb[168].mxu0 %v5154_v2  ;;  %v1666_v40 = vpop.f32.mrb[91].mxu1  ;;  %v5162_v2 = vld [vmem:[%s7606_s3 + $0x4c] ss:$12 sps:$4 sm:$0xff]  }
 0x192   :  { %3373 = vmatprep.mubr.bf16.mxu0 %v5156_v34  ;;  %v5164_v40 = vld [vmem:[%s7605_s2 + $0x1b4] ss:$12 sps:$4 sm:$0xff]  }
 0x193   :  { %2593 = vmatmul.mubr.bf16.gmra.mrb[196].mxu1 %v5155_v57 }
 0x194   :  { %v808_v7 = vpop.f32.mrb[64].mxu0  ;;  %2600 = vmatprep.mubr.bf16.mxu1 %v5158_v27 }
 0x195   :  { %v6439_v5 = vadd.f32 %v6024_v23, %v808_v7  ;;  %v810_v48 = vpop.f32.mrb[65].mxu0  ;;  %v5161_v23 = vld [vmem:[%s7605_s2 + $0x198] ss:$12 sps:$4 sm:$0xff]  }
 0x196   :  { %v811_v43 = vpop.f32.mrb[66].mxu0  ;;  %v6444_v0 = vpop.f32.mrb[92].mxu1 }
 0x197   :  { %7703 = vst [vmem:[#allocation25_spill] sm:$0xff] %v6439_v5  ;;  %v6450_v34 = vadd.f32 %v6035_v28, %v811_v43  ;;  %v813_v57 = vpop.f32.mrb[67].mxu0  ;;  %v1671_v27 = vpop.f32.mrb[93].mxu1 }
 0x198   :  { %v6455_v7 = vpop.f32.mrb[94].mxu1  ;;  %v5166_v57 = vld [vmem:[%s7606_s3 + $0x48] ss:$12 sps:$4 sm:$0xff]  }
 0x199   :  { %7704 = vst [vmem:[#allocation26_spill] sm:$0xff] %v6450_v34  ;;  %3374 = vmatmul.mubr.bf16.gmra.mrb[172].mxu0 %v5160_v46  ;;  %v1674_v48 = vpop.f32.mrb[95].mxu1  ;;  %v5168_v46 = vld [vmem:[%s7606_s3 + $0x64] ss:$12 sps:$4 sm:$0xff]  }
 0x19a   :  { %3381 = vmatprep.mubr.bf16.mxu0 %v5162_v2  ;;  %v5170_v48 = vld [vmem:[%s7605_s2 + $0x1cc] ss:$12 sps:$4 sm:$0xff]  }
 0x19b   :  { %2601 = vmatmul.mubr.bf16.gmra.mrb[200].mxu1 %v5161_v23 }
 0x19c   :  { %v816_v5 = vpop.f32.mrb[68].mxu0  ;;  %2608 = vmatprep.mubr.bf16.mxu1 %v5164_v40 }
 0x19d   :  { %v6461_v28 = vadd.f32 %v6019_v19, %v816_v5  ;;  %v818_v43 = vpop.f32.mrb[69].mxu0  ;;  %v5167_v19 = vld [vmem:[%s7605_s2 + $0x1b0] ss:$12 sps:$4 sm:$0xff]  }
 0x19e   :  { %v819_v27 = vpop.f32.mrb[70].mxu0  ;;  %v6466_v34 = vpop.f32.mrb[96].mxu1 }
 0x19f   :  { %7705 = vst [vmem:[#allocation27_spill] sm:$0xff] %v6461_v28  ;;  %v6472_v2 = vadd.f32 %v6029_v26, %v819_v27  ;;  %v821_v23 = vpop.f32.mrb[71].mxu0  ;;  %v1679_v40 = vpop.f32.mrb[97].mxu1 }
 0x1a0   :  { %v6477_v5 = vpop.f32.mrb[98].mxu1  ;;  %v5172_v23 = vld [vmem:[%s7606_s3 + $0x60] ss:$12 sps:$4 sm:$0xff]  }
 0x1a1   :  { %7706 = vst [vmem:[#allocation28_spill] sm:$0xff] %v6472_v2  ;;  %3382 = vmatmul.mubr.bf16.gmra.mrb[176].mxu0 %v5166_v57  ;;  %v1682_v43 = vpop.f32.mrb[99].mxu1  ;;  %v5174_v57 = vld [vmem:[%s7606_s3 + $0x7c] ss:$12 sps:$4 sm:$0xff]  }
 0x1a2   :  { %3389 = vmatprep.mubr.bf16.mxu0 %v5168_v46  ;;  %v5176_v43 = vld [vmem:[%s7605_s2 + $0x1e4] ss:$12 sps:$4 sm:$0xff]  }
 0x1a3   :  { %2609 = vmatmul.mubr.bf16.gmra.mrb[204].mxu1 %v5167_v19 }
 0x1a4   :  { %v824_v28 = vpop.f32.mrb[72].mxu0  ;;  %2616 = vmatprep.mubr.bf16.mxu1 %v5170_v48 }
 0x1a5   :  { %v6483_v26 = vadd.f32 %v6052_v45, %v824_v28  ;;  %v826_v27 = vpop.f32.mrb[73].mxu0  ;;  %v5173_v45 = vld [vmem:[%s7605_s2 + $0x1c8] ss:$12 sps:$4 sm:$0xff]  }
 0x1a6   :  { %v827_v40 = vpop.f32.mrb[74].mxu0  ;;  %v6488_v2 = vpop.f32.mrb[100].mxu1 }
 0x1a7   :  { %7707 = vst [vmem:[#allocation29_spill] sm:$0xff] %v6483_v26  ;;  %7708 = vst [vmem:[#allocation30_spill] sm:$0xff] %v6488_v2  ;;  %v6494_v46 = vadd.f32 %v6063_v50, %v827_v40  ;;  %v829_v19 = vpop.f32.mrb[75].mxu0  ;;  %v1687_v48 = vpop.f32.mrb[101].mxu1 }
 0x1a8   :  { %v6499_v28 = vpop.f32.mrb[102].mxu1  ;;  %v5178_v19 = vld [vmem:[%s7606_s3 + $0x78] ss:$12 sps:$4 sm:$0xff]  }
 0x1a9   :  { %7709 = vst [vmem:[#allocation31_spill] sm:$0xff] %v6494_v46  ;;  %7710 = vst [vmem:[#allocation32_spill] sm:$0xff] %v6499_v28  ;;  %3390 = vmatmul.mubr.bf16.gmra.mrb[180].mxu0 %v5172_v23  ;;  %v1690_v27 = vpop.f32.mrb[103].mxu1  ;;  %v2039_v48 = vld [vmem:[%s7605_s2 + $0x1f8] sm:$0xff]  ;;  %v5180_v23 = vld [vmem:[%s7606_s3 + $0x94] ss:$12 sps:$4 sm:$0xff]  }
 0x1aa   :  { %3397 = vmatprep.mubr.bf16.mxu0 %v5174_v57  ;;  %v4399_v27 = vcombine.high %v2039_v48, %v2039_v48 }
 0x1ab   :  { %2617 = vmatmul.mubr.bf16.gmra.mrb[208].mxu1 %v5173_v45  ;;  %v5179_v45 = vld [vmem:[%s7605_s2 + $0x1e0] ss:$12 sps:$4 sm:$0xff]  }
 0x1ac   :  { %v832_v26 = vpop.f32.mrb[76].mxu0  ;;  %2624 = vmatprep.mubr.bf16.mxu1 %v5176_v43 }
 0x1ad   :  { %v6505_v50 = vadd.f32 %v6047_v39, %v832_v26  ;;  %v834_v40 = vpop.f32.mrb[77].mxu0 }
 0x1ae   :  { %v835_v46 = vpop.f32.mrb[78].mxu0  ;;  %v6513_v28 = vpop.f32.mrb[104].mxu1 }
 0x1af   :  { %7711 = vst [vmem:[#allocation33_spill] sm:$0xff] %v6505_v50  ;;  %v6519_v57 = vadd.f32 %v6057_v49, %v835_v46  ;;  %v837_v39 = vpop.f32.mrb[79].mxu0  ;;  %v1695_v26 = vpop.f32.mrb[105].mxu1  ;;  %v5183_v46 = vld [vmem:[%s7606_s3 + $0x90] ss:$12 sps:$4 sm:$0xff]  }
 0x1b0   :  { %v6524_v43 = vpop.f32.mrb[106].mxu1 }
 0x1b1   :  { %7712 = vst [vmem:[#allocation34_spill] sm:$0xff] %v6519_v57  ;;  %3398 = vmatmul.mubr.bf16.gmra.mrb[184].mxu0 %v5178_v19  ;;  %v1698_v40 = vpop.f32.mrb[107].mxu1  ;;  %v5185_v19 = vld [vmem:[%s7606_s3 + $0xac] ss:$12 sps:$4 sm:$0xff]  }
 0x1b2   :  { %3405 = vmatprep.mubr.bf16.mxu0 %v5180_v23  ;;  %v4398_v40 = vcombine.low %v2039_v48, %v2039_v48  ;;  %v5188_v48 = vld [vmem:[%s7606_s3 + $0xa8] ss:$12 sps:$4 sm:$0xff]  }
 0x1b3   :  { %2625 = vmatmul.mubr.bf16.gmra.mrb[212].mxu1 %v5179_v45 }
 0x1b4   :  { %v840_v50 = vpop.f32.mrb[80].mxu0  ;;  %2632 = vmatprep.mubr.bf16.mxu1 %v4399_v27 }
 0x1b5   :  { %v6527_v2 = vadd.f32 %v6080_v11, %v840_v50  ;;  %v842_v49 = vpop.f32.mrb[81].mxu0  ;;  %v5187_v50 = vld [vmem:[%s7605_s2 + $0x188] ss:$12 sps:$4 sm:$0xff]  }
 0x1b6   :  { %v843_v39 = vpop.f32.mrb[82].mxu0  ;;  %v6532_v26 = vpop.f32.mrb[108].mxu1 }
 0x1b7   :  { %7713 = vst [vmem:[#allocation35_spill] sm:$0xff] %v6527_v2  ;;  %v6538_v23 = vadd.f32 %v6089_v21, %v843_v39  ;;  %v845_v45 = vpop.f32.mrb[83].mxu0  ;;  %v1703_v27 = vpop.f32.mrb[109].mxu1 }
 0x1b8   :  { %v6540_v11 = vpop.f32.mrb[110].mxu1 }
 0x1b9   :  { %7714 = vst [vmem:[#allocation36_spill] sm:$0xff] %v6538_v23  ;;  %3406 = vmatmul.mubr.bf16.gmra.mrb[188].mxu0 %v5183_v46  ;;  %v1706_v49 = vpop.f32.mrb[111].mxu1  ;;  %v5190_v46 = vld [vmem:[%s7606_s3 + $0xc4] ss:$12 sps:$4 sm:$0xff]  }
 0x1ba   :  { %3413 = vmatprep.mubr.bf16.mxu0 %v5185_v19 }
 0x1bb   :  { %2633 = vmatmul.mubr.bf16.gmra.mrb[216].mxu1 %v4398_v40  ;;  %v5189_v40 = vld [vmem:[%s7605_s2 + $0x1a0] ss:$12 sps:$4 sm:$0xff]  }
 0x1bc   :  { %v848_v2 = vpop.f32.mrb[84].mxu0  ;;  %4826 = vmatprep.mubr.msk.bf16.mxu1 %vm579_vm0, %v5187_v50 }
 0x1bd   :  { %v6547_v57 = vadd.f32 %v6072_v3, %v848_v2  ;;  %v850_v21 = vpop.f32.mrb[85].mxu0  ;;  %v5192_v2 = vld [vmem:[%s7605_s2 + $0x1b8] ss:$12 sps:$4 sm:$0xff]  }
 0x1be   :  { %v851_v39 = vpop.f32.mrb[86].mxu0  ;;  %v6552_v45 = vpop.f32.mrb[112].mxu1  ;;  %v5275_v21 = vld [vmem:[%s7602_s4 + $0x80] sm:$0xff]  }
 0x1bf   :  { %7715 = vst [vmem:[#allocation37_spill] sm:$0xff] %v6547_v57  ;;  %v852_v19 = vpop.f32.mrb[87].mxu0  ;;  %v1711_v27 = vpop.f32.mrb[113].mxu1 }
 0x1c0   :  { %v6560_v3 = vpop.f32.mrb[114].mxu1 }
 0x1c1   :  { %3414 = vmatmul.mubr.bf16.gmra.mrb[192].mxu0 %v5188_v48  ;;  %v1714_v50 = vpop.f32.mrb[115].mxu1  ;;  %v5193_v48 = vld [vmem:[%s7606_s3 + $0xc0] ss:$12 sps:$4 sm:$0xff]  }
 0x1c2   :  { %3421 = vmatprep.mubr.bf16.mxu0 %v5190_v46  ;;  %v5276_v46 = vld [vmem:[%s7602_s4 + $0x88] sm:$0xff]  }
 0x1c3   :  { %4827 = vmatmul.mubr.msk.bf16.vlgmr.msra.gmra.mrb[220].mxu1 %vm579_vm0, %v5189_v40 }
 0x1c4   :  { %v4748_v49 = vpop.f32.mrb[88].mxu0  ;;  %4839 = vmatpush3.bf16.msra.mxu1 %v5275_v21  ;;  %4830 = vmatprep.mubr.msk.bf16.mxu1 %vm579_vm0, %v5192_v2  ;;  %v5197_v2 = vld [vmem:[%s7605_s2 + $0x1e8] ss:$12 sps:$4 sm:$0xff]  }
 0x1c5   :  { %v6571_v39 = vadd.f32 %v4748_v49, %v6122_v62  ;;  %v1781_v19 = vpop.f32.mrb[89].mxu0  ;;  %4840 = vmatprep.subr.bf16.mxu1 %v5276_v46  ;;  %v5195_v62 = vld [vmem:[%s7606_s3 + $0xdc] ss:$12 sps:$4 sm:$0xff]  }
 0x1c6   :  { %v6580_v27 = vadd.f32 %v1781_v19, %v6098_v31  ;;  %v4749_v40 = vpop.f32.mrb[90].mxu0  ;;  %v6582_v50 = vpop.f32.mrb[116].mxu1  ;;  %v5194_v31 = vld [vmem:[%s7605_s2 + $0x1d0] ss:$12 sps:$4 sm:$0xff]  }
 0x1c7   :  { %7716 = vst [vmem:[#allocation38_spill] sm:$0xff] %v6582_v50  ;;  %v6590_v49 = vadd.f32 %v4749_v40, %v6133_v58  ;;  %v1784_v21 = vpop.f32.mrb[91].mxu0  ;;  %v1719_v23 = vpop.f32.mrb[117].mxu1 }
 0x1c8   :  { %v6598_v57 = vadd.f32 %v1784_v21, %v6109_v1  ;;  %v6600_v50 = vpop.f32.mrb[118].mxu1  ;;  %4841 = vmatpush3.bf16.msra.mxu1 %v5276_v46  ;;  %v5198_v46 = vld [vmem:[%s7606_s3 + $0xd8] ss:$12 sps:$4 sm:$0xff]  }
 0x1c9   :  { %3422 = vmatmul.mubr.bf16.gmra.mrb[196].mxu0 %v5193_v48  ;;  %v1722_v23 = vpop.f32.mrb[119].mxu1 }
 0x1ca   :  { %7717 = vst [vmem:[#allocation39_spill] sm:$0xff] %v6598_v57  ;;  %3429 = vmatprep.mubr.bf16.mxu0 %v5195_v62  ;;  %v5200_v62 = vld [vmem:[%s7606_s3 + $0xf4] ss:$12 sps:$4 sm:$0xff]  }
 0x1cb   :  { %4831 = vmatmul.mubr.msk.bf16.gmra.mrb[224].mxu1 %vm579_vm0, %v5194_v31 }
 0x1cc   :  { %v4752_v1 = vpop.f32.mrb[92].mxu0  ;;  %4834 = vmatprep.mubr.msk.bf16.mxu1 %vm579_vm0, %v5197_v2  ;;  %v5203_v2 = vld [vmem:[%s7606_s3 + $0x8] ss:$12 sps:$4 sm:$0xff]  }
 0x1cd   :  { %v6612_v21 = vadd.f32 %v4752_v1, %v6177_v6  ;;  %v1797_v19 = vpop.f32.mrb[93].mxu0 }
 0x1ce   :  { %v6618_v48 = vadd.f32 %v1797_v19, %v6146_v53  ;;  %v4753_v23 = vpop.f32.mrb[94].mxu0  ;;  %v6620_v58 = vpop.f32.mrb[120].mxu1  ;;  %v5199_v53 = vld [vmem:[%s7605_s2 + $0x200] ss:$0 sps:$4 sm:$0xff]  }
 0x1cf   :  { %v6628_v6 = vadd.f32 %v4753_v23, %v6189_v4  ;;  %v1800_v31 = vpop.f32.mrb[95].mxu0  ;;  %v1727_v1 = vpop.f32.mrb[121].mxu1 }
 0x1d0   :  { %7718 = vst [vmem:[#allocation40_spill] sm:$0xff] %v6618_v48  ;;  %v6636_v40 = vadd.f32 %v1800_v31, %v6157_v16  ;;  %v6638_v57 = vpop.f32.mrb[122].mxu1  ;;  %v5202_v48 = vld [vmem:[%s7606_s3 + $0xf0] ss:$12 sps:$4 sm:$0xff]  }
 0x1d1   :  { %3430 = vmatmul.mubr.bf16.gmra.mrb[200].mxu0 %v5198_v46  ;;  %v1730_v23 = vpop.f32.mrb[123].mxu1 }
 0x1d2   :  { %7719 = vst [vmem:[#allocation41_spill] sm:$0xff] %v6636_v40  ;;  %3437 = vmatprep.mubr.bf16.mxu0 %v5200_v62  ;;  %v5205_v62 = vld [vmem:[%s7606_s3 + $0x10c] ss:$12 sps:$4 sm:$0xff]  }
 0x1d3   :  { %4835 = vmatmul.mubr.msk.bf16.gmra.mrb[228].mxu1 %vm579_vm0, %v5199_v53 }
 0x1d4   :  { %v4756_v19 = vpop.f32.mrb[96].mxu0  ;;  %4842 = vmatprep.mubr.msk.bf16.mxu1 %vm579_vm0, %v5203_v2  ;;  %v5208_v2 = vld [vmem:[%s7606_s3 + $0x38] ss:$12 sps:$4 sm:$0xff]  }
 0x1d5   :  { %v6650_v16 = vadd.f32 %v4756_v19, %v6241_v9  ;;  %v1813_v31 = vpop.f32.mrb[97].mxu0 }
 0x1d6   :  { %v6656_v46 = vadd.f32 %v1813_v31, %v6209_v14  ;;  %v4757_v23 = vpop.f32.mrb[98].mxu0  ;;  %v6658_v4 = vpop.f32.mrb[124].mxu1  ;;  %v5204_v14 = vld [vmem:[%s7606_s3 + $0x20] ss:$12 sps:$4 sm:$0xff]  }
 0x1d7   :  { %v6666_v9 = vadd.f32 %v4757_v23, %v6253_v20  ;;  %v1816_v53 = vpop.f32.mrb[99].mxu0  ;;  %v1735_v19 = vpop.f32.mrb[125].mxu1 }
 0x1d8   :  { %7720 = vst [vmem:[#allocation42_spill] sm:$0xff] %v6656_v46  ;;  %v6674_v1 = vadd.f32 %v1816_v53, %v6221_v22  ;;  %v6676_v40 = vpop.f32.mrb[126].mxu1  ;;  %v5207_v46 = vld [vmem:[%s7606_s3 + $0x108] ss:$12 sps:$4 sm:$0xff]  }
 0x1d9   :  { %7721 = vst [vmem:[#allocation43_spill] sm:$0xff] %v6666_v9  ;;  %3438 = vmatmul.mubr.bf16.gmra.mrb[204].mxu0 %v5202_v48  ;;  %v1738_v23 = vpop.f32.mrb[127].mxu1 }
 0x1da   :  { %7722 = vst [vmem:[#allocation44_spill] sm:$0xff] %v6674_v1  ;;  %3445 = vmatprep.mubr.bf16.mxu0 %v5205_v62  ;;  %v5210_v62 = vld [vmem:[%s7606_s3 + $0x124] ss:$12 sps:$4 sm:$0xff]  }
 0x1db   :  { %4843 = vmatmul.mubr.msk.bf16.vlgmr.msra.gmra.mrb[232].mxu1 %vm579_vm0, %v5204_v14 }
 0x1dc   :  { %v4760_v31 = vpop.f32.mrb[100].mxu0  ;;  %4846 = vmatprep.mubr.msk.bf16.mxu1 %vm579_vm0, %v5208_v2  ;;  %v5213_v2 = vld [vmem:[%s7606_s3 + $0x68] ss:$12 sps:$4 sm:$0xff]  }
 0x1dd   :  { %v6688_v22 = vadd.f32 %v4760_v31, %v6305_v10  ;;  %v1829_v53 = vpop.f32.mrb[101].mxu0 }
 0x1de   :  { %v6694_v48 = vadd.f32 %v1829_v53, %v6273_v24  ;;  %v4761_v23 = vpop.f32.mrb[102].mxu0  ;;  %v6696_v20 = vpop.f32.mrb[128].mxu1  ;;  %v5209_v24 = vld [vmem:[%s7606_s3 + $0x50] ss:$12 sps:$4 sm:$0xff]  }
 0x1df   :  { %7723 = vst [vmem:[#allocation45_spill] sm:$0xff] %v6688_v22  ;;  %v6704_v10 = vadd.f32 %v4761_v23, %v6317_v36  ;;  %v1832_v14 = vpop.f32.mrb[103].mxu0  ;;  %v1743_v31 = vpop.f32.mrb[129].mxu1 }
 0x1e0   :  { %7724 = vst [vmem:[#allocation46_spill] sm:$0xff] %v6694_v48  ;;  %v6712_v19 = vadd.f32 %v1832_v14, %v6285_v8  ;;  %v1744_v1 = vpop.f32.mrb[130].mxu1  ;;  %v5212_v14 = vld [vmem:[%s7606_s3 + $0x120] ss:$12 sps:$4 sm:$0xff]  }
 0x1e1   :  { %7725 = vst [vmem:[#allocation47_spill] sm:$0xff] %v6704_v10  ;;  %3446 = vmatmul.mubr.bf16.gmra.mrb[208].mxu0 %v5207_v46  ;;  %v1745_v23 = vpop.f32.mrb[131].mxu1 }
 0x1e2   :  { %7726 = vst [vmem:[#allocation48_spill] sm:$0xff] %v6712_v19  ;;  %3453 = vmatprep.mubr.bf16.mxu0 %v5210_v62  ;;  %v5215_v62 = vld [vmem:[%s7606_s3 + $0x13c] ss:$12 sps:$4 sm:$0xff]  }
 0x1e3   :  { %4847 = vmatmul.mubr.msk.bf16.gmra.mrb[236].mxu1 %vm579_vm0, %v5209_v24 }
 0x1e4   :  { %v4764_v53 = vpop.f32.mrb[104].mxu0  ;;  %4850 = vmatprep.mubr.msk.bf16.mxu1 %vm579_vm0, %v5213_v2  ;;  %v5218_v2 = vld [vmem:[%s7606_s3 + $0x98] ss:$12 sps:$4 sm:$0xff]  }
 0x1e5   :  { %v6724_v8 = vadd.f32 %v4764_v53, %v6369_v54  ;;  %v1845_v1 = vpop.f32.mrb[105].mxu0 }
 0x1e6   :  { %v6730_v46 = vadd.f32 %v1845_v1, %v6337_v32  ;;  %v4765_v23 = vpop.f32.mrb[106].mxu0  ;;  %v6732_v36 = vpop.f32.mrb[132].mxu1  ;;  %v5214_v32 = vld [vmem:[%s7606_s3 + $0x80] ss:$12 sps:$4 sm:$0xff]  }
 0x1e7   :  { %7727 = vst [vmem:[#allocation49_spill] sm:$0xff] %v6724_v8  ;;  %v6740_v54 = vadd.f32 %v4765_v23, %v6381_v44  ;;  %v1848_v24 = vpop.f32.mrb[107].mxu0  ;;  %v2468_v53 = vpop.f32.mrb[133].mxu1 }
 0x1e8   :  { %7728 = vst [vmem:[#allocation50_spill] sm:$0xff] %v6730_v46  ;;  %v6748_v31 = vadd.f32 %v1848_v24, %v6349_v30  ;;  %v6750_v19 = vpop.f32.mrb[134].mxu1  ;;  %v5217_v46 = vld [vmem:[%s7606_s3 + $0x138] ss:$12 sps:$4 sm:$0xff]  }
 0x1e9   :  { %7729 = vst [vmem:[#allocation51_spill] sm:$0xff] %v6740_v54  ;;  %3454 = vmatmul.mubr.bf16.gmra.mrb[212].mxu0 %v5212_v14  ;;  %v2471_v53 = vpop.f32.mrb[135].mxu1 }
 0x1ea   :  { %7730 = vst [vmem:[#allocation52_spill] sm:$0xff] %v6748_v31  ;;  %3461 = vmatprep.mubr.bf16.mxu0 %v5215_v62  ;;  %v5220_v62 = vld [vmem:[%s7606_s3 + $0x154] ss:$12 sps:$4 sm:$0xff]  }
 0x1eb   :  { %4851 = vmatmul.mubr.msk.bf16.gmra.mrb[240].mxu1 %vm579_vm0, %v5214_v32  ;;  %v5223_v32 = vld [vmem:[%s7606_s3 + $0xc8] ss:$12 sps:$4 sm:$0xff]  }
 0x1ec   :  { %v4768_v1 = vpop.f32.mrb[108].mxu0  ;;  %4854 = vmatprep.mubr.msk.bf16.mxu1 %vm579_vm0, %v5218_v2 }
 0x1ed   :  { %v6762_v30 = vadd.f32 %v4768_v1, %v6422_v63  ;;  %v1861_v24 = vpop.f32.mrb[109].mxu0 }
 0x1ee   :  { %v6768_v14 = vadd.f32 %v1861_v24, %v6400_v12  ;;  %v4769_v53 = vpop.f32.mrb[110].mxu0  ;;  %v6770_v23 = vpop.f32.mrb[136].mxu1  ;;  %v5219_v12 = vld [vmem:[%s7606_s3 + $0xb0] ss:$12 sps:$4 sm:$0xff]  }
 0x1ef   :  { %7733 = vst [vmem:[#allocation53_spill] sm:$0xff] %v6762_v30  ;;  %v6778_v63 = vadd.f32 %v4769_v53, %v6433_v38  ;;  %v1864_v1 = vpop.f32.mrb[111].mxu0  ;;  %v2476_v56 = vpop.f32.mrb[137].mxu1 }
 0x1f0   :  { %7734 = vst [vmem:[#allocation54_spill] sm:$0xff] %v6768_v14  ;;  %v6786_v8 = vadd.f32 %v1864_v1, %v6411_v47  ;;  %v6788_v54 = vpop.f32.mrb[138].mxu1  ;;  %v5222_v14 = vld [vmem:[%s7606_s3 + $0x150] ss:$12 sps:$4 sm:$0xff]  }
 0x1f1   :  { %7736 = vst [vmem:[#allocation55_spill] sm:$0xff] %v6778_v63  ;;  %3462 = vmatmul.mubr.bf16.gmra.mrb[216].mxu0 %v5217_v46  ;;  %v2479_v56 = vpop.f32.mrb[139].mxu1 }
 0x1f2   :  { %7738 = vst [vmem:[#allocation56_spill] sm:$0xff] %v6786_v8  ;;  %3469 = vmatprep.mubr.bf16.mxu0 %v5220_v62  ;;  %v5225_v62 = vld [vmem:[%s7606_s3 + $0x16c] ss:$12 sps:$4 sm:$0xff]  }
 0x1f3   :  { %4855 = vmatmul.mubr.msk.bf16.gmra.mrb[244].mxu1 %vm579_vm0, %v5219_v12  ;;  %v5228_v12 = vld [vmem:[%s7606_s3 + $0xf8] ss:$12 sps:$4 sm:$0xff]  }
 0x1f4   :  { %v4772_v31 = vpop.f32.mrb[112].mxu0  ;;  %4858 = vmatprep.mubr.msk.bf16.mxu1 %vm579_vm0, %v5223_v32 }
 0x1f5   :  { %v6800_v47 = vadd.f32 %v4772_v31, %v6466_v34  ;;  %v1877_v1 = vpop.f32.mrb[113].mxu0 }
 0x1f6   :  { %v6806_v46 = vadd.f32 %v1877_v1, %v6444_v0  ;;  %v4773_v56 = vpop.f32.mrb[114].mxu0  ;;  %v6808_v53 = vpop.f32.mrb[140].mxu1  ;;  %v5224_v0 = vld [vmem:[%s7606_s3 + $0xe0] ss:$12 sps:$4 sm:$0xff]  }
 0x1f7   :  { %7741 = vst [vmem:[#allocation57_spill] sm:$0xff] %v6800_v47  ;;  %v6816_v34 = vadd.f32 %v4773_v56, %v6477_v5  ;;  %v1880_v31 = vpop.f32.mrb[115].mxu0  ;;  %v2484_v2 = vpop.f32.mrb[141].mxu1  ;;  %v7750_v56 = vld [vmem:[#allocation30_spill] sm:$0xff]  ;;  %v7755_v47 = vld [vmem:[#allocation32_spill] sm:$0xff] }
 0x1f8   :  { %7742 = vst [vmem:[#allocation58_spill] sm:$0xff] %v6806_v46  ;;  %v6824_v30 = vadd.f32 %v1880_v31, %v6455_v7  ;;  %v6826_v63 = vpop.f32.mrb[142].mxu1  ;;  %v5227_v46 = vld [vmem:[%s7606_s3 + $0x168] ss:$12 sps:$4 sm:$0xff]  }
 0x1f9   :  { %7744 = vst [vmem:[#allocation59_spill] sm:$0xff] %v6816_v34  ;;  %3470 = vmatmul.mubr.bf16.gmra.mrb[220].mxu0 %v5222_v14  ;;  %v2487_v2 = vpop.f32.mrb[143].mxu1 }
 0x1fa   :  { %7746 = vst [vmem:[#allocation60_spill] sm:$0xff] %v6824_v30  ;;  %3477 = vmatprep.mubr.bf16.mxu0 %v5225_v62  ;;  %v5230_v62 = vld [vmem:[%s7606_s3 + $0x184] ss:$12 sps:$4 sm:$0xff]  }
 0x1fb   :  { %4859 = vmatmul.mubr.msk.bf16.gmra.mrb[248].mxu1 %vm579_vm0, %v5224_v0  ;;  %v5233_v0 = vld [vmem:[%s7606_s3 + $0x128] ss:$12 sps:$4 sm:$0xff]  }
 0x1fc   :  { %v4776_v8 = vpop.f32.mrb[116].mxu0  ;;  %4862 = vmatprep.mubr.msk.bf16.mxu1 %vm579_vm0, %v5228_v12 }
 0x1fd   :  { %v6838_v7 = vadd.f32 %v4776_v8, %v6513_v28  ;;  %v1893_v31 = vpop.f32.mrb[117].mxu0 }
 0x1fe   :  { %v6844_v14 = vadd.f32 %v1893_v31, %v7750_v56  ;;  %v4777_v2 = vpop.f32.mrb[118].mxu0  ;;  %v6846_v34 = vpop.f32.mrb[144].mxu1  ;;  %v5229_v56 = vld [vmem:[%s7606_s3 + $0x110] ss:$12 sps:$4 sm:$0xff]  }
 0x1ff   :  { %7749 = vst [vmem:[#allocation61_spill] sm:$0xff] %v6838_v7  ;;  %v6854_v28 = vadd.f32 %v4777_v2, %v6524_v43  ;;  %v1896_v8 = vpop.f32.mrb[119].mxu0  ;;  %v2492_v32 = vpop.f32.mrb[145].mxu1 }
 0x200   :  { %7751 = vst [vmem:[#allocation30_spill] sm:$0xff] %v6844_v14  ;;  %v6862_v5 = vadd.f32 %v1896_v8, %v7755_v47  ;;  %v6864_v1 = vpop.f32.mrb[146].mxu1  ;;  %v5232_v14 = vld [vmem:[%s7606_s3 + $0x180] ss:$12 sps:$4 sm:$0xff]  }
 0x201   :  { %7753 = vst [vmem:[#allocation62_spill] sm:$0xff] %v6854_v28  ;;  %3478 = vmatmul.mubr.bf16.gmra.mrb[224].mxu0 %v5227_v46  ;;  %v2495_v32 = vpop.f32.mrb[147].mxu1 }
 0x202   :  { %7756 = vst [vmem:[#allocation32_spill] sm:$0xff] %v6862_v5  ;;  %3485 = vmatprep.mubr.bf16.mxu0 %v5230_v62  ;;  %v5235_v62 = vld [vmem:[%s7606_s3 + $0x19c] ss:$12 sps:$4 sm:$0xff]  }
 0x203   :  { %4863 = vmatmul.mubr.msk.bf16.gmra.mrb[252].mxu1 %vm579_vm0, %v5229_v56  ;;  %v5238_v56 = vld [vmem:[%s7606_s3 + $0x158] ss:$12 sps:$4 sm:$0xff]  }
 0x204   :  { %v4780_v30 = vpop.f32.mrb[120].mxu0  ;;  %4866 = vmatprep.mubr.msk.bf16.mxu1 %vm579_vm0, %v5233_v0 }
 0x205   :  { %v6876_v47 = vadd.f32 %v4780_v30, %v6552_v45  ;;  %v1909_v8 = vpop.f32.mrb[121].mxu0 }
 0x206   :  { %v6882_v46 = vadd.f32 %v1909_v8, %v6532_v26  ;;  %v4781_v32 = vpop.f32.mrb[122].mxu0  ;;  %v6884_v2 = vpop.f32.mrb[148].mxu1  ;;  %v5234_v26 = vld [vmem:[%s7606_s3 + $0x140] ss:$12 sps:$4 sm:$0xff]  }
 0x207   :  { %7759 = vst [vmem:[#allocation63_spill] sm:$0xff] %v6876_v47  ;;  %v6892_v45 = vadd.f32 %v4781_v32, %v6560_v3  ;;  %v1912_v30 = vpop.f32.mrb[123].mxu0  ;;  %v2500_v12 = vpop.f32.mrb[149].mxu1  ;;  %v7768_v32 = vld [vmem:[#allocation38_spill] sm:$0xff] }
 0x208   :  { %7760 = vst [vmem:[#allocation64_spill] sm:$0xff] %v6882_v46  ;;  %v6900_v7 = vadd.f32 %v1912_v30, %v6540_v11  ;;  %v6902_v28 = vpop.f32.mrb[150].mxu1  ;;  %v5237_v46 = vld [vmem:[%s7606_s3 + $0x198] ss:$12 sps:$4 sm:$0xff]  }
 0x209   :  { %7762 = vst [vmem:[#allocation65_spill] sm:$0xff] %v6892_v45  ;;  %3486 = vmatmul.mubr.bf16.gmra.mrb[228].mxu0 %v5232_v14  ;;  %v2503_v12 = vpop.f32.mrb[151].mxu1 }
 0x20a   :  { %7764 = vst [vmem:[#allocation66_spill] sm:$0xff] %v6900_v7  ;;  %3493 = vmatprep.mubr.bf16.mxu0 %v5235_v62  ;;  %v5240_v62 = vld [vmem:[%s7606_s3 + $0x1b4] ss:$12 sps:$4 sm:$0xff]  }
 0x20b   :  { %4867 = vmatmul.mubr.msk.bf16.gmra.mrb[0].mxu1 %vm579_vm0, %v5234_v26  ;;  %v5243_v26 = vld [vmem:[%s7606_s3 + $0x188] ss:$12 sps:$4 sm:$0xff]  }
 0x20c   :  { %v4784_v5 = vpop.f32.mrb[124].mxu0  ;;  %4870 = vmatprep.mubr.msk.bf16.mxu1 %vm579_vm0, %v5238_v56  ;;  %v5244_v56 = vld [vmem:[%s7606_s3 + $0x1a0] ss:$12 sps:$4 sm:$0xff]  }
 0x20d   :  { %v6914_v11 = vadd.f32 %v4784_v5, %v6620_v58  ;;  %v1925_v30 = vpop.f32.mrb[125].mxu0 }
 0x20e   :  { %v6920_v14 = vadd.f32 %v1925_v30, %v7768_v32  ;;  %v4785_v12 = vpop.f32.mrb[126].mxu0  ;;  %v6922_v45 = vpop.f32.mrb[152].mxu1  ;;  %v5239_v32 = vld [vmem:[%s7606_s3 + $0x170] ss:$12 sps:$4 sm:$0xff]  }
 0x20f   :  { %7767 = vst [vmem:[#allocation67_spill] sm:$0xff] %v6914_v11  ;;  %v6930_v58 = vadd.f32 %v4785_v12, %v6638_v57  ;;  %v1928_v5 = vpop.f32.mrb[127].mxu0  ;;  %v2508_v0 = vpop.f32.mrb[153].mxu1  ;;  %v5248_v11 = vld [vmem:[%s7606_s3 + $0x1b8] ss:$12 sps:$4 sm:$0xff]  }
 0x210   :  { %7769 = vst [vmem:[#allocation38_spill] sm:$0xff] %v6920_v14  ;;  %v6938_v47 = vadd.f32 %v1928_v5, %v6600_v50  ;;  %v6940_v3 = vpop.f32.mrb[154].mxu1  ;;  %v5242_v14 = vld [vmem:[%s7606_s3 + $0x1b0] ss:$12 sps:$4 sm:$0xff]  }
 0x211   :  { %7771 = vst [vmem:[#allocation68_spill] sm:$0xff] %v6930_v58  ;;  %3494 = vmatmul.mubr.bf16.gmra.mrb[232].mxu0 %v5237_v46  ;;  %v2511_v0 = vpop.f32.mrb[155].mxu1 }
 0x212   :  { %7773 = vst [vmem:[#allocation69_spill] sm:$0xff] %v6938_v47  ;;  %3501 = vmatprep.mubr.bf16.mxu0 %v5240_v62  ;;  %v5245_v62 = vld [vmem:[%s7606_s3 + $0x1cc] ss:$12 sps:$4 sm:$0xff]  }
 0x213   :  { %4871 = vmatmul.mubr.msk.bf16.gmra.mrb[4].mxu1 %vm579_vm0, %v5239_v32 }
 0x214   :  { %v4788_v7 = vpop.f32.mrb[128].mxu0  ;;  %4874 = vmatprep.mubr.msk.bf16.mxu1 %vm579_vm0, %v5243_v26 }
 0x215   :  { %v6952_v50 = vadd.f32 %v4788_v7, %v6696_v20  ;;  %v1941_v5 = vpop.f32.mrb[129].mxu0 }
 0x216   :  { %v6958_v46 = vadd.f32 %v1941_v5, %v6658_v4  ;;  %v4789_v0 = vpop.f32.mrb[130].mxu0  ;;  %v6960_v12 = vpop.f32.mrb[156].mxu1  ;;  %v5247_v4 = vld [vmem:[%s7606_s3 + $0x1c8] ss:$12 sps:$4 sm:$0xff]  }
 0x217   :  { %7776 = vst [vmem:[#allocation70_spill] sm:$0xff] %v6952_v50  ;;  %v1944_v20 = vpop.f32.mrb[131].mxu0  ;;  %v2516_v7 = vpop.f32.mrb[157].mxu1 }
 0x218   :  { %7777 = vst [vmem:[#allocation71_spill] sm:$0xff] %v6958_v46  ;;  %v6973_v5 = vadd.f32 %v1944_v20, %v6676_v40  ;;  %v6975_v0 = vpop.f32.mrb[158].mxu1 }
 0x219   :  { %3502 = vmatmul.mubr.bf16.gmra.mrb[236].mxu0 %v5242_v14  ;;  %v2519_v32 = vpop.f32.mrb[159].mxu1 }
 0x21a   :  { %7780 = vst [vmem:[#allocation72_spill] sm:$0xff] %v6973_v5  ;;  %3509 = vmatprep.mubr.bf16.mxu0 %v5245_v62 }
 0x21b   :  { %4875 = vmatmul.mubr.msk.bf16.gmra.mrb[8].mxu1 %vm579_vm0, %v5244_v56  ;;  %v5250_v56 = vld [vmem:[%s7606_s3 + $0x1e4] ss:$12 sps:$4 sm:$0xff]  }
 0x21c   :  { %v4796_v26 = vpop.f32.mrb[132].mxu0  ;;  %4878 = vmatprep.mubr.msk.bf16.mxu1 %vm579_vm0, %v5248_v11 }
 0x21d   :  { %v6985_v40 = vadd.f32 %v4796_v26, %v6770_v23  ;;  %v2674_v20 = vpop.f32.mrb[133].mxu0  ;;  %v5249_v26 = vld [vmem:[%s7606_s3 + $0x1d0] ss:$12 sps:$4 sm:$0xff]  }
 0x21e   :  { %v6991_v14 = vadd.f32 %v2674_v20, %v6732_v36  ;;  %v4797_v32 = vpop.f32.mrb[134].mxu0  ;;  %v2522_v46 = vpop.f32.mrb[160].mxu1  ;;  %v5253_v20 = vld [vmem:[%s7606_s3 + $0x1e8] ss:$12 sps:$4 sm:$0xff]  }
 0x21f   :  { %v6997_v62 = vadd.f32 %v4797_v32, %v6788_v54  ;;  %v2677_v11 = vpop.f32.mrb[135].mxu0  ;;  %v2524_v23 = vpop.f32.mrb[161].mxu1  ;;  %v2932_v54 = vld [vmem:[%s7606_s3 + $0x1f8] sm:$0xff] }
 0x220   :  { %v7003_v50 = vadd.f32 %v2677_v11, %v6750_v19  ;;  %v2525_v36 = vpop.f32.mrb[162].mxu1  ;;  %v5252_v23 = vld [vmem:[%s7606_s3 + $0x1e0] ss:$12 sps:$4 sm:$0xff]  }
 0x221   :  { %3510 = vmatmul.mubr.bf16.gmra.mrb[240].mxu0 %v5247_v4  ;;  %v2527_v5 = vpop.f32.mrb[163].mxu1 }
 0x222   :  { %3517 = vmatprep.mubr.bf16.mxu0 %v5250_v56 }
 0x223   :  { %4879 = vmatmul.mubr.msk.bf16.gmra.mrb[12].mxu1 %vm579_vm0, %v5249_v26  ;;  %v4487_v26 = vcombine.high %v2932_v54, %v2932_v54 }
 0x224   :  { %v4800_v32 = vpop.f32.mrb[136].mxu0  ;;  %4882 = vmatprep.mubr.msk.bf16.mxu1 %vm579_vm0, %v5253_v20 }
 0x225   :  { %v7014_v19 = vadd.f32 %v4800_v32, %v6846_v34  ;;  %v2690_v11 = vpop.f32.mrb[137].mxu0  ;;  %v5254_v34 = vld [vmem:[%s7606_s3 + $0x200] ss:$0 sps:$4 sm:$0xff]  }
 0x226   :  { %v7020_v4 = vadd.f32 %v2690_v11, %v6808_v53  ;;  %v4801_v5 = vpop.f32.mrb[138].mxu0  ;;  %v2530_v56 = vpop.f32.mrb[164].mxu1 }
 0x227   :  { %v7023_v7 = vadd.f32 %v4801_v5, %v6864_v1  ;;  %v2693_v47 = vpop.f32.mrb[139].mxu0  ;;  %v2532_v58 = vpop.f32.mrb[165].mxu1  ;;  %v4486_v5 = vcombine.low %v2932_v54, %v2932_v54 }
 0x228   :  { %v7029_v20 = vadd.f32 %v2693_v47, %v6826_v63  ;;  %v2533_v32 = vpop.f32.mrb[166].mxu1 }
 0x229   :  { %3518 = vmatmul.mubr.bf16.gmra.mrb[244].mxu0 %v5252_v23  ;;  %v2535_v57 = vpop.f32.mrb[167].mxu1 }
 0x22a   :  { %3525 = vmatprep.mubr.bf16.mxu0 %v4487_v26 }
 0x22b   :  { %4883 = vmatmul.mubr.msk.bf16.gmra.mrb[16].mxu1 %vm579_vm0, %v5254_v34 }
 0x22c   :  { %v4804_v53 = vpop.f32.mrb[140].mxu0 }
 0x22d   :  { %v7033_v11 = vadd.f32 %v4804_v53, %v6922_v45  ;;  %v2706_v1 = vpop.f32.mrb[141].mxu0 }
 0x22e   :  { %v7036_v58 = vadd.f32 %v2706_v1, %v6884_v2  ;;  %v4805_v30 = vpop.f32.mrb[142].mxu0  ;;  %v2538_v8 = vpop.f32.mrb[168].mxu1 }
 0x22f   :  { %v7039_v63 = vadd.f32 %v4805_v30, %v6940_v3  ;;  %v2709_v47 = vpop.f32.mrb[143].mxu0  ;;  %v2540_v23 = vpop.f32.mrb[169].mxu1 }
 0x230   :  { %v7042_v57 = vadd.f32 %v2709_v47, %v6902_v28  ;;  %v2541_v26 = vpop.f32.mrb[170].mxu1 }
 0x231   :  { %3526 = vmatmul.mubr.bf16.gmra.mrb[248].mxu0 %v4486_v5  ;;  %v2543_v34 = vpop.f32.mrb[171].mxu1 }
 0x232   :  { %7782 = vst [vmem:[#allocation73_spill] sm:$0xff] %v7042_v57 }
 0x234   :  { %v4808_v45 = vpop.f32.mrb[144].mxu0 }
 0x235   :  { %v7044_v53 = vadd.f32 %v4808_v45, %v2522_v46  ;;  %v2722_v54 = vpop.f32.mrb[145].mxu0 }
 0x236   :  { %v7047_v2 = vadd.f32 %v2722_v54, %v6960_v12  ;;  %v4809_v1 = vpop.f32.mrb[146].mxu0  ;;  %v2546_v43 = vpop.f32.mrb[172].mxu1 }
 0x237   :  { %7783 = vst [vmem:[#allocation74_spill] sm:$0xff] %v7044_v53  ;;  %v7049_v31 = vadd.f32 %v4809_v1, %v2525_v36  ;;  %v2725_v3 = vpop.f32.mrb[147].mxu0  ;;  %v2548_v30 = vpop.f32.mrb[173].mxu1 }
 0x238   :  { %7784 = vst [vmem:[#allocation75_spill] sm:$0xff] %v7047_v2  ;;  %v7052_v23 = vadd.f32 %v2725_v3, %v6975_v0  ;;  %v2549_v28 = vpop.f32.mrb[174].mxu1 }
 0x239   :  { %7785 = vst [vmem:[#allocation76_spill] sm:$0xff] %v7049_v31  ;;  %v2551_v47 = vpop.f32.mrb[175].mxu1 }
 0x23a   :  { %7786 = vst [vmem:[#allocation77_spill] sm:$0xff] %v7052_v23 }
 0x23c   :  { %v4812_v5 = vpop.f32.mrb[148].mxu0 }
 0x23d   :  { %v7054_v34 = vadd.f32 %v4812_v5, %v2538_v8  ;;  %v2738_v46 = vpop.f32.mrb[149].mxu0 }
 0x23e   :  { %v7056_v45 = vadd.f32 %v2738_v46, %v2530_v56  ;;  %v4813_v38 = vpop.f32.mrb[150].mxu0  ;;  %v2554_v12 = vpop.f32.mrb[176].mxu1 }
 0x23f   :  { %7787 = vst [vmem:[#allocation78_spill] sm:$0xff] %v7054_v34  ;;  %v7058_v54 = vadd.f32 %v4813_v38, %v2541_v26  ;;  %v2741_v24 = vpop.f32.mrb[151].mxu0  ;;  %v2556_v36 = vpop.f32.mrb[177].mxu1 }
 0x240   :  { %7788 = vst [vmem:[#allocation79_spill] sm:$0xff] %v7056_v45  ;;  %v7060_v1 = vadd.f32 %v2741_v24, %v2533_v32  ;;  %v2557_v30 = vpop.f32.mrb[178].mxu1 }
 0x241   :  { %7789 = vst [vmem:[#allocation80_spill] sm:$0xff] %v7058_v54  ;;  %v2559_v44 = vpop.f32.mrb[179].mxu1 }
 0x242   :  { %7790 = vst [vmem:[#allocation81_spill] sm:$0xff] %v7060_v1 }
 0x244   :  { %v4816_v0 = vpop.f32.mrb[152].mxu0 }
 0x245   :  { %v7062_v3 = vadd.f32 %v4816_v0, %v2554_v12  ;;  %v2754_v47 = vpop.f32.mrb[153].mxu0 }
 0x246   :  { %v7064_v35 = vadd.f32 %v2754_v47, %v2546_v43  ;;  %v4817_v8 = vpop.f32.mrb[154].mxu0  ;;  %v2562_v5 = vpop.f32.mrb[180].mxu1 }
 0x247   :  { %7791 = vst [vmem:[#allocation82_spill] sm:$0xff] %v7062_v3  ;;  %v7066_v56 = vadd.f32 %v4817_v8, %v2557_v30  ;;  %v2757_v46 = vpop.f32.mrb[155].mxu0  ;;  %v2564_v45 = vpop.f32.mrb[181].mxu1 }
 0x248   :  { %7792 = vst [vmem:[#allocation83_spill] sm:$0xff] %v7064_v35  ;;  %v7068_v38 = vadd.f32 %v2757_v46, %v2549_v28  ;;  %v2565_v26 = vpop.f32.mrb[182].mxu1 }
 0x249   :  { %7793 = vst [vmem:[#allocation84_spill] sm:$0xff] %v7066_v56  ;;  %v2567_v36 = vpop.f32.mrb[183].mxu1 }
 0x24a   :  { %7794 = vst [vmem:[#allocation85_spill] sm:$0xff] %v7068_v38 }
 0x24c   :  { %v4820_v24 = vpop.f32.mrb[156].mxu0 }
 0x24d   :  { %v2770_v32 = vpop.f32.mrb[157].mxu0 }
 0x24e   :  { %v2570_v1 = vpop.f32.mrb[184].mxu1  ;;  %v7070_v44 = vadd.f32 %v2770_v32, %v2562_v5  ;;  %v4821_v12 = vpop.f32.mrb[158].mxu0 }
 0x24f   :  { %v7072_v0 = vadd.f32 %v4820_v24, %v2570_v1  ;;  %v2572_v43 = vpop.f32.mrb[185].mxu1  ;;  %v2773_v47 = vpop.f32.mrb[159].mxu0 }
 0x250   :  { %7795 = vst [vmem:[#allocation86_spill] sm:$0xff] %v7070_v44  ;;  %v2573_v35 = vpop.f32.mrb[186].mxu1  ;;  %v7074_v3 = vadd.f32 %v2773_v47, %v2565_v26 }
 0x251   :  { %7796 = vst [vmem:[#allocation87_spill] sm:$0xff] %v7072_v0  ;;  %v7076_v30 = vadd.f32 %v4821_v12, %v2573_v35  ;;  %v2575_v45 = vpop.f32.mrb[187].mxu1 }
 0x252   :  { %7797 = vst [vmem:[#allocation88_spill] sm:$0xff] %v7074_v3 }
 0x253   :  { %7798 = vst [vmem:[#allocation89_spill] sm:$0xff] %v7076_v30 }
 0x254   :  { %v4824_v28 = vpop.f32.mrb[160].mxu0 }
 0x255   :  { %v2786_v8 = vpop.f32.mrb[161].mxu0 }
 0x256   :  { %v2578_v46 = vpop.f32.mrb[188].mxu1  ;;  %v4825_v36 = vpop.f32.mrb[162].mxu0 }
 0x257   :  { %v7078_v38 = vadd.f32 %v2786_v8, %v2578_v46  ;;  %v2580_v56 = vpop.f32.mrb[189].mxu1  ;;  %v2789_v5 = vpop.f32.mrb[163].mxu0 }
 0x258   :  { %v2581_v32 = vpop.f32.mrb[190].mxu1 }
 0x259   :  { %7799 = vst [vmem:[#allocation90_spill] sm:$0xff] %v7078_v38  ;;  %v7080_v44 = vadd.f32 %v2789_v5, %v2581_v32  ;;  %v2583_v1 = vpop.f32.mrb[191].mxu1 }
 0x25b   :  { %7800 = vst [vmem:[#allocation91_spill] sm:$0xff] %v7080_v44 }
 0x25c   :  { %v7082_v24 = vpop.f32.mrb[164].mxu0 }
 0x25d   :  { %v3361_v43 = vpop.f32.mrb[165].mxu0 }
 0x25e   :  { %v2586_v26 = vpop.f32.mrb[192].mxu1  ;;  %v7084_v47 = vpop.f32.mrb[166].mxu0 }
 0x25f   :  { %v7086_v35 = vadd.f32 %v4824_v28, %v2586_v26  ;;  %v2588_v12 = vpop.f32.mrb[193].mxu1  ;;  %v3364_v45 = vpop.f32.mrb[167].mxu0 }
 0x260   :  { %v2589_v3 = vpop.f32.mrb[194].mxu1 }
 0x261   :  { %7801 = vst [vmem:[#allocation92_spill] sm:$0xff] %v7086_v35  ;;  %v7088_v30 = vadd.f32 %v4825_v36, %v2589_v3  ;;  %v2591_v8 = vpop.f32.mrb[195].mxu1 }
 0x263   :  { %7802 = vst [vmem:[#allocation93_spill] sm:$0xff] %v7088_v30 }
 0x264   :  { %v7090_v56 = vpop.f32.mrb[168].mxu0 }
 0x265   :  { %v3369_v46 = vpop.f32.mrb[169].mxu0 }
 0x266   :  { %v7092_v5 = vpop.f32.mrb[170].mxu0  ;;  %v2594_v32 = vpop.f32.mrb[196].mxu1 }
 0x267   :  { %v3372_v1 = vpop.f32.mrb[171].mxu0  ;;  %v2596_v44 = vpop.f32.mrb[197].mxu1 }
 0x268   :  { %v2597_v43 = vpop.f32.mrb[198].mxu1 }
 0x269   :  { %v2599_v38 = vpop.f32.mrb[199].mxu1 }
 0x26c   :  { %v7094_v0 = vpop.f32.mrb[172].mxu0 }
 0x26d   :  { %v3377_v28 = vpop.f32.mrb[173].mxu0 }
 0x26e   :  { %v7096_v26 = vpop.f32.mrb[174].mxu0  ;;  %v2602_v12 = vpop.f32.mrb[200].mxu1 }
 0x26f   :  { %v3380_v45 = vpop.f32.mrb[175].mxu0  ;;  %v2604_v3 = vpop.f32.mrb[201].mxu1 }
 0x270   :  { %v2605_v36 = vpop.f32.mrb[202].mxu1 }
 0x271   :  { %v2607_v8 = vpop.f32.mrb[203].mxu1 }
 0x274   :  { %v7098_v30 = vpop.f32.mrb[176].mxu0 }
 0x275   :  { %v3385_v46 = vpop.f32.mrb[177].mxu0 }
 0x276   :  { %v7100_v35 = vpop.f32.mrb[178].mxu0  ;;  %v2610_v54 = vpop.f32.mrb[204].mxu1 }
 0x277   :  { %v3388_v1 = vpop.f32.mrb[179].mxu0  ;;  %v2612_v44 = vpop.f32.mrb[205].mxu1 }
 0x278   :  { %v2613_v34 = vpop.f32.mrb[206].mxu1 }
 0x279   :  { %v2615_v38 = vpop.f32.mrb[207].mxu1 }
 0x27c   :  { %v7102_v61 = vpop.f32.mrb[180].mxu0 }
 0x27d   :  { %v3393_v28 = vpop.f32.mrb[181].mxu0 }
 0x27e   :  { %v7104_v10 = vpop.f32.mrb[182].mxu0  ;;  %v2618_v18 = vpop.f32.mrb[208].mxu1 }
 0x27f   :  { %v3396_v45 = vpop.f32.mrb[183].mxu0  ;;  %v2620_v3 = vpop.f32.mrb[209].mxu1 }
 0x280   :  { %v2621_v23 = vpop.f32.mrb[210].mxu1 }
 0x281   :  { %v2623_v8 = vpop.f32.mrb[211].mxu1 }
 0x284   :  { %v7106_v48 = vpop.f32.mrb[184].mxu0 }
 0x285   :  { %v3401_v46 = vpop.f32.mrb[185].mxu0 }
 0x286   :  { %v7108_v42 = vpop.f32.mrb[186].mxu0  ;;  %v2626_v31 = vpop.f32.mrb[212].mxu1 }
 0x287   :  { %v3404_v1 = vpop.f32.mrb[187].mxu0  ;;  %v2628_v44 = vpop.f32.mrb[213].mxu1 }
 0x288   :  { %v2629_v22 = vpop.f32.mrb[214].mxu1 }
 0x289   :  { %v2631_v38 = vpop.f32.mrb[215].mxu1 }
 0x28c   :  { %v7110_v29 = vpop.f32.mrb[188].mxu0 }
 0x28d   :  { %7803 = vst [vmem:[#allocation94_spill] sm:$0xff] %v7110_v29  ;;  %v3409_v28 = vpop.f32.mrb[189].mxu0 }
 0x28e   :  { %v7112_v2 = vpop.f32.mrb[190].mxu0  ;;  %v2634_v53 = vpop.f32.mrb[216].mxu1 }
 0x28f   :  { %7804 = vst [vmem:[#allocation95_spill] sm:$0xff] %v7112_v2  ;;  %v3412_v45 = vpop.f32.mrb[191].mxu0  ;;  %v2636_v3 = vpop.f32.mrb[217].mxu1 }
 0x290   :  { %v2637_v37 = vpop.f32.mrb[218].mxu1 }
 0x291   :  { %v2638_v8 = vpop.f32.mrb[219].mxu1 }
 0x294   :  { %v7114_v9 = vpop.f32.mrb[192].mxu0 }
 0x295   :  { %7805 = vst [vmem:[#allocation96_spill] sm:$0xff] %v7114_v9  ;;  %v3417_v46 = vpop.f32.mrb[193].mxu0 }
 0x296   :  { %v4828_v17 = vpop.f32.mrb[220].mxu1  ;;  %v7116_v57 = vpop.f32.mrb[194].mxu0 }
 0x297   :  { %v7118_v1 = vadd.f32 %v4828_v17, %v2602_v12  ;;  %v2802_v44 = vpop.f32.mrb[221].mxu1  ;;  %v3420_v38 = vpop.f32.mrb[195].mxu0 }
 0x298   :  { %v7120_v25 = vadd.f32 %v2802_v44, %v2594_v32  ;;  %v4829_v28 = vpop.f32.mrb[222].mxu1 }
 0x299   :  { %7806 = vst [vmem:[#allocation97_spill] sm:$0xff] %v7118_v1  ;;  %v7122_v29 = vadd.f32 %v4829_v28, %v2605_v36  ;;  %v2805_v2 = vpop.f32.mrb[223].mxu1 }
 0x29a   :  { %v7124_v45 = vadd.f32 %v2805_v2, %v2597_v43 }
 0x29c   :  { %7807 = vst [vmem:[#allocation98_spill] sm:$0xff] %v7124_v45  ;;  %v7126_v37 = vpop.f32.mrb[196].mxu0 }
 0x29d   :  { %v3425_v3 = vpop.f32.mrb[197].mxu0 }
 0x29e   :  { %v4832_v8 = vpop.f32.mrb[224].mxu1  ;;  %v7128_v46 = vpop.f32.mrb[198].mxu0 }
 0x29f   :  { %v7130_v9 = vadd.f32 %v4832_v8, %v2618_v18  ;;  %v2818_v17 = vpop.f32.mrb[225].mxu1  ;;  %v3428_v12 = vpop.f32.mrb[199].mxu0 }
 0x2a0   :  { %v7132_v1 = vadd.f32 %v2818_v17, %v2610_v54  ;;  %v4833_v32 = vpop.f32.mrb[226].mxu1 }
 0x2a1   :  { %7808 = vst [vmem:[#allocation99_spill] sm:$0xff] %v7130_v9  ;;  %v7134_v44 = vadd.f32 %v4833_v32, %v2621_v23  ;;  %v2821_v36 = vpop.f32.mrb[227].mxu1 }
 0x2a2   :  { %v7136_v38 = vadd.f32 %v2821_v36, %v2613_v34 }
 0x2a3   :  { %7809 = vst [vmem:[#allocation100_spill] sm:$0xff] %v7134_v44 }
 0x2a4   :  { %7810 = vst [vmem:[#allocation101_spill] sm:$0xff] %v7136_v38  ;;  %v7138_v2 = vpop.f32.mrb[200].mxu0 }
 0x2a5   :  { %v3433_v43 = vpop.f32.mrb[201].mxu0 }
 0x2a6   :  { %v4836_v28 = vpop.f32.mrb[228].mxu1  ;;  %v7140_v3 = vpop.f32.mrb[202].mxu0 }
 0x2a7   :  { %v7142_v45 = vadd.f32 %v4836_v28, %v2634_v53  ;;  %v2834_v18 = vpop.f32.mrb[229].mxu1  ;;  %v3436_v8 = vpop.f32.mrb[203].mxu0 }
 0x2a8   :  { %v7144_v9 = vadd.f32 %v2834_v18, %v2626_v31  ;;  %v4837_v54 = vpop.f32.mrb[230].mxu1 }
 0x2a9   :  { %v2837_v17 = vpop.f32.mrb[231].mxu1 }
 0x2aa   :  { %v7146_v12 = vadd.f32 %v2837_v17, %v2629_v22  ;;  %v7159_v22 = vld [vmem:[%s7607_s5] ss:$0 sm:$0xff] }
 0x2ac   :  { %v7148_v23 = vpop.f32.mrb[204].mxu0 }
 0x2ad   :  { %v3441_v34 = vpop.f32.mrb[205].mxu0 }
 0x2ae   :  { %v4844_v32 = vpop.f32.mrb[232].mxu1  ;;  %v7150_v36 = vpop.f32.mrb[206].mxu0 }
 0x2af   :  { %v3576_v43 = vadd.f32 %v4844_v32, %v7090_v56  ;;  %v3567_v38 = vpop.f32.mrb[233].mxu1  ;;  %v3444_v44 = vpop.f32.mrb[207].mxu0  ;;  %v7811_v56 = vmax.f32 %v6017_v13, %v6571_v39  ;;  %v7814_v39 = vld [vmem:[#allocation39_spill] sm:$0xff] }
 0x2b0   :  { %v3568_v53 = vadd.f32 %v3567_v38, %v7082_v24  ;;  %v4845_v28 = vpop.f32.mrb[234].mxu1 }
 0x2b1   :  { %v3786_v31 = vmax.f32 %v6985_v40, %v3576_v43  ;;  %v3579_v18 = vadd.f32 %v4845_v28, %v7092_v5  ;;  %v3570_v8 = vpop.f32.mrb[235].mxu1  ;;  %v7812_v40 = vmax.f32 %v5986_v52, %v6580_v27 }
 0x2b2   :  { %v3784_v54 = vmax.f32 %v6991_v14, %v3568_v53  ;;  %v3571_v17 = vadd.f32 %v3570_v8, %v7084_v47  ;;  %v7813_v14 = vmax.f32 %v6022_v15, %v6590_v49 }
 0x2b3   :  { %v3829_v44 = vmax.f32 %v7811_v56, %v3786_v31  ;;  %v3787_v24 = vmax.f32 %v6997_v62, %v3579_v18  ;;  %v7815_v62 = vmax.f32 %v5992_v59, %v7814_v39 }
 0x2b4   :  { %v3827_v5 = vmax.f32 %v7812_v40, %v3784_v54  ;;  %v3785_v38 = vmax.f32 %v7003_v50, %v3571_v17  ;;  %v7171_v34 = vpop.f32.mrb[208].mxu0 }
 0x2b5   :  { %v3879_v32 = vadd.f32 %v7159_v22, %v3829_v44  ;;  %v3830_v47 = vmax.f32 %v7813_v14, %v3787_v24  ;;  %v3449_v43 = vpop.f32.mrb[209].mxu0 }
 0x2b6   :  { %v3877_v13 = vadd.f32 %v7159_v22, %v3827_v5  ;;  %v3828_v53 = vmax.f32 %v7815_v62, %v3785_v38  ;;  %v4848_v52 = vpop.f32.mrb[236].mxu1  ;;  %v7181_v27 = vpop.f32.mrb[210].mxu0 }
 0x2b7   :  { %v4557_v50 = vpack.c.bf16 %v3879_v32, %v3879_v32  ;;  %v3880_v28 = vadd.f32 %v7159_v22, %v3830_v47  ;;  %v3592_v31 = vadd.f32 %v4848_v52, %v7098_v30  ;;  %v3583_v18 = vpop.f32.mrb[237].mxu1  ;;  %v3452_v8 = vpop.f32.mrb[211].mxu0 }
 0x2b8   :  { %v4555_v15 = vpack.c.bf16 %v3877_v13, %v3877_v13  ;;  %v3878_v49 = vadd.f32 %v7159_v22, %v3828_v53  ;;  %v3584_v54 = vadd.f32 %v3583_v18, %v7094_v0  ;;  %v4849_v17 = vpop.f32.mrb[238].mxu1  ;;  %v7820_v13 = vld [vmem:[#allocation41_spill] sm:$0xff] }
 0x2b9   :  { %4096 = vst.msk [vmem:[%s7608_s6 + $0x8] sm:$0xf] %vm4093_vm1, %v4557_v50  ;;  %v4558_v59 = vpack.c.bf16 %v3880_v28, %v3880_v28  ;;  %v3790_v56 = vmax.f32 %v7014_v19, %v3592_v31  ;;  %v3595_v44 = vadd.f32 %v4849_v17, %v7100_v35  ;;  %v3586_v24 = vpop.f32.mrb[239].mxu1  ;;  %v7816_v19 = vmax.f32 %v6067_v51, %v6612_v21 }
 0x2ba   :  { %4094 = vst.msk [vmem:[%s7608_s6] sm:$0xf] %vm4093_vm1, %v4555_v15  ;;  %v4556_v30 = vpack.c.bf16 %v3878_v49, %v3878_v49  ;;  %v3788_v0 = vmax.f32 %v7020_v4, %v3584_v54  ;;  %v3587_v40 = vadd.f32 %v3586_v24, %v7096_v26  ;;  %v7817_v4 = vld [vmem:[#allocation40_spill] sm:$0xff]  ;;  %v7819_v51 = vmax.f32 %v6078_v60, %v6628_v6  ;;  %v7826_v24 = vld [vmem:[#allocation73_spill] sm:$0xff] }
 0x2bb   :  { %4097 = vst.msk [vmem:[%s7608_s6 + $0xc] sm:$0xf] %vm4093_vm1, %v4558_v59  ;;  %v3833_v35 = vmax.f32 %v7816_v19, %v3790_v56  ;;  %v3791_v5 = vmax.f32 %v7023_v7, %v3595_v44  ;;  %v7818_v38 = vmax.f32 %v6045_v33, %v7817_v4  ;;  %v7821_v39 = vmax.f32 %v6050_v41, %v7820_v13  ;;  %v7823_v56 = vld [vmem:[#allocation2_spill] sm:$0xff]  ;;  %v7827_v19 = vld [vmem:[#allocation4_spill] sm:$0xff]  ;;  %v7830_v4 = vld [vmem:[#allocation3_spill] sm:$0xff] }
 0x2bc   :  { %4095 = vst.msk [vmem:[%s7608_s6 + $0x4] sm:$0xf] %vm4093_vm1, %v4556_v30  ;;  %v3789_v32 = vmax.f32 %v7029_v20, %v3587_v40  ;;  %v7215_v14 = vpop.f32.mrb[212].mxu0 }
 0x2bd   :  { %v3831_v26 = vmax.f32 %v7818_v38, %v3788_v0  ;;  %v3883_v47 = vadd.f32 %v7159_v22, %v3833_v35  ;;  %v3834_v21 = vmax.f32 %v7819_v51, %v3791_v5  ;;  %v3457_v7 = vpop.f32.mrb[213].mxu0  ;;  %v7831_v38 = vld [vmem:[#allocation44_spill] sm:$0xff] }
 0x2be   :  { %v3832_v62 = vmax.f32 %v7821_v39, %v3789_v32  ;;  %v4852_v53 = vpop.f32.mrb[240].mxu1  ;;  %v7225_v33 = vpop.f32.mrb[214].mxu0 }
 0x2bf   :  { %v3881_v43 = vadd.f32 %v7159_v22, %v3831_v26  ;;  %v4561_v52 = vpack.c.bf16 %v3883_v47, %v3883_v47  ;;  %v3884_v20 = vadd.f32 %v7159_v22, %v3834_v21  ;;  %v3608_v50 = vadd.f32 %v4852_v53, %v7106_v48  ;;  %v3599_v28 = vpop.f32.mrb[241].mxu1  ;;  %v3460_v31 = vpop.f32.mrb[215].mxu0 }
 0x2c0   :  { %v3882_v60 = vadd.f32 %v7159_v22, %v3832_v62  ;;  %v3600_v6 = vadd.f32 %v3599_v28, %v7102_v61  ;;  %v4853_v8 = vpop.f32.mrb[242].mxu1  ;;  %v7832_v26 = vmax.f32 %v7830_v4, %v7831_v38  ;;  %v7849_v38 = vld [vmem:[#allocation6_spill] sm:$0xff] }
 0x2c1   :  { %v4559_v18 = vpack.c.bf16 %v3881_v43, %v3881_v43  ;;  %4100 = vst.msk [vmem:[%s7608_s6 + $0x18] sm:$0xf] %vm4093_vm1, %v4561_v52  ;;  %v4562_v41 = vpack.c.bf16 %v3884_v20, %v3884_v20  ;;  %v3794_v15 = vmax.f32 %v7033_v11, %v3608_v50  ;;  %v3611_v49 = vadd.f32 %v4853_v8, %v7108_v42  ;;  %v3602_v54 = vpop.f32.mrb[243].mxu1  ;;  %v7833_v43 = vld [vmem:[#allocation96_spill] sm:$0xff]  ;;  %v7834_v20 = vld [vmem:[#allocation94_spill] sm:$0xff] }
 0x2c2   :  { %v4560_v48 = vpack.c.bf16 %v3882_v60, %v3882_v60  ;;  %v3792_v61 = vmax.f32 %v7036_v58, %v3600_v6  ;;  %v3603_v17 = vadd.f32 %v3602_v54, %v7104_v10  ;;  %v7822_v11 = vmax.f32 %v6117_v55, %v6650_v16  ;;  %v7824_v58 = vld [vmem:[#allocation42_spill] sm:$0xff]  ;;  %v7828_v55 = vld [vmem:[#allocation43_spill] sm:$0xff] }
 0x2c3   :  { %4098 = vst.msk [vmem:[%s7608_s6 + $0x10] sm:$0xf] %vm4093_vm1, %v4559_v18  ;;  %4101 = vst.msk [vmem:[%s7608_s6 + $0x1c] sm:$0xf] %vm4093_vm1, %v4562_v41  ;;  %v3795_v59 = vmax.f32 %v7039_v63, %v3611_v49  ;;  %v7825_v44 = vmax.f32 %v7823_v56, %v7824_v58  ;;  %v7829_v16 = vmax.f32 %v7827_v19, %v7828_v55  ;;  %v7835_v18 = vld [vmem:[#allocation74_spill] sm:$0xff]  ;;  %v7837_v54 = vld [vmem:[#allocation95_spill] sm:$0xff] }
 0x2c4   :  { %v3837_v42 = vmax.f32 %v7822_v11, %v3794_v15  ;;  %4099 = vst.msk [vmem:[%s7608_s6 + $0x14] sm:$0xf] %vm4093_vm1, %v4560_v48  ;;  %v3793_v30 = vmax.f32 %v7826_v24, %v3603_v17  ;;  %v7259_v0 = vpop.f32.mrb[216].mxu0  ;;  %v7836_v15 = vld [vmem:[#allocation75_spill] sm:$0xff]  ;;  %v7839_v17 = vld [vmem:[#allocation45_spill] sm:$0xff]  ;;  %v7843_v58 = vld [vmem:[#allocation46_spill] sm:$0xff] }
 0x2c5   :  { %v3835_v10 = vmax.f32 %v7825_v44, %v3792_v61  ;;  %v3838_v35 = vmax.f32 %v7829_v16, %v3795_v59  ;;  %v3465_v63 = vpop.f32.mrb[217].mxu0  ;;  %v7838_v61 = vld [vmem:[#allocation7_spill] sm:$0xff]  ;;  %v7842_v56 = vld [vmem:[#allocation5_spill] sm:$0xff]  ;;  %v7846_v55 = vld [vmem:[#allocation8_spill] sm:$0xff] }
 0x2c6   :  { %v3887_v40 = vadd.f32 %v7159_v22, %v3837_v42  ;;  %v3836_v32 = vmax.f32 %v7832_v26, %v3793_v30  ;;  %v4856_v47 = vpop.f32.mrb[244].mxu1  ;;  %v7269_v51 = vpop.f32.mrb[218].mxu0  ;;  %v7840_v11 = vmax.f32 %v7838_v61, %v7839_v17  ;;  %v7841_v42 = vld [vmem:[#allocation76_spill] sm:$0xff]  ;;  %v7844_v44 = vmax.f32 %v7842_v56, %v7843_v58  ;;  %v7845_v24 = vld [vmem:[#allocation77_spill] sm:$0xff]  ;;  %v7847_v16 = vld [vmem:[#allocation47_spill] sm:$0xff] }
 0x2c7   :  { %v3885_v5 = vadd.f32 %v7159_v22, %v3835_v10  ;;  %v3888_v7 = vadd.f32 %v7159_v22, %v3838_v35  ;;  %v3624_v13 = vadd.f32 %v4856_v47, %v7833_v43  ;;  %v3615_v39 = vpop.f32.mrb[245].mxu1  ;;  %v3468_v62 = vpop.f32.mrb[219].mxu0  ;;  %v7848_v35 = vmax.f32 %v7846_v55, %v7847_v16  ;;  %v7850_v26 = vld [vmem:[#allocation48_spill] sm:$0xff] }
 0x2c8   :  { %v4565_v21 = vpack.c.bf16 %v3887_v40, %v3887_v40  ;;  %v3886_v52 = vadd.f32 %v7159_v22, %v3836_v32  ;;  %v3616_v50 = vadd.f32 %v3615_v39, %v7834_v20  ;;  %v4857_v28 = vpop.f32.mrb[246].mxu1  ;;  %v7851_v32 = vmax.f32 %v7849_v38, %v7850_v26  ;;  %v7857_v61 = vld [vmem:[#allocation80_spill] sm:$0xff] }
 0x2c9   :  { %v4563_v53 = vpack.c.bf16 %v3885_v5, %v3885_v5  ;;  %v4566_v31 = vpack.c.bf16 %v3888_v7, %v3888_v7  ;;  %v3798_v60 = vmax.f32 %v7835_v18, %v3624_v13  ;;  %v3627_v6 = vadd.f32 %v4857_v28, %v7116_v57  ;;  %v3618_v8 = vpop.f32.mrb[247].mxu1  ;;  %v7852_v18 = vld [vmem:[#allocation78_spill] sm:$0xff] }
 0x2ca   :  { %4104 = vst.msk [vmem:[%s7608_s6 + $0x28] sm:$0xf] %vm4093_vm1, %v4565_v21  ;;  %v4564_v41 = vpack.c.bf16 %v3886_v52, %v3886_v52  ;;  %v3796_v49 = vmax.f32 %v7836_v15, %v3616_v50  ;;  %v3619_v48 = vadd.f32 %v3618_v8, %v7837_v54  ;;  %v7855_v54 = vld [vmem:[#allocation49_spill] sm:$0xff] }
 0x2cb   :  { %4102 = vst.msk [vmem:[%s7608_s6 + $0x20] sm:$0xf] %vm4093_vm1, %v4563_v53  ;;  %4105 = vst.msk [vmem:[%s7608_s6 + $0x2c] sm:$0xf] %vm4093_vm1, %v4566_v31  ;;  %v3841_v57 = vmax.f32 %v7840_v11, %v3798_v60  ;;  %v3799_v59 = vmax.f32 %v7841_v42, %v3627_v6  ;;  %v7858_v11 = vld [vmem:[#allocation9_spill] sm:$0xff] }
 0x2cc   :  { %4103 = vst.msk [vmem:[%s7608_s6 + $0x24] sm:$0xf] %vm4093_vm1, %v4564_v41  ;;  %v3839_v10 = vmax.f32 %v7844_v44, %v3796_v49  ;;  %v3797_v30 = vmax.f32 %v7845_v24, %v3619_v48  ;;  %v7303_v40 = vpop.f32.mrb[220].mxu0  ;;  %v7853_v41 = vld [vmem:[#allocation79_spill] sm:$0xff] }
 0x2cd   :  { %v3891_v19 = vadd.f32 %v7159_v22, %v3841_v57  ;;  %v3842_v63 = vmax.f32 %v7848_v35, %v3799_v59  ;;  %v3473_v5 = vpop.f32.mrb[221].mxu0  ;;  %v7854_v49 = vld [vmem:[#allocation11_spill] sm:$0xff]  ;;  %v7859_v57 = vld [vmem:[#allocation50_spill] sm:$0xff]  ;;  %v7861_v59 = vld [vmem:[#allocation81_spill] sm:$0xff] }
 0x2ce   :  { %v3889_v4 = vadd.f32 %v7159_v22, %v3839_v10  ;;  %v3840_v47 = vmax.f32 %v7851_v32, %v3797_v30  ;;  %v4860_v21 = vpop.f32.mrb[248].mxu1  ;;  %v7313_v7 = vpop.f32.mrb[222].mxu0  ;;  %v7856_v48 = vmax.f32 %v7854_v49, %v7855_v54  ;;  %v7860_v42 = vmax.f32 %v7858_v11, %v7859_v57  ;;  %v7862_v10 = vld [vmem:[#allocation12_spill] sm:$0xff]  ;;  %v7863_v24 = vld [vmem:[#allocation51_spill] sm:$0xff]  ;;  %v7865_v35 = vld [vmem:[#allocation10_spill] sm:$0xff] }
 0x2cf   :  { %v4569_v43 = vpack.c.bf16 %v3891_v19, %v3891_v19  ;;  %v3892_v13 = vadd.f32 %v7159_v22, %v3842_v63  ;;  %v3640_v39 = vadd.f32 %v4860_v21, %v7138_v2  ;;  %v3631_v62 = vpop.f32.mrb[249].mxu1  ;;  %v3476_v53 = vpop.f32.mrb[223].mxu0  ;;  %v7864_v30 = vmax.f32 %v7862_v10, %v7863_v24  ;;  %v7866_v63 = vld [vmem:[#allocation52_spill] sm:$0xff]  ;;  %v7874_v49 = vld [vmem:[#allocation13_spill] sm:$0xff]  ;;  %v7875_v54 = vld [vmem:[#allocation54_spill] sm:$0xff] }
 0x2d0   :  { %v4567_v52 = vpack.c.bf16 %v3889_v4, %v3889_v4  ;;  %v3890_v20 = vadd.f32 %v7159_v22, %v3840_v47  ;;  %v3632_v50 = vadd.f32 %v3631_v62, %v7126_v37  ;;  %v4861_v28 = vpop.f32.mrb[250].mxu1  ;;  %v7867_v5 = vmax.f32 %v7865_v35, %v7866_v63  ;;  %v7878_v57 = vld [vmem:[#allocation16_spill] sm:$0xff]  ;;  %v7881_v10 = vld [vmem:[#allocation14_spill] sm:$0xff] }
 0x2d1   :  { %4108 = vst.msk [vmem:[%s7608_s6 + $0x38] sm:$0xf] %vm4093_vm1, %v4569_v43  ;;  %v4570_v31 = vpack.c.bf16 %v3892_v13, %v3892_v13  ;;  %v3802_v60 = vmax.f32 %v7852_v18, %v3640_v39  ;;  %v3643_v6 = vadd.f32 %v4861_v28, %v7140_v3  ;;  %v3634_v8 = vpop.f32.mrb[251].mxu1  ;;  %v7882_v24 = vld [vmem:[#allocation56_spill] sm:$0xff] }
 0x2d2   :  { %4106 = vst.msk [vmem:[%s7608_s6 + $0x30] sm:$0xf] %vm4093_vm1, %v4567_v52  ;;  %v4568_v2 = vpack.c.bf16 %v3890_v20, %v3890_v20  ;;  %v3800_v37 = vmax.f32 %v7853_v41, %v3632_v50  ;;  %v3635_v15 = vadd.f32 %v3634_v8, %v7128_v46  ;;  %v7868_v50 = vld [vmem:[#allocation82_spill] sm:$0xff]  ;;  %v7870_v8 = vld [vmem:[#allocation15_spill] sm:$0xff] }
 0x2d3   :  { %4109 = vst.msk [vmem:[%s7608_s6 + $0x3c] sm:$0xf] %vm4093_vm1, %v4570_v31  ;;  %v3845_v3 = vmax.f32 %v7856_v48, %v3802_v60  ;;  %v3803_v17 = vmax.f32 %v7857_v61, %v3643_v6  ;;  %v7869_v60 = vld [vmem:[#allocation83_spill] sm:$0xff]  ;;  %v7876_v48 = vmax.f32 %v7874_v49, %v7875_v54 }
 0x2d4   :  { %4107 = vst.msk [vmem:[%s7608_s6 + $0x34] sm:$0xf] %vm4093_vm1, %v4568_v2  ;;  %v3843_v46 = vmax.f32 %v7860_v42, %v3800_v37  ;;  %v3801_v56 = vmax.f32 %v7861_v59, %v3635_v15  ;;  %v7347_v58 = vpop.f32.mrb[224].mxu0  ;;  %v7871_v2 = vld [vmem:[#allocation53_spill] sm:$0xff]  ;;  %v7873_v37 = vld [vmem:[#allocation84_spill] sm:$0xff]  ;;  %v7879_v42 = vld [vmem:[#allocation55_spill] sm:$0xff] }
 0x2d5   :  { %v3895_v44 = vadd.f32 %v7159_v22, %v3845_v3  ;;  %v3846_v19 = vmax.f32 %v7864_v30, %v3803_v17  ;;  %v3481_v55 = vpop.f32.mrb[225].mxu0  ;;  %v7872_v41 = vmax.f32 %v7870_v8, %v7871_v2  ;;  %v7877_v3 = vld [vmem:[#allocation85_spill] sm:$0xff]  ;;  %v7883_v30 = vmax.f32 %v7881_v10, %v7882_v24  ;;  %v7893_v2 = vld [vmem:[#allocation88_spill] sm:$0xff]  ;;  %v7895_v49 = vld [vmem:[#allocation59_spill] sm:$0xff] }
 0x2d6   :  { %v3893_v16 = vadd.f32 %v7159_v22, %v3843_v46  ;;  %v3844_v4 = vmax.f32 %v7867_v5, %v3801_v56  ;;  %v4864_v38 = vpop.f32.mrb[252].mxu1  ;;  %v7357_v26 = vpop.f32.mrb[226].mxu0  ;;  %v7880_v46 = vmax.f32 %v7878_v57, %v7879_v42 }
 0x2d7   :  { %v4573_v32 = vpack.c.bf16 %v3895_v44, %v3895_v44  ;;  %v3896_v47 = vadd.f32 %v7159_v22, %v3846_v19  ;;  %v3656_v21 = vadd.f32 %v4864_v38, %v7171_v34  ;;  %v3647_v43 = vpop.f32.mrb[253].mxu1  ;;  %v3484_v13 = vpop.f32.mrb[227].mxu0 }
 0x2d8   :  { %v4571_v39 = vpack.c.bf16 %v3893_v16, %v3893_v16  ;;  %v3894_v62 = vadd.f32 %v7159_v22, %v3844_v4  ;;  %v3648_v53 = vadd.f32 %v3647_v43, %v7148_v23  ;;  %v4865_v52 = vpop.f32.mrb[254].mxu1 }
 0x2d9   :  { %4112 = vst.msk [vmem:[%s7608_s6 + $0x48] sm:$0xf] %vm4093_vm1, %v4573_v32  ;;  %v4574_v20 = vpack.c.bf16 %v3896_v47, %v3896_v47  ;;  %v3806_v28 = vmax.f32 %v7868_v50, %v3656_v21  ;;  %v3659_v31 = vadd.f32 %v4865_v52, %v7181_v27  ;;  %v3650_v18 = vpop.f32.mrb[255].mxu1 }
 0x2da   :  { %4110 = vst.msk [vmem:[%s7608_s6 + $0x40] sm:$0xf] %vm4093_vm1, %v4571_v39  ;;  %v4572_v34 = vpack.c.bf16 %v3894_v62, %v3894_v62  ;;  %v3804_v23 = vmax.f32 %v7869_v60, %v3648_v53  ;;  %v3651_v6 = vadd.f32 %v3650_v18, %v7150_v36  ;;  %v7884_v39 = vld [vmem:[#allocation87_spill] sm:$0xff] }
 0x2db   :  { %4113 = vst.msk [vmem:[%s7608_s6 + $0x4c] sm:$0xf] %vm4093_vm1, %v4574_v20  ;;  %v3849_v27 = vmax.f32 %v7872_v41, %v3806_v28  ;;  %v3807_v15 = vmax.f32 %v7873_v37, %v3659_v31  ;;  %v7885_v20 = vld [vmem:[#allocation86_spill] sm:$0xff]  ;;  %v7886_v28 = vld [vmem:[#allocation19_spill] sm:$0xff]  ;;  %v7887_v31 = vld [vmem:[#allocation57_spill] sm:$0xff] }
 0x2dc   :  { %4111 = vst.msk [vmem:[%s7608_s6 + $0x44] sm:$0xf] %vm4093_vm1, %v4572_v34  ;;  %v3847_v36 = vmax.f32 %v7876_v48, %v3804_v23  ;;  %v3805_v61 = vmax.f32 %v7877_v3, %v3651_v6  ;;  %v7391_v17 = vpop.f32.mrb[228].mxu0  ;;  %v7888_v18 = vmax.f32 %v7886_v28, %v7887_v31  ;;  %v7889_v34 = vld [vmem:[#allocation89_spill] sm:$0xff]  ;;  %v7891_v6 = vld [vmem:[#allocation58_spill] sm:$0xff] }
 0x2dd   :  { %v3899_v11 = vadd.f32 %v7159_v22, %v3849_v27  ;;  %v3850_v59 = vmax.f32 %v7880_v46, %v3807_v15  ;;  %v3489_v56 = vpop.f32.mrb[229].mxu0  ;;  %v7890_v23 = vld [vmem:[#allocation17_spill] sm:$0xff]  ;;  %v7894_v15 = vld [vmem:[#allocation20_spill] sm:$0xff] }
 0x2de   :  { %v3897_v44 = vadd.f32 %v7159_v22, %v3847_v36  ;;  %v3848_v19 = vmax.f32 %v7883_v30, %v3805_v61  ;;  %v4868_v55 = vpop.f32.mrb[0].mxu1  ;;  %v7401_v16 = vpop.f32.mrb[230].mxu0  ;;  %v7892_v8 = vmax.f32 %v7890_v23, %v7891_v6  ;;  %v7896_v54 = vmax.f32 %v7894_v15, %v7895_v49  ;;  %v7897_v61 = vld [vmem:[#allocation18_spill] sm:$0xff] }
 0x2df   :  { %v4577_v35 = vpack.c.bf16 %v3899_v11, %v3899_v11  ;;  %v3900_v63 = vadd.f32 %v7159_v22, %v3850_v59  ;;  %v3672_v5 = vadd.f32 %v4868_v55, %v7259_v0  ;;  %v3663_v4 = vpop.f32.mrb[1].mxu1  ;;  %v3492_v38 = vpop.f32.mrb[231].mxu0  ;;  %v7898_v11 = vld [vmem:[#allocation60_spill] sm:$0xff] }
 0x2e0   :  { %v4575_v32 = vpack.c.bf16 %v3897_v44, %v3897_v44  ;;  %v3898_v47 = vadd.f32 %v7159_v22, %v3848_v19  ;;  %v3664_v21 = vadd.f32 %v3663_v4, %v7215_v14  ;;  %v4869_v43 = vpop.f32.mrb[2].mxu1  ;;  %v7899_v57 = vmax.f32 %v7897_v61, %v7898_v11  ;;  %v7900_v4 = vld [vmem:[#allocation92_spill] sm:$0xff] }
 0x2e1   :  { %4116 = vst.msk [vmem:[%s7608_s6 + $0x58] sm:$0xf] %vm4093_vm1, %v4577_v35  ;;  %v4578_v13 = vpack.c.bf16 %v3900_v63, %v3900_v63  ;;  %v3810_v62 = vmax.f32 %v7884_v39, %v3672_v5  ;;  %v3675_v53 = vadd.f32 %v4869_v43, %v7269_v51  ;;  %v3666_v52 = vpop.f32.mrb[3].mxu1  ;;  %v7903_v39 = vld [vmem:[#allocation61_spill] sm:$0xff] }
 0x2e2   :  { %4114 = vst.msk [vmem:[%s7608_s6 + $0x50] sm:$0xf] %vm4093_vm1, %v4575_v32  ;;  %v4576_v0 = vpack.c.bf16 %v3898_v47, %v3898_v47  ;;  %v3808_v14 = vmax.f32 %v7885_v20, %v3664_v21  ;;  %v3667_v50 = vadd.f32 %v3666_v52, %v7225_v33  ;;  %v7901_v21 = vld [vmem:[#allocation90_spill] sm:$0xff] }
 0x2e3   :  { %4117 = vst.msk [vmem:[%s7608_s6 + $0x5c] sm:$0xf] %vm4093_vm1, %v4578_v13  ;;  %v3853_v51 = vmax.f32 %v7888_v18, %v3810_v62  ;;  %v3811_v60 = vmax.f32 %v7889_v34, %v3675_v53  ;;  %v7902_v13 = vld [vmem:[#allocation23_spill] sm:$0xff]  ;;  %v7905_v53 = vld [vmem:[#allocation93_spill] sm:$0xff]  ;;  %v7907_v20 = vld [vmem:[#allocation30_spill] sm:$0xff] }
 0x2e4   :  { %4115 = vst.msk [vmem:[%s7608_s6 + $0x54] sm:$0xf] %vm4093_vm1, %v4576_v0  ;;  %v3851_v33 = vmax.f32 %v7892_v8, %v3808_v14  ;;  %v3809_v41 = vmax.f32 %v7893_v2, %v3667_v50  ;;  %v3495_v27 = vpop.f32.mrb[232].mxu0  ;;  %v7904_v62 = vmax.f32 %v7902_v13, %v7903_v39  ;;  %v7906_v0 = vld [vmem:[#allocation21_spill] sm:$0xff]  ;;  %v7909_v50 = vld [vmem:[#allocation91_spill] sm:$0xff]  ;;  %v7911_v34 = vld [vmem:[#allocation62_spill] sm:$0xff] }
 0x2e5   :  { %v3903_v37 = vadd.f32 %v7159_v22, %v3853_v51  ;;  %v3854_v48 = vmax.f32 %v7896_v54, %v3811_v60  ;;  %v3497_v36 = vpop.f32.mrb[233].mxu0  ;;  %v7908_v14 = vmax.f32 %v7906_v0, %v7907_v20  ;;  %v7910_v51 = vld [vmem:[#allocation24_spill] sm:$0xff] }
 0x2e6   :  { %v3901_v3 = vadd.f32 %v7159_v22, %v3851_v33  ;;  %v3852_v42 = vmax.f32 %v7899_v57, %v3809_v41  ;;  %v4872_v46 = vpop.f32.mrb[4].mxu1  ;;  %v3498_v59 = vpop.f32.mrb[234].mxu0  ;;  %v7912_v60 = vmax.f32 %v7910_v51, %v7911_v34  ;;  %v7913_v33 = vld [vmem:[#allocation22_spill] sm:$0xff]  ;;  %v7914_v2 = vld [vmem:[#allocation32_spill] sm:$0xff] }
 0x2e7   :  { %v4581_v56 = vpack.c.bf16 %v3903_v37, %v3903_v37  ;;  %v3904_v44 = vadd.f32 %v7159_v22, %v3854_v48  ;;  %v3688_v10 = vadd.f32 %v4872_v46, %v7347_v58  ;;  %v3679_v24 = vpop.f32.mrb[5].mxu1  ;;  %v3500_v30 = vpop.f32.mrb[235].mxu0  ;;  %v7915_v41 = vmax.f32 %v7913_v33, %v7914_v2  ;;  %v7930_v33 = vld [vmem:[#allocation99_spill] sm:$0xff] }
 0x2e8   :  { %v4579_v19 = vpack.c.bf16 %v3901_v3, %v3901_v3  ;;  %v3902_v55 = vadd.f32 %v7159_v22, %v3852_v42  ;;  %v3680_v35 = vadd.f32 %v3679_v24, %v7303_v40  ;;  %v4873_v63 = vpop.f32.mrb[6].mxu1 }
 0x2e9   :  { %4120 = vst.msk [vmem:[%s7608_s6 + $0x68] sm:$0xf] %vm4093_vm1, %v4581_v56  ;;  %v4582_v5 = vpack.c.bf16 %v3904_v44, %v3904_v44  ;;  %v3814_v38 = vmax.f32 %v7900_v4, %v3688_v10  ;;  %v3691_v32 = vadd.f32 %v4873_v63, %v7357_v26  ;;  %v3682_v47 = vpop.f32.mrb[7].mxu1  ;;  %v7916_v44 = vld [vmem:[#allocation97_spill] sm:$0xff] }
 0x2ea   :  { %4118 = vst.msk [vmem:[%s7608_s6 + $0x60] sm:$0xf] %vm4093_vm1, %v4579_v19  ;;  %v4580_v58 = vpack.c.bf16 %v3902_v55, %v3902_v55  ;;  %v3812_v40 = vmax.f32 %v7901_v21, %v3680_v35  ;;  %v3683_v43 = vadd.f32 %v3682_v47, %v7313_v7  ;;  %v7917_v55 = vld [vmem:[#allocation27_spill] sm:$0xff]  ;;  %v7920_v4 = vld [vmem:[#allocation25_spill] sm:$0xff] }
 0x2eb   :  { %4121 = vst.msk [vmem:[%s7608_s6 + $0x6c] sm:$0xf] %vm4093_vm1, %v4582_v5  ;;  %v3857_v26 = vmax.f32 %v7904_v62, %v3814_v38  ;;  %v3815_v52 = vmax.f32 %v7905_v53, %v3691_v32  ;;  %v7918_v35 = vld [vmem:[#allocation63_spill] sm:$0xff]  ;;  %v7923_v32 = vld [vmem:[#allocation98_spill] sm:$0xff] }
 0x2ec   :  { %4119 = vst.msk [vmem:[%s7608_s6 + $0x64] sm:$0xf] %vm4093_vm1, %v4580_v58  ;;  %v3855_v7 = vmax.f32 %v7908_v14, %v3812_v40  ;;  %v3813_v28 = vmax.f32 %v7909_v50, %v3683_v43  ;;  %v3503_v31 = vpop.f32.mrb[236].mxu0  ;;  %v7919_v63 = vmax.f32 %v7917_v55, %v7918_v35  ;;  %v7924_v40 = vld [vmem:[#allocation28_spill] sm:$0xff]  ;;  %v7925_v43 = vld [vmem:[#allocation65_spill] sm:$0xff]  ;;  %v7928_v53 = vld [vmem:[#allocation66_spill] sm:$0xff] }
 0x2ed   :  { %v3907_v18 = vadd.f32 %v7159_v22, %v3857_v26  ;;  %v3858_v23 = vmax.f32 %v7912_v60, %v3815_v52  ;;  %v3505_v6 = vpop.f32.mrb[237].mxu0  ;;  %v7926_v13 = vmax.f32 %v7924_v40, %v7925_v43  ;;  %v7927_v26 = vld [vmem:[#allocation26_spill] sm:$0xff] }
 0x2ee   :  { %v3905_v8 = vadd.f32 %v7159_v22, %v3855_v7  ;;  %v3856_v37 = vmax.f32 %v7915_v41, %v3813_v28  ;;  %v4876_v15 = vpop.f32.mrb[8].mxu1  ;;  %v3506_v49 = vpop.f32.mrb[238].mxu0  ;;  %v7929_v52 = vmax.f32 %v7927_v26, %v7928_v53 }
 0x2ef   :  { %v4585_v54 = vpack.c.bf16 %v3907_v18, %v3907_v18  ;;  %v3908_v48 = vadd.f32 %v7159_v22, %v3858_v23  ;;  %v3704_v36 = vadd.f32 %v4876_v15, %v3495_v27  ;;  %v3695_v3 = vpop.f32.mrb[9].mxu1  ;;  %v3508_v61 = vpop.f32.mrb[239].mxu0 }
 0x2f0   :  { %v4583_v11 = vpack.c.bf16 %v3905_v8, %v3905_v8  ;;  %v3906_v57 = vadd.f32 %v7159_v22, %v3856_v37  ;;  %v3696_v42 = vadd.f32 %v3695_v3, %v7391_v17  ;;  %v4877_v46 = vpop.f32.mrb[10].mxu1 }
 0x2f1   :  { %4124 = vst.msk [vmem:[%s7608_s6 + $0x78] sm:$0xf] %vm4093_vm1, %v4585_v54  ;;  %v4586_v56 = vpack.c.bf16 %v3908_v48, %v3908_v48  ;;  %v3818_v10 = vmax.f32 %v7916_v44, %v3704_v36  ;;  %v3707_v24 = vadd.f32 %v4877_v46, %v3498_v59  ;;  %v3698_v30 = vpop.f32.mrb[11].mxu1  ;;  %v7931_v48 = vld [vmem:[#allocation33_spill] sm:$0xff]  ;;  %v7932_v36 = vld [vmem:[#allocation67_spill] sm:$0xff]  ;;  %v7936_v46 = vld [vmem:[#allocation38_spill] sm:$0xff] }
 0x2f2   :  { %4122 = vst.msk [vmem:[%s7608_s6 + $0x70] sm:$0xf] %vm4093_vm1, %v4583_v11  ;;  %v4584_v27 = vpack.c.bf16 %v3906_v57, %v3906_v57  ;;  %v3816_v19 = vmax.f32 %v7120_v25, %v3696_v42  ;;  %v3699_v17 = vadd.f32 %v3698_v30, %v7401_v16  ;;  %v7921_v25 = vld [vmem:[#allocation64_spill] sm:$0xff]  ;;  %v7933_v3 = vmax.f32 %v7931_v48, %v7932_v36  ;;  %v7935_v42 = vld [vmem:[#allocation29_spill] sm:$0xff]  ;;  %v7939_v30 = vld [vmem:[#allocation34_spill] sm:$0xff] }
 0x2f3   :  { %4125 = vst.msk [vmem:[%s7608_s6 + $0x7c] sm:$0xf] %vm4093_vm1, %v4586_v56  ;;  %v3861_v59 = vmax.f32 %v7919_v63, %v3818_v10  ;;  %v3819_v5 = vmax.f32 %v7122_v29, %v3707_v24  ;;  %v7922_v38 = vmax.f32 %v7920_v4, %v7921_v25  ;;  %v7934_v11 = vld [vmem:[#allocation100_spill] sm:$0xff]  ;;  %v7938_v56 = vld [vmem:[#allocation101_spill] sm:$0xff]  ;;  %v7942_v63 = vld [vmem:[#allocation31_spill] sm:$0xff] }
 0x2f4   :  { %4123 = vst.msk [vmem:[%s7608_s6 + $0x74] sm:$0xf] %vm4093_vm1, %v4584_v27  ;;  %v3817_v47 = vmax.f32 %v7923_v32, %v3699_v17  ;;  %v3511_v58 = vpop.f32.mrb[240].mxu0  ;;  %v7940_v27 = vld [vmem:[#allocation68_spill] sm:$0xff] }
 0x2f5   :  { %v3859_v16 = vmax.f32 %v7922_v38, %v3816_v19  ;;  %v3911_v21 = vadd.f32 %v7159_v22, %v3861_v59  ;;  %v3862_v39 = vmax.f32 %v7926_v13, %v3819_v5  ;;  %v3513_v62 = vpop.f32.mrb[241].mxu0  ;;  %v7941_v19 = vmax.f32 %v7939_v30, %v7940_v27  ;;  %v7943_v59 = vld [vmem:[#allocation69_spill] sm:$0xff] }
 0x2f6   :  { %v3860_v0 = vmax.f32 %v7929_v52, %v3817_v47  ;;  %v4880_v20 = vpop.f32.mrb[12].mxu1  ;;  %v3514_v14 = vpop.f32.mrb[242].mxu0  ;;  %v7944_v5 = vmax.f32 %v7942_v63, %v7943_v59  ;;  %v7945_v52 = vld [vmem:[#allocation35_spill] sm:$0xff] }
 0x2f7   :  { %v3909_v29 = vadd.f32 %v7159_v22, %v3859_v16  ;;  %v4589_v7 = vpack.c.bf16 %v3911_v21, %v3911_v21  ;;  %v3912_v50 = vadd.f32 %v7159_v22, %v3862_v39  ;;  %v3720_v28 = vadd.f32 %v4880_v20, %v3511_v58  ;;  %v3711_v18 = vpop.f32.mrb[13].mxu1  ;;  %v3516_v51 = vpop.f32.mrb[243].mxu0 }
 0x2f8   :  { %v3910_v60 = vadd.f32 %v7159_v22, %v3860_v0  ;;  %v3712_v23 = vadd.f32 %v3711_v18, %v3503_v31  ;;  %v4881_v6 = vpop.f32.mrb[14].mxu1  ;;  %v7946_v0 = vld [vmem:[#allocation71_spill] sm:$0xff]  ;;  %v7948_v51 = vld [vmem:[#allocation36_spill] sm:$0xff] }
 0x2f9   :  { %v4587_v34 = vpack.c.bf16 %v3909_v29, %v3909_v29  ;;  %4128 = vst.msk [vmem:[%s7608_s6 + $0x88] sm:$0xf] %vm4093_vm1, %v4589_v7  ;;  %v4590_v8 = vpack.c.bf16 %v3912_v50, %v3912_v50  ;;  %v3822_v2 = vmax.f32 %v7930_v33, %v3720_v28  ;;  %v3723_v41 = vadd.f32 %v4881_v6, %v3514_v14  ;;  %v3714_v37 = vpop.f32.mrb[15].mxu1 }
 0x2fa   :  { %v4588_v15 = vpack.c.bf16 %v3910_v60, %v3910_v60  ;;  %v3820_v54 = vmax.f32 %v7132_v1, %v3712_v23  ;;  %v3715_v31 = vadd.f32 %v3714_v37, %v3506_v49  ;;  %v7937_v1 = vmax.f32 %v7935_v42, %v7936_v46  ;;  %v7951_v37 = vld [vmem:[#allocation37_spill] sm:$0xff] }
 0x2fb   :  { %4126 = vst.msk [vmem:[%s7608_s6 + $0x80] sm:$0xf] %vm4093_vm1, %v4587_v34  ;;  %4129 = vst.msk [vmem:[%s7608_s6 + $0x8c] sm:$0xf] %vm4093_vm1, %v4590_v8  ;;  %v3865_v61 = vmax.f32 %v7933_v3, %v3822_v2  ;;  %v3823_v57 = vmax.f32 %v7934_v11, %v3723_v41  ;;  %v7947_v20 = vmax.f32 %v7945_v52, %v7946_v0  ;;  %v7949_v34 = vld [vmem:[#allocation72_spill] sm:$0xff] }
 0x2fc   :  { %4127 = vst.msk [vmem:[%s7608_s6 + $0x84] sm:$0xf] %vm4093_vm1, %v4588_v15  ;;  %v3863_v49 = vmax.f32 %v7937_v1, %v3820_v54  ;;  %v3821_v44 = vmax.f32 %v7938_v56, %v3715_v31  ;;  %v3519_v10 = vpop.f32.mrb[244].mxu0  ;;  %v7950_v60 = vmax.f32 %v7948_v51, %v7949_v34  ;;  %v7952_v15 = vld [vmem:[#allocation70_spill] sm:$0xff] }
 0x2fd   :  { %v3915_v24 = vadd.f32 %v7159_v22, %v3865_v61  ;;  %v3866_v17 = vmax.f32 %v7941_v19, %v3823_v57  ;;  %v3521_v55 = vpop.f32.mrb[245].mxu0  ;;  %v7953_v54 = vmax.f32 %v7951_v37, %v7952_v15 }
 0x2fe   :  { %v3913_v35 = vadd.f32 %v7159_v22, %v3863_v49  ;;  %v3864_v4 = vmax.f32 %v7944_v5, %v3821_v44  ;;  %v4884_v25 = vpop.f32.mrb[16].mxu1  ;;  %v3522_v38 = vpop.f32.mrb[246].mxu0 }
 0x2ff   :  { %v4593_v16 = vpack.c.bf16 %v3915_v24, %v3915_v24  ;;  %v3916_v32 = vadd.f32 %v7159_v22, %v3866_v17  ;;  %v3727_v47 = vpop.f32.mrb[17].mxu1  ;;  %v3524_v58 = vpop.f32.mrb[247].mxu0 }
 0x300   :  { %v4591_v21 = vpack.c.bf16 %v3913_v35, %v3913_v35  ;;  %v3914_v40 = vadd.f32 %v7159_v22, %v3864_v4  ;;  %v3728_v43 = vadd.f32 %v3727_v47, %v3519_v10  ;;  %v4885_v13 = vpop.f32.mrb[18].mxu1 }
 0x301   :  { %4132 = vst.msk [vmem:[%s7608_s6 + $0x98] sm:$0xf] %vm4093_vm1, %v4593_v16  ;;  %v4594_v39 = vpack.c.bf16 %v3916_v32, %v3916_v32  ;;  %v3730_v62 = vpop.f32.mrb[19].mxu1 }
 0x302   :  { %4130 = vst.msk [vmem:[%s7608_s6 + $0x90] sm:$0xf] %vm4093_vm1, %v4591_v21  ;;  %v4592_v29 = vpack.c.bf16 %v3914_v40, %v3914_v40  ;;  %v3824_v26 = vmax.f32 %v7144_v9, %v3728_v43  ;;  %v3731_v53 = vadd.f32 %v3730_v62, %v3522_v38 }
 0x303   :  { %4133 = vst.msk [vmem:[%s7608_s6 + $0x9c] sm:$0xf] %vm4093_vm1, %v4594_v39 }
 0x304   :  { %4131 = vst.msk [vmem:[%s7608_s6 + $0x94] sm:$0xf] %vm4093_vm1, %v4592_v29  ;;  %v3867_v14 = vmax.f32 %v7947_v20, %v3824_v26  ;;  %v3825_v7 = vmax.f32 %v7146_v12, %v3731_v53  ;;  %v3527_v50 = vpop.f32.mrb[248].mxu0 }
 0x305   :  { %v3736_v28 = vadd.f32 %v4884_v25, %v3527_v50  ;;  %v3529_v9 = vpop.f32.mrb[249].mxu0 }
 0x306   :  { %v3917_v18 = vadd.f32 %v7159_v22, %v3867_v14  ;;  %v3868_v23 = vmax.f32 %v7950_v60, %v3825_v7  ;;  %v3530_v6 = vpop.f32.mrb[250].mxu0 }
 0x307   :  { %v3826_v8 = vmax.f32 %v7142_v45, %v3736_v28  ;;  %v3531_v33 = vpop.f32.mrb[251].mxu0 }
 0x308   :  { %v4595_v2 = vpack.c.bf16 %v3917_v18, %v3917_v18  ;;  %v3918_v41 = vadd.f32 %v7159_v22, %v3868_v23 }
 0x309   :  { %v3869_v12 = vmax.f32 %v7953_v54, %v3826_v8 }
 0x30a   :  { %4134 = vst.msk [vmem:[%s7608_s6 + $0xa0] sm:$0xf] %vm4093_vm1, %v4595_v2  ;;  %v4596_v31 = vpack.c.bf16 %v3918_v41, %v3918_v41 }
 0x30b   :  { %v3919_v48 = vadd.f32 %v7159_v22, %v3869_v12 }
 0x30c   :  { %4135 = vst.msk [vmem:[%s7608_s6 + $0xa4] sm:$0xf] %vm4093_vm1, %v4596_v31 }
 0x30d   :  { %v4597_v45 = vpack.c.bf16 %v3919_v48, %v3919_v48 }
 0x30f   :  { %4136 = vst.msk [vmem:[%s7608_s6 + $0xa8] sm:$0xf] %vm4093_vm1, %v4597_v45 }

// kernel: melanoma_forward.5
= control target key start
LH: loop header
LB: loop body
LE: loop exit
PB: predicated region body
PF: predicated region fallthrough
CT: control target
= control target key end

     0   :  { %v1407_v27 = vlaneseq  ;;  %v10318_v35 = vmov 1966171168   ;;  %s12636_s0 = inlined_call_operand.vmem [shape: bf16[2,10816], index: 0, kind: input, shape index: {}]   ;;  %s12637_s1 = inlined_call_operand.vmem [shape: bf16[10816,128], index: 1, kind: input, shape index: {}]   ;;  %s12638_s2 = inlined_call_operand.vmem [shape: f32[1,128], index: 2, kind: input, shape index: {}]   ;;  %s12639_s3 = inlined_call_operand.vmem [shape: f32[128,2], index: 3, kind: input, shape index: {}]   ;;  %s12640_s4 = inlined_call_operand.vmem [shape: f32[1,2], index: 4, kind: input, shape index: {}]   ;;  %s12641_s5 = inlined_call_operand.hbm [shape: f32[2,2], index: 5, kind: output, shape index: {}]  }
   0x1   :  { %v9607_v0 = vld [vmem:[%s12637_s1 + $0x40] sm:$0xff]   ;;  %v9611_v4 = vld [vmem:[%s12637_s1 + $0x48] sm:$0xff]   ;;  %v9615_v8 = vld [vmem:[%s12637_s1 + $0x50] sm:$0xff]   ;;  %v1405_v36 = vunpack.c.l.s4 %v10318_v35 }
   0x2   :  { %v9608_v1 = vld [vmem:[%s12637_s1] sm:$0xff]   ;;  %8585 = vmatprep.subr.bf16.mxu0 %v9607_v0  ;;  %v9612_v5 = vld [vmem:[%s12637_s1 + $0x8] sm:$0xff]   ;;  %v9616_v9 = vld [vmem:[%s12637_s1 + $0x10] sm:$0xff]   ;;  %v1408_v32 = vshrl.u32 %v1407_v27, 7 }
   0x3   :  { %v9609_v2 = vld [vmem:[%s12637_s1 + $0xc0] sm:$0xff]   ;;  %8586 = vmatpush3.bf16.msra.mxu0 %v9608_v1  ;;  %v9613_v6 = vld [vmem:[%s12637_s1 + $0xc8] sm:$0xff]   ;;  %v9617_v10 = vld [vmem:[%s12637_s1 + $0xd0] sm:$0xff]   ;;  %v1406_v39 = vunpack.c.0.s8 %v1405_v36 }
   0x4   :  { %v9610_v3 = vld [vmem:[%s12637_s1 + $0x80] sm:$0xff]   ;;  %8607 = vmatprep.subr.bf16.mxu1 %v9609_v2  ;;  %8587 = vmatprep.subr.bf16.mxu0 %v9611_v4  ;;  %v9614_v7 = vld [vmem:[%s12637_s1 + $0x88] sm:$0xff]   ;;  %v9618_v11 = vld [vmem:[%s12637_s1 + $0x90] sm:$0xff]  }
   0x5   :  { %8608 = vmatpush3.bf16.msra.mxu1 %v9610_v3  ;;  %v9619_v12 = vld [vmem:[%s12637_s1 + $0x58] sm:$0xff]   ;;  %v9623_v16 = vld [vmem:[%s12637_s1 + $0x60] sm:$0xff]   ;;  %v9627_v20 = vld [vmem:[%s12637_s1 + $0x68] sm:$0xff]   ;;  %v10458_v41 = vsub.s32 %v1406_v39, %v1408_v32 }
   0x6   :  { %8609 = vmatprep.subr.bf16.mxu1 %v9613_v6  ;;  %v9620_v13 = vld [vmem:[%s12637_s1 + $0x18] sm:$0xff]   ;;  %v9624_v17 = vld [vmem:[%s12637_s1 + $0x20] sm:$0xff]   ;;  %v9628_v21 = vld [vmem:[%s12637_s1 + $0x28] sm:$0xff]  }
   0x7   :  { %8588 = vmatpush3.bf16.msra.mxu0 %v9612_v5  ;;  %v9621_v14 = vld [vmem:[%s12637_s1 + $0xd8] sm:$0xff]   ;;  %v9625_v18 = vld [vmem:[%s12637_s1 + $0xe0] sm:$0xff]   ;;  %v9629_v22 = vld [vmem:[%s12637_s1 + $0xe8] sm:$0xff]  }
   0x8   :  { %8589 = vmatprep.subr.bf16.mxu0 %v9615_v8  ;;  %v9622_v15 = vld [vmem:[%s12637_s1 + $0x98] sm:$0xff]   ;;  %v9626_v19 = vld [vmem:[%s12637_s1 + $0xa0] sm:$0xff]   ;;  %v9630_v23 = vld [vmem:[%s12637_s1 + $0xa8] sm:$0xff]  }
   0x9   :  { %8610 = vmatpush3.bf16.msra.mxu1 %v9614_v7  ;;  %v9631_v24 = vld [vmem:[%s12637_s1 + $0x70] sm:$0xff]   ;;  %v9635_v29 = vld [vmem:[%s12637_s1 + $0x78] sm:$0xff]   ;;  %v22_v33 = vld [vmem:[%s12636_s0] sm:$0xff] }
   0xa   :  { %8611 = vmatprep.subr.bf16.mxu1 %v9617_v10  ;;  %v9632_v25 = vld [vmem:[%s12637_s1 + $0x30] sm:$0xff]   ;;  %v9636_v30 = vld [vmem:[%s12637_s1 + $0x38] sm:$0xff]   ;;  %v9640_v37 = vld [vmem:[%s12637_s1 + $0x140] sm:$0xff]   ;;  %v1403_v38 = vcombine.high %v22_v33, %v22_v33  ;;  %v1410_v42 = vrot.slane %v22_v33, %v10458_v41 }
   0xb   :  { %8590 = vmatpush3.bf16.msra.mxu0 %v9616_v9  ;;  %v9633_v26 = vld [vmem:[%s12637_s1 + $0xf0] sm:$0xff]   ;;  %v9637_v31 = vld [vmem:[%s12637_s1 + $0xf8] sm:$0xff]   ;;  %v9642_v40 = vld [vmem:[%s12637_s1 + $0x1c0] sm:$0xff]  }
   0xc   :  { %8591 = vmatprep.subr.bf16.mxu0 %v9619_v12  ;;  %v9634_v28 = vld [vmem:[%s12637_s1 + $0xb0] sm:$0xff]   ;;  %v9639_v34 = vld [vmem:[%s12637_s1 + $0xb8] sm:$0xff]   ;;  %v10462_v43 = vrot.slane %v1403_v38, %v10458_v41  ;;  %v1418_v44 = vcombine.high %v1410_v42, %v1410_v42  ;;  %v1426_v45 = vrot.slane %v1410_v42, %v10458_v41  ;;  %v9641_v47 = vld [vmem:[%s12637_s1 + $0x100] sm:$0xff]  }
   0xd   :  { %8612 = vmatpush3.bf16.msra.mxu1 %v9618_v11  ;;  %v9643_v49 = vld [vmem:[%s12637_s1 + $0x180] sm:$0xff]   ;;  %v9644_v52 = vld [vmem:[%s12637_s1 + $0x148] sm:$0xff]   ;;  %v9648_v58 = vld [vmem:[%s12637_s1 + $0x150] sm:$0xff]  }
   0xe   :  { %8613 = vmatprep.subr.bf16.mxu1 %v9621_v14  ;;  %v1419_v46 = vcombine.high %v10462_v43, %v10462_v43  ;;  %v1440_v48 = vrot.slane %v1418_v44, %v10458_v41  ;;  %v1448_v51 = vcombine.high %v1426_v45, %v1426_v45  ;;  %v9645_v54 = vld [vmem:[%s12637_s1 + $0x108] sm:$0xff]   ;;  %v9649_v59 = vld [vmem:[%s12637_s1 + $0x110] sm:$0xff]   ;;  %v9652_v62 = vld [vmem:[%s12637_s1 + $0x158] sm:$0xff]  }
   0xf   :  { %8592 = vmatpush3.bf16.msra.mxu0 %v9620_v13  ;;  %v9646_v55 = vld [vmem:[%s12637_s1 + $0x1c8] sm:$0xff]   ;;  %v9650_v60 = vld [vmem:[%s12637_s1 + $0x1d0] sm:$0xff]   ;;  %v9653_v63 = vld [vmem:[%s12637_s1 + $0x118] sm:$0xff]  }
  0x10   :  { %8593 = vmatprep.subr.bf16.mxu0 %v9623_v16  ;;  %v1447_v50 = vrot.slane %v1419_v46, %v10458_v41  ;;  %6108 = vmatprep.mubr.bf16.mxu0 %v1440_v48  ;;  %v1450_v53 = vcombine.high %v1440_v48, %v1440_v48  ;;  %v9647_v57 = vld [vmem:[%s12637_s1 + $0x188] sm:$0xff]   ;;  %v9651_v61 = vld [vmem:[%s12637_s1 + $0x190] sm:$0xff]   ;;  %v9654_v0 = vld [vmem:[%s12637_s1 + $0x1d8] sm:$0xff]  }
  0x11   :  { %8614 = vmatpush3.bf16.msra.mxu1 %v9622_v15  ;;  %v9655_v1 = vld [vmem:[%s12637_s1 + $0x198] sm:$0xff]   ;;  %v9656_v2 = vld [vmem:[%s12637_s1 + $0x160] sm:$0xff]   ;;  %v9660_v6 = vld [vmem:[%s12637_s1 + $0x168] sm:$0xff]  }
  0x12   :  { %8615 = vmatprep.subr.bf16.mxu1 %v9625_v18  ;;  %v1451_v56 = vcombine.high %v1447_v50, %v1447_v50  ;;  %6148 = vmatprep.mubr.bf16.mxu1 %v1450_v53  ;;  %v9657_v3 = vld [vmem:[%s12637_s1 + $0x120] sm:$0xff]   ;;  %v9661_v7 = vld [vmem:[%s12637_s1 + $0x128] sm:$0xff]   ;;  %v9664_v10 = vld [vmem:[%s12637_s1 + $0x170] sm:$0xff]   ;;  %v1433_v18 = vrot.slane %v10462_v43, %v10458_v41 }
  0x13   :  { %8594 = vmatpush3.bf16.msra.mxu0 %v9624_v17  ;;  %v9658_v4 = vld [vmem:[%s12637_s1 + $0x1e0] sm:$0xff]   ;;  %v9662_v8 = vld [vmem:[%s12637_s1 + $0x1e8] sm:$0xff]   ;;  %v9665_v11 = vld [vmem:[%s12637_s1 + $0x130] sm:$0xff]  }
  0x14   :  { %8595 = vmatprep.subr.bf16.mxu0 %v9627_v20  ;;  %v9659_v5 = vld [vmem:[%s12637_s1 + $0x1a0] sm:$0xff]   ;;  %v9663_v9 = vld [vmem:[%s12637_s1 + $0x1a8] sm:$0xff]   ;;  %v9666_v12 = vld [vmem:[%s12637_s1 + $0x1f0] sm:$0xff]  }
  0x15   :  { %8616 = vmatpush3.bf16.msra.mxu1 %v9626_v19  ;;  %v9667_v13 = vld [vmem:[%s12637_s1 + $0x1b0] sm:$0xff]   ;;  %v9668_v14 = vld [vmem:[%s12637_s1 + $0x178] sm:$0xff]   ;;  %v9672_v19 = vld [vmem:[%s12637_s1 + $0x240] sm:$0xff]  }
  0x16   :  { %8617 = vmatprep.subr.bf16.mxu1 %v9629_v22  ;;  %v9669_v15 = vld [vmem:[%s12637_s1 + $0x138] sm:$0xff]   ;;  %v9673_v20 = vld [vmem:[%s12637_s1 + $0x200] sm:$0xff]   ;;  %v9679_v27 = vld [vmem:[%s12637_s1 + $0x288] sm:$0xff]  }
  0x17   :  { %8596 = vmatpush3.bf16.msra.mxu0 %v9628_v21  ;;  %v9670_v16 = vld [vmem:[%s12637_s1 + $0x1f8] sm:$0xff]   ;;  %v9674_v21 = vld [vmem:[%s12637_s1 + $0x2c0] sm:$0xff]   ;;  %v9693_v42 = vld [vmem:[%s12637_s1 + $0x228] sm:$0xff]  }
  0x18   :  { %8597 = vmatprep.subr.bf16.mxu0 %v9631_v24  ;;  %v9671_v17 = vld [vmem:[%s12637_s1 + $0x1b8] sm:$0xff]   ;;  %v9675_v22 = vld [vmem:[%s12637_s1 + $0x280] sm:$0xff]   ;;  %v9676_v24 = vld [vmem:[%s12637_s1 + $0x248] sm:$0xff]  }
  0x19   :  { %8618 = vmatpush3.bf16.msra.mxu1 %v9630_v23  ;;  %v1449_v23 = vcombine.high %v1433_v18, %v1433_v18  ;;  %v9684_v32 = vld [vmem:[%s12637_s1 + $0x258] sm:$0xff]   ;;  %v9688_v36 = vld [vmem:[%s12637_s1 + $0x260] sm:$0xff]   ;;  %v9694_v43 = vld [vmem:[%s12637_s1 + $0x2e8] sm:$0xff]  }
  0x1a   :  { %8619 = vmatprep.subr.bf16.mxu1 %v9633_v26  ;;  %v9678_v26 = vld [vmem:[%s12637_s1 + $0x2c8] sm:$0xff]   ;;  %v9685_v33 = vld [vmem:[%s12637_s1 + $0x218] sm:$0xff]   ;;  %v9690_v38 = vld [vmem:[%s12637_s1 + $0x2e0] sm:$0xff]  }
  0x1b   :  { %8598 = vmatpush3.bf16.msra.mxu0 %v9632_v25  ;;  %v9677_v25 = vld [vmem:[%s12637_s1 + $0x208] sm:$0xff]   ;;  %v9687_v35 = vld [vmem:[%s12637_s1 + $0x298] sm:$0xff]   ;;  %v9691_v39 = vld [vmem:[%s12637_s1 + $0x2a0] sm:$0xff]  }
  0x1c   :  { %8599 = vmatprep.subr.bf16.mxu0 %v9635_v29  ;;  %v9681_v29 = vld [vmem:[%s12637_s1 + $0x210] sm:$0xff]   ;;  %v9695_v44 = vld [vmem:[%s12637_s1 + $0x2a8] sm:$0xff]  }
  0x1d   :  { %8620 = vmatpush3.bf16.msra.mxu1 %v9634_v28  ;;  %v9680_v28 = vld [vmem:[%s12637_s1 + $0x250] sm:$0xff]   ;;  %v23_v46 = vld [vmem:[%s12636_s0 + $0x8] sm:$0xff] }
  0x1e   :  { %8621 = vmatprep.subr.bf16.mxu1 %v9637_v31  ;;  %v9683_v31 = vld [vmem:[%s12637_s1 + $0x290] sm:$0xff]   ;;  %v1459_v48 = vrot.slane %v23_v46, %v10458_v41 }
  0x1f   :  { %8600 = vmatpush3.bf16.msra.mxu0 %v9636_v30  ;;  %v9682_v30 = vld [vmem:[%s12637_s1 + $0x2d0] sm:$0xff]  }
  0x20   :  { %8629 = vmatprep.subr.bf16.mxu0 %v9640_v37  ;;  %v9689_v37 = vld [vmem:[%s12637_s1 + $0x220] sm:$0xff]  }
  0x21   :  { %8622 = vmatpush3.bf16.msra.mxu1 %v9639_v34  ;;  %v9686_v34 = vld [vmem:[%s12637_s1 + $0x2d8] sm:$0xff]  }
  0x22   :  { %8651 = vmatprep.subr.bf16.mxu1 %v9642_v40  ;;  %6109 = vmatmul.mubr.bf16.vlgmr.msra.gmra.mrb[0].mxu0 %v1426_v45  ;;  %v9692_v40 = vld [vmem:[%s12637_s1 + $0x268] sm:$0xff]   ;;  %v9696_v45 = vld [vmem:[%s12637_s1 + $0x270] sm:$0xff]  }
  0x23   :  { %8630 = vmatpush3.bf16.msra.mxu0 %v9641_v47  ;;  %6188 = vmatprep.mubr.bf16.mxu0 %v1447_v50  ;;  %v9697_v47 = vld [vmem:[%s12637_s1 + $0x230] sm:$0xff]  }
  0x24   :  { %6149 = vmatmul.mubr.bf16.vlgmr.msra.gmra.mrb[0].mxu1 %v1448_v51  ;;  %8631 = vmatprep.subr.bf16.mxu0 %v9644_v52  ;;  %v9698_v50 = vld [vmem:[%s12637_s1 + $0x2f0] sm:$0xff]   ;;  %v1467_v52 = vcombine.high %v1459_v48, %v1459_v48 }
  0x25   :  { %8652 = vmatpush3.bf16.msra.mxu1 %v9643_v49  ;;  %6228 = vmatprep.mubr.bf16.mxu1 %v1451_v56  ;;  %v1452_v49 = vcombine.high %v23_v46, %v23_v46  ;;  %v9699_v51 = vld [vmem:[%s12637_s1 + $0x2b0] sm:$0xff]  }
  0x26   :  { %8653 = vmatprep.subr.bf16.mxu1 %v9646_v55  ;;  %v9701_v55 = vld [vmem:[%s12637_s1 + $0x238] sm:$0xff]   ;;  %v1489_v56 = vrot.slane %v1467_v52, %v10458_v41  ;;  %v9747_v46 = vld [vmem:[%s12637_s1 + $0x4d0] sm:$0xff]   ;;  %v9753_v52 = vld [vmem:[%s12637_s1 + $0x460] sm:$0xff]  }
  0x27   :  { %8632 = vmatpush3.bf16.msra.mxu0 %v9645_v54  ;;  %v10650_v53 = vrot.slane %v1452_v49, %v10458_v41  ;;  %v9700_v54 = vld [vmem:[%s12637_s1 + $0x278] sm:$0xff]  }
  0x28   :  { %8633 = vmatprep.subr.bf16.mxu0 %v9648_v58  ;;  %v9702_v58 = vld [vmem:[%s12637_s1 + $0x2f8] sm:$0xff]  }
  0x29   :  { %8654 = vmatpush3.bf16.msra.mxu1 %v9647_v57  ;;  %v1468_v57 = vcombine.high %v10650_v53, %v10650_v53  ;;  %v9750_v49 = vld [vmem:[%s12637_s1 + $0x418] sm:$0xff]  }
  0x2a   :  { %8655 = vmatprep.subr.bf16.mxu1 %v9650_v60  ;;  %v1499_v60 = vcombine.high %v1489_v56, %v1489_v56 }
  0x2b   :  { %8634 = vmatpush3.bf16.msra.mxu0 %v9649_v59  ;;  %v9703_v59 = vld [vmem:[%s12637_s1 + $0x2b8] sm:$0xff]  }
  0x2c   :  { %8635 = vmatprep.subr.bf16.mxu0 %v9652_v62  ;;  %v9704_v62 = vld [vmem:[%s12637_s1 + $0x340] sm:$0xff]  }
  0x2d   :  { %8656 = vmatpush3.bf16.msra.mxu1 %v9651_v61  ;;  %v1475_v61 = vrot.slane %v1459_v48, %v10458_v41  ;;  %v9749_v48 = vld [vmem:[%s12637_s1 + $0x458] sm:$0xff]  }
  0x2e   :  { %8657 = vmatprep.subr.bf16.mxu1 %v9654_v0  ;;  %v1496_v0 = vrot.slane %v1468_v57, %v10458_v41  ;;  %v9758_v57 = vld [vmem:[%s12637_s1 + $0x428] sm:$0xff]  }
  0x2f   :  { %8636 = vmatpush3.bf16.msra.mxu0 %v9653_v63  ;;  %v9705_v63 = vld [vmem:[%s12637_s1 + $0x300] sm:$0xff]  }
  0x30   :  { %8637 = vmatprep.subr.bf16.mxu0 %v9656_v2  ;;  %v9707_v2 = vld [vmem:[%s12637_s1 + $0x380] sm:$0xff]  }
  0x31   :  { %8658 = vmatpush3.bf16.msra.mxu1 %v9655_v1  ;;  %v9706_v1 = vld [vmem:[%s12637_s1 + $0x3c0] sm:$0xff]  }
  0x32   :  { %8659 = vmatprep.subr.bf16.mxu1 %v9658_v4  ;;  %v9708_v4 = vld [vmem:[%s12637_s1 + $0x348] sm:$0xff]  }
  0x33   :  { %8638 = vmatpush3.bf16.msra.mxu0 %v9657_v3  ;;  %v1497_v3 = vcombine.high %v1475_v61, %v1475_v61 }
  0x34   :  { %8639 = vmatprep.subr.bf16.mxu0 %v9660_v6  ;;  %v1500_v6 = vcombine.high %v1496_v0, %v1496_v0 }
  0x35   :  { %8660 = vmatpush3.bf16.msra.mxu1 %v9659_v5  ;;  %v9709_v5 = vld [vmem:[%s12637_s1 + $0x308] sm:$0xff]  }
  0x36   :  { %8661 = vmatprep.subr.bf16.mxu1 %v9662_v8  ;;  %v9711_v8 = vld [vmem:[%s12637_s1 + $0x388] sm:$0xff]  }
  0x37   :  { %8640 = vmatpush3.bf16.msra.mxu0 %v9661_v7  ;;  %v9710_v7 = vld [vmem:[%s12637_s1 + $0x3c8] sm:$0xff]  }
  0x38   :  { %8641 = vmatprep.subr.bf16.mxu0 %v9664_v10  ;;  %v9713_v10 = vld [vmem:[%s12637_s1 + $0x310] sm:$0xff]  }
  0x39   :  { %8662 = vmatpush3.bf16.msra.mxu1 %v9663_v9  ;;  %v9712_v9 = vld [vmem:[%s12637_s1 + $0x350] sm:$0xff]  }
  0x3a   :  { %8663 = vmatprep.subr.bf16.mxu1 %v9666_v12  ;;  %v9715_v12 = vld [vmem:[%s12637_s1 + $0x390] sm:$0xff]  }
  0x3b   :  { %8642 = vmatpush3.bf16.msra.mxu0 %v9665_v11  ;;  %v9714_v11 = vld [vmem:[%s12637_s1 + $0x3d0] sm:$0xff]  }
  0x3c   :  { %8643 = vmatprep.subr.bf16.mxu0 %v9668_v14  ;;  %v9717_v14 = vld [vmem:[%s12637_s1 + $0x318] sm:$0xff]  }
  0x3d   :  { %8664 = vmatpush3.bf16.msra.mxu1 %v9667_v13  ;;  %v9716_v13 = vld [vmem:[%s12637_s1 + $0x358] sm:$0xff]  }
  0x3e   :  { %8665 = vmatprep.subr.bf16.mxu1 %v9670_v16  ;;  %v9719_v16 = vld [vmem:[%s12637_s1 + $0x398] sm:$0xff]  }
  0x3f   :  { %8644 = vmatpush3.bf16.msra.mxu0 %v9669_v15  ;;  %v9718_v15 = vld [vmem:[%s12637_s1 + $0x3d8] sm:$0xff]  }
  0x40   :  { %8673 = vmatprep.subr.bf16.mxu0 %v9672_v19  ;;  %v9722_v19 = vld [vmem:[%s12637_s1 + $0x3e0] sm:$0xff]  }
  0x41   :  { %8666 = vmatpush3.bf16.msra.mxu1 %v9671_v17  ;;  %v9720_v17 = vld [vmem:[%s12637_s1 + $0x360] sm:$0xff]  }
  0x42   :  { %6189 = vmatmul.mubr.bf16.vlgmr.msra.gmra.mrb[4].mxu0 %v1433_v18  ;;  %8695 = vmatprep.subr.bf16.mxu1 %v9674_v21  ;;  %v9721_v18 = vld [vmem:[%s12637_s1 + $0x320] sm:$0xff]   ;;  %v9724_v21 = vld [vmem:[%s12637_s1 + $0x368] sm:$0xff]  }
  0x43   :  { %8674 = vmatpush3.bf16.msra.mxu0 %v9673_v20  ;;  %6268 = vmatprep.mubr.bf16.mxu0 %v1489_v56  ;;  %v9723_v20 = vld [vmem:[%s12637_s1 + $0x3a0] sm:$0xff]   ;;  %v9757_v56 = vld [vmem:[%s12637_s1 + $0x468] sm:$0xff]  }
  0x44   :  { %6229 = vmatmul.mubr.bf16.vlgmr.msra.gmra.mrb[4].mxu1 %v1449_v23  ;;  %8675 = vmatprep.subr.bf16.mxu0 %v9676_v24  ;;  %v9726_v23 = vld [vmem:[%s12637_s1 + $0x3e8] sm:$0xff]  }
  0x45   :  { %8696 = vmatpush3.bf16.msra.mxu1 %v9675_v22  ;;  %6308 = vmatprep.mubr.bf16.mxu1 %v1499_v60  ;;  %v9725_v22 = vld [vmem:[%s12637_s1 + $0x328] sm:$0xff]   ;;  %v9761_v60 = vld [vmem:[%s12637_s1 + $0x470] sm:$0xff]  }
  0x46   :  { %8697 = vmatprep.subr.bf16.mxu1 %v9678_v26  ;;  %v9727_v24 = vld [vmem:[%s12637_s1 + $0x3a8] sm:$0xff]   ;;  %v9729_v26 = vld [vmem:[%s12637_s1 + $0x330] sm:$0xff]  }
  0x47   :  { %8676 = vmatpush3.bf16.msra.mxu0 %v9677_v25  ;;  %v9728_v25 = vld [vmem:[%s12637_s1 + $0x370] sm:$0xff]  }
  0x48   :  { %8677 = vmatprep.subr.bf16.mxu0 %v9680_v28  ;;  %v9731_v28 = vld [vmem:[%s12637_s1 + $0x3b0] sm:$0xff]  }
  0x49   :  { %8698 = vmatpush3.bf16.msra.mxu1 %v9679_v27  ;;  %v9730_v27 = vld [vmem:[%s12637_s1 + $0x3f0] sm:$0xff]  }
  0x4a   :  { %8699 = vmatprep.subr.bf16.mxu1 %v9682_v30  ;;  %v9733_v30 = vld [vmem:[%s12637_s1 + $0x338] sm:$0xff]  }
  0x4b   :  { %8678 = vmatpush3.bf16.msra.mxu0 %v9681_v29  ;;  %v9732_v29 = vld [vmem:[%s12637_s1 + $0x378] sm:$0xff]  }
  0x4c   :  { %8679 = vmatprep.subr.bf16.mxu0 %v9684_v32  ;;  %v9736_v32 = vld [vmem:[%s12637_s1 + $0x3b8] sm:$0xff]  }
  0x4d   :  { %8700 = vmatpush3.bf16.msra.mxu1 %v9683_v31  ;;  %v9734_v31 = vld [vmem:[%s12637_s1 + $0x3f8] sm:$0xff]  }
  0x4e   :  { %8701 = vmatprep.subr.bf16.mxu1 %v9686_v34  ;;  %v9737_v34 = vld [vmem:[%s12637_s1 + $0x440] sm:$0xff]  }
  0x4f   :  { %8680 = vmatpush3.bf16.msra.mxu0 %v9685_v33  ;;  %v1482_v33 = vrot.slane %v10650_v53, %v10458_v41  ;;  %v9754_v53 = vld [vmem:[%s12637_s1 + $0x420] sm:$0xff]  }
  0x50   :  { %8681 = vmatprep.subr.bf16.mxu0 %v9688_v36  ;;  %v9739_v36 = vld [vmem:[%s12637_s1 + $0x4c0] sm:$0xff]  }
  0x51   :  { %8702 = vmatpush3.bf16.msra.mxu1 %v9687_v35  ;;  %v9738_v35 = vld [vmem:[%s12637_s1 + $0x400] sm:$0xff]  }
  0x52   :  { %8703 = vmatprep.subr.bf16.mxu1 %v9690_v38  ;;  %v1498_v38 = vcombine.high %v1482_v33, %v1482_v33 }
  0x53   :  { %8682 = vmatpush3.bf16.msra.mxu0 %v9689_v37  ;;  %v9740_v37 = vld [vmem:[%s12637_s1 + $0x480] sm:$0xff]  }
  0x54   :  { %8683 = vmatprep.subr.bf16.mxu0 %v9692_v40  ;;  %v9742_v40 = vld [vmem:[%s12637_s1 + $0x408] sm:$0xff]  }
  0x55   :  { %8704 = vmatpush3.bf16.msra.mxu1 %v9691_v39  ;;  %v9741_v39 = vld [vmem:[%s12637_s1 + $0x448] sm:$0xff]  }
  0x56   :  { %8705 = vmatprep.subr.bf16.mxu1 %v9694_v43  ;;  %v9744_v43 = vld [vmem:[%s12637_s1 + $0x488] sm:$0xff]  }
  0x57   :  { %8684 = vmatpush3.bf16.msra.mxu0 %v9693_v42  ;;  %v9743_v42 = vld [vmem:[%s12637_s1 + $0x4c8] sm:$0xff]  }
  0x58   :  { %8685 = vmatprep.subr.bf16.mxu0 %v9696_v45  ;;  %v9746_v45 = vld [vmem:[%s12637_s1 + $0x410] sm:$0xff]  }
  0x59   :  { %8706 = vmatpush3.bf16.msra.mxu1 %v9695_v44  ;;  %v9745_v44 = vld [vmem:[%s12637_s1 + $0x450] sm:$0xff]  }
  0x5a   :  { %8707 = vmatprep.subr.bf16.mxu1 %v9698_v50  ;;  %v9751_v50 = vld [vmem:[%s12637_s1 + $0x4d8] sm:$0xff]  }
  0x5b   :  { %8686 = vmatpush3.bf16.msra.mxu0 %v9697_v47  ;;  %v9748_v47 = vld [vmem:[%s12637_s1 + $0x490] sm:$0xff]  }
  0x5c   :  { %8687 = vmatprep.subr.bf16.mxu0 %v9700_v54  ;;  %v9755_v54 = vld [vmem:[%s12637_s1 + $0x4e0] sm:$0xff]  }
  0x5d   :  { %8708 = vmatpush3.bf16.msra.mxu1 %v9699_v51  ;;  %v9752_v51 = vld [vmem:[%s12637_s1 + $0x498] sm:$0xff]  }
  0x5e   :  { %8709 = vmatprep.subr.bf16.mxu1 %v9702_v58  ;;  %v9759_v58 = vld [vmem:[%s12637_s1 + $0x4e8] sm:$0xff]  }
  0x5f   :  { %8688 = vmatpush3.bf16.msra.mxu0 %v9701_v55  ;;  %v9756_v55 = vld [vmem:[%s12637_s1 + $0x4a0] sm:$0xff]  }
  0x60   :  { %8717 = vmatprep.subr.bf16.mxu0 %v9704_v62  ;;  %v9762_v62 = vld [vmem:[%s12637_s1 + $0x430] sm:$0xff]  }
  0x61   :  { %8710 = vmatpush3.bf16.msra.mxu1 %v9703_v59  ;;  %v9760_v59 = vld [vmem:[%s12637_s1 + $0x4a8] sm:$0xff]  }
  0x62   :  { %6269 = vmatmul.mubr.bf16.vlgmr.msra.gmra.mrb[8].mxu0 %v1475_v61  ;;  %8739 = vmatprep.subr.bf16.mxu1 %v9706_v1  ;;  %v24_v61 = vld [vmem:[%s12636_s0 + $0x10] sm:$0xff] }
  0x63   :  { %8718 = vmatpush3.bf16.msra.mxu0 %v9705_v63  ;;  %6348 = vmatprep.mubr.bf16.mxu0 %v1496_v0  ;;  %v1508_v63 = vrot.slane %v24_v61, %v10458_v41  ;;  %v1501_v0 = vcombine.high %v24_v61, %v24_v61  ;;  %v9763_v1 = vld [vmem:[%s12637_s1 + $0x4f0] sm:$0xff]  }
  0x64   :  { %6309 = vmatmul.mubr.bf16.vlgmr.msra.gmra.mrb[8].mxu1 %v1497_v3  ;;  %8719 = vmatprep.subr.bf16.mxu0 %v9708_v4  ;;  %v9812_v61 = vld [vmem:[%s12637_s1 + $0x6d0] sm:$0xff]  }
  0x65   :  { %8740 = vmatpush3.bf16.msra.mxu1 %v9707_v2  ;;  %6388 = vmatprep.mubr.bf16.mxu1 %v1500_v6  ;;  %v9764_v2 = vld [vmem:[%s12637_s1 + $0x4b0] sm:$0xff]   ;;  %v1516_v3 = vcombine.high %v1508_v63, %v1508_v63  ;;  %v10856_v4 = vrot.slane %v1501_v0, %v10458_v41  ;;  %v9766_v6 = vld [vmem:[%s12637_s1 + $0x438] sm:$0xff]  }
  0x66   :  { %8741 = vmatprep.subr.bf16.mxu1 %v9710_v7  ;;  %v9815_v0 = vld [vmem:[%s12637_s1 + $0x618] sm:$0xff]  }
  0x67   :  { %8720 = vmatpush3.bf16.msra.mxu0 %v9709_v5  ;;  %v9765_v5 = vld [vmem:[%s12637_s1 + $0x478] sm:$0xff]   ;;  %v1538_v7 = vrot.slane %v1516_v3, %v10458_v41  ;;  %v9818_v3 = vld [vmem:[%s12637_s1 + $0x660] sm:$0xff]  }
  0x68   :  { %8721 = vmatprep.subr.bf16.mxu0 %v9712_v9  ;;  %v9767_v9 = vld [vmem:[%s12637_s1 + $0x4f8] sm:$0xff]  }
  0x69   :  { %8742 = vmatpush3.bf16.msra.mxu1 %v9711_v8  ;;  %v1517_v8 = vcombine.high %v10856_v4, %v10856_v4 }
  0x6a   :  { %8743 = vmatprep.subr.bf16.mxu1 %v9714_v11  ;;  %v1548_v11 = vcombine.high %v1538_v7, %v1538_v7 }
  0x6b   :  { %8722 = vmatpush3.bf16.msra.mxu0 %v9713_v10  ;;  %v9768_v10 = vld [vmem:[%s12637_s1 + $0x4b8] sm:$0xff]  }
  0x6c   :  { %8723 = vmatprep.subr.bf16.mxu0 %v9716_v13  ;;  %v9769_v13 = vld [vmem:[%s12637_s1 + $0x540] sm:$0xff]  }
  0x6d   :  { %8744 = vmatpush3.bf16.msra.mxu1 %v9715_v12  ;;  %v1524_v12 = vrot.slane %v1508_v63, %v10458_v41  ;;  %v9814_v63 = vld [vmem:[%s12637_s1 + $0x658] sm:$0xff]  }
  0x6e   :  { %8745 = vmatprep.subr.bf16.mxu1 %v9718_v15  ;;  %v1545_v15 = vrot.slane %v1517_v8, %v10458_v41  ;;  %v9823_v8 = vld [vmem:[%s12637_s1 + $0x628] sm:$0xff]  }
  0x6f   :  { %8724 = vmatpush3.bf16.msra.mxu0 %v9717_v14  ;;  %v9770_v14 = vld [vmem:[%s12637_s1 + $0x500] sm:$0xff]  }
  0x70   :  { %8725 = vmatprep.subr.bf16.mxu0 %v9720_v17  ;;  %v9772_v17 = vld [vmem:[%s12637_s1 + $0x580] sm:$0xff]  }
  0x71   :  { %8746 = vmatpush3.bf16.msra.mxu1 %v9719_v16  ;;  %v9771_v16 = vld [vmem:[%s12637_s1 + $0x5c0] sm:$0xff]  }
  0x72   :  { %8747 = vmatprep.subr.bf16.mxu1 %v9722_v19  ;;  %v9773_v19 = vld [vmem:[%s12637_s1 + $0x548] sm:$0xff]  }
  0x73   :  { %8726 = vmatpush3.bf16.msra.mxu0 %v9721_v18  ;;  %v1546_v18 = vcombine.high %v1524_v12, %v1524_v12 }
  0x74   :  { %8727 = vmatprep.subr.bf16.mxu0 %v9724_v21  ;;  %v1549_v21 = vcombine.high %v1545_v15, %v1545_v15 }
  0x75   :  { %8748 = vmatpush3.bf16.msra.mxu1 %v9723_v20  ;;  %v9774_v20 = vld [vmem:[%s12637_s1 + $0x508] sm:$0xff]  }
  0x76   :  { %8749 = vmatprep.subr.bf16.mxu1 %v9726_v23  ;;  %v9776_v23 = vld [vmem:[%s12637_s1 + $0x588] sm:$0xff]  }
  0x77   :  { %8728 = vmatpush3.bf16.msra.mxu0 %v9725_v22  ;;  %v9775_v22 = vld [vmem:[%s12637_s1 + $0x5c8] sm:$0xff]  }
  0x78   :  { %8729 = vmatprep.subr.bf16.mxu0 %v9728_v25  ;;  %v9778_v25 = vld [vmem:[%s12637_s1 + $0x510] sm:$0xff]  }
  0x79   :  { %8750 = vmatpush3.bf16.msra.mxu1 %v9727_v24  ;;  %v9777_v24 = vld [vmem:[%s12637_s1 + $0x550] sm:$0xff]  }
  0x7a   :  { %8751 = vmatprep.subr.bf16.mxu1 %v9730_v27  ;;  %v9780_v27 = vld [vmem:[%s12637_s1 + $0x590] sm:$0xff]  }
  0x7b   :  { %8730 = vmatpush3.bf16.msra.mxu0 %v9729_v26  ;;  %v9779_v26 = vld [vmem:[%s12637_s1 + $0x5d0] sm:$0xff]  }
  0x7c   :  { %8731 = vmatprep.subr.bf16.mxu0 %v9732_v29  ;;  %v9782_v29 = vld [vmem:[%s12637_s1 + $0x518] sm:$0xff]  }
  0x7d   :  { %8752 = vmatpush3.bf16.msra.mxu1 %v9731_v28  ;;  %v9781_v28 = vld [vmem:[%s12637_s1 + $0x558] sm:$0xff]  }
  0x7e   :  { %8753 = vmatprep.subr.bf16.mxu1 %v9734_v31  ;;  %v9784_v31 = vld [vmem:[%s12637_s1 + $0x598] sm:$0xff]  }
  0x7f   :  { %8732 = vmatpush3.bf16.msra.mxu0 %v9733_v30  ;;  %v9783_v30 = vld [vmem:[%s12637_s1 + $0x5d8] sm:$0xff]  }
  0x80   :  { %8761 = vmatprep.subr.bf16.mxu0 %v9737_v34  ;;  %v9787_v34 = vld [vmem:[%s12637_s1 + $0x5e0] sm:$0xff]  }
  0x81   :  { %8754 = vmatpush3.bf16.msra.mxu1 %v9736_v32  ;;  %v9785_v32 = vld [vmem:[%s12637_s1 + $0x560] sm:$0xff]  }
  0x82   :  { %6349 = vmatmul.mubr.bf16.vlgmr.msra.gmra.mrb[12].mxu0 %v1482_v33  ;;  %8783 = vmatprep.subr.bf16.mxu1 %v9739_v36  ;;  %v9786_v33 = vld [vmem:[%s12637_s1 + $0x520] sm:$0xff]   ;;  %v9789_v36 = vld [vmem:[%s12637_s1 + $0x568] sm:$0xff]  }
  0x83   :  { %8762 = vmatpush3.bf16.msra.mxu0 %v9738_v35  ;;  %6428 = vmatprep.mubr.bf16.mxu0 %v1538_v7  ;;  %v9788_v35 = vld [vmem:[%s12637_s1 + $0x5a0] sm:$0xff]   ;;  %v9822_v7 = vld [vmem:[%s12637_s1 + $0x668] sm:$0xff]  }
  0x84   :  { %6389 = vmatmul.mubr.bf16.vlgmr.msra.gmra.mrb[12].mxu1 %v1498_v38  ;;  %8763 = vmatprep.subr.bf16.mxu0 %v9741_v39  ;;  %v9791_v38 = vld [vmem:[%s12637_s1 + $0x5e8] sm:$0xff]  }
  0x85   :  { %8784 = vmatpush3.bf16.msra.mxu1 %v9740_v37  ;;  %6468 = vmatprep.mubr.bf16.mxu1 %v1548_v11  ;;  %v9790_v37 = vld [vmem:[%s12637_s1 + $0x528] sm:$0xff]   ;;  %v9826_v11 = vld [vmem:[%s12637_s1 + $0x670] sm:$0xff]  }
  0x86   :  { %8785 = vmatprep.subr.bf16.mxu1 %v9743_v42  ;;  %v9792_v39 = vld [vmem:[%s12637_s1 + $0x5a8] sm:$0xff]   ;;  %v9794_v42 = vld [vmem:[%s12637_s1 + $0x530] sm:$0xff]  }
  0x87   :  { %8764 = vmatpush3.bf16.msra.mxu0 %v9742_v40  ;;  %v9793_v40 = vld [vmem:[%s12637_s1 + $0x570] sm:$0xff]  }
  0x88   :  { %8765 = vmatprep.subr.bf16.mxu0 %v9745_v44  ;;  %v9796_v44 = vld [vmem:[%s12637_s1 + $0x5b0] sm:$0xff]  }
  0x89   :  { %8786 = vmatpush3.bf16.msra.mxu1 %v9744_v43  ;;  %v9795_v43 = vld [vmem:[%s12637_s1 + $0x5f0] sm:$0xff]  }
  0x8a   :  { %8787 = vmatprep.subr.bf16.mxu1 %v9747_v46  ;;  %v9798_v46 = vld [vmem:[%s12637_s1 + $0x538] sm:$0xff]  }
  0x8b   :  { %8766 = vmatpush3.bf16.msra.mxu0 %v9746_v45  ;;  %v9797_v45 = vld [vmem:[%s12637_s1 + $0x578] sm:$0xff]  }
  0x8c   :  { %8767 = vmatprep.subr.bf16.mxu0 %v9749_v48  ;;  %v9801_v48 = vld [vmem:[%s12637_s1 + $0x5b8] sm:$0xff]  }
  0x8d   :  { %8788 = vmatpush3.bf16.msra.mxu1 %v9748_v47  ;;  %v9799_v47 = vld [vmem:[%s12637_s1 + $0x5f8] sm:$0xff]  }
  0x8e   :  { %8789 = vmatprep.subr.bf16.mxu1 %v9751_v50  ;;  %v9802_v50 = vld [vmem:[%s12637_s1 + $0x640] sm:$0xff]  }
  0x8f   :  { %8768 = vmatpush3.bf16.msra.mxu0 %v9750_v49  ;;  %v1531_v49 = vrot.slane %v10856_v4, %v10458_v41  ;;  %v9819_v4 = vld [vmem:[%s12637_s1 + $0x620] sm:$0xff]  }
  0x90   :  { %8769 = vmatprep.subr.bf16.mxu0 %v9753_v52  ;;  %v9804_v52 = vld [vmem:[%s12637_s1 + $0x6c0] sm:$0xff]  }
  0x91   :  { %8790 = vmatpush3.bf16.msra.mxu1 %v9752_v51  ;;  %v9803_v51 = vld [vmem:[%s12637_s1 + $0x600] sm:$0xff]  }
  0x92   :  { %8791 = vmatprep.subr.bf16.mxu1 %v9755_v54  ;;  %v1547_v54 = vcombine.high %v1531_v49, %v1531_v49 }
  0x93   :  { %8770 = vmatpush3.bf16.msra.mxu0 %v9754_v53  ;;  %v9805_v53 = vld [vmem:[%s12637_s1 + $0x680] sm:$0xff]  }
  0x94   :  { %8771 = vmatprep.subr.bf16.mxu0 %v9757_v56  ;;  %v9807_v56 = vld [vmem:[%s12637_s1 + $0x608] sm:$0xff]  }
  0x95   :  { %8792 = vmatpush3.bf16.msra.mxu1 %v9756_v55  ;;  %v9806_v55 = vld [vmem:[%s12637_s1 + $0x648] sm:$0xff]  }
  0x96   :  { %8793 = vmatprep.subr.bf16.mxu1 %v9759_v58  ;;  %v9809_v58 = vld [vmem:[%s12637_s1 + $0x688] sm:$0xff]  }
  0x97   :  { %8772 = vmatpush3.bf16.msra.mxu0 %v9758_v57  ;;  %v9808_v57 = vld [vmem:[%s12637_s1 + $0x6c8] sm:$0xff]  }
  0x98   :  { %8773 = vmatprep.subr.bf16.mxu0 %v9761_v60  ;;  %v9811_v60 = vld [vmem:[%s12637_s1 + $0x610] sm:$0xff]  }
  0x99   :  { %8794 = vmatpush3.bf16.msra.mxu1 %v9760_v59  ;;  %v9810_v59 = vld [vmem:[%s12637_s1 + $0x650] sm:$0xff]  }
  0x9a   :  { %8795 = vmatprep.subr.bf16.mxu1 %v9763_v1  ;;  %v9816_v1 = vld [vmem:[%s12637_s1 + $0x6d8] sm:$0xff]  }
  0x9b   :  { %8774 = vmatpush3.bf16.msra.mxu0 %v9762_v62  ;;  %v9813_v62 = vld [vmem:[%s12637_s1 + $0x690] sm:$0xff]  }
  0x9c   :  { %8775 = vmatprep.subr.bf16.mxu0 %v9765_v5  ;;  %v9820_v5 = vld [vmem:[%s12637_s1 + $0x6e0] sm:$0xff]  }
  0x9d   :  { %8796 = vmatpush3.bf16.msra.mxu1 %v9764_v2  ;;  %v9817_v2 = vld [vmem:[%s12637_s1 + $0x698] sm:$0xff]  }
  0x9e   :  { %8797 = vmatprep.subr.bf16.mxu1 %v9767_v9  ;;  %v9824_v9 = vld [vmem:[%s12637_s1 + $0x6e8] sm:$0xff]  }
  0x9f   :  { %8776 = vmatpush3.bf16.msra.mxu0 %v9766_v6  ;;  %v9821_v6 = vld [vmem:[%s12637_s1 + $0x6a0] sm:$0xff]  }
  0xa0   :  { %8805 = vmatprep.subr.bf16.mxu0 %v9769_v13  ;;  %v9828_v13 = vld [vmem:[%s12637_s1 + $0x6f0] sm:$0xff]  }
  0xa1   :  { %8798 = vmatpush3.bf16.msra.mxu1 %v9768_v10  ;;  %v9825_v10 = vld [vmem:[%s12637_s1 + $0x6a8] sm:$0xff]  }
  0xa2   :  { %6429 = vmatmul.mubr.bf16.vlgmr.msra.gmra.mrb[16].mxu0 %v1524_v12  ;;  %8827 = vmatprep.subr.bf16.mxu1 %v9771_v16  ;;  %v25_v12 = vld [vmem:[%s12636_s0 + $0x18] sm:$0xff]  ;;  %v9827_v16 = vld [vmem:[%s12637_s1 + $0x630] sm:$0xff]  }
  0xa3   :  { %8806 = vmatpush3.bf16.msra.mxu0 %v9770_v14  ;;  %6508 = vmatprep.mubr.bf16.mxu0 %v1545_v15  ;;  %v1557_v14 = vrot.slane %v25_v12, %v10458_v41  ;;  %v1550_v15 = vcombine.high %v25_v12, %v25_v12  ;;  %v9866_v12 = vld [vmem:[%s12637_s1 + $0x7b8] sm:$0xff]  }
  0xa4   :  { %6469 = vmatmul.mubr.bf16.vlgmr.msra.gmra.mrb[16].mxu1 %v1546_v18  ;;  %8807 = vmatprep.subr.bf16.mxu0 %v9773_v19 }
  0xa5   :  { %8828 = vmatpush3.bf16.msra.mxu1 %v9772_v17  ;;  %6548 = vmatprep.mubr.bf16.mxu1 %v1549_v21  ;;  %v9830_v17 = vld [vmem:[%s12637_s1 + $0x678] sm:$0xff]   ;;  %v1565_v18 = vcombine.high %v1557_v14, %v1557_v14  ;;  %v11062_v19 = vrot.slane %v1550_v15, %v10458_v41  ;;  %v9868_v15 = vld [vmem:[%s12637_s1 + $0x800] sm:$0xff]  }
  0xa6   :  { %8829 = vmatprep.subr.bf16.mxu1 %v9775_v22  ;;  %v9832_v21 = vld [vmem:[%s12637_s1 + $0x6f8] sm:$0xff]  }
  0xa7   :  { %8808 = vmatpush3.bf16.msra.mxu0 %v9774_v20  ;;  %v9829_v20 = vld [vmem:[%s12637_s1 + $0x6b0] sm:$0xff]   ;;  %v1587_v22 = vrot.slane %v1565_v18, %v10458_v41 }
  0xa8   :  { %8809 = vmatprep.subr.bf16.mxu0 %v9777_v24  ;;  %v9831_v24 = vld [vmem:[%s12637_s1 + $0x638] sm:$0xff]  }
  0xa9   :  { %8830 = vmatpush3.bf16.msra.mxu1 %v9776_v23  ;;  %v1566_v23 = vcombine.high %v11062_v19, %v11062_v19 }
  0xaa   :  { %8831 = vmatprep.subr.bf16.mxu1 %v9779_v26  ;;  %v9834_v26 = vld [vmem:[%s12637_s1 + $0x740] sm:$0xff]  }
  0xab   :  { %8810 = vmatpush3.bf16.msra.mxu0 %v9778_v25  ;;  %v1573_v25 = vrot.slane %v1557_v14, %v10458_v41  ;;  %v9867_v14 = vld [vmem:[%s12637_s1 + $0x840] sm:$0xff]  }
  0xac   :  { %8811 = vmatprep.subr.bf16.mxu0 %v9781_v28  ;;  %v9833_v28 = vld [vmem:[%s12637_s1 + $0x6b8] sm:$0xff]  }
  0xad   :  { %8832 = vmatpush3.bf16.msra.mxu1 %v9780_v27  ;;  %v1597_v27 = vcombine.high %v1587_v22, %v1587_v22 }
  0xae   :  { %8833 = vmatprep.subr.bf16.mxu1 %v9783_v30  ;;  %v9836_v30 = vld [vmem:[%s12637_s1 + $0x7c0] sm:$0xff]  }
  0xaf   :  { %8812 = vmatpush3.bf16.msra.mxu0 %v9782_v29  ;;  %v1594_v29 = vrot.slane %v1566_v23, %v10458_v41  ;;  %v9875_v23 = vld [vmem:[%s12637_s1 + $0x850] sm:$0xff]  }
  0xb0   :  { %8813 = vmatprep.subr.bf16.mxu0 %v9785_v32  ;;  %v1595_v32 = vcombine.high %v1573_v25, %v1573_v25 }
  0xb1   :  { %8834 = vmatpush3.bf16.msra.mxu1 %v9784_v31  ;;  %v9835_v31 = vld [vmem:[%s12637_s1 + $0x700] sm:$0xff]  }
  0xb2   :  { %8835 = vmatprep.subr.bf16.mxu1 %v9787_v34  ;;  %v9837_v34 = vld [vmem:[%s12637_s1 + $0x780] sm:$0xff]  }
  0xb3   :  { %8814 = vmatpush3.bf16.msra.mxu0 %v9786_v33  ;;  %v9838_v33 = vld [vmem:[%s12637_s1 + $0x748] sm:$0xff]  }
  0xb4   :  { %8815 = vmatprep.subr.bf16.mxu0 %v9789_v36  ;;  %v9840_v36 = vld [vmem:[%s12637_s1 + $0x7c8] sm:$0xff]  }
  0xb5   :  { %8836 = vmatpush3.bf16.msra.mxu1 %v9788_v35  ;;  %v1598_v35 = vcombine.high %v1594_v29, %v1594_v29 }
  0xb6   :  { %8837 = vmatprep.subr.bf16.mxu1 %v9791_v38  ;;  %v9842_v38 = vld [vmem:[%s12637_s1 + $0x750] sm:$0xff]  }
  0xb7   :  { %8816 = vmatpush3.bf16.msra.mxu0 %v9790_v37  ;;  %v9839_v37 = vld [vmem:[%s12637_s1 + $0x708] sm:$0xff]  }
  0xb8   :  { %8817 = vmatprep.subr.bf16.mxu0 %v9793_v40  ;;  %v9844_v40 = vld [vmem:[%s12637_s1 + $0x7d0] sm:$0xff]  }
  0xb9   :  { %8838 = vmatpush3.bf16.msra.mxu1 %v9792_v39  ;;  %v9841_v39 = vld [vmem:[%s12637_s1 + $0x788] sm:$0xff]  }
  0xba   :  { %8839 = vmatprep.subr.bf16.mxu1 %v9795_v43  ;;  %v9846_v43 = vld [vmem:[%s12637_s1 + $0x758] sm:$0xff]  }
  0xbb   :  { %8818 = vmatpush3.bf16.msra.mxu0 %v9794_v42  ;;  %v9843_v42 = vld [vmem:[%s12637_s1 + $0x710] sm:$0xff]  }
  0xbc   :  { %8819 = vmatprep.subr.bf16.mxu0 %v9797_v45  ;;  %v9847_v45 = vld [vmem:[%s12637_s1 + $0x718] sm:$0xff]  }
  0xbd   :  { %8840 = vmatpush3.bf16.msra.mxu1 %v9796_v44  ;;  %v9845_v44 = vld [vmem:[%s12637_s1 + $0x790] sm:$0xff]  }
  0xbe   :  { %8841 = vmatprep.subr.bf16.mxu1 %v9799_v47  ;;  %v9849_v47 = vld [vmem:[%s12637_s1 + $0x798] sm:$0xff]  }
  0xbf   :  { %8820 = vmatpush3.bf16.msra.mxu0 %v9798_v46  ;;  %v9848_v46 = vld [vmem:[%s12637_s1 + $0x7d8] sm:$0xff]  }
  0xc0   :  { %8849 = vmatprep.subr.bf16.mxu0 %v9802_v50  ;;  %v9852_v50 = vld [vmem:[%s12637_s1 + $0x7e0] sm:$0xff]  }
  0xc1   :  { %8842 = vmatpush3.bf16.msra.mxu1 %v9801_v48  ;;  %v9850_v48 = vld [vmem:[%s12637_s1 + $0x760] sm:$0xff]  }
  0xc2   :  { %6509 = vmatmul.mubr.bf16.vlgmr.msra.gmra.mrb[20].mxu0 %v1531_v49  ;;  %8871 = vmatprep.subr.bf16.mxu1 %v9804_v52  ;;  %v9851_v49 = vld [vmem:[%s12637_s1 + $0x720] sm:$0xff]   ;;  %v9854_v52 = vld [vmem:[%s12637_s1 + $0x768] sm:$0xff]  }
  0xc3   :  { %8850 = vmatpush3.bf16.msra.mxu0 %v9803_v51  ;;  %6588 = vmatprep.mubr.bf16.mxu0 %v1587_v22  ;;  %v9853_v51 = vld [vmem:[%s12637_s1 + $0x7a0] sm:$0xff]   ;;  %v9874_v22 = vld [vmem:[%s12637_s1 + $0x888] sm:$0xff]  }
  0xc4   :  { %6549 = vmatmul.mubr.bf16.vlgmr.msra.gmra.mrb[20].mxu1 %v1547_v54  ;;  %8851 = vmatprep.subr.bf16.mxu0 %v9806_v55  ;;  %v9856_v54 = vld [vmem:[%s12637_s1 + $0x7e8] sm:$0xff]  }
  0xc5   :  { %8872 = vmatpush3.bf16.msra.mxu1 %v9805_v53  ;;  %6628 = vmatprep.mubr.bf16.mxu1 %v1597_v27  ;;  %v9855_v53 = vld [vmem:[%s12637_s1 + $0x728] sm:$0xff]   ;;  %v9879_v27 = vld [vmem:[%s12637_s1 + $0x858] sm:$0xff]  }
  0xc6   :  { %8873 = vmatprep.subr.bf16.mxu1 %v9808_v57  ;;  %v9857_v55 = vld [vmem:[%s12637_s1 + $0x7a8] sm:$0xff]   ;;  %v9858_v57 = vld [vmem:[%s12637_s1 + $0x770] sm:$0xff]  }
  0xc7   :  { %8852 = vmatpush3.bf16.msra.mxu0 %v9807_v56  ;;  %v7906_v56 = vld [vmem:[%s12638_s2] ss:$0 sm:$0xff] }
  0xc8   :  { %8853 = vmatprep.subr.bf16.mxu0 %v9810_v59  ;;  %v9859_v59 = vld [vmem:[%s12637_s1 + $0x730] sm:$0xff]  }
  0xc9   :  { %8874 = vmatpush3.bf16.msra.mxu1 %v9809_v58 }
  0xca   :  { %8875 = vmatprep.subr.bf16.mxu1 %v9812_v61  ;;  %v9860_v61 = vld [vmem:[%s12637_s1 + $0x7f0] sm:$0xff]  }
  0xcb   :  { %8854 = vmatpush3.bf16.msra.mxu0 %v9811_v60 }
  0xcc   :  { %8855 = vmatprep.subr.bf16.mxu0 %v9814_v63 }
  0xcd   :  { %8876 = vmatpush3.bf16.msra.mxu1 %v9813_v62 }
  0xce   :  { %8877 = vmatprep.subr.bf16.mxu1 %v9816_v1  ;;  %v9861_v1 = vld [vmem:[%s12637_s1 + $0x7b0] sm:$0xff]  }
  0xcf   :  { %8856 = vmatpush3.bf16.msra.mxu0 %v9815_v0 }
  0xd0   :  { %8857 = vmatprep.subr.bf16.mxu0 %v9818_v3 }
  0xd1   :  { %8878 = vmatpush3.bf16.msra.mxu1 %v9817_v2  ;;  %v9862_v2 = vld [vmem:[%s12637_s1 + $0x778] sm:$0xff]  }
  0xd2   :  { %8879 = vmatprep.subr.bf16.mxu1 %v9820_v5 }
  0xd3   :  { %8858 = vmatpush3.bf16.msra.mxu0 %v9819_v4 }
  0xd4   :  { %8859 = vmatprep.subr.bf16.mxu0 %v9822_v7  ;;  %v9863_v7 = vld [vmem:[%s12637_s1 + $0x738] sm:$0xff]  }
  0xd5   :  { %8880 = vmatpush3.bf16.msra.mxu1 %v9821_v6 }
  0xd6   :  { %8881 = vmatprep.subr.bf16.mxu1 %v9824_v9  ;;  %v9864_v9 = vld [vmem:[%s12637_s1 + $0x7f8] sm:$0xff]  }
  0xd7   :  { %8860 = vmatpush3.bf16.msra.mxu0 %v9823_v8 }
  0xd8   :  { %8861 = vmatprep.subr.bf16.mxu0 %v9826_v11 }
  0xd9   :  { %8882 = vmatpush3.bf16.msra.mxu1 %v9825_v10 }
  0xda   :  { %8883 = vmatprep.subr.bf16.mxu1 %v9828_v13  ;;  %v1580_v13 = vrot.slane %v11062_v19, %v10458_v41  ;;  %v9871_v19 = vld [vmem:[%s12637_s1 + $0x848] sm:$0xff]  }
  0xdb   :  { %8862 = vmatpush3.bf16.msra.mxu0 %v9827_v16  ;;  %v9869_v16 = vld [vmem:[%s12637_s1 + $0x8c0] sm:$0xff]  }
  0xdc   :  { %8863 = vmatprep.subr.bf16.mxu0 %v9830_v17  ;;  %v9870_v17 = vld [vmem:[%s12637_s1 + $0x880] sm:$0xff]   ;;  %v1596_v18 = vcombine.high %v1580_v13, %v1580_v13 }
  0xdd   :  { %8884 = vmatpush3.bf16.msra.mxu1 %v9829_v20  ;;  %v9872_v20 = vld [vmem:[%s12637_s1 + $0x808] sm:$0xff]  }
  0xde   :  { %8885 = vmatprep.subr.bf16.mxu1 %v9832_v21  ;;  %v9873_v21 = vld [vmem:[%s12637_s1 + $0x8c8] sm:$0xff]  }
  0xdf   :  { %8864 = vmatpush3.bf16.msra.mxu0 %v9831_v24  ;;  %v9876_v24 = vld [vmem:[%s12637_s1 + $0x810] sm:$0xff]  }
  0xe0   :  { %8893 = vmatprep.subr.bf16.mxu0 %v9834_v26  ;;  %v9878_v26 = vld [vmem:[%s12637_s1 + $0x890] sm:$0xff]  }
  0xe1   :  { %8886 = vmatpush3.bf16.msra.mxu1 %v9833_v28  ;;  %v9880_v28 = vld [vmem:[%s12637_s1 + $0x818] sm:$0xff]  }
  0xe2   :  { %6589 = vmatmul.mubr.bf16.vlgmr.msra.gmra.mrb[24].mxu0 %v1573_v25  ;;  %8915 = vmatprep.subr.bf16.mxu1 %v9836_v30  ;;  %v9877_v25 = vld [vmem:[%s12637_s1 + $0x8d0] sm:$0xff]   ;;  %v9882_v30 = vld [vmem:[%s12637_s1 + $0x898] sm:$0xff]  }
  0xe3   :  { %8894 = vmatpush3.bf16.msra.mxu0 %v9835_v31  ;;  %6668 = vmatprep.mubr.bf16.mxu0 %v1594_v29  ;;  %v9881_v29 = vld [vmem:[%s12637_s1 + $0x8d8] sm:$0xff]   ;;  %v9883_v31 = vld [vmem:[%s12637_s1 + $0x860] sm:$0xff]  }
  0xe4   :  { %6629 = vmatmul.mubr.bf16.vlgmr.msra.gmra.mrb[24].mxu1 %v1595_v32  ;;  %8895 = vmatprep.subr.bf16.mxu0 %v9838_v33  ;;  %v9884_v32 = vld [vmem:[%s12637_s1 + $0x820] sm:$0xff]  }
  0xe5   :  { %8916 = vmatpush3.bf16.msra.mxu1 %v9837_v34  ;;  %6708 = vmatprep.mubr.bf16.mxu1 %v1598_v35  ;;  %v9885_v33 = vld [vmem:[%s12637_s1 + $0x8e0] sm:$0xff]   ;;  %v9887_v35 = vld [vmem:[%s12637_s1 + $0x868] sm:$0xff]  }
  0xe6   :  { %8917 = vmatprep.subr.bf16.mxu1 %v9840_v36  ;;  %v9886_v34 = vld [vmem:[%s12637_s1 + $0x8a0] sm:$0xff]   ;;  %v9888_v36 = vld [vmem:[%s12637_s1 + $0x828] sm:$0xff]  }
  0xe7   :  { %8896 = vmatpush3.bf16.msra.mxu0 %v9839_v37  ;;  %v9889_v37 = vld [vmem:[%s12637_s1 + $0x8e8] sm:$0xff]  }
  0xe8   :  { %8897 = vmatprep.subr.bf16.mxu0 %v9842_v38  ;;  %v9890_v38 = vld [vmem:[%s12637_s1 + $0x8a8] sm:$0xff]  }
  0xe9   :  { %8918 = vmatpush3.bf16.msra.mxu1 %v9841_v39  ;;  %v9891_v39 = vld [vmem:[%s12637_s1 + $0x870] sm:$0xff]  }
  0xea   :  { %8919 = vmatprep.subr.bf16.mxu1 %v9844_v40 }
  0xeb   :  { %8898 = vmatpush3.bf16.msra.mxu0 %v9843_v42  ;;  %v9892_v42 = vld [vmem:[%s12637_s1 + $0x830] sm:$0xff]  }
  0xec   :  { %8899 = vmatprep.subr.bf16.mxu0 %v9846_v43  ;;  %v9893_v43 = vld [vmem:[%s12637_s1 + $0x8f0] sm:$0xff]  }
  0xed   :  { %8920 = vmatpush3.bf16.msra.mxu1 %v9845_v44 }
  0xee   :  { %8921 = vmatprep.subr.bf16.mxu1 %v9848_v46 }
  0xef   :  { %8900 = vmatpush3.bf16.msra.mxu0 %v9847_v45  ;;  %v26_v45 = vld [vmem:[%s12636_s0 + $0x20] sm:$0xff] }
  0xf0   :  { %8901 = vmatprep.subr.bf16.mxu0 %v9850_v48 }
  0xf1   :  { %8922 = vmatpush3.bf16.msra.mxu1 %v9849_v47 }
  0xf2   :  { %8923 = vmatprep.subr.bf16.mxu1 %v9852_v50  ;;  %v9895_v50 = vld [vmem:[%s12637_s1 + $0x878] sm:$0xff]  }
  0xf3   :  { %8902 = vmatpush3.bf16.msra.mxu0 %v9851_v49  ;;  %v9894_v49 = vld [vmem:[%s12637_s1 + $0x8b0] sm:$0xff]  }
  0xf4   :  { %8903 = vmatprep.subr.bf16.mxu0 %v9854_v52  ;;  %v1599_v52 = vcombine.high %v26_v45, %v26_v45 }
  0xf5   :  { %v8601_v58 = vpop.f32.mrb[0].mxu0  ;;  %8924 = vmatpush3.bf16.msra.mxu1 %v9853_v51  ;;  %v1606_v51 = vrot.slane %v26_v45, %v10458_v41 }
  0xf6   :  { %v8602_v60 = vpop.f32.mrb[1].mxu0  ;;  %8925 = vmatprep.subr.bf16.mxu1 %v9856_v54 }
  0xf7   :  { %v8603_v62 = vadd.f32 %v8602_v60, %v8601_v58  ;;  %v8604_v63 = vpop.f32.mrb[2].mxu0  ;;  %v8623_v0 = vpop.f32.mrb[0].mxu1  ;;  %8904 = vmatpush3.bf16.msra.mxu0 %v9855_v53  ;;  %v9897_v60 = vld [vmem:[%s12637_s1 + $0x8f8] sm:$0xff]  }
  0xf8   :  { %v8605_v3 = vpop.f32.mrb[3].mxu0  ;;  %v8624_v4 = vpop.f32.mrb[1].mxu1  ;;  %8905 = vmatprep.subr.bf16.mxu0 %v9858_v57  ;;  %v9896_v57 = vld [vmem:[%s12637_s1 + $0x838] sm:$0xff]  }
  0xf9   :  { %v6111_v5 = vadd.f32 %v8603_v62, %v7906_v56  ;;  %v8625_v6 = vadd.f32 %v8624_v4, %v8623_v0  ;;  %8926 = vmatpush3.bf16.msra.mxu1 %v9857_v55  ;;  %v8626_v8 = vpop.f32.mrb[2].mxu1  ;;  %v11283_v62 = vrot.slane %v1599_v52, %v10458_v41  ;;  %v9899_v3 = vld [vmem:[%s12637_s1 + $0x940] sm:$0xff]   ;;  %v9931_v52 = vld [vmem:[%s12637_s1 + $0x9b8] sm:$0xff]  }
  0xfa   :  { %8927 = vmatprep.subr.bf16.mxu1 %v9860_v61  ;;  %v8627_v10 = vpop.f32.mrb[3].mxu1 }
  0xfb   :  { %v11177_v11 = vadd.f32 %v8625_v6, %v6111_v5  ;;  %8906 = vmatpush3.bf16.msra.mxu0 %v9859_v59  ;;  %v1614_v59 = vcombine.high %v1606_v51, %v1606_v51  ;;  %v1615_v4 = vcombine.high %v11283_v62, %v11283_v62  ;;  %v9900_v6 = vld [vmem:[%s12637_s1 + $0x900] sm:$0xff]  }
  0xfc   :  { %8907 = vmatprep.subr.bf16.mxu0 %v9862_v2  ;;  %v1622_v2 = vrot.slane %v1606_v51, %v10458_v41 }
  0xfd   :  { %8928 = vmatpush3.bf16.msra.mxu1 %v9861_v1  ;;  %v1636_v0 = vrot.slane %v1614_v59, %v10458_v41  ;;  %v9898_v1 = vld [vmem:[%s12637_s1 + $0x8b8] sm:$0xff]   ;;  %v1643_v8 = vrot.slane %v1615_v4, %v10458_v41  ;;  %v9936_v59 = vld [vmem:[%s12637_s1 + $0xa48] sm:$0xff]  }
  0xfe   :  { %8929 = vmatprep.subr.bf16.mxu1 %v9864_v9  ;;  %v9902_v9 = vld [vmem:[%s12637_s1 + $0x980] sm:$0xff]   ;;  %v1644_v10 = vcombine.high %v1622_v2, %v1622_v2  ;;  %v9945_v4 = vld [vmem:[%s12637_s1 + $0xa18] sm:$0xff]  }
  0xff   :  { %8908 = vmatpush3.bf16.msra.mxu0 %v9863_v7  ;;  %v1646_v5 = vcombine.high %v1636_v0, %v1636_v0  ;;  %v9901_v7 = vld [vmem:[%s12637_s1 + $0x9c0] sm:$0xff]  }
 0x100   :  { %8937 = vmatprep.subr.bf16.mxu0 %v9867_v14  ;;  %v9905_v14 = vld [vmem:[%s12637_s1 + $0x9c8] sm:$0xff]  }
 0x101   :  { %8930 = vmatpush3.bf16.msra.mxu1 %v9866_v12  ;;  %v9904_v12 = vld [vmem:[%s12637_s1 + $0x908] sm:$0xff]  }
 0x102   :  { %6669 = vmatmul.mubr.bf16.vlgmr.msra.gmra.mrb[28].mxu0 %v1580_v13  ;;  %8959 = vmatprep.subr.bf16.mxu1 %v9869_v16  ;;  %v1647_v13 = vcombine.high %v1643_v8, %v1643_v8  ;;  %v9907_v16 = vld [vmem:[%s12637_s1 + $0x950] sm:$0xff]  }
 0x103   :  { %8938 = vmatpush3.bf16.msra.mxu0 %v9868_v15  ;;  %6748 = vmatprep.mubr.bf16.mxu0 %v1636_v0  ;;  %v9906_v15 = vld [vmem:[%s12637_s1 + $0x988] sm:$0xff]   ;;  %v9941_v0 = vld [vmem:[%s12637_s1 + $0xa10] sm:$0xff]  }
 0x104   :  { %6709 = vmatmul.mubr.bf16.vlgmr.msra.gmra.mrb[28].mxu1 %v1596_v18  ;;  %8939 = vmatprep.subr.bf16.mxu0 %v9871_v19  ;;  %v9909_v18 = vld [vmem:[%s12637_s1 + $0x9d0] sm:$0xff]  }
 0x105   :  { %8960 = vmatpush3.bf16.msra.mxu1 %v9870_v17  ;;  %6788 = vmatprep.mubr.bf16.mxu1 %v1646_v5  ;;  %v9908_v17 = vld [vmem:[%s12637_s1 + $0x910] sm:$0xff]   ;;  %v9946_v5 = vld [vmem:[%s12637_s1 + $0xad8] sm:$0xff]  }
 0x106   :  { %8961 = vmatprep.subr.bf16.mxu1 %v9873_v21  ;;  %v9910_v19 = vld [vmem:[%s12637_s1 + $0x990] sm:$0xff]   ;;  %v9912_v21 = vld [vmem:[%s12637_s1 + $0x918] sm:$0xff]  }
 0x107   :  { %8940 = vmatpush3.bf16.msra.mxu0 %v9872_v20  ;;  %v9911_v20 = vld [vmem:[%s12637_s1 + $0x958] sm:$0xff]  }
 0x108   :  { %8941 = vmatprep.subr.bf16.mxu0 %v9875_v23  ;;  %v9914_v23 = vld [vmem:[%s12637_s1 + $0x998] sm:$0xff]  }
 0x109   :  { %8962 = vmatpush3.bf16.msra.mxu1 %v9874_v22  ;;  %v9913_v22 = vld [vmem:[%s12637_s1 + $0x9d8] sm:$0xff]  }
 0x10a   :  { %8963 = vmatprep.subr.bf16.mxu1 %v9877_v25  ;;  %v9916_v25 = vld [vmem:[%s12637_s1 + $0x920] sm:$0xff]  }
 0x10b   :  { %8942 = vmatpush3.bf16.msra.mxu0 %v9876_v24  ;;  %v9915_v24 = vld [vmem:[%s12637_s1 + $0x960] sm:$0xff]  }
 0x10c   :  { %8943 = vmatprep.subr.bf16.mxu0 %v9879_v27  ;;  %v9918_v27 = vld [vmem:[%s12637_s1 + $0x9a0] sm:$0xff]  }
 0x10d   :  { %8964 = vmatpush3.bf16.msra.mxu1 %v9878_v26  ;;  %v9917_v26 = vld [vmem:[%s12637_s1 + $0x9e0] sm:$0xff]  }
 0x10e   :  { %8965 = vmatprep.subr.bf16.mxu1 %v9881_v29  ;;  %v9920_v29 = vld [vmem:[%s12637_s1 + $0x928] sm:$0xff]  }
 0x10f   :  { %8944 = vmatpush3.bf16.msra.mxu0 %v9880_v28  ;;  %v9919_v28 = vld [vmem:[%s12637_s1 + $0x968] sm:$0xff]  }
 0x110   :  { %8945 = vmatprep.subr.bf16.mxu0 %v9883_v31  ;;  %v9922_v31 = vld [vmem:[%s12637_s1 + $0x9a8] sm:$0xff]  }
 0x111   :  { %8966 = vmatpush3.bf16.msra.mxu1 %v9882_v30  ;;  %v9921_v30 = vld [vmem:[%s12637_s1 + $0x9e8] sm:$0xff]  }
 0x112   :  { %8967 = vmatprep.subr.bf16.mxu1 %v9885_v33 }
 0x113   :  { %8946 = vmatpush3.bf16.msra.mxu0 %v9884_v32  ;;  %v9923_v32 = vld [vmem:[%s12637_s1 + $0x970] sm:$0xff]  }
 0x114   :  { %8947 = vmatprep.subr.bf16.mxu0 %v9887_v35 }
 0x115   :  { %v8645_v40 = vpop.f32.mrb[4].mxu0  ;;  %8968 = vmatpush3.bf16.msra.mxu1 %v9886_v34  ;;  %v9924_v34 = vld [vmem:[%s12637_s1 + $0x930] sm:$0xff]  }
 0x116   :  { %v8646_v44 = vpop.f32.mrb[5].mxu0  ;;  %8969 = vmatprep.subr.bf16.mxu1 %v9889_v37 }
 0x117   :  { %v8647_v46 = vadd.f32 %v8646_v44, %v8645_v40  ;;  %v8648_v47 = vpop.f32.mrb[6].mxu0  ;;  %v8667_v48 = vpop.f32.mrb[4].mxu1  ;;  %8948 = vmatpush3.bf16.msra.mxu0 %v9888_v36  ;;  %v9925_v36 = vld [vmem:[%s12637_s1 + $0x9f0] sm:$0xff]  }
 0x118   :  { %v8649_v53 = vpop.f32.mrb[7].mxu0  ;;  %v8668_v54 = vpop.f32.mrb[5].mxu1  ;;  %8949 = vmatprep.subr.bf16.mxu0 %v9891_v39  ;;  %v9926_v40 = vld [vmem:[%s12637_s1 + $0x9b0] sm:$0xff]   ;;  %v9928_v47 = vld [vmem:[%s12637_s1 + $0x938] sm:$0xff]  }
 0x119   :  { %v6191_v55 = vadd.f32 %v8647_v46, %v11177_v11  ;;  %v8669_v56 = vadd.f32 %v8668_v54, %v8667_v48  ;;  %8970 = vmatpush3.bf16.msra.mxu1 %v9890_v38  ;;  %v8670_v58 = vpop.f32.mrb[6].mxu1  ;;  %v9903_v11 = vld [vmem:[%s12637_s1 + $0x948] sm:$0xff]   ;;  %v1629_v53 = vrot.slane %v11283_v62, %v10458_v41  ;;  %v9932_v54 = vld [vmem:[%s12637_s1 + $0xa40] sm:$0xff]  }
 0x11a   :  { %8971 = vmatprep.subr.bf16.mxu1 %v9893_v43  ;;  %v8671_v61 = vpop.f32.mrb[7].mxu1  ;;  %v9939_v62 = vld [vmem:[%s12637_s1 + $0xa88] sm:$0xff]  }
 0x11b   :  { %v11285_v63 = vadd.f32 %v8669_v56, %v6191_v55  ;;  %8950 = vmatpush3.bf16.msra.mxu0 %v9892_v42  ;;  %v9927_v42 = vld [vmem:[%s12637_s1 + $0x978] sm:$0xff]   ;;  %v9933_v55 = vld [vmem:[%s12637_s1 + $0xa00] sm:$0xff]   ;;  %v1645_v58 = vcombine.high %v1629_v53, %v1629_v53  ;;  %v9938_v61 = vld [vmem:[%s12637_s1 + $0xac8] sm:$0xff]  }
 0x11c   :  { %8951 = vmatprep.subr.bf16.mxu0 %v9895_v50  ;;  %v9934_v56 = vld [vmem:[%s12637_s1 + $0xac0] sm:$0xff]  }
 0x11d   :  { %8972 = vmatpush3.bf16.msra.mxu1 %v9894_v49  ;;  %v9929_v49 = vld [vmem:[%s12637_s1 + $0x9f8] sm:$0xff]  }
 0x11e   :  { %8973 = vmatprep.subr.bf16.mxu1 %v9897_v60  ;;  %v9937_v60 = vld [vmem:[%s12637_s1 + $0xa08] sm:$0xff]  }
 0x11f   :  { %8952 = vmatpush3.bf16.msra.mxu0 %v9896_v57  ;;  %v9935_v57 = vld [vmem:[%s12637_s1 + $0xa80] sm:$0xff]  }
 0x120   :  { %8981 = vmatprep.subr.bf16.mxu0 %v9899_v3  ;;  %v9944_v3 = vld [vmem:[%s12637_s1 + $0xa58] sm:$0xff]  }
 0x121   :  { %8974 = vmatpush3.bf16.msra.mxu1 %v9898_v1  ;;  %v9942_v1 = vld [vmem:[%s12637_s1 + $0xad0] sm:$0xff]  }
 0x122   :  { %6749 = vmatmul.mubr.bf16.vlgmr.msra.gmra.mrb[32].mxu0 %v1622_v2  ;;  %9003 = vmatprep.subr.bf16.mxu1 %v9901_v7  ;;  %v9943_v2 = vld [vmem:[%s12637_s1 + $0xa90] sm:$0xff]   ;;  %v9948_v7 = vld [vmem:[%s12637_s1 + $0xa60] sm:$0xff]  }
 0x123   :  { %8982 = vmatpush3.bf16.msra.mxu0 %v9900_v6  ;;  %6828 = vmatprep.mubr.bf16.mxu0 %v1643_v8  ;;  %v9947_v6 = vld [vmem:[%s12637_s1 + $0xa98] sm:$0xff]   ;;  %v9949_v8 = vld [vmem:[%s12637_s1 + $0xa20] sm:$0xff]  }
 0x124   :  { %6789 = vmatmul.mubr.bf16.vlgmr.msra.gmra.mrb[32].mxu1 %v1644_v10  ;;  %8983 = vmatprep.subr.bf16.mxu0 %v9903_v11  ;;  %v9951_v10 = vld [vmem:[%s12637_s1 + $0xaa0] sm:$0xff]   ;;  %v9952_v11 = vld [vmem:[%s12637_s1 + $0xa68] sm:$0xff]  }
 0x125   :  { %9004 = vmatpush3.bf16.msra.mxu1 %v9902_v9  ;;  %6868 = vmatprep.mubr.bf16.mxu1 %v1647_v13  ;;  %v9950_v9 = vld [vmem:[%s12637_s1 + $0xae0] sm:$0xff]   ;;  %v9954_v13 = vld [vmem:[%s12637_s1 + $0xae8] sm:$0xff]  }
 0x126   :  { %9005 = vmatprep.subr.bf16.mxu1 %v9905_v14  ;;  %v9955_v14 = vld [vmem:[%s12637_s1 + $0xaa8] sm:$0xff]  }
 0x127   :  { %8984 = vmatpush3.bf16.msra.mxu0 %v9904_v12  ;;  %v9953_v12 = vld [vmem:[%s12637_s1 + $0xa28] sm:$0xff]  }
 0x128   :  { %8985 = vmatprep.subr.bf16.mxu0 %v9907_v16 }
 0x129   :  { %9006 = vmatpush3.bf16.msra.mxu1 %v9906_v15  ;;  %v9956_v15 = vld [vmem:[%s12637_s1 + $0xa70] sm:$0xff]  }
 0x12a   :  { %9007 = vmatprep.subr.bf16.mxu1 %v9909_v18 }
 0x12b   :  { %8986 = vmatpush3.bf16.msra.mxu0 %v9908_v17  ;;  %v9957_v17 = vld [vmem:[%s12637_s1 + $0xa30] sm:$0xff]  }
 0x12c   :  { %8987 = vmatprep.subr.bf16.mxu0 %v9911_v20 }
 0x12d   :  { %9008 = vmatpush3.bf16.msra.mxu1 %v9910_v19  ;;  %v9958_v19 = vld [vmem:[%s12637_s1 + $0xaf0] sm:$0xff]  }
 0x12e   :  { %9009 = vmatprep.subr.bf16.mxu1 %v9913_v22 }
 0x12f   :  { %8988 = vmatpush3.bf16.msra.mxu0 %v9912_v21 }
 0x130   :  { %8989 = vmatprep.subr.bf16.mxu0 %v9915_v24  ;;  %v9960_v24 = vld [vmem:[%s12637_s1 + $0xa78] sm:$0xff]  }
 0x131   :  { %9010 = vmatpush3.bf16.msra.mxu1 %v9914_v23  ;;  %v9959_v23 = vld [vmem:[%s12637_s1 + $0xab0] sm:$0xff]  }
 0x132   :  { %9011 = vmatprep.subr.bf16.mxu1 %v9917_v26 }
 0x133   :  { %8990 = vmatpush3.bf16.msra.mxu0 %v9916_v25  ;;  %v27_v25 = vld [vmem:[%s12636_s0 + $0x28] sm:$0xff] }
 0x134   :  { %8991 = vmatprep.subr.bf16.mxu0 %v9919_v28  ;;  %v1655_v28 = vrot.slane %v27_v25, %v10458_v41 }
 0x135   :  { %v8689_v33 = vpop.f32.mrb[8].mxu0  ;;  %9012 = vmatpush3.bf16.msra.mxu1 %v9918_v27 }
 0x136   :  { %v8690_v35 = vpop.f32.mrb[9].mxu0  ;;  %9013 = vmatprep.subr.bf16.mxu1 %v9921_v30 }
 0x137   :  { %v8691_v37 = vadd.f32 %v8690_v35, %v8689_v33  ;;  %v8692_v38 = vpop.f32.mrb[10].mxu0  ;;  %v8711_v39 = vpop.f32.mrb[8].mxu1  ;;  %8992 = vmatpush3.bf16.msra.mxu0 %v9920_v29  ;;  %v1648_v29 = vcombine.high %v27_v25, %v27_v25 }
 0x138   :  { %v8693_v43 = vpop.f32.mrb[11].mxu0  ;;  %v8712_v44 = vpop.f32.mrb[9].mxu1  ;;  %8993 = vmatprep.subr.bf16.mxu0 %v9923_v32  ;;  %v9961_v32 = vld [vmem:[%s12637_s1 + $0xa38] sm:$0xff]  }
 0x139   :  { %v6271_v45 = vadd.f32 %v8691_v37, %v11285_v63  ;;  %v8713_v46 = vadd.f32 %v8712_v44, %v8711_v39  ;;  %9014 = vmatpush3.bf16.msra.mxu1 %v9922_v31  ;;  %v8714_v48 = vpop.f32.mrb[10].mxu1  ;;  %v9940_v63 = vld [vmem:[%s12637_s1 + $0xa50] sm:$0xff]   ;;  %v11495_v37 = vrot.slane %v1648_v29, %v10458_v41  ;;  %v9963_v39 = vld [vmem:[%s12637_s1 + $0xab8] sm:$0xff]   ;;  %v9964_v43 = vld [vmem:[%s12637_s1 + $0xb40] sm:$0xff]  }
 0x13a   :  { %9015 = vmatprep.subr.bf16.mxu1 %v9925_v36  ;;  %v8715_v50 = vpop.f32.mrb[11].mxu1  ;;  %v1663_v36 = vcombine.high %v1655_v28, %v1655_v28  ;;  %v9997_v29 = vld [vmem:[%s12637_s1 + $0xc40] sm:$0xff]  }
 0x13b   :  { %v11389_v51 = vadd.f32 %v8713_v46, %v6271_v45  ;;  %8994 = vmatpush3.bf16.msra.mxu0 %v9924_v34  ;;  %v9962_v34 = vld [vmem:[%s12637_s1 + $0xaf8] sm:$0xff]   ;;  %v1664_v44 = vcombine.high %v11495_v37, %v11495_v37  ;;  %v9965_v45 = vld [vmem:[%s12637_s1 + $0xb00] sm:$0xff]  }
 0x13c   :  { %8995 = vmatprep.subr.bf16.mxu0 %v9927_v42  ;;  %v1671_v42 = vrot.slane %v1655_v28, %v10458_v41  ;;  %v1678_v28 = vrot.slane %v11495_v37, %v10458_v41  ;;  %v10004_v37 = vld [vmem:[%s12637_s1 + $0xc88] sm:$0xff]  }
 0x13d   :  { %9016 = vmatpush3.bf16.msra.mxu1 %v9926_v40  ;;  %v1685_v40 = vrot.slane %v1663_v36, %v10458_v41  ;;  %v1692_v48 = vrot.slane %v1664_v44, %v10458_v41  ;;  %v10003_v36 = vld [vmem:[%s12637_s1 + $0xcc8] sm:$0xff]   ;;  %v10010_v44 = vld [vmem:[%s12637_s1 + $0xc18] sm:$0xff]  }
 0x13e   :  { %9017 = vmatprep.subr.bf16.mxu1 %v9929_v49  ;;  %v9967_v49 = vld [vmem:[%s12637_s1 + $0xb80] sm:$0xff]   ;;  %v1693_v50 = vcombine.high %v1671_v42, %v1671_v42 }
 0x13f   :  { %8996 = vmatpush3.bf16.msra.mxu0 %v9928_v47  ;;  %v1695_v46 = vcombine.high %v1685_v40, %v1685_v40  ;;  %v9966_v47 = vld [vmem:[%s12637_s1 + $0xbc0] sm:$0xff]  }
 0x140   :  { %9025 = vmatprep.subr.bf16.mxu0 %v9932_v54  ;;  %v9970_v54 = vld [vmem:[%s12637_s1 + $0xbc8] sm:$0xff]  }
 0x141   :  { %9018 = vmatpush3.bf16.msra.mxu1 %v9931_v52  ;;  %v9969_v52 = vld [vmem:[%s12637_s1 + $0xb08] sm:$0xff]  }
 0x142   :  { %6829 = vmatmul.mubr.bf16.vlgmr.msra.gmra.mrb[36].mxu0 %v1629_v53  ;;  %9047 = vmatprep.subr.bf16.mxu1 %v9934_v56  ;;  %v1696_v53 = vcombine.high %v1692_v48, %v1692_v48  ;;  %v9972_v56 = vld [vmem:[%s12637_s1 + $0xb50] sm:$0xff]  }
 0x143   :  { %9026 = vmatpush3.bf16.msra.mxu0 %v9933_v55  ;;  %6908 = vmatprep.mubr.bf16.mxu0 %v1685_v40  ;;  %v9971_v55 = vld [vmem:[%s12637_s1 + $0xb88] sm:$0xff]   ;;  %v10007_v40 = vld [vmem:[%s12637_s1 + $0xcd0] sm:$0xff]  }
 0x144   :  { %6869 = vmatmul.mubr.bf16.vlgmr.msra.gmra.mrb[36].mxu1 %v1645_v58  ;;  %9027 = vmatprep.subr.bf16.mxu0 %v9936_v59  ;;  %v9974_v58 = vld [vmem:[%s12637_s1 + $0xbd0] sm:$0xff]  }
 0x145   :  { %9048 = vmatpush3.bf16.msra.mxu1 %v9935_v57  ;;  %6948 = vmatprep.mubr.bf16.mxu1 %v1695_v46  ;;  %v9973_v57 = vld [vmem:[%s12637_s1 + $0xb10] sm:$0xff]   ;;  %v10012_v46 = vld [vmem:[%s12637_s1 + $0xc98] sm:$0xff]  }
 0x146   :  { %9049 = vmatprep.subr.bf16.mxu1 %v9938_v61  ;;  %v9975_v59 = vld [vmem:[%s12637_s1 + $0xb90] sm:$0xff]   ;;  %v9977_v61 = vld [vmem:[%s12637_s1 + $0xb18] sm:$0xff]  }
 0x147   :  { %9028 = vmatpush3.bf16.msra.mxu0 %v9937_v60  ;;  %v9976_v60 = vld [vmem:[%s12637_s1 + $0xb58] sm:$0xff]  }
 0x148   :  { %9029 = vmatprep.subr.bf16.mxu0 %v9940_v63  ;;  %v9979_v63 = vld [vmem:[%s12637_s1 + $0xb98] sm:$0xff]  }
 0x149   :  { %9050 = vmatpush3.bf16.msra.mxu1 %v9939_v62  ;;  %v9978_v62 = vld [vmem:[%s12637_s1 + $0xbd8] sm:$0xff]  }
 0x14a   :  { %9051 = vmatprep.subr.bf16.mxu1 %v9942_v1  ;;  %v9981_v1 = vld [vmem:[%s12637_s1 + $0xb20] sm:$0xff]  }
 0x14b   :  { %9030 = vmatpush3.bf16.msra.mxu0 %v9941_v0  ;;  %v9980_v0 = vld [vmem:[%s12637_s1 + $0xb60] sm:$0xff]  }
 0x14c   :  { %9031 = vmatprep.subr.bf16.mxu0 %v9944_v3  ;;  %v9983_v3 = vld [vmem:[%s12637_s1 + $0xba0] sm:$0xff]  }
 0x14d   :  { %9052 = vmatpush3.bf16.msra.mxu1 %v9943_v2  ;;  %v9982_v2 = vld [vmem:[%s12637_s1 + $0xbe0] sm:$0xff]  }
 0x14e   :  { %9053 = vmatprep.subr.bf16.mxu1 %v9946_v5  ;;  %v9985_v5 = vld [vmem:[%s12637_s1 + $0xb28] sm:$0xff]  }
 0x14f   :  { %9032 = vmatpush3.bf16.msra.mxu0 %v9945_v4  ;;  %v9984_v4 = vld [vmem:[%s12637_s1 + $0xb68] sm:$0xff]  }
 0x150   :  { %9033 = vmatprep.subr.bf16.mxu0 %v9948_v7  ;;  %v9987_v7 = vld [vmem:[%s12637_s1 + $0xba8] sm:$0xff]  }
 0x151   :  { %9054 = vmatpush3.bf16.msra.mxu1 %v9947_v6  ;;  %v9986_v6 = vld [vmem:[%s12637_s1 + $0xbe8] sm:$0xff]  }
 0x152   :  { %9055 = vmatprep.subr.bf16.mxu1 %v9950_v9 }
 0x153   :  { %9034 = vmatpush3.bf16.msra.mxu0 %v9949_v8  ;;  %v9988_v8 = vld [vmem:[%s12637_s1 + $0xb70] sm:$0xff]  }
 0x154   :  { %9035 = vmatprep.subr.bf16.mxu0 %v9952_v11 }
 0x155   :  { %v8733_v16 = vpop.f32.mrb[12].mxu0  ;;  %9056 = vmatpush3.bf16.msra.mxu1 %v9951_v10  ;;  %v9989_v10 = vld [vmem:[%s12637_s1 + $0xb30] sm:$0xff]  }
 0x156   :  { %v8734_v18 = vpop.f32.mrb[13].mxu0  ;;  %9057 = vmatprep.subr.bf16.mxu1 %v9954_v13 }
 0x157   :  { %v8735_v20 = vadd.f32 %v8734_v18, %v8733_v16  ;;  %v8736_v21 = vpop.f32.mrb[14].mxu0  ;;  %v8755_v22 = vpop.f32.mrb[12].mxu1  ;;  %9036 = vmatpush3.bf16.msra.mxu0 %v9953_v12  ;;  %v9990_v12 = vld [vmem:[%s12637_s1 + $0xbf0] sm:$0xff]  }
 0x158   :  { %v8737_v26 = vpop.f32.mrb[15].mxu0  ;;  %v8756_v27 = vpop.f32.mrb[13].mxu1  ;;  %9037 = vmatprep.subr.bf16.mxu0 %v9956_v15  ;;  %v9991_v16 = vld [vmem:[%s12637_s1 + $0xbb0] sm:$0xff]  }
 0x159   :  { %v6351_v30 = vadd.f32 %v8735_v20, %v11389_v51  ;;  %v8757_v31 = vadd.f32 %v8756_v27, %v8755_v22  ;;  %9058 = vmatpush3.bf16.msra.mxu1 %v9955_v14  ;;  %v8758_v33 = vpop.f32.mrb[14].mxu1  ;;  %v9968_v51 = vld [vmem:[%s12637_s1 + $0xb48] sm:$0xff]   ;;  %v9993_v22 = vld [vmem:[%s12637_s1 + $0xb38] sm:$0xff]  }
 0x15a   :  { %9059 = vmatprep.subr.bf16.mxu1 %v9958_v19  ;;  %v8759_v35 = vpop.f32.mrb[15].mxu1  ;;  %v9996_v27 = vld [vmem:[%s12637_s1 + $0xbb8] sm:$0xff]   ;;  %v1694_v33 = vcombine.high %v1678_v28, %v1678_v28 }
 0x15b   :  { %v11497_v38 = vadd.f32 %v8757_v31, %v6351_v30  ;;  %9038 = vmatpush3.bf16.msra.mxu0 %v9957_v17  ;;  %v9992_v17 = vld [vmem:[%s12637_s1 + $0xb78] sm:$0xff]   ;;  %v9998_v30 = vld [vmem:[%s12637_s1 + $0xc00] sm:$0xff]   ;;  %v10002_v35 = vld [vmem:[%s12637_s1 + $0xc08] sm:$0xff]  }
 0x15c   :  { %9039 = vmatprep.subr.bf16.mxu0 %v9960_v24  ;;  %v9994_v24 = vld [vmem:[%s12637_s1 + $0xbf8] sm:$0xff]   ;;  %v9999_v31 = vld [vmem:[%s12637_s1 + $0xcc0] sm:$0xff]  }
 0x15d   :  { %9060 = vmatpush3.bf16.msra.mxu1 %v9959_v23 }
 0x15e   :  { %9061 = vmatprep.subr.bf16.mxu1 %v9962_v34  ;;  %v10001_v34 = vld [vmem:[%s12637_s1 + $0xc48] sm:$0xff]  }
 0x15f   :  { %9040 = vmatpush3.bf16.msra.mxu0 %v9961_v32  ;;  %v10000_v32 = vld [vmem:[%s12637_s1 + $0xc80] sm:$0xff]  }
 0x160   :  { %9069 = vmatprep.subr.bf16.mxu0 %v9964_v43  ;;  %v10009_v43 = vld [vmem:[%s12637_s1 + $0xc58] sm:$0xff]  }
 0x161   :  { %9062 = vmatpush3.bf16.msra.mxu1 %v9963_v39  ;;  %v10006_v39 = vld [vmem:[%s12637_s1 + $0xc10] sm:$0xff]  }
 0x162   :  { %6909 = vmatmul.mubr.bf16.vlgmr.msra.gmra.mrb[40].mxu0 %v1671_v42  ;;  %9091 = vmatprep.subr.bf16.mxu1 %v9966_v47  ;;  %v10008_v42 = vld [vmem:[%s12637_s1 + $0xc90] sm:$0xff]   ;;  %v10013_v47 = vld [vmem:[%s12637_s1 + $0xc60] sm:$0xff]  }
 0x163   :  { %9070 = vmatpush3.bf16.msra.mxu0 %v9965_v45  ;;  %6988 = vmatprep.mubr.bf16.mxu0 %v1692_v48  ;;  %v10011_v45 = vld [vmem:[%s12637_s1 + $0xcd8] sm:$0xff]   ;;  %v10014_v48 = vld [vmem:[%s12637_s1 + $0xc20] sm:$0xff]  }
 0x164   :  { %6949 = vmatmul.mubr.bf16.vlgmr.msra.gmra.mrb[40].mxu1 %v1693_v50  ;;  %9071 = vmatprep.subr.bf16.mxu0 %v9968_v51  ;;  %v10016_v50 = vld [vmem:[%s12637_s1 + $0xca0] sm:$0xff]   ;;  %v10017_v51 = vld [vmem:[%s12637_s1 + $0xc68] sm:$0xff]  }
 0x165   :  { %9092 = vmatpush3.bf16.msra.mxu1 %v9967_v49  ;;  %7028 = vmatprep.mubr.bf16.mxu1 %v1696_v53  ;;  %v10015_v49 = vld [vmem:[%s12637_s1 + $0xce0] sm:$0xff]   ;;  %v10019_v53 = vld [vmem:[%s12637_s1 + $0xce8] sm:$0xff]  }
 0x166   :  { %9093 = vmatprep.subr.bf16.mxu1 %v9970_v54  ;;  %v10020_v54 = vld [vmem:[%s12637_s1 + $0xca8] sm:$0xff]  }
 0x167   :  { %9072 = vmatpush3.bf16.msra.mxu0 %v9969_v52  ;;  %v10018_v52 = vld [vmem:[%s12637_s1 + $0xc28] sm:$0xff]  }
 0x168   :  { %9073 = vmatprep.subr.bf16.mxu0 %v9972_v56 }
 0x169   :  { %9094 = vmatpush3.bf16.msra.mxu1 %v9971_v55  ;;  %v10021_v55 = vld [vmem:[%s12637_s1 + $0xc70] sm:$0xff]  }
 0x16a   :  { %9095 = vmatprep.subr.bf16.mxu1 %v9974_v58 }
 0x16b   :  { %9074 = vmatpush3.bf16.msra.mxu0 %v9973_v57  ;;  %v10022_v57 = vld [vmem:[%s12637_s1 + $0xc30] sm:$0xff]  }
 0x16c   :  { %9075 = vmatprep.subr.bf16.mxu0 %v9976_v60 }
 0x16d   :  { %9096 = vmatpush3.bf16.msra.mxu1 %v9975_v59  ;;  %v10023_v59 = vld [vmem:[%s12637_s1 + $0xcf0] sm:$0xff]  }
 0x16e   :  { %9097 = vmatprep.subr.bf16.mxu1 %v9978_v62 }
 0x16f   :  { %9076 = vmatpush3.bf16.msra.mxu0 %v9977_v61 }
 0x170   :  { %9077 = vmatprep.subr.bf16.mxu0 %v9980_v0 }
 0x171   :  { %9098 = vmatpush3.bf16.msra.mxu1 %v9979_v63  ;;  %v10024_v63 = vld [vmem:[%s12637_s1 + $0xcb0] sm:$0xff]  }
 0x172   :  { %9099 = vmatprep.subr.bf16.mxu1 %v9982_v2  ;;  %v10025_v2 = vld [vmem:[%s12637_s1 + $0xc78] sm:$0xff]  }
 0x173   :  { %9078 = vmatpush3.bf16.msra.mxu0 %v9981_v1 }
 0x174   :  { %9079 = vmatprep.subr.bf16.mxu0 %v9984_v4 }
 0x175   :  { %v8777_v9 = vpop.f32.mrb[16].mxu0  ;;  %9100 = vmatpush3.bf16.msra.mxu1 %v9983_v3  ;;  %v28_v3 = vld [vmem:[%s12636_s0 + $0x30] sm:$0xff] }
 0x176   :  { %v8778_v11 = vpop.f32.mrb[17].mxu0  ;;  %9101 = vmatprep.subr.bf16.mxu1 %v9986_v6  ;;  %v10026_v6 = vld [vmem:[%s12637_s1 + $0xc38] sm:$0xff]  }
 0x177   :  { %v8779_v13 = vadd.f32 %v8778_v11, %v8777_v9  ;;  %v8780_v14 = vpop.f32.mrb[18].mxu0  ;;  %v8799_v15 = vpop.f32.mrb[16].mxu1  ;;  %9080 = vmatpush3.bf16.msra.mxu0 %v9985_v5  ;;  %v1697_v9 = vcombine.high %v28_v3, %v28_v3 }
 0x178   :  { %v8781_v18 = vpop.f32.mrb[19].mxu0  ;;  %v8800_v19 = vpop.f32.mrb[17].mxu1  ;;  %9081 = vmatprep.subr.bf16.mxu0 %v9988_v8  ;;  %v1704_v8 = vrot.slane %v28_v3, %v10458_v41  ;;  %v10028_v14 = vld [vmem:[%s12637_s1 + $0xcb8] sm:$0xff]  }
 0x179   :  { %v6431_v20 = vadd.f32 %v8779_v13, %v11497_v38  ;;  %v8801_v21 = vadd.f32 %v8800_v19, %v8799_v15  ;;  %9102 = vmatpush3.bf16.msra.mxu1 %v9987_v7  ;;  %v8802_v23 = vpop.f32.mrb[18].mxu1  ;;  %v10005_v38 = vld [vmem:[%s12637_s1 + $0xc50] sm:$0xff]   ;;  %v11712_v15 = vrot.slane %v1697_v9, %v10458_v41  ;;  %v10030_v19 = vld [vmem:[%s12637_s1 + $0xd00] sm:$0xff]   ;;  %v10061_v3 = vld [vmem:[%s12637_s1 + $0xdb8] sm:$0xff]  }
 0x17a   :  { %9103 = vmatprep.subr.bf16.mxu1 %v9990_v12  ;;  %v8803_v25 = vpop.f32.mrb[19].mxu1  ;;  %v1712_v13 = vcombine.high %v1704_v8, %v1704_v8  ;;  %v10032_v23 = vld [vmem:[%s12637_s1 + $0xd80] sm:$0xff]  }
 0x17b   :  { %v11601_v26 = vadd.f32 %v8801_v21, %v6431_v20  ;;  %9082 = vmatpush3.bf16.msra.mxu0 %v9989_v10  ;;  %v10027_v10 = vld [vmem:[%s12637_s1 + $0xcf8] sm:$0xff]   ;;  %v1713_v20 = vcombine.high %v11712_v15, %v11712_v15  ;;  %v10031_v21 = vld [vmem:[%s12637_s1 + $0xdc0] sm:$0xff]  }
 0x17c   :  { %9083 = vmatprep.subr.bf16.mxu0 %v9992_v17  ;;  %v10029_v17 = vld [vmem:[%s12637_s1 + $0xd40] sm:$0xff]   ;;  %v1734_v18 = vrot.slane %v1712_v13, %v10458_v41  ;;  %v10069_v13 = vld [vmem:[%s12637_s1 + $0xe88] sm:$0xff]  }
 0x17d   :  { %9104 = vmatpush3.bf16.msra.mxu1 %v9991_v16  ;;  %v1720_v16 = vrot.slane %v1704_v8, %v10458_v41  ;;  %v10065_v8 = vld [vmem:[%s12637_s1 + $0xe80] sm:$0xff]  }
 0x17e   :  { %9105 = vmatprep.subr.bf16.mxu1 %v9994_v24  ;;  %v1741_v24 = vrot.slane %v1713_v20, %v10458_v41  ;;  %v10076_v20 = vld [vmem:[%s12637_s1 + $0xed8] sm:$0xff]  }
 0x17f   :  { %9084 = vmatpush3.bf16.msra.mxu0 %v9993_v22  ;;  %v1744_v22 = vcombine.high %v1734_v18, %v1734_v18  ;;  %v1742_v25 = vcombine.high %v1720_v16, %v1720_v16 }
 0x180   :  { %9113 = vmatprep.subr.bf16.mxu0 %v9997_v29  ;;  %v10035_v29 = vld [vmem:[%s12637_s1 + $0xdc8] sm:$0xff]  }
 0x181   :  { %9106 = vmatpush3.bf16.msra.mxu1 %v9996_v27  ;;  %v10034_v27 = vld [vmem:[%s12637_s1 + $0xd08] sm:$0xff]  }
 0x182   :  { %6989 = vmatmul.mubr.bf16.vlgmr.msra.gmra.mrb[44].mxu0 %v1678_v28  ;;  %9135 = vmatprep.subr.bf16.mxu1 %v9999_v31  ;;  %v1745_v28 = vcombine.high %v1741_v24, %v1741_v24  ;;  %v10037_v31 = vld [vmem:[%s12637_s1 + $0xd50] sm:$0xff]  }
 0x183   :  { %9114 = vmatpush3.bf16.msra.mxu0 %v9998_v30  ;;  %7068 = vmatprep.mubr.bf16.mxu0 %v1734_v18  ;;  %v10036_v30 = vld [vmem:[%s12637_s1 + $0xd88] sm:$0xff]   ;;  %v10074_v18 = vld [vmem:[%s12637_s1 + $0xe58] sm:$0xff]  }
 0x184   :  { %7029 = vmatmul.mubr.bf16.vlgmr.msra.gmra.mrb[44].mxu1 %v1694_v33  ;;  %9115 = vmatprep.subr.bf16.mxu0 %v10001_v34  ;;  %v10039_v33 = vld [vmem:[%s12637_s1 + $0xdd0] sm:$0xff]  }
 0x185   :  { %9136 = vmatpush3.bf16.msra.mxu1 %v10000_v32  ;;  %7108 = vmatprep.mubr.bf16.mxu1 %v1744_v22  ;;  %v10038_v32 = vld [vmem:[%s12637_s1 + $0xd10] sm:$0xff]   ;;  %v10078_v22 = vld [vmem:[%s12637_s1 + $0xe60] sm:$0xff]  }
 0x186   :  { %9137 = vmatprep.subr.bf16.mxu1 %v10003_v36  ;;  %v10040_v34 = vld [vmem:[%s12637_s1 + $0xd90] sm:$0xff]   ;;  %v10042_v36 = vld [vmem:[%s12637_s1 + $0xd18] sm:$0xff]  }
 0x187   :  { %9116 = vmatpush3.bf16.msra.mxu0 %v10002_v35  ;;  %v10041_v35 = vld [vmem:[%s12637_s1 + $0xd58] sm:$0xff]  }
 0x188   :  { %9117 = vmatprep.subr.bf16.mxu0 %v10005_v38  ;;  %v10044_v38 = vld [vmem:[%s12637_s1 + $0xd98] sm:$0xff]  }
 0x189   :  { %9138 = vmatpush3.bf16.msra.mxu1 %v10004_v37  ;;  %v10043_v37 = vld [vmem:[%s12637_s1 + $0xdd8] sm:$0xff]  }
 0x18a   :  { %9139 = vmatprep.subr.bf16.mxu1 %v10007_v40  ;;  %v10046_v40 = vld [vmem:[%s12637_s1 + $0xd20] sm:$0xff]  }
 0x18b   :  { %9118 = vmatpush3.bf16.msra.mxu0 %v10006_v39  ;;  %v10045_v39 = vld [vmem:[%s12637_s1 + $0xd60] sm:$0xff]  }
 0x18c   :  { %9119 = vmatprep.subr.bf16.mxu0 %v10009_v43  ;;  %v10048_v43 = vld [vmem:[%s12637_s1 + $0xda0] sm:$0xff]  }
 0x18d   :  { %9140 = vmatpush3.bf16.msra.mxu1 %v10008_v42  ;;  %v10047_v42 = vld [vmem:[%s12637_s1 + $0xde0] sm:$0xff]  }
 0x18e   :  { %9141 = vmatprep.subr.bf16.mxu1 %v10011_v45  ;;  %v10050_v45 = vld [vmem:[%s12637_s1 + $0xd28] sm:$0xff]  }
 0x18f   :  { %9120 = vmatpush3.bf16.msra.mxu0 %v10010_v44  ;;  %v10049_v44 = vld [vmem:[%s12637_s1 + $0xd68] sm:$0xff]  }
 0x190   :  { %9121 = vmatprep.subr.bf16.mxu0 %v10013_v47  ;;  %v10052_v47 = vld [vmem:[%s12637_s1 + $0xda8] sm:$0xff]  }
 0x191   :  { %9142 = vmatpush3.bf16.msra.mxu1 %v10012_v46  ;;  %v10051_v46 = vld [vmem:[%s12637_s1 + $0xde8] sm:$0xff]  }
 0x192   :  { %9143 = vmatprep.subr.bf16.mxu1 %v10015_v49 }
 0x193   :  { %9122 = vmatpush3.bf16.msra.mxu0 %v10014_v48  ;;  %v10053_v48 = vld [vmem:[%s12637_s1 + $0xd70] sm:$0xff]  }
 0x194   :  { %9123 = vmatprep.subr.bf16.mxu0 %v10017_v51 }
 0x195   :  { %v8821_v56 = vpop.f32.mrb[20].mxu0  ;;  %9144 = vmatpush3.bf16.msra.mxu1 %v10016_v50  ;;  %v10054_v50 = vld [vmem:[%s12637_s1 + $0xd30] sm:$0xff]  }
 0x196   :  { %v8822_v58 = vpop.f32.mrb[21].mxu0  ;;  %9145 = vmatprep.subr.bf16.mxu1 %v10019_v53 }
 0x197   :  { %v8823_v60 = vadd.f32 %v8822_v58, %v8821_v56  ;;  %v8824_v61 = vpop.f32.mrb[22].mxu0  ;;  %v8843_v62 = vpop.f32.mrb[20].mxu1  ;;  %9124 = vmatpush3.bf16.msra.mxu0 %v10018_v52  ;;  %v10055_v52 = vld [vmem:[%s12637_s1 + $0xdf0] sm:$0xff]  }
 0x198   :  { %v8825_v0 = vpop.f32.mrb[23].mxu0  ;;  %v8844_v1 = vpop.f32.mrb[21].mxu1  ;;  %9125 = vmatprep.subr.bf16.mxu0 %v10021_v55  ;;  %v10056_v56 = vld [vmem:[%s12637_s1 + $0xdb0] sm:$0xff]  }
 0x199   :  { %v6511_v4 = vadd.f32 %v8823_v60, %v11601_v26  ;;  %v8845_v5 = vadd.f32 %v8844_v1, %v8843_v62  ;;  %9146 = vmatpush3.bf16.msra.mxu1 %v10020_v54  ;;  %v8846_v7 = vpop.f32.mrb[22].mxu1  ;;  %v10033_v26 = vld [vmem:[%s12637_s1 + $0xd48] sm:$0xff]   ;;  %v10058_v62 = vld [vmem:[%s12637_s1 + $0xd38] sm:$0xff]  }
 0x19a   :  { %9147 = vmatprep.subr.bf16.mxu1 %v10023_v59  ;;  %v8847_v11 = vpop.f32.mrb[23].mxu1  ;;  %v10059_v0 = vld [vmem:[%s12637_s1 + $0xdf8] sm:$0xff]   ;;  %v10064_v7 = vld [vmem:[%s12637_s1 + $0xec0] sm:$0xff]  }
 0x19b   :  { %v11706_v12 = vadd.f32 %v8845_v5, %v6511_v4  ;;  %9126 = vmatpush3.bf16.msra.mxu0 %v10022_v57  ;;  %v10057_v57 = vld [vmem:[%s12637_s1 + $0xd78] sm:$0xff]   ;;  %v1727_v4 = vrot.slane %v11712_v15, %v10458_v41  ;;  %v10062_v5 = vld [vmem:[%s12637_s1 + $0xe40] sm:$0xff]   ;;  %v10067_v11 = vld [vmem:[%s12637_s1 + $0xe08] sm:$0xff]  }
 0x19c   :  { %9127 = vmatprep.subr.bf16.mxu0 %v10025_v2  ;;  %v10071_v15 = vld [vmem:[%s12637_s1 + $0xe10] sm:$0xff]  }
 0x19d   :  { %9148 = vmatpush3.bf16.msra.mxu1 %v10024_v63  ;;  %v1743_v9 = vcombine.high %v1727_v4, %v1727_v4 }
 0x19e   :  { %9149 = vmatprep.subr.bf16.mxu1 %v10027_v10  ;;  %v10066_v10 = vld [vmem:[%s12637_s1 + $0xe48] sm:$0xff]  }
 0x19f   :  { %9128 = vmatpush3.bf16.msra.mxu0 %v10026_v6  ;;  %v10063_v6 = vld [vmem:[%s12637_s1 + $0xe00] sm:$0xff]  }
 0x1a0   :  { %9157 = vmatprep.subr.bf16.mxu0 %v10029_v17  ;;  %v10073_v17 = vld [vmem:[%s12637_s1 + $0xe90] sm:$0xff]  }
 0x1a1   :  { %9150 = vmatpush3.bf16.msra.mxu1 %v10028_v14  ;;  %v10070_v14 = vld [vmem:[%s12637_s1 + $0xe50] sm:$0xff]  }
 0x1a2   :  { %7069 = vmatmul.mubr.bf16.vlgmr.msra.gmra.mrb[48].mxu0 %v1720_v16  ;;  %9179 = vmatprep.subr.bf16.mxu1 %v10031_v21  ;;  %v10072_v16 = vld [vmem:[%s12637_s1 + $0xed0] sm:$0xff]   ;;  %v10077_v21 = vld [vmem:[%s12637_s1 + $0xe98] sm:$0xff]  }
 0x1a3   :  { %9158 = vmatpush3.bf16.msra.mxu0 %v10030_v19  ;;  %7148 = vmatprep.mubr.bf16.mxu0 %v1741_v24  ;;  %v10075_v19 = vld [vmem:[%s12637_s1 + $0xe18] sm:$0xff]   ;;  %v10080_v24 = vld [vmem:[%s12637_s1 + $0xee0] sm:$0xff]  }
 0x1a4   :  { %7109 = vmatmul.mubr.bf16.vlgmr.msra.gmra.mrb[48].mxu1 %v1742_v25  ;;  %9159 = vmatprep.subr.bf16.mxu0 %v10033_v26  ;;  %v10081_v25 = vld [vmem:[%s12637_s1 + $0xea0] sm:$0xff]   ;;  %v10082_v26 = vld [vmem:[%s12637_s1 + $0xe68] sm:$0xff]  }
 0x1a5   :  { %9180 = vmatpush3.bf16.msra.mxu1 %v10032_v23  ;;  %7188 = vmatprep.mubr.bf16.mxu1 %v1745_v28  ;;  %v10079_v23 = vld [vmem:[%s12637_s1 + $0xe20] sm:$0xff]   ;;  %v10084_v28 = vld [vmem:[%s12637_s1 + $0xee8] sm:$0xff]  }
 0x1a6   :  { %9181 = vmatprep.subr.bf16.mxu1 %v10035_v29  ;;  %v10085_v29 = vld [vmem:[%s12637_s1 + $0xea8] sm:$0xff]  }
 0x1a7   :  { %9160 = vmatpush3.bf16.msra.mxu0 %v10034_v27  ;;  %v10083_v27 = vld [vmem:[%s12637_s1 + $0xe28] sm:$0xff]  }
 0x1a8   :  { %9161 = vmatprep.subr.bf16.mxu0 %v10037_v31 }
 0x1a9   :  { %9182 = vmatpush3.bf16.msra.mxu1 %v10036_v30  ;;  %v10086_v30 = vld [vmem:[%s12637_s1 + $0xe70] sm:$0xff]  }
 0x1aa   :  { %9183 = vmatprep.subr.bf16.mxu1 %v10039_v33 }
 0x1ab   :  { %9162 = vmatpush3.bf16.msra.mxu0 %v10038_v32  ;;  %v10087_v32 = vld [vmem:[%s12637_s1 + $0xe30] sm:$0xff]  }
 0x1ac   :  { %9163 = vmatprep.subr.bf16.mxu0 %v10041_v35 }
 0x1ad   :  { %9184 = vmatpush3.bf16.msra.mxu1 %v10040_v34  ;;  %v10088_v34 = vld [vmem:[%s12637_s1 + $0xef0] sm:$0xff]  }
 0x1ae   :  { %9185 = vmatprep.subr.bf16.mxu1 %v10043_v37 }
 0x1af   :  { %9164 = vmatpush3.bf16.msra.mxu0 %v10042_v36 }
 0x1b0   :  { %9165 = vmatprep.subr.bf16.mxu0 %v10045_v39 }
 0x1b1   :  { %9186 = vmatpush3.bf16.msra.mxu1 %v10044_v38 }
 0x1b2   :  { %9187 = vmatprep.subr.bf16.mxu1 %v10047_v42  ;;  %v10090_v42 = vld [vmem:[%s12637_s1 + $0xe78] sm:$0xff]  }
 0x1b3   :  { %9166 = vmatpush3.bf16.msra.mxu0 %v10046_v40  ;;  %v10089_v40 = vld [vmem:[%s12637_s1 + $0xeb0] sm:$0xff]  }
 0x1b4   :  { %9167 = vmatprep.subr.bf16.mxu0 %v10049_v44 }
 0x1b5   :  { %v8865_v49 = vpop.f32.mrb[24].mxu0  ;;  %9188 = vmatpush3.bf16.msra.mxu1 %v10048_v43 }
 0x1b6   :  { %v8866_v51 = vpop.f32.mrb[25].mxu0  ;;  %9189 = vmatprep.subr.bf16.mxu1 %v10051_v46 }
 0x1b7   :  { %v8867_v53 = vadd.f32 %v8866_v51, %v8865_v49  ;;  %v8868_v54 = vpop.f32.mrb[26].mxu0  ;;  %v8887_v55 = vpop.f32.mrb[24].mxu1  ;;  %9168 = vmatpush3.bf16.msra.mxu0 %v10050_v45  ;;  %v10091_v45 = vld [vmem:[%s12637_s1 + $0xe38] sm:$0xff]  }
 0x1b8   :  { %v8869_v58 = vpop.f32.mrb[27].mxu0  ;;  %v8888_v59 = vpop.f32.mrb[25].mxu1  ;;  %9169 = vmatprep.subr.bf16.mxu0 %v10053_v48  ;;  %v10092_v48 = vld [vmem:[%s12637_s1 + $0xef8] sm:$0xff]  }
 0x1b9   :  { %v6591_v60 = vadd.f32 %v8867_v53, %v11706_v12  ;;  %v8889_v61 = vadd.f32 %v8888_v59, %v8887_v55  ;;  %9190 = vmatpush3.bf16.msra.mxu1 %v10052_v47  ;;  %v8890_v63 = vpop.f32.mrb[26].mxu1  ;;  %v10068_v12 = vld [vmem:[%s12637_s1 + $0xec8] sm:$0xff]   ;;  %v29_v47 = vld [vmem:[%s12636_s0 + $0x38] sm:$0xff]  ;;  %v10095_v58 = vld [vmem:[%s12637_s1 + $0xf00] sm:$0xff]  }
 0x1ba   :  { %9191 = vmatprep.subr.bf16.mxu1 %v10055_v52  ;;  %v8891_v1 = vpop.f32.mrb[27].mxu1  ;;  %v1746_v51 = vcombine.high %v29_v47, %v29_v47  ;;  %v10093_v53 = vld [vmem:[%s12637_s1 + $0xeb8] sm:$0xff]  }
 0x1bb   :  { %v11813_v2 = vadd.f32 %v8889_v61, %v6591_v60  ;;  %9170 = vmatpush3.bf16.msra.mxu0 %v10054_v50  ;;  %v1753_v50 = vrot.slane %v29_v47, %v10458_v41  ;;  %v10096_v60 = vld [vmem:[%s12637_s1 + $0xfc0] sm:$0xff]   ;;  %v10098_v1 = vld [vmem:[%s12637_s1 + $0xf48] sm:$0xff]  }
 0x1bc   :  { %9171 = vmatprep.subr.bf16.mxu0 %v10057_v57  ;;  %v11928_v57 = vrot.slane %v1746_v51, %v10458_v41  ;;  %v10129_v47 = vld [vmem:[%s12637_s1 + $0x10c0] sm:$0xff]   ;;  %v10132_v51 = vld [vmem:[%s12637_s1 + $0x1008] sm:$0xff]  }
 0x1bd   :  { %9192 = vmatpush3.bf16.msra.mxu1 %v10056_v56  ;;  %v1761_v54 = vcombine.high %v1753_v50, %v1753_v50  ;;  %v1769_v55 = vrot.slane %v1753_v50, %v10458_v41  ;;  %v10094_v56 = vld [vmem:[%s12637_s1 + $0xf40] sm:$0xff]   ;;  %v10131_v50 = vld [vmem:[%s12637_s1 + $0x1048] sm:$0xff]  }
 0x1be   :  { %9193 = vmatprep.subr.bf16.mxu1 %v10059_v0  ;;  %v1762_v61 = vcombine.high %v11928_v57, %v11928_v57 }
 0x1bf   :  { %9172 = vmatpush3.bf16.msra.mxu0 %v10058_v62  ;;  %v1783_v59 = vrot.slane %v1761_v54, %v10458_v41  ;;  %v10097_v62 = vld [vmem:[%s12637_s1 + $0xf80] sm:$0xff]   ;;  %v1791_v0 = vcombine.high %v1769_v55, %v1769_v55  ;;  %v10135_v54 = vld [vmem:[%s12637_s1 + $0x1050] sm:$0xff]  }
 0x1c0   :  { %9201 = vmatprep.subr.bf16.mxu0 %v10062_v5 }
 0x1c1   :  { %9194 = vmatpush3.bf16.msra.mxu1 %v10061_v3  ;;  %v1793_v63 = vcombine.high %v1783_v59, %v1783_v59  ;;  %v10099_v3 = vld [vmem:[%s12637_s1 + $0xf08] sm:$0xff]  }
 0x1c2   :  { %7149 = vmatmul.mubr.bf16.vlgmr.msra.gmra.mrb[52].mxu0 %v1727_v4  ;;  %9223 = vmatprep.subr.bf16.mxu1 %v10064_v7  ;;  %v10100_v4 = vld [vmem:[%s12637_s1 + $0xfc8] sm:$0xff]   ;;  %v10102_v7 = vld [vmem:[%s12637_s1 + $0xf50] sm:$0xff]  }
 0x1c3   :  { %9202 = vmatpush3.bf16.msra.mxu0 %v10063_v6  ;;  %7228 = vmatprep.mubr.bf16.mxu0 %v1783_v59  ;;  %v10101_v6 = vld [vmem:[%s12637_s1 + $0xf88] sm:$0xff]   ;;  %v10140_v59 = vld [vmem:[%s12637_s1 + $0x1018] sm:$0xff]  }
 0x1c4   :  { %7189 = vmatmul.mubr.bf16.vlgmr.msra.gmra.mrb[52].mxu1 %v1743_v9  ;;  %9203 = vmatprep.subr.bf16.mxu0 %v10066_v10  ;;  %v10104_v9 = vld [vmem:[%s12637_s1 + $0xfd0] sm:$0xff]  }
 0x1c5   :  { %9224 = vmatpush3.bf16.msra.mxu1 %v10065_v8  ;;  %7268 = vmatprep.mubr.bf16.mxu1 %v1793_v63  ;;  %v10103_v8 = vld [vmem:[%s12637_s1 + $0xf10] sm:$0xff]   ;;  %v10144_v63 = vld [vmem:[%s12637_s1 + $0x1020] sm:$0xff]  }
 0x1c6   :  { %9225 = vmatprep.subr.bf16.mxu1 %v10068_v12  ;;  %v10105_v10 = vld [vmem:[%s12637_s1 + $0xf90] sm:$0xff]   ;;  %v10107_v12 = vld [vmem:[%s12637_s1 + $0xf18] sm:$0xff]  }
 0x1c7   :  { %9204 = vmatpush3.bf16.msra.mxu0 %v10067_v11  ;;  %v10106_v11 = vld [vmem:[%s12637_s1 + $0xf58] sm:$0xff]  }
 0x1c8   :  { %9205 = vmatprep.subr.bf16.mxu0 %v10070_v14  ;;  %v10109_v14 = vld [vmem:[%s12637_s1 + $0xf98] sm:$0xff]  }
 0x1c9   :  { %9226 = vmatpush3.bf16.msra.mxu1 %v10069_v13  ;;  %v10108_v13 = vld [vmem:[%s12637_s1 + $0xfd8] sm:$0xff]  }
 0x1ca   :  { %9227 = vmatprep.subr.bf16.mxu1 %v10072_v16  ;;  %v10111_v16 = vld [vmem:[%s12637_s1 + $0xf20] sm:$0xff]  }
 0x1cb   :  { %9206 = vmatpush3.bf16.msra.mxu0 %v10071_v15  ;;  %v10110_v15 = vld [vmem:[%s12637_s1 + $0xf60] sm:$0xff]  }
 0x1cc   :  { %9207 = vmatprep.subr.bf16.mxu0 %v10074_v18  ;;  %v10113_v18 = vld [vmem:[%s12637_s1 + $0xfa0] sm:$0xff]  }
 0x1cd   :  { %9228 = vmatpush3.bf16.msra.mxu1 %v10073_v17  ;;  %v10112_v17 = vld [vmem:[%s12637_s1 + $0xfe0] sm:$0xff]  }
 0x1ce   :  { %9229 = vmatprep.subr.bf16.mxu1 %v10076_v20  ;;  %v10115_v20 = vld [vmem:[%s12637_s1 + $0xf28] sm:$0xff]  }
 0x1cf   :  { %9208 = vmatpush3.bf16.msra.mxu0 %v10075_v19  ;;  %v10114_v19 = vld [vmem:[%s12637_s1 + $0xf68] sm:$0xff]  }
 0x1d0   :  { %9209 = vmatprep.subr.bf16.mxu0 %v10078_v22  ;;  %v10117_v22 = vld [vmem:[%s12637_s1 + $0xfa8] sm:$0xff]  }
 0x1d1   :  { %9230 = vmatpush3.bf16.msra.mxu1 %v10077_v21  ;;  %v10116_v21 = vld [vmem:[%s12637_s1 + $0xfe8] sm:$0xff]  }
 0x1d2   :  { %9231 = vmatprep.subr.bf16.mxu1 %v10080_v24 }
 0x1d3   :  { %9210 = vmatpush3.bf16.msra.mxu0 %v10079_v23  ;;  %v10118_v23 = vld [vmem:[%s12637_s1 + $0xf70] sm:$0xff]  }
 0x1d4   :  { %9211 = vmatprep.subr.bf16.mxu0 %v10082_v26 }
 0x1d5   :  { %v8909_v31 = vpop.f32.mrb[28].mxu0  ;;  %9232 = vmatpush3.bf16.msra.mxu1 %v10081_v25  ;;  %v10119_v25 = vld [vmem:[%s12637_s1 + $0xf30] sm:$0xff]  }
 0x1d6   :  { %v8910_v33 = vpop.f32.mrb[29].mxu0  ;;  %9233 = vmatprep.subr.bf16.mxu1 %v10084_v28 }
 0x1d7   :  { %v8911_v35 = vadd.f32 %v8910_v33, %v8909_v31  ;;  %v8912_v36 = vpop.f32.mrb[30].mxu0  ;;  %v8931_v37 = vpop.f32.mrb[28].mxu1  ;;  %9212 = vmatpush3.bf16.msra.mxu0 %v10083_v27  ;;  %v10120_v27 = vld [vmem:[%s12637_s1 + $0xff0] sm:$0xff]  }
 0x1d8   :  { %v8913_v38 = vpop.f32.mrb[31].mxu0  ;;  %v8932_v39 = vpop.f32.mrb[29].mxu1  ;;  %9213 = vmatprep.subr.bf16.mxu0 %v10086_v30  ;;  %v10121_v31 = vld [vmem:[%s12637_s1 + $0xfb0] sm:$0xff]  }
 0x1d9   :  { %v6671_v43 = vadd.f32 %v8911_v35, %v11813_v2  ;;  %v8933_v44 = vadd.f32 %v8932_v39, %v8931_v37  ;;  %9234 = vmatpush3.bf16.msra.mxu1 %v10085_v29  ;;  %v8934_v46 = vpop.f32.mrb[30].mxu1  ;;  %v1790_v2 = vrot.slane %v1762_v61, %v10458_v41  ;;  %v10123_v37 = vld [vmem:[%s12637_s1 + $0xf38] sm:$0xff]  }
 0x1da   :  { %9235 = vmatprep.subr.bf16.mxu1 %v10088_v34  ;;  %v8935_v49 = vpop.f32.mrb[31].mxu1  ;;  %v10124_v39 = vld [vmem:[%s12637_s1 + $0xff8] sm:$0xff]   ;;  %v10128_v46 = vld [vmem:[%s12637_s1 + $0x1000] sm:$0xff]  }
 0x1db   :  { %v11918_v52 = vadd.f32 %v8933_v44, %v6671_v43  ;;  %9214 = vmatpush3.bf16.msra.mxu0 %v10087_v32  ;;  %v1794_v5 = vcombine.high %v1790_v2, %v1790_v2  ;;  %v10122_v32 = vld [vmem:[%s12637_s1 + $0xf78] sm:$0xff]   ;;  %v1776_v44 = vrot.slane %v11928_v57, %v10458_v41  ;;  %v10138_v57 = vld [vmem:[%s12637_s1 + $0x1090] sm:$0xff]  }
 0x1dc   :  { %9215 = vmatprep.subr.bf16.mxu0 %v10090_v42  ;;  %v10126_v43 = vld [vmem:[%s12637_s1 + $0xfb8] sm:$0xff]  }
 0x1dd   :  { %9236 = vmatpush3.bf16.msra.mxu1 %v10089_v40  ;;  %v1792_v49 = vcombine.high %v1776_v44, %v1776_v44  ;;  %v10142_v61 = vld [vmem:[%s12637_s1 + $0x1098] sm:$0xff]  }
 0x1de   :  { %9237 = vmatprep.subr.bf16.mxu1 %v10092_v48  ;;  %v10130_v48 = vld [vmem:[%s12637_s1 + $0x1080] sm:$0xff]  }
 0x1df   :  { %9216 = vmatpush3.bf16.msra.mxu0 %v10091_v45  ;;  %v10127_v45 = vld [vmem:[%s12637_s1 + $0x1040] sm:$0xff]  }
 0x1e0   :  { %9245 = vmatprep.subr.bf16.mxu0 %v10094_v56  ;;  %v10137_v56 = vld [vmem:[%s12637_s1 + $0x10d0] sm:$0xff]  }
 0x1e1   :  { %9238 = vmatpush3.bf16.msra.mxu1 %v10093_v53  ;;  %v10134_v53 = vld [vmem:[%s12637_s1 + $0x1088] sm:$0xff]  }
 0x1e2   :  { %7229 = vmatmul.mubr.bf16.vlgmr.msra.gmra.mrb[56].mxu0 %v1769_v55  ;;  %9267 = vmatprep.subr.bf16.mxu1 %v10096_v60  ;;  %v10136_v55 = vld [vmem:[%s12637_s1 + $0x1010] sm:$0xff]   ;;  %v10141_v60 = vld [vmem:[%s12637_s1 + $0x10d8] sm:$0xff]  }
 0x1e3   :  { %9246 = vmatpush3.bf16.msra.mxu0 %v10095_v58  ;;  %7308 = vmatprep.mubr.bf16.mxu0 %v1790_v2  ;;  %v10139_v58 = vld [vmem:[%s12637_s1 + $0x1058] sm:$0xff]   ;;  %v10147_v2 = vld [vmem:[%s12637_s1 + $0x1068] sm:$0xff]  }
 0x1e4   :  { %7269 = vmatmul.mubr.bf16.vlgmr.msra.gmra.mrb[56].mxu1 %v1791_v0  ;;  %9247 = vmatprep.subr.bf16.mxu0 %v10098_v1  ;;  %v10145_v0 = vld [vmem:[%s12637_s1 + $0x10e0] sm:$0xff]  }
 0x1e5   :  { %9268 = vmatpush3.bf16.msra.mxu1 %v10097_v62  ;;  %7348 = vmatprep.mubr.bf16.mxu1 %v1794_v5  ;;  %v10143_v62 = vld [vmem:[%s12637_s1 + $0x1060] sm:$0xff]   ;;  %v10150_v5 = vld [vmem:[%s12637_s1 + $0x10a8] sm:$0xff]  }
 0x1e6   :  { %9269 = vmatprep.subr.bf16.mxu1 %v10100_v4  ;;  %v10146_v1 = vld [vmem:[%s12637_s1 + $0x10a0] sm:$0xff]   ;;  %v10149_v4 = vld [vmem:[%s12637_s1 + $0x10e8] sm:$0xff]  }
 0x1e7   :  { %9248 = vmatpush3.bf16.msra.mxu0 %v10099_v3  ;;  %v10148_v3 = vld [vmem:[%s12637_s1 + $0x1028] sm:$0xff]  }
 0x1e8   :  { %9249 = vmatprep.subr.bf16.mxu0 %v10102_v7 }
 0x1e9   :  { %9270 = vmatpush3.bf16.msra.mxu1 %v10101_v6  ;;  %v10151_v6 = vld [vmem:[%s12637_s1 + $0x1070] sm:$0xff]  }
 0x1ea   :  { %9271 = vmatprep.subr.bf16.mxu1 %v10104_v9 }
 0x1eb   :  { %9250 = vmatpush3.bf16.msra.mxu0 %v10103_v8  ;;  %v10152_v8 = vld [vmem:[%s12637_s1 + $0x1030] sm:$0xff]  }
 0x1ec   :  { %9251 = vmatprep.subr.bf16.mxu0 %v10106_v11 }
 0x1ed   :  { %9272 = vmatpush3.bf16.msra.mxu1 %v10105_v10  ;;  %v10153_v10 = vld [vmem:[%s12637_s1 + $0x10f0] sm:$0xff]  }
 0x1ee   :  { %9273 = vmatprep.subr.bf16.mxu1 %v10108_v13 }
 0x1ef   :  { %9252 = vmatpush3.bf16.msra.mxu0 %v10107_v12 }
 0x1f0   :  { %9253 = vmatprep.subr.bf16.mxu0 %v10110_v15 }
 0x1f1   :  { %9274 = vmatpush3.bf16.msra.mxu1 %v10109_v14 }
 0x1f2   :  { %9275 = vmatprep.subr.bf16.mxu1 %v10112_v17  ;;  %v10155_v17 = vld [vmem:[%s12637_s1 + $0x1078] sm:$0xff]  }
 0x1f3   :  { %9254 = vmatpush3.bf16.msra.mxu0 %v10111_v16  ;;  %v10154_v16 = vld [vmem:[%s12637_s1 + $0x10b0] sm:$0xff]  }
 0x1f4   :  { %9255 = vmatprep.subr.bf16.mxu0 %v10114_v19 }
 0x1f5   :  { %v8953_v24 = vpop.f32.mrb[32].mxu0  ;;  %9276 = vmatpush3.bf16.msra.mxu1 %v10113_v18 }
 0x1f6   :  { %v8954_v26 = vpop.f32.mrb[33].mxu0  ;;  %9277 = vmatprep.subr.bf16.mxu1 %v10116_v21 }
 0x1f7   :  { %v8955_v28 = vadd.f32 %v8954_v26, %v8953_v24  ;;  %v8956_v29 = vpop.f32.mrb[34].mxu0  ;;  %v8975_v30 = vpop.f32.mrb[32].mxu1  ;;  %9256 = vmatpush3.bf16.msra.mxu0 %v10115_v20  ;;  %v10156_v20 = vld [vmem:[%s12637_s1 + $0x1038] sm:$0xff]   ;;  %v30_v24 = vld [vmem:[%s12636_s0 + $0x40] sm:$0xff] }
 0x1f8   :  { %v8957_v33 = vpop.f32.mrb[35].mxu0  ;;  %v8976_v34 = vpop.f32.mrb[33].mxu1  ;;  %9257 = vmatprep.subr.bf16.mxu0 %v10118_v23  ;;  %v1802_v26 = vrot.slane %v30_v24, %v10458_v41  ;;  %v10159_v29 = vld [vmem:[%s12637_s1 + $0x1140] sm:$0xff]  }
 0x1f9   :  { %v6751_v35 = vadd.f32 %v8955_v28, %v11918_v52  ;;  %v8977_v36 = vadd.f32 %v8976_v34, %v8975_v30  ;;  %9278 = vmatpush3.bf16.msra.mxu1 %v10117_v22  ;;  %v8978_v38 = vpop.f32.mrb[34].mxu1  ;;  %v10133_v52 = vld [vmem:[%s12637_s1 + $0x10c8] sm:$0xff]   ;;  %v10157_v22 = vld [vmem:[%s12637_s1 + $0x10f8] sm:$0xff]   ;;  %v1795_v28 = vcombine.high %v30_v24, %v30_v24  ;;  %v10161_v34 = vld [vmem:[%s12637_s1 + $0x11c0] sm:$0xff]  }
 0x1fa   :  { %9279 = vmatprep.subr.bf16.mxu1 %v10120_v27  ;;  %v8979_v40 = vpop.f32.mrb[35].mxu1  ;;  %v10158_v27 = vld [vmem:[%s12637_s1 + $0x10b8] sm:$0xff]   ;;  %v1810_v30 = vcombine.high %v1802_v26, %v1802_v26 }
 0x1fb   :  { %v12025_v42 = vadd.f32 %v8977_v36, %v6751_v35  ;;  %9258 = vmatpush3.bf16.msra.mxu0 %v10119_v25  ;;  %v12143_v33 = vrot.slane %v1795_v28, %v10458_v41  ;;  %v10162_v36 = vld [vmem:[%s12637_s1 + $0x1180] sm:$0xff]   ;;  %v10199_v28 = vld [vmem:[%s12637_s1 + $0x1288] sm:$0xff]  }
 0x1fc   :  { %9259 = vmatprep.subr.bf16.mxu0 %v10122_v32  ;;  %v10160_v32 = vld [vmem:[%s12637_s1 + $0x1100] sm:$0xff]   ;;  %v1832_v35 = vrot.slane %v1810_v30, %v10458_v41  ;;  %v10201_v30 = vld [vmem:[%s12637_s1 + $0x1210] sm:$0xff]  }
 0x1fd   :  { %9280 = vmatpush3.bf16.msra.mxu1 %v10121_v31  ;;  %v1818_v31 = vrot.slane %v1802_v26, %v10458_v41  ;;  %v10197_v26 = vld [vmem:[%s12637_s1 + $0x1208] sm:$0xff]  }
 0x1fe   :  { %9281 = vmatprep.subr.bf16.mxu1 %v10124_v39  ;;  %v10163_v39 = vld [vmem:[%s12637_s1 + $0x1148] sm:$0xff]   ;;  %v1842_v40 = vcombine.high %v1832_v35, %v1832_v35 }
 0x1ff   :  { %9260 = vmatpush3.bf16.msra.mxu0 %v10123_v37  ;;  %v1811_v37 = vcombine.high %v12143_v33, %v12143_v33  ;;  %v1840_v38 = vcombine.high %v1818_v31, %v1818_v31 }
 0x200   :  { %9289 = vmatprep.subr.bf16.mxu0 %v10127_v45  ;;  %v10166_v45 = vld [vmem:[%s12637_s1 + $0x1188] sm:$0xff]  }
 0x201   :  { %9282 = vmatpush3.bf16.msra.mxu1 %v10126_v43  ;;  %v1839_v43 = vrot.slane %v1811_v37, %v10458_v41  ;;  %v10208_v37 = vld [vmem:[%s12637_s1 + $0x1260] sm:$0xff]  }
 0x202   :  { %7309 = vmatmul.mubr.bf16.vlgmr.msra.gmra.mrb[60].mxu0 %v1776_v44  ;;  %9311 = vmatprep.subr.bf16.mxu1 %v10129_v47  ;;  %v10165_v44 = vld [vmem:[%s12637_s1 + $0x11c8] sm:$0xff]   ;;  %v10167_v47 = vld [vmem:[%s12637_s1 + $0x1150] sm:$0xff]  }
 0x203   :  { %9290 = vmatpush3.bf16.msra.mxu0 %v10128_v46  ;;  %7388 = vmatprep.mubr.bf16.mxu0 %v1832_v35  ;;  %v1843_v46 = vcombine.high %v1839_v43, %v1839_v43  ;;  %v10206_v35 = vld [vmem:[%s12637_s1 + $0x12d8] sm:$0xff]  }
 0x204   :  { %7349 = vmatmul.mubr.bf16.vlgmr.msra.gmra.mrb[60].mxu1 %v1792_v49  ;;  %9291 = vmatprep.subr.bf16.mxu0 %v10131_v50  ;;  %v10169_v49 = vld [vmem:[%s12637_s1 + $0x11d0] sm:$0xff]  }
 0x205   :  { %9312 = vmatpush3.bf16.msra.mxu1 %v10130_v48  ;;  %7428 = vmatprep.mubr.bf16.mxu1 %v1842_v40  ;;  %v10168_v48 = vld [vmem:[%s12637_s1 + $0x1110] sm:$0xff]   ;;  %v10211_v40 = vld [vmem:[%s12637_s1 + $0x12a0] sm:$0xff]  }
 0x206   :  { %9313 = vmatprep.subr.bf16.mxu1 %v10133_v52  ;;  %v10170_v50 = vld [vmem:[%s12637_s1 + $0x1190] sm:$0xff]   ;;  %v10172_v52 = vld [vmem:[%s12637_s1 + $0x1118] sm:$0xff]  }
 0x207   :  { %9292 = vmatpush3.bf16.msra.mxu0 %v10132_v51  ;;  %v10171_v51 = vld [vmem:[%s12637_s1 + $0x1158] sm:$0xff]  }
 0x208   :  { %9293 = vmatprep.subr.bf16.mxu0 %v10135_v54  ;;  %v10174_v54 = vld [vmem:[%s12637_s1 + $0x1198] sm:$0xff]  }
 0x209   :  { %9314 = vmatpush3.bf16.msra.mxu1 %v10134_v53  ;;  %v10173_v53 = vld [vmem:[%s12637_s1 + $0x11d8] sm:$0xff]  }
 0x20a   :  { %9315 = vmatprep.subr.bf16.mxu1 %v10137_v56  ;;  %v10176_v56 = vld [vmem:[%s12637_s1 + $0x1120] sm:$0xff]  }
 0x20b   :  { %9294 = vmatpush3.bf16.msra.mxu0 %v10136_v55  ;;  %v10175_v55 = vld [vmem:[%s12637_s1 + $0x1160] sm:$0xff]  }
 0x20c   :  { %9295 = vmatprep.subr.bf16.mxu0 %v10139_v58  ;;  %v10178_v58 = vld [vmem:[%s12637_s1 + $0x11a0] sm:$0xff]  }
 0x20d   :  { %9316 = vmatpush3.bf16.msra.mxu1 %v10138_v57  ;;  %v10177_v57 = vld [vmem:[%s12637_s1 + $0x11e0] sm:$0xff]  }
 0x20e   :  { %9317 = vmatprep.subr.bf16.mxu1 %v10141_v60  ;;  %v10180_v60 = vld [vmem:[%s12637_s1 + $0x1128] sm:$0xff]  }
 0x20f   :  { %9296 = vmatpush3.bf16.msra.mxu0 %v10140_v59  ;;  %v10179_v59 = vld [vmem:[%s12637_s1 + $0x1168] sm:$0xff]  }
 0x210   :  { %9297 = vmatprep.subr.bf16.mxu0 %v10143_v62  ;;  %v10182_v62 = vld [vmem:[%s12637_s1 + $0x11a8] sm:$0xff]  }
 0x211   :  { %9318 = vmatpush3.bf16.msra.mxu1 %v10142_v61  ;;  %v10181_v61 = vld [vmem:[%s12637_s1 + $0x11e8] sm:$0xff]  }
 0x212   :  { %9319 = vmatprep.subr.bf16.mxu1 %v10145_v0 }
 0x213   :  { %9298 = vmatpush3.bf16.msra.mxu0 %v10144_v63  ;;  %v10183_v63 = vld [vmem:[%s12637_s1 + $0x1170] sm:$0xff]  }
 0x214   :  { %9299 = vmatprep.subr.bf16.mxu0 %v10147_v2 }
 0x215   :  { %v8997_v7 = vpop.f32.mrb[36].mxu0  ;;  %9320 = vmatpush3.bf16.msra.mxu1 %v10146_v1  ;;  %v10184_v1 = vld [vmem:[%s12637_s1 + $0x1130] sm:$0xff]  }
 0x216   :  { %v8998_v9 = vpop.f32.mrb[37].mxu0  ;;  %9321 = vmatprep.subr.bf16.mxu1 %v10149_v4 }
 0x217   :  { %v8999_v11 = vadd.f32 %v8998_v9, %v8997_v7  ;;  %v9000_v12 = vpop.f32.mrb[38].mxu0  ;;  %v9019_v13 = vpop.f32.mrb[36].mxu1  ;;  %9300 = vmatpush3.bf16.msra.mxu0 %v10148_v3  ;;  %v10185_v3 = vld [vmem:[%s12637_s1 + $0x11f0] sm:$0xff]  }
 0x218   :  { %v9001_v14 = vpop.f32.mrb[39].mxu0  ;;  %v9020_v15 = vpop.f32.mrb[37].mxu1  ;;  %9301 = vmatprep.subr.bf16.mxu0 %v10151_v6  ;;  %v10186_v7 = vld [vmem:[%s12637_s1 + $0x11b0] sm:$0xff]  }
 0x219   :  { %v6831_v18 = vadd.f32 %v8999_v11, %v12025_v42  ;;  %v9021_v19 = vadd.f32 %v9020_v15, %v9019_v13  ;;  %9322 = vmatpush3.bf16.msra.mxu1 %v10150_v5  ;;  %v9022_v21 = vpop.f32.mrb[38].mxu1  ;;  %v10164_v42 = vld [vmem:[%s12637_s1 + $0x1108] sm:$0xff]   ;;  %v10188_v13 = vld [vmem:[%s12637_s1 + $0x1138] sm:$0xff]  }
 0x21a   :  { %9323 = vmatprep.subr.bf16.mxu1 %v10153_v10  ;;  %v9023_v23 = vpop.f32.mrb[39].mxu1  ;;  %v10189_v15 = vld [vmem:[%s12637_s1 + $0x11f8] sm:$0xff]   ;;  %v10193_v21 = vld [vmem:[%s12637_s1 + $0x1200] sm:$0xff]  }
 0x21b   :  { %v12129_v25 = vadd.f32 %v9021_v19, %v6831_v18  ;;  %9302 = vmatpush3.bf16.msra.mxu0 %v10152_v8  ;;  %v10187_v8 = vld [vmem:[%s12637_s1 + $0x1178] sm:$0xff]   ;;  %v1825_v19 = vrot.slane %v12143_v33, %v10458_v41  ;;  %v10195_v23 = vld [vmem:[%s12637_s1 + $0x1280] sm:$0xff]  }
 0x21c   :  { %9303 = vmatprep.subr.bf16.mxu0 %v10155_v17  ;;  %v10191_v18 = vld [vmem:[%s12637_s1 + $0x11b8] sm:$0xff]  }
 0x21d   :  { %9324 = vmatpush3.bf16.msra.mxu1 %v10154_v16  ;;  %v1841_v24 = vcombine.high %v1825_v19, %v1825_v19  ;;  %v10204_v33 = vld [vmem:[%s12637_s1 + $0x1258] sm:$0xff]  }
 0x21e   :  { %9325 = vmatprep.subr.bf16.mxu1 %v10157_v22  ;;  %v10194_v22 = vld [vmem:[%s12637_s1 + $0x12c0] sm:$0xff]  }
 0x21f   :  { %9304 = vmatpush3.bf16.msra.mxu0 %v10156_v20  ;;  %v10192_v20 = vld [vmem:[%s12637_s1 + $0x1240] sm:$0xff]  }
 0x220   :  { %9333 = vmatprep.subr.bf16.mxu0 %v10159_v29  ;;  %v10200_v29 = vld [vmem:[%s12637_s1 + $0x1250] sm:$0xff]  }
 0x221   :  { %9326 = vmatpush3.bf16.msra.mxu1 %v10158_v27  ;;  %v10198_v27 = vld [vmem:[%s12637_s1 + $0x12c8] sm:$0xff]  }
 0x222   :  { %7389 = vmatmul.mubr.bf16.vlgmr.msra.gmra.mrb[64].mxu0 %v1818_v31  ;;  %9355 = vmatprep.subr.bf16.mxu1 %v10161_v34  ;;  %v10202_v31 = vld [vmem:[%s12637_s1 + $0x12d0] sm:$0xff]   ;;  %v10205_v34 = vld [vmem:[%s12637_s1 + $0x1218] sm:$0xff]  }
 0x223   :  { %9334 = vmatpush3.bf16.msra.mxu0 %v10160_v32  ;;  %7468 = vmatprep.mubr.bf16.mxu0 %v1839_v43  ;;  %v10203_v32 = vld [vmem:[%s12637_s1 + $0x1290] sm:$0xff]   ;;  %v10213_v43 = vld [vmem:[%s12637_s1 + $0x1228] sm:$0xff]  }
 0x224   :  { %7429 = vmatmul.mubr.bf16.vlgmr.msra.gmra.mrb[64].mxu1 %v1840_v38  ;;  %9335 = vmatprep.subr.bf16.mxu0 %v10163_v39  ;;  %v10209_v38 = vld [vmem:[%s12637_s1 + $0x1220] sm:$0xff]  }
 0x225   :  { %9356 = vmatpush3.bf16.msra.mxu1 %v10162_v36  ;;  %7508 = vmatprep.mubr.bf16.mxu1 %v1843_v46  ;;  %v10207_v36 = vld [vmem:[%s12637_s1 + $0x1298] sm:$0xff]   ;;  %v10210_v39 = vld [vmem:[%s12637_s1 + $0x12e0] sm:$0xff]   ;;  %v10216_v46 = vld [vmem:[%s12637_s1 + $0x1270] sm:$0xff]  }
 0x226   :  { %9357 = vmatprep.subr.bf16.mxu1 %v10165_v44  ;;  %v10214_v44 = vld [vmem:[%s12637_s1 + $0x12e8] sm:$0xff]  }
 0x227   :  { %9336 = vmatpush3.bf16.msra.mxu0 %v10164_v42  ;;  %v10212_v42 = vld [vmem:[%s12637_s1 + $0x1268] sm:$0xff]  }
 0x228   :  { %9337 = vmatprep.subr.bf16.mxu0 %v10167_v47 }
 0x229   :  { %9358 = vmatpush3.bf16.msra.mxu1 %v10166_v45  ;;  %v10215_v45 = vld [vmem:[%s12637_s1 + $0x12a8] sm:$0xff]  }
 0x22a   :  { %9359 = vmatprep.subr.bf16.mxu1 %v10169_v49 }
 0x22b   :  { %9338 = vmatpush3.bf16.msra.mxu0 %v10168_v48  ;;  %v10217_v48 = vld [vmem:[%s12637_s1 + $0x1230] sm:$0xff]  }
 0x22c   :  { %9339 = vmatprep.subr.bf16.mxu0 %v10171_v51 }
 0x22d   :  { %9360 = vmatpush3.bf16.msra.mxu1 %v10170_v50  ;;  %v10218_v50 = vld [vmem:[%s12637_s1 + $0x12f0] sm:$0xff]  }
 0x22e   :  { %9361 = vmatprep.subr.bf16.mxu1 %v10173_v53 }
 0x22f   :  { %9340 = vmatpush3.bf16.msra.mxu0 %v10172_v52 }
 0x230   :  { %9341 = vmatprep.subr.bf16.mxu0 %v10175_v55 }
 0x231   :  { %9362 = vmatpush3.bf16.msra.mxu1 %v10174_v54 }
 0x232   :  { %9363 = vmatprep.subr.bf16.mxu1 %v10177_v57  ;;  %v10220_v57 = vld [vmem:[%s12637_s1 + $0x1278] sm:$0xff]  }
 0x233   :  { %9342 = vmatpush3.bf16.msra.mxu0 %v10176_v56  ;;  %v10219_v56 = vld [vmem:[%s12637_s1 + $0x12b0] sm:$0xff]  }
 0x234   :  { %9343 = vmatprep.subr.bf16.mxu0 %v10179_v59 }
 0x235   :  { %v9041_v0 = vpop.f32.mrb[40].mxu0  ;;  %9364 = vmatpush3.bf16.msra.mxu1 %v10178_v58 }
 0x236   :  { %v9042_v2 = vpop.f32.mrb[41].mxu0  ;;  %9365 = vmatprep.subr.bf16.mxu1 %v10181_v61 }
 0x237   :  { %v9043_v4 = vadd.f32 %v9042_v2, %v9041_v0  ;;  %v9044_v5 = vpop.f32.mrb[42].mxu0  ;;  %v9063_v6 = vpop.f32.mrb[40].mxu1  ;;  %9344 = vmatpush3.bf16.msra.mxu0 %v10180_v60  ;;  %v10221_v60 = vld [vmem:[%s12637_s1 + $0x1238] sm:$0xff]  }
 0x238   :  { %v9045_v9 = vpop.f32.mrb[43].mxu0  ;;  %v9064_v10 = vpop.f32.mrb[41].mxu1  ;;  %9345 = vmatprep.subr.bf16.mxu0 %v10183_v63  ;;  %v10222_v63 = vld [vmem:[%s12637_s1 + $0x12f8] sm:$0xff]   ;;  %v10224_v5 = vld [vmem:[%s12637_s1 + $0x1340] sm:$0xff]  }
 0x239   :  { %v6911_v11 = vadd.f32 %v9043_v4, %v12129_v25  ;;  %v9065_v12 = vadd.f32 %v9064_v10, %v9063_v6  ;;  %9366 = vmatpush3.bf16.msra.mxu1 %v10182_v62  ;;  %v9066_v14 = vpop.f32.mrb[42].mxu1  ;;  %v10196_v25 = vld [vmem:[%s12637_s1 + $0x1248] sm:$0xff]   ;;  %v10226_v9 = vld [vmem:[%s12637_s1 + $0x13c0] sm:$0xff]  }
 0x23a   :  { %9367 = vmatprep.subr.bf16.mxu1 %v10185_v3  ;;  %v9067_v16 = vpop.f32.mrb[43].mxu1  ;;  %v10223_v3 = vld [vmem:[%s12637_s1 + $0x12b8] sm:$0xff]   ;;  %v10228_v14 = vld [vmem:[%s12637_s1 + $0x1348] sm:$0xff]  }
 0x23b   :  { %v12237_v17 = vadd.f32 %v9065_v12, %v6911_v11  ;;  %9346 = vmatpush3.bf16.msra.mxu0 %v10184_v1  ;;  %v31_v1 = vld [vmem:[%s12636_s0 + $0x48] sm:$0xff]  ;;  %v10225_v11 = vld [vmem:[%s12637_s1 + $0x1300] sm:$0xff]  }
 0x23c   :  { %9347 = vmatprep.subr.bf16.mxu0 %v10187_v8  ;;  %v1851_v2 = vrot.slane %v31_v1, %v10458_v41  ;;  %v1844_v4 = vcombine.high %v31_v1, %v31_v1  ;;  %v10227_v16 = vld [vmem:[%s12637_s1 + $0x1380] sm:$0xff]   ;;  %v10261_v1 = vld [vmem:[%s12637_s1 + $0x1448] sm:$0xff]  }
 0x23d   :  { %9368 = vmatpush3.bf16.msra.mxu1 %v10186_v7 }
 0x23e   :  { %9369 = vmatprep.subr.bf16.mxu1 %v10189_v15  ;;  %v1859_v6 = vcombine.high %v1851_v2, %v1851_v2  ;;  %v1867_v7 = vrot.slane %v1851_v2, %v10458_v41  ;;  %v12352_v8 = vrot.slane %v1844_v4, %v10458_v41  ;;  %v10262_v2 = vld [vmem:[%s12637_s1 + $0x1408] sm:$0xff]  }
 0x23f   :  { %9348 = vmatpush3.bf16.msra.mxu0 %v10188_v13  ;;  %v10264_v4 = vld [vmem:[%s12637_s1 + $0x1488] sm:$0xff]  }
 0x240   :  { %9377 = vmatprep.subr.bf16.mxu0 %v10192_v20  ;;  %v1881_v10 = vrot.slane %v1859_v6, %v10458_v41  ;;  %v1860_v12 = vcombine.high %v12352_v8, %v12352_v8  ;;  %v1889_v13 = vcombine.high %v1867_v7, %v1867_v7  ;;  %v10266_v6 = vld [vmem:[%s12637_s1 + $0x1410] sm:$0xff]  }
 0x241   :  { %9370 = vmatpush3.bf16.msra.mxu1 %v10191_v18  ;;  %v10230_v18 = vld [vmem:[%s12637_s1 + $0x13c8] sm:$0xff]  }
 0x242   :  { %7469 = vmatmul.mubr.bf16.vlgmr.msra.gmra.mrb[68].mxu0 %v1825_v19  ;;  %9399 = vmatprep.subr.bf16.mxu1 %v10194_v22  ;;  %v1891_v15 = vcombine.high %v1881_v10, %v1881_v10  ;;  %v10229_v19 = vld [vmem:[%s12637_s1 + $0x1308] sm:$0xff]  }
 0x243   :  { %9378 = vmatpush3.bf16.msra.mxu0 %v10193_v21  ;;  %7548 = vmatprep.mubr.bf16.mxu0 %v1881_v10  ;;  %v10232_v21 = vld [vmem:[%s12637_s1 + $0x1350] sm:$0xff]   ;;  %v10231_v22 = vld [vmem:[%s12637_s1 + $0x1388] sm:$0xff]   ;;  %v10270_v10 = vld [vmem:[%s12637_s1 + $0x1418] sm:$0xff]  }
 0x244   :  { %7509 = vmatmul.mubr.bf16.vlgmr.msra.gmra.mrb[68].mxu1 %v1841_v24  ;;  %9379 = vmatprep.subr.bf16.mxu0 %v10196_v25  ;;  %v10233_v24 = vld [vmem:[%s12637_s1 + $0x1310] sm:$0xff]   ;;  %v10236_v25 = vld [vmem:[%s12637_s1 + $0x1358] sm:$0xff]  }
 0x245   :  { %9400 = vmatpush3.bf16.msra.mxu1 %v10195_v23  ;;  %7588 = vmatprep.mubr.bf16.mxu1 %v1891_v15  ;;  %v10234_v23 = vld [vmem:[%s12637_s1 + $0x13d0] sm:$0xff]   ;;  %v10275_v15 = vld [vmem:[%s12637_s1 + $0x14e0] sm:$0xff]  }
 0x246   :  { %9401 = vmatprep.subr.bf16.mxu1 %v10198_v27  ;;  %v10238_v27 = vld [vmem:[%s12637_s1 + $0x13d8] sm:$0xff]  }
 0x247   :  { %9380 = vmatpush3.bf16.msra.mxu0 %v10197_v26  ;;  %v10235_v26 = vld [vmem:[%s12637_s1 + $0x1390] sm:$0xff]  }
 0x248   :  { %9381 = vmatprep.subr.bf16.mxu0 %v10200_v29  ;;  %v10240_v29 = vld [vmem:[%s12637_s1 + $0x1360] sm:$0xff]  }
 0x249   :  { %9402 = vmatpush3.bf16.msra.mxu1 %v10199_v28  ;;  %v10237_v28 = vld [vmem:[%s12637_s1 + $0x1318] sm:$0xff]  }
 0x24a   :  { %9403 = vmatprep.subr.bf16.mxu1 %v10202_v31  ;;  %v10242_v31 = vld [vmem:[%s12637_s1 + $0x13e0] sm:$0xff]  }
 0x24b   :  { %9382 = vmatpush3.bf16.msra.mxu0 %v10201_v30  ;;  %v10239_v30 = vld [vmem:[%s12637_s1 + $0x1398] sm:$0xff]  }
 0x24c   :  { %9383 = vmatprep.subr.bf16.mxu0 %v10204_v33  ;;  %v10244_v33 = vld [vmem:[%s12637_s1 + $0x1368] sm:$0xff]  }
 0x24d   :  { %9404 = vmatpush3.bf16.msra.mxu1 %v10203_v32  ;;  %v10241_v32 = vld [vmem:[%s12637_s1 + $0x1320] sm:$0xff]  }
 0x24e   :  { %9405 = vmatprep.subr.bf16.mxu1 %v10206_v35  ;;  %v10246_v35 = vld [vmem:[%s12637_s1 + $0x13e8] sm:$0xff]  }
 0x24f   :  { %9384 = vmatpush3.bf16.msra.mxu0 %v10205_v34  ;;  %v10243_v34 = vld [vmem:[%s12637_s1 + $0x13a0] sm:$0xff]  }
 0x250   :  { %9385 = vmatprep.subr.bf16.mxu0 %v10208_v37 }
 0x251   :  { %9406 = vmatpush3.bf16.msra.mxu1 %v10207_v36  ;;  %v10245_v36 = vld [vmem:[%s12637_s1 + $0x1328] sm:$0xff]  }
 0x252   :  { %9407 = vmatprep.subr.bf16.mxu1 %v10210_v39 }
 0x253   :  { %9386 = vmatpush3.bf16.msra.mxu0 %v10209_v38  ;;  %v10248_v38 = vld [vmem:[%s12637_s1 + $0x1370] sm:$0xff]  }
 0x254   :  { %9387 = vmatprep.subr.bf16.mxu0 %v10212_v42 }
 0x255   :  { %v9085_v47 = vpop.f32.mrb[44].mxu0  ;;  %9408 = vmatpush3.bf16.msra.mxu1 %v10211_v40  ;;  %v10247_v40 = vld [vmem:[%s12637_s1 + $0x13a8] sm:$0xff]  }
 0x256   :  { %v9086_v49 = vpop.f32.mrb[45].mxu0  ;;  %9409 = vmatprep.subr.bf16.mxu1 %v10214_v44 }
 0x257   :  { %v9087_v51 = vadd.f32 %v9086_v49, %v9085_v47  ;;  %v9088_v52 = vpop.f32.mrb[46].mxu0  ;;  %v9107_v53 = vpop.f32.mrb[44].mxu1  ;;  %9388 = vmatpush3.bf16.msra.mxu0 %v10213_v43  ;;  %v10251_v49 = vld [vmem:[%s12637_s1 + $0x13b0] sm:$0xff]  }
 0x258   :  { %v9089_v54 = vpop.f32.mrb[47].mxu0  ;;  %v9108_v55 = vpop.f32.mrb[45].mxu1  ;;  %9389 = vmatprep.subr.bf16.mxu0 %v10216_v46  ;;  %v10250_v46 = vld [vmem:[%s12637_s1 + $0x13f0] sm:$0xff]   ;;  %v10252_v52 = vld [vmem:[%s12637_s1 + $0x1378] sm:$0xff]  }
 0x259   :  { %v6991_v58 = vadd.f32 %v9087_v51, %v12237_v17  ;;  %v9109_v59 = vadd.f32 %v9108_v55, %v9107_v53  ;;  %9410 = vmatpush3.bf16.msra.mxu1 %v10215_v45  ;;  %v9110_v61 = vpop.f32.mrb[46].mxu1  ;;  %v1888_v17 = vrot.slane %v1860_v12, %v10458_v41  ;;  %v10249_v45 = vld [vmem:[%s12637_s1 + $0x1330] sm:$0xff]   ;;  %v10253_v54 = vld [vmem:[%s12637_s1 + $0x1338] sm:$0xff]  }
 0x25a   :  { %9411 = vmatprep.subr.bf16.mxu1 %v10218_v50  ;;  %v9111_v0 = vpop.f32.mrb[47].mxu1  ;;  %v10258_v61 = vld [vmem:[%s12637_s1 + $0x1400] sm:$0xff]   ;;  %v10272_v12 = vld [vmem:[%s12637_s1 + $0x1498] sm:$0xff]  }
 0x25b   :  { %v12335_v62 = vadd.f32 %v9109_v59, %v6991_v58  ;;  %9390 = vmatpush3.bf16.msra.mxu0 %v10217_v48  ;;  %v1892_v20 = vcombine.high %v1888_v17, %v1888_v17  ;;  %v10256_v58 = vld [vmem:[%s12637_s1 + $0x13b8] sm:$0xff]   ;;  %v1874_v59 = vrot.slane %v12352_v8, %v10458_v41  ;;  %v10268_v8 = vld [vmem:[%s12637_s1 + $0x1490] sm:$0xff]  }
 0x25c   :  { %9391 = vmatprep.subr.bf16.mxu0 %v10220_v57  ;;  %v10254_v57 = vld [vmem:[%s12637_s1 + $0x13f8] sm:$0xff]  }
 0x25d   :  { %9412 = vmatpush3.bf16.msra.mxu1 %v10219_v56  ;;  %v1890_v0 = vcombine.high %v1874_v59, %v1874_v59 }
 0x25e   :  { %9413 = vmatprep.subr.bf16.mxu1 %v10222_v63  ;;  %v10260_v63 = vld [vmem:[%s12637_s1 + $0x1480] sm:$0xff]  }
 0x25f   :  { %9392 = vmatpush3.bf16.msra.mxu0 %v10221_v60  ;;  %v10257_v60 = vld [vmem:[%s12637_s1 + $0x1440] sm:$0xff]  }
 0x260   :  { %9421 = vmatprep.subr.bf16.mxu0 %v10224_v5  ;;  %v10265_v5 = vld [vmem:[%s12637_s1 + $0x1450] sm:$0xff]  }
 0x261   :  { %9414 = vmatpush3.bf16.msra.mxu1 %v10223_v3  ;;  %v10263_v3 = vld [vmem:[%s12637_s1 + $0x14c8] sm:$0xff]  }
 0x262   :  { %9443 = vmatprep.subr.bf16.mxu1 %v10226_v9  ;;  %7549 = vmatmul.mubr.bf16.vlgmr.msra.gmra.mrb[72].mxu0 %v1867_v7  ;;  %v10267_v7 = vld [vmem:[%s12637_s1 + $0x14d0] sm:$0xff]   ;;  %v10269_v9 = vld [vmem:[%s12637_s1 + $0x1458] sm:$0xff]  }
 0x263   :  { %9422 = vmatpush3.bf16.msra.mxu0 %v10225_v11  ;;  %7628 = vmatprep.mubr.bf16.mxu0 %v1888_v17  ;;  %v10271_v11 = vld [vmem:[%s12637_s1 + $0x14d8] sm:$0xff]   ;;  %v10277_v17 = vld [vmem:[%s12637_s1 + $0x1468] sm:$0xff]  }
 0x264   :  { %7589 = vmatmul.mubr.bf16.vlgmr.msra.gmra.mrb[72].mxu1 %v1889_v13  ;;  %9423 = vmatprep.subr.bf16.mxu0 %v10228_v14  ;;  %v10273_v13 = vld [vmem:[%s12637_s1 + $0x1460] sm:$0xff]  }
 0x265   :  { %9444 = vmatpush3.bf16.msra.mxu1 %v10227_v16  ;;  %7668 = vmatprep.mubr.bf16.mxu1 %v1892_v20  ;;  %v10274_v14 = vld [vmem:[%s12637_s1 + $0x1420] sm:$0xff]   ;;  %v10280_v20 = vld [vmem:[%s12637_s1 + $0x14a8] sm:$0xff]  }
 0x266   :  { %9445 = vmatprep.subr.bf16.mxu1 %v10230_v18  ;;  %v10276_v16 = vld [vmem:[%s12637_s1 + $0x14a0] sm:$0xff]   ;;  %v10278_v18 = vld [vmem:[%s12637_s1 + $0x1428] sm:$0xff]  }
 0x267   :  { %9424 = vmatpush3.bf16.msra.mxu0 %v10229_v19  ;;  %v10279_v19 = vld [vmem:[%s12637_s1 + $0x14e8] sm:$0xff]  }
 0x268   :  { %9425 = vmatprep.subr.bf16.mxu0 %v10232_v21 }
 0x269   :  { %9446 = vmatpush3.bf16.msra.mxu1 %v10231_v22  ;;  %v10281_v22 = vld [vmem:[%s12637_s1 + $0x1470] sm:$0xff]  }
 0x26a   :  { %9447 = vmatprep.subr.bf16.mxu1 %v10234_v23 }
 0x26b   :  { %9426 = vmatpush3.bf16.msra.mxu0 %v10233_v24  ;;  %v10282_v24 = vld [vmem:[%s12637_s1 + $0x1430] sm:$0xff]  }
 0x26c   :  { %9427 = vmatprep.subr.bf16.mxu0 %v10236_v25 }
 0x26d   :  { %9448 = vmatpush3.bf16.msra.mxu1 %v10235_v26 }
 0x26e   :  { %9449 = vmatprep.subr.bf16.mxu1 %v10238_v27 }
 0x26f   :  { %9428 = vmatpush3.bf16.msra.mxu0 %v10237_v28 }
 0x270   :  { %9429 = vmatprep.subr.bf16.mxu0 %v10240_v29 }
 0x271   :  { %9450 = vmatpush3.bf16.msra.mxu1 %v10239_v30  ;;  %v10283_v30 = vld [vmem:[%s12637_s1 + $0x14f0] sm:$0xff]  }
 0x272   :  { %9451 = vmatprep.subr.bf16.mxu1 %v10242_v31  ;;  %v10284_v31 = vld [vmem:[%s12637_s1 + $0x14b0] sm:$0xff]  }
 0x273   :  { %9430 = vmatpush3.bf16.msra.mxu0 %v10241_v32 }
 0x274   :  { %9431 = vmatprep.subr.bf16.mxu0 %v10244_v33 }
 0x275   :  { %v9129_v37 = vpop.f32.mrb[48].mxu0  ;;  %9452 = vmatpush3.bf16.msra.mxu1 %v10243_v34  ;;  %v10285_v34 = vld [vmem:[%s12637_s1 + $0x1478] sm:$0xff]  }
 0x276   :  { %v9130_v39 = vpop.f32.mrb[49].mxu0  ;;  %9453 = vmatprep.subr.bf16.mxu1 %v10246_v35 }
 0x277   :  { %v9131_v42 = vadd.f32 %v9130_v39, %v9129_v37  ;;  %v9132_v43 = vpop.f32.mrb[50].mxu0  ;;  %v9151_v44 = vpop.f32.mrb[48].mxu1  ;;  %9432 = vmatpush3.bf16.msra.mxu0 %v10245_v36  ;;  %v10286_v37 = vld [vmem:[%s12637_s1 + $0x1438] sm:$0xff]  }
 0x278   :  { %v9133_v47 = vpop.f32.mrb[51].mxu0  ;;  %v9152_v48 = vpop.f32.mrb[49].mxu1  ;;  %9433 = vmatprep.subr.bf16.mxu0 %v10248_v38  ;;  %v10287_v39 = vld [vmem:[%s12637_s1 + $0x14f8] sm:$0xff]  }
 0x279   :  { %v7071_v50 = vadd.f32 %v9131_v42, %v12335_v62  ;;  %v9153_v51 = vadd.f32 %v9152_v48, %v9151_v44  ;;  %v9154_v53 = vpop.f32.mrb[50].mxu1  ;;  %9454 = vmatpush3.bf16.msra.mxu1 %v10247_v40  ;;  %v10259_v62 = vld [vmem:[%s12637_s1 + $0x14c0] sm:$0xff]   ;;  %v32_v40 = vld [vmem:[%s12636_s0 + $0x50] sm:$0x1f]  ;;  %v10289_v43 = vld [vmem:[%s12637_s1 + $0x14b8] sm:$0xff]   ;;  %v10319_v47 = vmov 0.0  }
 0x27a   :  { %v9155_v55 = vpop.f32.mrb[51].mxu1  ;;  %9455 = vmatprep.subr.bf16.mxu1 %v10250_v46  ;;  %v1900_v42 = vrot.slane %v32_v40, %v10458_v41  ;;  %v10290_v48 = vld [vmem:[%s12637_s1 + $0x1500] sm:$0xff]  }
 0x27b   :  { %v12446_v56 = vadd.f32 %v9153_v51, %v7071_v50  ;;  %9434 = vmatpush3.bf16.msra.mxu0 %v10249_v45 }
 0x27c   :  { %9435 = vmatprep.subr.bf16.mxu0 %v10252_v52  ;;  %v1908_v44 = vcombine.high %v1900_v42, %v1900_v42  ;;  %v1915_v45 = vrot.slane %v1900_v42, %v10458_v41 }
 0x27d   :  { %9456 = vmatpush3.bf16.msra.mxu1 %v10251_v49 }
 0x27e   :  { %9457 = vmatprep.subr.bf16.mxu1 %v10254_v57  ;;  %v1929_v46 = vrot.slane %v1908_v44, %v10458_v41 }
 0x27f   :  { %9436 = vmatpush3.bf16.msra.mxu0 %v10253_v54 }
 0x280   :  { %9465 = vmatprep.subr.bf16.mxu0 %v10257_v60 }
 0x281   :  { %9458 = vmatpush3.bf16.msra.mxu1 %v10256_v58 }
 0x282   :  { %7629 = vmatmul.mubr.bf16.vlgmr.msra.gmra.mrb[76].mxu0 %v1874_v59  ;;  %9487 = vmatprep.subr.bf16.mxu1 %v10259_v62 }
 0x283   :  { %9466 = vmatpush3.bf16.msra.mxu0 %v10258_v61 }
 0x284   :  { %7669 = vmatmul.mubr.bf16.vlgmr.msra.gmra.mrb[76].mxu1 %v1890_v0  ;;  %9467 = vmatprep.subr.bf16.mxu0 %v10261_v1 }
 0x285   :  { %9488 = vmatpush3.bf16.msra.mxu1 %v10260_v63 }
 0x286   :  { %9489 = vmatprep.subr.bf16.mxu1 %v10263_v3 }
 0x287   :  { %9468 = vmatpush3.bf16.msra.mxu0 %v10262_v2 }
 0x288   :  { %9469 = vmatprep.subr.bf16.mxu0 %v10265_v5 }
 0x289   :  { %9490 = vmatpush3.bf16.msra.mxu1 %v10264_v4 }
 0x28a   :  { %9491 = vmatprep.subr.bf16.mxu1 %v10267_v7 }
 0x28b   :  { %9470 = vmatpush3.bf16.msra.mxu0 %v10266_v6 }
 0x28c   :  { %9471 = vmatprep.subr.bf16.mxu0 %v10269_v9 }
 0x28d   :  { %9492 = vmatpush3.bf16.msra.mxu1 %v10268_v8 }
 0x28e   :  { %9493 = vmatprep.subr.bf16.mxu1 %v10271_v11 }
 0x28f   :  { %9472 = vmatpush3.bf16.msra.mxu0 %v10270_v10 }
 0x290   :  { %9473 = vmatprep.subr.bf16.mxu0 %v10273_v13 }
 0x291   :  { %9494 = vmatpush3.bf16.msra.mxu1 %v10272_v12 }
 0x292   :  { %9495 = vmatprep.subr.bf16.mxu1 %v10275_v15 }
 0x293   :  { %9474 = vmatpush3.bf16.msra.mxu0 %v10274_v14 }
 0x294   :  { %9475 = vmatprep.subr.bf16.mxu0 %v10277_v17 }
 0x295   :  { %v9173_v21 = vpop.f32.mrb[52].mxu0  ;;  %9496 = vmatpush3.bf16.msra.mxu1 %v10276_v16 }
 0x296   :  { %v9174_v23 = vpop.f32.mrb[53].mxu0  ;;  %9497 = vmatprep.subr.bf16.mxu1 %v10279_v19 }
 0x297   :  { %v9175_v25 = vadd.f32 %v9174_v23, %v9173_v21  ;;  %v9176_v26 = vpop.f32.mrb[54].mxu0  ;;  %v9195_v27 = vpop.f32.mrb[52].mxu1  ;;  %9476 = vmatpush3.bf16.msra.mxu0 %v10278_v18 }
 0x298   :  { %v9177_v28 = vpop.f32.mrb[55].mxu0  ;;  %v9196_v29 = vpop.f32.mrb[53].mxu1  ;;  %9477 = vmatprep.subr.bf16.mxu0 %v10281_v22 }
 0x299   :  { %v7151_v32 = vadd.f32 %v9175_v25, %v12446_v56  ;;  %v9197_v33 = vadd.f32 %v9196_v29, %v9195_v27  ;;  %9498 = vmatpush3.bf16.msra.mxu1 %v10280_v20  ;;  %v9198_v35 = vpop.f32.mrb[54].mxu1 }
 0x29a   :  { %9499 = vmatprep.subr.bf16.mxu1 %v10283_v30  ;;  %v9199_v38 = vpop.f32.mrb[55].mxu1 }
 0x29b   :  { %v7191_v36 = vadd.f32 %v9197_v33, %v7151_v32  ;;  %9478 = vmatpush3.bf16.msra.mxu0 %v10282_v24 }
 0x29c   :  { %9479 = vmatprep.subr.bf16.mxu0 %v10285_v34 }
 0x29d   :  { %9500 = vmatpush3.bf16.msra.mxu1 %v10284_v31 }
 0x29e   :  { %9501 = vmatprep.subr.bf16.mxu1 %v10287_v39 }
 0x29f   :  { %9480 = vmatpush3.bf16.msra.mxu0 %v10286_v37 }
 0x2a0   :  { %9531 = vmatprep.subr.bf16.mxu0 %v10319_v47 }
 0x2a1   :  { %10 = vsyncpa [#allocation3], 0  ;;  %9502 = vmatpush3.bf16.msra.mxu1 %v10289_v43  ;;  %v1930_v49 = vcombine.high %v1915_v45, %v1915_v45  ;;  %7708 = vmatprep.mubr.bf16.mxu0 %v1929_v46  ;;  %v1931_v50 = vcombine.high %v1929_v46, %v1929_v46  ;;  %v10291_v51 = vld [vmem:[%s12637_s1 + $0x1508] sm:$0xff]   ;;  %vm10320_vm0 = vmmov 0   ;;  %v1893_v52 = vcombine.high %v32_v40, %v32_v40  ;;  %v10292_v53 = vld [vmem:[%s12637_s1 + $0x1510] sm:$0xff]   ;;  %s10322_s13 = smov [#allocation2]  }
 0x2a2   :  { %7709 = vmatmul.mubr.bf16.vlgmr.msra.gmra.mrb[80].mxu0 %v1915_v45  ;;  %v10293_v55 = vld [vmem:[%s12637_s1 + $0x1518] sm:$0xff]   ;;  %vm6072_vm1 = vcmask 523264   ;;  %v7797_v16 = vld [vmem:[%s12639_s3] sm:$0xff]  ;;  %v7798_v17 = vld [vmem:[%s12639_s3 + $0x8] sm:$0xff]  ;;  %v10321_v19 = vmov 0.0|0.0   ;;  %s7898_s14 = sshll.u32 %s10322_s13, 4  ;;  %s7899_s14 = int_to_ptr.vmem [resolvable:$true] %s7898_s14 }
 0x2a3   :  { %7748 = vmatprep.mubr.bf16.mxu1 %v1931_v50  ;;  %9532 = vmatpush3.bf16.msra.mxu0 %v10290_v48  ;;  %v1907_v54 = vrot.slane %v1893_v52, %v10458_v41  ;;  %v7799_v18 = vld [vmem:[%s12639_s3 + $0x10] sm:$0xff]  ;;  %v9579_v20 = vpack.c.bf16 %v7798_v17, %v7797_v16  ;;  %v7800_v21 = vld [vmem:[%s12639_s3 + $0x18] sm:$0xff]  ;;  %v7801_v23 = vld [vmem:[%s12639_s3 + $0x20] sm:$0xff]  ;;  %vm7890_vm2 = vcmask 9216   ;;  %s10294_s15 = scalar_lea.vmem %s7899_s14, 32  ;;  %p10299_p1 = scmp.lt.s32.totalorder %s7899_s14, %s7899_s14 }
 0x2a4   :  { %7749 = vmatmul.mubr.bf16.vlgmr.msra.gmra.mrb[80].mxu1 %v1930_v49  ;;  %9533 = vmatprep.subr.bf16.mxu0 %v10319_v47  ;;  %v9582_v22 = vpack.c.bf16 %v7800_v21, %v7799_v18  ;;  %v7802_v24 = vld [vmem:[%s12639_s3 + $0x28] sm:$0xff]  ;;  %v7803_v28 = vld [vmem:[%s12639_s3 + $0x30] sm:$0xff]  ;;  %v7804_v29 = vld [vmem:[%s12639_s3 + $0x38] sm:$0xff]  ;;  %p10295_p0 = scmp.ne.s32.totalorder %s7899_s14, %s10294_s15  ;;  %p10300_p2 = scmp.lt.s32.totalorder %s10294_s15, %s10294_s15 }
 0x2a5   :  { %9539 = vmatprep.mubr.msk.bf16.mxu0 %vm10320_vm0, %v10319_v47  ;;  %9575 = vmatprep.mubr.msk.f32.mxu1 %vm10320_vm0, %v10319_v47  ;;  %v1922_v56 = vrot.slane %v1907_v54, %v10458_v41  ;;  %v9585_v25 = vpack.c.bf16 %v7802_v24, %v7801_v23  ;;  %v9588_v33 = vpack.c.bf16 %v7804_v29, %v7803_v28  ;;  %v7805_v40 = vld [vmem:[%s12639_s3 + $0x40] sm:$0xff]  ;;  %v7806_v42 = vld [vmem:[%s12639_s3 + $0x48] sm:$0xff]  ;;  %v7807_v45 = vld [vmem:[%s12639_s3 + $0x50] sm:$0xff] }
 0x2a6   :  { %9578 = vmatprep.subr.bf16.mxu1 %v10321_v19  ;;  %v9591_v44 = vpack.c.bf16 %v7806_v42, %v7805_v40  ;;  %v7808_v46 = vld [vmem:[%s12639_s3 + $0x58] sm:$0xff]  ;;  %v7809_v48 = vld [vmem:[%s12639_s3 + $0x60] sm:$0xff]  ;;  %v7810_v49 = vld [vmem:[%s12639_s3 + $0x68] sm:$0xff]  ;;  %p10301_p3 = por %p10300_p2, %p10299_p1 }
 0x2a7   :  { %9534 = vmatpush3.bf16.msra.mxu0 %v10291_v51  ;;  %9580 = vmatpush3.bf16.msra.mxu1 %v9579_v20  ;;  %v9597_v50 = vpack.c.bf16 %v7810_v49, %v7809_v48  ;;  %v7811_v51 = vld [vmem:[%s12639_s3 + $0x70] sm:$0xff]  ;;  %v7812_v52 = vld [vmem:[%s12639_s3 + $0x78] sm:$0xff] }
 0x2a8   :  { %9535 = vmatprep.subr.bf16.mxu0 %v10319_v47  ;;  %9581 = vmatprep.subr.bf16.mxu1 %v10321_v19  ;;  %p10302_p4 = pnand %p10301_p3, %p10295_p0 }
 0x2ab   :  { %9536 = vmatpush3.bf16.msra.mxu0 %v10292_v53  ;;  %9583 = vmatpush3.bf16.msra.mxu1 %v9582_v22  ;;  %v9600_v53 = vpack.c.bf16 %v7812_v52, %v7811_v51 }
 0x2ac   :  { %9537 = vmatprep.subr.bf16.mxu0 %v10319_v47  ;;  %9584 = vmatprep.subr.bf16.mxu1 %v10321_v19  ;;  %v9594_v47 = vpack.c.bf16 %v7808_v46, %v7807_v45 }
 0x2af   :  { %9538 = vmatpush3.bf16.msra.mxu0 %v10293_v55  ;;  %9586 = vmatpush3.bf16.msra.mxu1 %v9585_v25 }
 0x2b0   :  { %9587 = vmatprep.subr.bf16.mxu1 %v10321_v19 }
 0x2b2   :  { %9540 = vmatmul.mubr.msk.bf16.vlgmr.msra.gmra.mrb[84].mxu0 %vm6072_vm1, %v1922_v56 }
 0x2b3   :  { %9589 = vmatpush3.bf16.msra.mxu1 %v9588_v33 }
 0x2b4   :  { %9590 = vmatprep.subr.bf16.mxu1 %v10321_v19 }
 0x2b5   :  { %v9217_v57 = vpop.f32.mrb[56].mxu0 }
 0x2b6   :  { %v9218_v58 = vpop.f32.mrb[57].mxu0 }
 0x2b7   :  { %v9219_v59 = vadd.f32 %v9218_v58, %v9217_v57  ;;  %v9220_v60 = vpop.f32.mrb[58].mxu0  ;;  %v9239_v61 = vpop.f32.mrb[56].mxu1  ;;  %9592 = vmatpush3.bf16.msra.mxu1 %v9591_v44  ;;  %v8584_v44 = vld [vmem:[%s12640_s4] ss:$0 sm:$0xff] }
 0x2b8   :  { %v9221_v62 = vpop.f32.mrb[59].mxu0  ;;  %v9240_v63 = vpop.f32.mrb[57].mxu1  ;;  %9593 = vmatprep.subr.bf16.mxu1 %v10321_v19 }
 0x2b9   :  { %v7231_v0 = vadd.f32 %v9219_v59, %v7191_v36  ;;  %v9241_v1 = vadd.f32 %v9240_v63, %v9239_v61  ;;  %v9242_v2 = vpop.f32.mrb[58].mxu1 }
 0x2ba   :  { %v9243_v3 = vpop.f32.mrb[59].mxu1 }
 0x2bb   :  { %v7271_v4 = vadd.f32 %v9241_v1, %v7231_v0  ;;  %9595 = vmatpush3.bf16.msra.mxu1 %v9594_v47 }
 0x2bc   :  { %9596 = vmatprep.subr.bf16.mxu1 %v10321_v19 }
 0x2bf   :  { %9598 = vmatpush3.bf16.msra.mxu1 %v9597_v50 }
 0x2c0   :  { %9599 = vmatprep.subr.bf16.mxu1 %v10321_v19 }
 0x2c3   :  { %9601 = vmatpush3.bf16.msra.mxu1 %v9600_v53 }
 0x2d5   :  { %v9261_v5 = vpop.f32.mrb[60].mxu0 }
 0x2d6   :  { %v9262_v6 = vpop.f32.mrb[61].mxu0 }
 0x2d7   :  { %v9263_v7 = vadd.f32 %v9262_v6, %v9261_v5  ;;  %v9264_v8 = vpop.f32.mrb[62].mxu0  ;;  %v9283_v41 = vpop.f32.mrb[60].mxu1 }
 0x2d8   :  { %v9265_v9 = vpop.f32.mrb[63].mxu0  ;;  %v9284_v10 = vpop.f32.mrb[61].mxu1 }
 0x2d9   :  { %v7311_v11 = vadd.f32 %v9263_v7, %v7271_v4  ;;  %v9285_v12 = vadd.f32 %v9284_v10, %v9283_v41  ;;  %v9286_v13 = vpop.f32.mrb[62].mxu1 }
 0x2da   :  { %v9287_v14 = vpop.f32.mrb[63].mxu1 }
 0x2db   :  { %v7351_v15 = vadd.f32 %v9285_v12, %v7311_v11 }
 0x2f5   :  { %v9305_v26 = vpop.f32.mrb[64].mxu0 }
 0x2f6   :  { %v9306_v27 = vpop.f32.mrb[65].mxu0 }
 0x2f7   :  { %v9307_v30 = vadd.f32 %v9306_v27, %v9305_v26  ;;  %v9308_v31 = vpop.f32.mrb[66].mxu0  ;;  %v9327_v32 = vpop.f32.mrb[64].mxu1 }
 0x2f8   :  { %v9309_v34 = vpop.f32.mrb[67].mxu0  ;;  %v9328_v35 = vpop.f32.mrb[65].mxu1 }
 0x2f9   :  { %v7391_v36 = vadd.f32 %v9307_v30, %v7351_v15  ;;  %v9329_v37 = vadd.f32 %v9328_v35, %v9327_v32  ;;  %v9330_v38 = vpop.f32.mrb[66].mxu1 }
 0x2fa   :  { %v9331_v39 = vpop.f32.mrb[67].mxu1 }
 0x2fb   :  { %v7431_v43 = vadd.f32 %v9329_v37, %v7391_v36 }
 0x315   :  { %v9349_v54 = vpop.f32.mrb[68].mxu0 }
 0x316   :  { %v9350_v55 = vpop.f32.mrb[69].mxu0 }
 0x317   :  { %v9351_v56 = vadd.f32 %v9350_v55, %v9349_v54  ;;  %v9352_v57 = vpop.f32.mrb[70].mxu0  ;;  %v9371_v58 = vpop.f32.mrb[68].mxu1 }
 0x318   :  { %v9353_v59 = vpop.f32.mrb[71].mxu0  ;;  %v9372_v60 = vpop.f32.mrb[69].mxu1 }
 0x319   :  { %v7471_v61 = vadd.f32 %v9351_v56, %v7431_v43  ;;  %v9373_v62 = vadd.f32 %v9372_v60, %v9371_v58  ;;  %v9374_v63 = vpop.f32.mrb[70].mxu1 }
 0x31a   :  { %v9375_v0 = vpop.f32.mrb[71].mxu1 }
 0x31b   :  { %v7511_v1 = vadd.f32 %v9373_v62, %v7471_v61 }
 0x335   :  { %v9393_v2 = vpop.f32.mrb[72].mxu0 }
 0x336   :  { %v9394_v3 = vpop.f32.mrb[73].mxu0 }
 0x337   :  { %v9395_v4 = vadd.f32 %v9394_v3, %v9393_v2  ;;  %v9396_v5 = vpop.f32.mrb[74].mxu0  ;;  %v9415_v6 = vpop.f32.mrb[72].mxu1 }
 0x338   :  { %v9397_v7 = vpop.f32.mrb[75].mxu0  ;;  %v9416_v8 = vpop.f32.mrb[73].mxu1 }
 0x339   :  { %v7551_v41 = vadd.f32 %v9395_v4, %v7511_v1  ;;  %v9417_v9 = vadd.f32 %v9416_v8, %v9415_v6  ;;  %v9418_v10 = vpop.f32.mrb[74].mxu1 }
 0x33a   :  { %v9419_v11 = vpop.f32.mrb[75].mxu1 }
 0x33b   :  { %v7591_v12 = vadd.f32 %v9417_v9, %v7551_v41 }
 0x355   :  { %v9437_v13 = vpop.f32.mrb[76].mxu0 }
 0x356   :  { %v9438_v14 = vpop.f32.mrb[77].mxu0 }
 0x357   :  { %v9439_v15 = vadd.f32 %v9438_v14, %v9437_v13  ;;  %v9440_v16 = vpop.f32.mrb[78].mxu0  ;;  %v9459_v17 = vpop.f32.mrb[76].mxu1 }
 0x358   :  { %v9441_v18 = vpop.f32.mrb[79].mxu0  ;;  %v9460_v19 = vpop.f32.mrb[77].mxu1 }
 0x359   :  { %v7631_v20 = vadd.f32 %v9439_v15, %v7591_v12  ;;  %v9461_v21 = vadd.f32 %v9460_v19, %v9459_v17  ;;  %v9462_v22 = vpop.f32.mrb[78].mxu1 }
 0x35a   :  { %v9463_v23 = vpop.f32.mrb[79].mxu1 }
 0x35b   :  { %v7671_v24 = vadd.f32 %v9461_v21, %v7631_v20 }
 0x375   :  { %v9481_v25 = vpop.f32.mrb[80].mxu0 }
 0x376   :  { %v9482_v26 = vpop.f32.mrb[81].mxu0 }
 0x377   :  { %v9483_v27 = vadd.f32 %v9482_v26, %v9481_v25  ;;  %v9484_v28 = vpop.f32.mrb[82].mxu0  ;;  %v9503_v29 = vpop.f32.mrb[80].mxu1 }
 0x378   :  { %v9485_v30 = vpop.f32.mrb[83].mxu0  ;;  %v9504_v31 = vpop.f32.mrb[81].mxu1 }
 0x379   :  { %v7711_v32 = vadd.f32 %v9483_v27, %v7671_v24  ;;  %v9505_v33 = vadd.f32 %v9504_v31, %v9503_v29  ;;  %v9506_v34 = vpop.f32.mrb[82].mxu1 }
 0x37a   :  { %v9507_v35 = vpop.f32.mrb[83].mxu1 }
 0x37b   :  { %v7751_v36 = vadd.f32 %v9505_v33, %v7711_v32 }
 0x385   :  { %v7790_v37 = vpop.f32.mrb[84].mxu0 }
 0x386   :  { %v7791_v38 = vadd.f32 %v7790_v37, %v7751_v36  ;;  %v9541_v39 = vpop.f32.mrb[85].mxu0 }
 0x387   :  { %v7793_v40 = vpop.f32.mrb[86].mxu0 }
 0x388   :  { %v7796_v42 = vmax.f32 %v7791_v38, 0.0  ;;  %v9542_v43 = vpop.f32.mrb[87].mxu0 }
 0x38a   :  { %9576 = vmatmul.mubr.f32.vlgmr.msra.gmra.mrb[84].mxu1 %v7796_v42 }
 0x45d   :  { %v7886_v45 = vpop.f32.mrb[84].mxu1 }
 0x45e   :  { %v7887_v46 = vadd.f32 %v8584_v44, %v7886_v45  ;;  %v9577_v47 = vpop.f32.mrb[85].mxu1 }
 0x460   :  { %7891 = vst.msk [vmem:[#allocation2] sm:$0x3] %vm7890_vm2, %v7887_v46 }
 0x461   :  { %10305 = shalt.err (!%p10302_p4)
}
 0x462   :  { %s10306_s18 = scalar_lea.hbm %s12641_s5, 32 }
 0x463   :  { %p10307_p5 = scmp.ne.s32.totalorder %s12641_s5, %s10306_s18  ;;  %p10310_p6 = scmp.lt.u32.totalorder %s10306_s18, %s12641_s5 }
 0x465   :  { %p10312_p7 = pnand %p10310_p6, %p10307_p5 }
 0x467   :  { %10315 = shalt.err (!%p10312_p7)
}
 0x468   :  { %7901 = dma.vmem_to_hbm [thread:$0]  %s7899_s14, 32, %s12641_s5, [#allocation3]  }
 0x469   :  { %10316 = dma.done.wait [#allocation3], 32  }
 0x46a   :  { %10317 = vsyncadd [#allocation3], 4294967264 }
 0x46b   :  { %7905 = vsyncpa [#allocation3], 1 }

</bundles_post_ra>
